<compile_context>
chip_gen: v7x
topology: tpu7x:2x2x1
jax: 0.10.0
libtpu: 0.0.40
codegen_flags: <defaults>
</compile_context>

<pallas_src>
import functools

import jax
import jax.numpy as jnp
from jax.experimental import pallas as pl
from jax.experimental.pallas import tpu as pltpu

BN_EPS = 1e-5


def _round_up(x, m):
    return (x + m - 1) // m * m


def _pick_point_tile(n):
    """Layer-1 point tile (lane dim of the NCL x block) and padded point count."""
    if n % 256 == 0:
        return 256, n
    if n % 128 == 0:
        return 128, n
    if n <= 256:                        # single tile per batch element
        n_pad = _round_up(n, 8)
        return n_pad, n_pad
    return 256, _round_up(n, 256)


def _pick_back_tile(tile_n1, n_pad):
    """Bigger point tile for the skinny back layers (must divide n_pad)."""
    for f in (4, 3, 2):
        t = tile_n1 * f
        if t <= 1024 and n_pad % t == 0:
            return t
    return tile_n1


def _vmem_limit_bytes():
    # >= 24 MiB headroom for Mosaic-internal scratch, capped at 48 MiB.
    # On v7x (64 MiB / TensorCore) this yields 40 MiB; 48 MiB on v5e/v6e.
    cap = 128 * 1024 * 1024
    try:
        cap = int(pltpu.get_tpu_info().vmem_capacity_bytes)
    except Exception:
        pass
    return max(min(cap - 24 * 1024 * 1024, 48 * 1024 * 1024), 16 * 1024 * 1024)


# Runtime probe: single-buffered resident constants via pipeline_mode=Buffered(1).
_SINGLE_BUFFER_OK = None


def _single_buffer_consts_supported():
    global _SINGLE_BUFFER_OK
    if _SINGLE_BUFFER_OK is None:
        try:
            cspec = pl.BlockSpec((8, 128), lambda i: (0, 0),
                                 pipeline_mode=pl.Buffered(1))

            def _k(c_ref, x_ref, o_ref):
                o_ref[...] = x_ref[...] + c_ref[...]

            out = pl.pallas_call(
                _k, grid=(2,),
                in_specs=[cspec, pl.BlockSpec((8, 128), lambda i: (i, 0))],
                out_specs=pl.BlockSpec((8, 128), lambda i: (i, 0)),
                out_shape=jax.ShapeDtypeStruct((16, 128), jnp.float32),
            )(jnp.ones((8, 128), jnp.float32), jnp.zeros((16, 128), jnp.float32))
            jax.block_until_ready(out)
            _SINGLE_BUFFER_OK = True
        except Exception:
            _SINGLE_BUFFER_OK = False
    return _SINGLE_BUFFER_OK


# ------------------------------ kernels -------------------------------------


def _tile_stats(h, *, tile_n, n_valid, ragged):
    """Per-tile partial BN stats from the f32 MXU accumulator:
    (sum over valid points, sum of squared deviations around the tile mean).
    The tile-mean shift makes the cross-tile merge robust to the
    E[x^2]-E[x]^2 cancellation.  Padded points are masked out when ragged."""
    if ragged:
        t = pl.program_id(1)
        pt = t * tile_n + jax.lax.broadcasted_iota(jnp.int32, (h.shape[0], 1), 0)
        valid = pt < n_valid
        cnt = jnp.minimum(n_valid - t * tile_n, tile_n).astype(jnp.float32)
        hm = jnp.where(valid, h, 0.0)
        s = jnp.sum(hm, axis=0, keepdims=True)
        d = jnp.where(valid, h - s / cnt, 0.0)
    else:
        s = jnp.sum(h, axis=0, keepdims=True)
        d = h - s * (1.0 / tile_n)
    m2 = jnp.sum(d * d, axis=0, keepdims=True)
    return s, m2


def _first_layer_kernel(x_ref, w_ref, h_ref, s_ref, m2_ref, *,
                        n_valid, tile_n, ragged):
    # x block: (1, C_in, tile_n) f32 in the module's NCL layout.  Cast to bf16
    # BEFORE the XLU transpose (halves transposed vregs / scratch), then MXU
    # matmul with f32 accumulation.  conv1's bias is dropped: it cancels
    # exactly under the following training-mode BatchNorm.
    x = jnp.transpose(x_ref[0].astype(jnp.bfloat16))        # (tile_n, C_in) bf16
    h = jnp.dot(x, w_ref[...], preferred_element_type=jnp.float32)
    h_ref[0] = h.astype(jnp.bfloat16)                       # bf16 inter-layer storage
    s, m2 = _tile_stats(h, tile_n=tile_n, n_valid=n_valid, ragged=ragged)
    s_ref[0, 0] = s
    m2_ref[0, 0] = m2


def _mid_layer_kernel(h_ref, sc_ref, sh_ref, w_ref, o_ref, s_ref, m2_ref, *,
                      n_valid, tile_n, ragged):
    # BN (f32 scale/shift from the previous layer's global stats) + ReLU on the
    # bf16-stored input, fused with this layer's matmul (bias dropped: cancels
    # under the next BN).  The affine stays f32 (bf16*f32 promotes): the shift
    # may cancel a large mean*scale, which bf16 arithmetic would corrupt.
    y = jnp.maximum(h_ref[0] * sc_ref[...] + sh_ref[...], 0.0)
    h = jnp.dot(y.astype(jnp.bfloat16), w_ref[...],
                preferred_element_type=jnp.float32)
    o_ref[0] = h.astype(jnp.bfloat16)
    s, m2 = _tile_stats(h, tile_n=tile_n, n_valid=n_valid, ragged=ragged)
    s_ref[0, 0] = s
    m2_ref[0, 0] = m2


def _last_layer_kernel(h_ref, sc_ref, sh_ref, w_ref, b_ref, o_ref):
    y = jnp.maximum(h_ref[0] * sc_ref[...] + sh_ref[...], 0.0)
    z = jnp.dot(y.astype(jnp.bfloat16), w_ref[...],
                preferred_element_type=jnp.float32) + b_ref[...]
    o_ref[0] = 0.5 * jnp.tanh(z)


# ------------------------------ wrapper --------------------------------------


def _bn_affine(s_part, m2_part, gamma, beta, n_valid, tile_n):
    """Parallel-variance (Chan et al.) merge of per-tile partial stats, then
    fold training-mode BN (biased variance over batch*points) into per-channel
    scale/shift.  All f32."""
    B, NT = s_part.shape[0], s_part.shape[1]
    starts = jnp.arange(NT, dtype=jnp.float32) * float(tile_n)
    cnt = jnp.clip(jnp.float32(n_valid) - starts, 1.0, float(tile_n))
    cnt = cnt.reshape(1, NT, 1, 1)                               # per-tile counts
    total = jnp.float32(B * n_valid)
    mean = jnp.sum(s_part, axis=(0, 1)) / total                  # (1, C)
    m_i = s_part / cnt                                           # per-tile means
    m2 = jnp.sum(m2_part, axis=(0, 1)) + jnp.sum(cnt * (m_i - mean) ** 2,
                                                 axis=(0, 1))
    var = jnp.maximum(m2 / total, 0.0)
    scale = gamma * jax.lax.rsqrt(var + BN_EPS)
    shift = beta - mean * scale
    return scale, shift


@functools.partial(jax.jit, static_argnames=("single_buffer_consts",))
def _forward_impl(x, params, single_buffer_consts):
    B, C1, N = x.shape
    (w1, b1, g1, be1, w2, b2, g2, be2, w3, b3, g3, be3, w4, b4) = params
    C2, C3, C4 = w2.shape[1], w3.shape[1], w4.shape[1]
    del b1, b2, b3   # conv bias before training-mode BN cancels exactly

    tile_n1, n_pad = _pick_point_tile(N)
    tile_nb = _pick_back_tile(tile_n1, n_pad)
    nt1, ntb = n_pad // tile_n1, n_pad // tile_nb
    ragged = (n_pad != N)
    if ragged:
        # Padded points are masked out of the BN stats inside the kernels and
        # sliced off at the end.
        x = jnp.pad(x, ((0, 0), (0, 0), (0, n_pad - N)))

    # bf16 weights for the MXU (f32 accumulation inside the kernels).
    w1b, w2b, w3b, w4b = (w.astype(jnp.bfloat16) for w in (w1, w2, w3, w4))

    cparams = pltpu.CompilerParams(
        dimension_semantics=("parallel", "parallel"),
        vmem_limit_bytes=_vmem_limit_bytes())

    def const_spec(arr):
        nd = arr.ndim
        if single_buffer_consts:
            # Resident block: double-buffering it only wastes VMEM.
            return pl.BlockSpec(arr.shape, lambda b, t: (0,) * nd,
                                pipeline_mode=pl.Buffered(1))
        return pl.BlockSpec(arr.shape, lambda b, t: (0,) * nd)

    def act_spec(tile, c):
        return pl.BlockSpec((1, tile, c), lambda b, t: (b, t, 0))

    def stats_out(nt, c):
        shape = jax.ShapeDtypeStruct((B, nt, 1, c), jnp.float32)
        spec = pl.BlockSpec((1, 1, 1, c), lambda b, t: (b, t, 0, 0))
        return shape, spec

    def cost(c_in, c_out, bytes_in, bytes_out, transc=0):
        return pl.CostEstimate(
            flops=2 * B * n_pad * c_in * c_out,
            transcendentals=transc,
            bytes_accessed=B * n_pad * (bytes_in * c_in + bytes_out * c_out)
            + 2 * c_in * c_out)

    # ---- layer 1: conv1 (NCL input, in-kernel bf16 transpose) + BN1 partials
    st1, sp1 = stats_out(nt1, C1)
    h1, s1, m21 = pl.pallas_call(
        functools.partial(_first_layer_kernel, n_valid=N, tile_n=tile_n1,
                          ragged=ragged),
        grid=(B, nt1),
        in_specs=[pl.BlockSpec((1, C1, tile_n1), lambda b, t: (b, 0, t)),
                  const_spec(w1b)],
        out_specs=[act_spec(tile_n1, C1), sp1, sp1],
        out_shape=[jax.ShapeDtypeStruct((B, n_pad, C1), jnp.bfloat16), st1, st1],
        compiler_params=cparams,
        cost_estimate=cost(C1, C1, 4, 2),
    )(x, w1b)
    sc1, sh1 = _bn_affine(s1, m21, g1, be1, N, tile_n1)

    # ---- layers 2 & 3: BN+ReLU of previous, conv, partial stats (big tiles) --
    def mid_layer(h_in, scale, shift, wb, c_in, c_out):
        st, sp = stats_out(ntb, c_out)
        return pl.pallas_call(
            functools.partial(_mid_layer_kernel, n_valid=N, tile_n=tile_nb,
                              ragged=ragged),
            grid=(B, ntb),
            in_specs=[act_spec(tile_nb, c_in), const_spec(scale),
                      const_spec(shift), const_spec(wb)],
            out_specs=[act_spec(tile_nb, c_out), sp, sp],
            out_shape=[jax.ShapeDtypeStruct((B, n_pad, c_out), jnp.bfloat16),
                       st, st],
            compiler_params=cparams,
            cost_estimate=cost(c_in, c_out, 2, 2),
        )(h_in, scale, shift, wb)

    h2, s2, m22 = mid_layer(h1, sc1, sh1, w2b, C1, C2)
    sc2, sh2 = _bn_affine(s2, m22, g2, be2, N, tile_nb)

    h3, s3, m23 = mid_layer(h2, sc2, sh2, w3b, C2, C3)
    sc3, sh3 = _bn_affine(s3, m23, g3, be3, N, tile_nb)

    # ---- layer 4: BN3 + ReLU, conv4 (+bias), 0.5 * tanh ----------------------
    out_pad = pl.pallas_call(
        _last_layer_kernel,
        grid=(B, ntb),
        in_specs=[act_spec(tile_nb, C3), const_spec(sc3), const_spec(sh3),
                  const_spec(w4b), const_spec(b4)],
        out_specs=act_spec(tile_nb, C4),
        out_shape=jax.ShapeDtypeStruct((B, n_pad, C4), jnp.float32),
        compiler_params=cparams,
        cost_estimate=cost(C3, C4, 2, 4, transc=B * n_pad * C4),
    )(h3, sc3, sh3, w4b, b4)

    # Drop padded points; transposing the tiny (B, N, 3) output back to the
    # module's NCL layout is negligible HBM traffic.
    return jnp.transpose(out_pad[:, :N, :], (0, 2, 1))


def pointgencon_shape_forward(x, params):
    """x: (B, C, N) float32 (PyTorch NCL).  Returns (B, 3, N) float32."""
    return _forward_impl(x, params,
                         single_buffer_consts=_single_buffer_consts_supported())


# ------------------------- params / reference --------------------------------


def make_params(key, bottleneck_size):
    """Synthetic parameters matching the module's shapes.

    Conv1d(c_in, c_out, 1).weight is (c_out, c_in, 1) in PyTorch; we store the
    kernel-ready transposed matrix (c_in, c_out).  BN gamma=1, beta=0 (PyTorch
    default).  Vectors are kept 2D (1, C) for TPU layout.  b1-b3 are generated
    for the f32 reference even though the kernel drops them (they cancel under
    training-mode BN)."""
    c1 = bottleneck_size
    c2 = bottleneck_size // 4
    c3 = bottleneck_size // 8
    dims = [(c1, c1), (c1, c2), (c2, c3), (c3, 3)]

    params = []
    for i, (cin, cout) in enumerate(dims):
        key, kw, kb = jax.random.split(key, 3)
        bound = 1.0 / (cin ** 0.5)
        w = jax.random.uniform(kw, (cin, cout), jnp.float32, -bound, bound)
        b = jax.random.uniform(kb, (1, cout), jnp.float32, -bound, bound)
        params.extend([w, b])
        if i < 3:  # bn1, bn2, bn3
            params.extend([jnp.ones((1, cout), jnp.float32),
                           jnp.zeros((1, cout), jnp.float32)])
    return tuple(params)


def reference_forward(x, params, use_bf16=True):
    """Pure-JAX reference.  use_bf16=True mirrors the kernel's precision
    choices (bf16 matmuls, bf16 inter-layer storage, f32 stats/affine,
    biasless layers 1-3); use_bf16=False is the exact f32 semantics of the
    PyTorch module (biases included)."""
    B, C, N = x.shape
    h0 = jnp.transpose(x, (0, 2, 1)).reshape(B * N, C)
    (w1, b1, g1, be1, w2, b2, g2, be2, w3, b3, g3, be3, w4, b4) = params

    if use_bf16:
        def mm(a, w):
            return jnp.dot(a.astype(jnp.bfloat16), w.astype(jnp.bfloat16),
                           preferred_element_type=jnp.float32)

        def bn_relu(h, g, be):
            m = jnp.mean(h, axis=0, keepdims=True)
            v = jnp.mean((h - m) ** 2, axis=0, keepdims=True)
            scale = g * jax.lax.rsqrt(v + BN_EPS)
            shift = be - m * scale
            hb = h.astype(jnp.bfloat16)      # bf16 inter-layer storage
            return jnp.maximum(hb * scale + shift, 0.0)

        h = bn_relu(mm(h0, w1), g1, be1)     # biases 1-3 cancel under BN
        h = bn_relu(mm(h, w2), g2, be2)
        h = bn_relu(mm(h, w3), g3, be3)
        h = 0.5 * jnp.tanh(mm(h, w4) + b4)
    else:
        def bn_relu(h, g, be):
            m = jnp.mean(h, axis=0, keepdims=True)
            v = jnp.mean((h - m) ** 2, axis=0, keepdims=True)
            return jnp.maximum(g * (h - m) * jax.lax.rsqrt(v + BN_EPS) + be, 0.0)

        h = bn_relu(jnp.dot(h0, w1) + b1, g1, be1)
        h = bn_relu(jnp.dot(h, w2) + b2, g2, be2)
        h = bn_relu(jnp.dot(h, w3) + b3, g3, be3)
        h = 0.5 * jnp.tanh(jnp.dot(h, w4) + b4)
    return jnp.transpose(h.reshape(B, N, 3), (0, 2, 1))


if __name__ == "__main__":
    def run_case(bottleneck_size, B, N, key):
        kx, kp = jax.random.split(key)
        x = jax.random.normal(kx, (B, bottleneck_size, N), jnp.float32)
        params = make_params(kp, bottleneck_size)

        out = jax.block_until_ready(pointgencon_shape_forward(x, params))
        assert out.shape == (B, 3, N), out.shape
        assert bool(jnp.all(jnp.isfinite(out)))

        # Tight check vs a reference matching the kernel's precision choices,
        # and a relaxed sanity bound vs exact f32 module semantics (output
        # lives in [-0.5, 0.5], so these are meaningful absolute bounds).
        ref_bf16 = reference_forward(x, params, use_bf16=True)
        ref_f32 = reference_forward(x, params, use_bf16=False)
        err_bf16 = float(jnp.max(jnp.abs(out - ref_bf16)))
        err_f32 = float(jnp.max(jnp.abs(out - ref_f32)))
        assert err_bf16 < 1e-2, ("precision-matched reference mismatch", err_bf16)
        assert err_f32 < 6e-2, ("f32 reference mismatch", err_f32)

    bottleneck_size = 256       # module default is 2048; small for the test
    key = jax.random.PRNGKey(0)
    k1, k2 = jax.random.split(key)

    # Ragged N: exercises padding, masked BN stats, and per-layer point tiles
    # (layer 1 uses 256-point tiles, layers 2-4 a single 512-point tile).
    run_case(bottleneck_size, 2, 500, k1)
    # Aligned N: exercises the unmasked fast path (no point masking at all).
    run_case(bottleneck_size, 2, 256, k2)

    print("KERNEL_OK")
</pallas_src>

<mosaic_0001>
module attributes {stable_mosaic.version = 11 : i64} {
  func.func @_k(%arg0: i32, %arg1: memref<8x128xf32, #tpu.memory_space<vmem>>, %arg2: memref<8x128xf32, #tpu.memory_space<vmem>>, %arg3: memref<8x128xf32, #tpu.memory_space<vmem>>) attributes {dimension_semantics = [#tpu.dimension_semantics<arbitrary>], iteration_bounds = array<i64: 2>, scalar_prefetch = 0 : i64, scratch_operands = 0 : i64, tpu.core_type = #tpu.core_type<tc>, window_params = [{pipeline_mode = #tpu.pipeline_mode<synchronous>, transform_indices = @transform_0, window_bounds = array<i64: 8, 128>}, {transform_indices = @transform_1, window_bounds = array<i64: 8, 128>}, {transform_indices = @transform_2, window_bounds = array<i64: 8, 128>}]} {
    %c0 = arith.constant 0 : index
    %c0_0 = arith.constant 0 : index
    %0 = vector.load %arg2[%c0, %c0_0] : memref<8x128xf32, #tpu.memory_space<vmem>>, vector<8x128xf32>
    %c0_1 = arith.constant 0 : index
    %c0_2 = arith.constant 0 : index
    %1 = vector.load %arg1[%c0_1, %c0_2] : memref<8x128xf32, #tpu.memory_space<vmem>>, vector<8x128xf32>
    %2 = arith.addf %0, %1 : vector<8x128xf32>
    %c0_3 = arith.constant 0 : index
    %c0_4 = arith.constant 0 : index
    %3 = vector.load %arg3[%c0_3, %c0_4] : memref<8x128xf32, #tpu.memory_space<vmem>>, vector<8x128xf32>
    tpu.vector_store %arg3[%c0_3, %c0_4], %2 {strides = array<i32>} : memref<8x128xf32, #tpu.memory_space<vmem>>, vector<8x128xf32>,
    return
  }
  func.func @transform_0(%arg0: i32) -> (i32, i32) {
    %c0_i32 = arith.constant 0 : i32
    %c0_i32_0 = arith.constant 0 : i32
    %c0_i32_1 = arith.constant 0 : i32
    return %c0_i32, %c0_i32_0 : i32, i32
  }
  func.func @transform_1(%arg0: i32) -> (i32, i32) {
    %c0_i32 = arith.constant 0 : i32
    %c0_i32_0 = arith.constant 0 : i32
    return %arg0, %c0_i32 : i32, i32
  }
  func.func @transform_2(%arg0: i32) -> (i32, i32) {
    %c0_i32 = arith.constant 0 : i32
    %c0_i32_0 = arith.constant 0 : i32
    return %arg0, %c0_i32 : i32, i32
  }
}

module attributes {stable_mosaic.version = 11 : i64} {
  func.func @_first_layer_kernel(%arg0: i32, %arg1: i32, %arg2: memref<1x256x256xf32, #tpu.memory_space<vmem>>, %arg3: memref<256x256xbf16, #tpu.memory_space<vmem>>, %arg4: memref<1x256x256xbf16, #tpu.memory_space<vmem>>, %arg5: memref<1x1x1x256xf32, #tpu.memory_space<vmem>>, %arg6: memref<1x1x1x256xf32, #tpu.memory_space<vmem>>) attributes {dimension_semantics = [#tpu.dimension_semantics<parallel>, #tpu.dimension_semantics<parallel>], iteration_bounds = array<i64: 2, 2>, scalar_prefetch = 0 : i64, scratch_operands = 0 : i64, tpu.core_type = #tpu.core_type<tc>, window_params = [{transform_indices = @transform_0, window_bounds = array<i64: 1, 256, 256>}, {pipeline_mode = #tpu.pipeline_mode<synchronous>, transform_indices = @transform_1, window_bounds = array<i64: 256, 256>}, {transform_indices = @transform_2, window_bounds = array<i64: 1, 256, 256>}, {transform_indices = @transform_3, window_bounds = array<i64: 1, 1, 1, 256>}, {transform_indices = @transform_4, window_bounds = array<i64: 1, 1, 1, 256>}]} {
    %c0 = arith.constant 0 : index
    %c0_0 = arith.constant 0 : index
    %c0_1 = arith.constant 0 : index
    %0 = vector.load %arg2[%c0, %c0_0, %c0_1] : memref<1x256x256xf32, #tpu.memory_space<vmem>>, vector<1x256x256xf32>
    %1 = vector.shape_cast %0 : vector<1x256x256xf32> to vector<256x256xf32>
    %2 = arith.truncf %1 : vector<256x256xf32> to vector<256x256xbf16>
    %3 = tpu.transpose %2, [1, 0] : vector<256x256xbf16> -> vector<256x256xbf16>
    %c0_2 = arith.constant 0 : index
    %c0_3 = arith.constant 0 : index
    %4 = vector.load %arg3[%c0_2, %c0_3] : memref<256x256xbf16, #tpu.memory_space<vmem>>, vector<256x256xbf16>
    %cst = arith.constant dense<0.000000e+00> : vector<256x256xf32>
    %5 = tpu.matmul %3, %4, %cst {dimension_numbers = #tpu.dot_dimension_numbers<[1], [0], [0], [1], [0, 0, 1, 1], [], []>} : vector<256x256xbf16>, vector<256x256xbf16>, vector<256x256xf32> -> vector<256x256xf32>
    %6 = arith.truncf %5 : vector<256x256xf32> to vector<256x256xbf16>
    %c0_4 = arith.constant 0 : index
    %c0_5 = arith.constant 0 : index
    %c0_6 = arith.constant 0 : index
    %7 = vector.load %arg4[%c0_4, %c0_5, %c0_6] : memref<1x256x256xbf16, #tpu.memory_space<vmem>>, vector<1x256x256xbf16>
    %8 = vector.shape_cast %7 : vector<1x256x256xbf16> to vector<256x256xbf16>
    %9 = vector.shape_cast %6 : vector<256x256xbf16> to vector<1x256x256xbf16>
    tpu.vector_store %arg4[%c0_4, %c0_5, %c0_6], %9 {strides = array<i32>} : memref<1x256x256xbf16, #tpu.memory_space<vmem>>, vector<1x256x256xbf16>,
    %c256_i32 = arith.constant 256 : i32
    %10 = arith.muli %arg1, %c256_i32 : i32
    %11 = tpu.iota {dimensions = array<i32: 0>} : vector<256x1xi32>
    %12 = vector.broadcast %10 : i32 to vector<256x1xi32>
    %13 = arith.addi %12, %11 : vector<256x1xi32>
    %c500_i32 = arith.constant 500 : i32
    %14 = vector.broadcast %c500_i32 : i32 to vector<256x1xi32>
    %15 = arith.cmpi slt, %13, %14 : vector<256x1xi32>
    %c256_i32_7 = arith.constant 256 : i32
    %16 = arith.muli %arg1, %c256_i32_7 : i32
    %c500_i32_8 = arith.constant 500 : i32
    %17 = arith.subi %c500_i32_8, %16 : i32
    %c256_i32_9 = arith.constant 256 : i32
    %18 = arith.minsi %17, %c256_i32_9 : i32
    %19 = arith.sitofp %18 : i32 to f32
    %cst_10 = arith.constant 0.000000e+00 : f32
    %20 = vector.shape_cast %15 : vector<256x1xi1> to vector<256x1xi1>
    %21 = vector.broadcast %20 : vector<256x1xi1> to vector<256x256xi1>
    %22 = vector.broadcast %cst_10 : f32 to vector<256x256xf32>
    %23 = arith.select %21, %5, %22 : vector<256x256xi1>, vector<256x256xf32>
    %cst_11 = arith.constant dense<0.000000e+00> : vector<256xf32>
    %24 = vector.multi_reduction <add>, %23, %cst_11 [0] : vector<256x256xf32> to vector<256xf32>
    %25 = vector.shape_cast %24 : vector<256xf32> to vector<1x256xf32>
    %26 = vector.broadcast %19 : f32 to vector<1x256xf32>
    %27 = arith.divf %25, %26 : vector<1x256xf32>
    %28 = vector.broadcast %27 : vector<1x256xf32> to vector<256x256xf32>
    %29 = arith.subf %5, %28 : vector<256x256xf32>
    %cst_12 = arith.constant 0.000000e+00 : f32
    %30 = vector.shape_cast %15 : vector<256x1xi1> to vector<256x1xi1>
    %31 = vector.broadcast %30 : vector<256x1xi1> to vector<256x256xi1>
    %32 = vector.broadcast %cst_12 : f32 to vector<256x256xf32>
    %33 = arith.select %31, %29, %32 : vector<256x256xi1>, vector<256x256xf32>
    %34 = arith.mulf %33, %33 : vector<256x256xf32>
    %cst_13 = arith.constant dense<0.000000e+00> : vector<256xf32>
    %35 = vector.multi_reduction <add>, %34, %cst_13 [0] : vector<256x256xf32> to vector<256xf32>
    %36 = vector.shape_cast %35 : vector<256xf32> to vector<1x256xf32>
    %c0_14 = arith.constant 0 : index
    %c0_15 = arith.constant 0 : index
    %c0_16 = arith.constant 0 : index
    %c0_17 = arith.constant 0 : index
    %37 = vector.load %arg5[%c0_14, %c0_15, %c0_16, %c0_17] : memref<1x1x1x256xf32, #tpu.memory_space<vmem>>, vector<1x1x1x256xf32>
    %38 = vector.shape_cast %37 : vector<1x1x1x256xf32> to vector<1x256xf32>
    %39 = vector.shape_cast %25 : vector<1x256xf32> to vector<1x1x1x256xf32>
    tpu.vector_store %arg5[%c0_14, %c0_15, %c0_16, %c0_17], %39 {strides = array<i32>} : memref<1x1x1x256xf32, #tpu.memory_space<vmem>>, vector<1x1x1x256xf32>,
    %c0_18 = arith.constant 0 : index
    %c0_19 = arith.constant 0 : index
    %c0_20 = arith.constant 0 : index
    %c0_21 = arith.constant 0 : index
    %40 = vector.load %arg6[%c0_18, %c0_19, %c0_20, %c0_21] : memref<1x1x1x256xf32, #tpu.memory_space<vmem>>, vector<1x1x1x256xf32>
    %41 = vector.shape_cast %40 : vector<1x1x1x256xf32> to vector<1x256xf32>
    %42 = vector.shape_cast %36 : vector<1x256xf32> to vector<1x1x1x256xf32>
    tpu.vector_store %arg6[%c0_18, %c0_19, %c0_20, %c0_21], %42 {strides = array<i32>} : memref<1x1x1x256xf32, #tpu.memory_space<vmem>>, vector<1x1x1x256xf32>,
    return
  }
  func.func @transform_0(%arg0: i32, %arg1: i32) -> (i32, i32, i32) {
    %c0_i32 = arith.constant 0 : i32
    %c0_i32_0 = arith.constant 0 : i32
    return %arg0, %c0_i32, %arg1 : i32, i32, i32
  }
  func.func @transform_1(%arg0: i32, %arg1: i32) -> (i32, i32) {
    %c0_i32 = arith.constant 0 : i32
    %c0_i32_0 = arith.constant 0 : i32
    %c0_i32_1 = arith.constant 0 : i32
    return %c0_i32, %c0_i32_0 : i32, i32
  }
  func.func @transform_2(%arg0: i32, %arg1: i32) -> (i32, i32, i32) {
    %c0_i32 = arith.constant 0 : i32
    %c0_i32_0 = arith.constant 0 : i32
    return %arg0, %arg1, %c0_i32 : i32, i32, i32
  }
  func.func @transform_3(%arg0: i32, %arg1: i32) -> (i32, i32, i32, i32) {
    %c0_i32 = arith.constant 0 : i32
    %c0_i32_0 = arith.constant 0 : i32
    %c0_i32_1 = arith.constant 0 : i32
    return %arg0, %arg1, %c0_i32, %c0_i32_0 : i32, i32, i32, i32
  }
  func.func @transform_4(%arg0: i32, %arg1: i32) -> (i32, i32, i32, i32) {
    %c0_i32 = arith.constant 0 : i32
    %c0_i32_0 = arith.constant 0 : i32
    %c0_i32_1 = arith.constant 0 : i32
    return %arg0, %arg1, %c0_i32, %c0_i32_0 : i32, i32, i32, i32
  }
}

module attributes {stable_mosaic.version = 11 : i64} {
  func.func @_mid_layer_kernel(%arg0: i32, %arg1: i32, %arg2: memref<1x512x256xbf16, #tpu.memory_space<vmem>>, %arg3: memref<1x256xf32, #tpu.memory_space<vmem>>, %arg4: memref<1x256xf32, #tpu.memory_space<vmem>>, %arg5: memref<256x64xbf16, #tpu.memory_space<vmem>>, %arg6: memref<1x512x64xbf16, #tpu.memory_space<vmem>>, %arg7: memref<1x1x1x64xf32, #tpu.memory_space<vmem>>, %arg8: memref<1x1x1x64xf32, #tpu.memory_space<vmem>>) attributes {dimension_semantics = [#tpu.dimension_semantics<parallel>, #tpu.dimension_semantics<parallel>], iteration_bounds = array<i64: 2, 1>, scalar_prefetch = 0 : i64, scratch_operands = 0 : i64, tpu.core_type = #tpu.core_type<tc>, window_params = [{transform_indices = @transform_0, window_bounds = array<i64: 1, 512, 256>}, {pipeline_mode = #tpu.pipeline_mode<synchronous>, transform_indices = @transform_1, window_bounds = array<i64: 1, 256>}, {pipeline_mode = #tpu.pipeline_mode<synchronous>, transform_indices = @transform_2, window_bounds = array<i64: 1, 256>}, {pipeline_mode = #tpu.pipeline_mode<synchronous>, transform_indices = @transform_3, window_bounds = array<i64: 256, 64>}, {transform_indices = @transform_4, window_bounds = array<i64: 1, 512, 64>}, {transform_indices = @transform_5, window_bounds = array<i64: 1, 1, 1, 64>}, {transform_indices = @transform_6, window_bounds = array<i64: 1, 1, 1, 64>}]} {
    %c0 = arith.constant 0 : index
    %c0_0 = arith.constant 0 : index
    %c0_1 = arith.constant 0 : index
    %0 = vector.load %arg2[%c0, %c0_0, %c0_1] : memref<1x512x256xbf16, #tpu.memory_space<vmem>>, vector<1x512x256xbf16>
    %1 = vector.shape_cast %0 : vector<1x512x256xbf16> to vector<512x256xbf16>
    %c0_2 = arith.constant 0 : index
    %c0_3 = arith.constant 0 : index
    %2 = vector.load %arg3[%c0_2, %c0_3] : memref<1x256xf32, #tpu.memory_space<vmem>>, vector<1x256xf32>
    %3 = arith.extf %1 : vector<512x256xbf16> to vector<512x256xf32>
    %4 = vector.broadcast %2 : vector<1x256xf32> to vector<512x256xf32>
    %5 = arith.mulf %3, %4 : vector<512x256xf32>
    %c0_4 = arith.constant 0 : index
    %c0_5 = arith.constant 0 : index
    %6 = vector.load %arg4[%c0_4, %c0_5] : memref<1x256xf32, #tpu.memory_space<vmem>>, vector<1x256xf32>
    %7 = vector.broadcast %6 : vector<1x256xf32> to vector<512x256xf32>
    %8 = arith.addf %5, %7 : vector<512x256xf32>
    %cst = arith.constant 0.000000e+00 : f32
    %9 = vector.broadcast %cst : f32 to vector<512x256xf32>
    %10 = arith.maximumf %8, %9 : vector<512x256xf32>
    %11 = arith.truncf %10 : vector<512x256xf32> to vector<512x256xbf16>
    %c0_6 = arith.constant 0 : index
    %c0_7 = arith.constant 0 : index
    %12 = vector.load %arg5[%c0_6, %c0_7] : memref<256x64xbf16, #tpu.memory_space<vmem>>, vector<256x64xbf16>
    %cst_8 = arith.constant dense<0.000000e+00> : vector<512x64xf32>
    %13 = tpu.matmul %11, %12, %cst_8 {dimension_numbers = #tpu.dot_dimension_numbers<[1], [0], [0], [1], [0, 0, 1, 1], [], []>} : vector<512x256xbf16>, vector<256x64xbf16>, vector<512x64xf32> -> vector<512x64xf32>
    %14 = arith.truncf %13 : vector<512x64xf32> to vector<512x64xbf16>
    %c0_9 = arith.constant 0 : index
    %c0_10 = arith.constant 0 : index
    %c0_11 = arith.constant 0 : index
    %15 = vector.load %arg6[%c0_9, %c0_10, %c0_11] : memref<1x512x64xbf16, #tpu.memory_space<vmem>>, vector<1x512x64xbf16>
    %16 = vector.shape_cast %15 : vector<1x512x64xbf16> to vector<512x64xbf16>
    %17 = vector.shape_cast %14 : vector<512x64xbf16> to vector<1x512x64xbf16>
    tpu.vector_store %arg6[%c0_9, %c0_10, %c0_11], %17 {strides = array<i32>} : memref<1x512x64xbf16, #tpu.memory_space<vmem>>, vector<1x512x64xbf16>,
    %c512_i32 = arith.constant 512 : i32
    %18 = arith.muli %arg1, %c512_i32 : i32
    %19 = tpu.iota {dimensions = array<i32: 0>} : vector<512x1xi32>
    %20 = vector.broadcast %18 : i32 to vector<512x1xi32>
    %21 = arith.addi %20, %19 : vector<512x1xi32>
    %c500_i32 = arith.constant 500 : i32
    %22 = vector.broadcast %c500_i32 : i32 to vector<512x1xi32>
    %23 = arith.cmpi slt, %21, %22 : vector<512x1xi32>
    %c512_i32_12 = arith.constant 512 : i32
    %24 = arith.muli %arg1, %c512_i32_12 : i32
    %c500_i32_13 = arith.constant 500 : i32
    %25 = arith.subi %c500_i32_13, %24 : i32
    %c512_i32_14 = arith.constant 512 : i32
    %26 = arith.minsi %25, %c512_i32_14 : i32
    %27 = arith.sitofp %26 : i32 to f32
    %cst_15 = arith.constant 0.000000e+00 : f32
    %28 = vector.shape_cast %23 : vector<512x1xi1> to vector<512x1xi1>
    %29 = vector.broadcast %28 : vector<512x1xi1> to vector<512x64xi1>
    %30 = vector.broadcast %cst_15 : f32 to vector<512x64xf32>
    %31 = arith.select %29, %13, %30 : vector<512x64xi1>, vector<512x64xf32>
    %cst_16 = arith.constant dense<0.000000e+00> : vector<64xf32>
    %32 = vector.multi_reduction <add>, %31, %cst_16 [0] : vector<512x64xf32> to vector<64xf32>
    %33 = vector.shape_cast %32 : vector<64xf32> to vector<1x64xf32>
    %34 = vector.broadcast %27 : f32 to vector<1x64xf32>
    %35 = arith.divf %33, %34 : vector<1x64xf32>
    %36 = vector.broadcast %35 : vector<1x64xf32> to vector<512x64xf32>
    %37 = arith.subf %13, %36 : vector<512x64xf32>
    %cst_17 = arith.constant 0.000000e+00 : f32
    %38 = vector.shape_cast %23 : vector<512x1xi1> to vector<512x1xi1>
    %39 = vector.broadcast %38 : vector<512x1xi1> to vector<512x64xi1>
    %40 = vector.broadcast %cst_17 : f32 to vector<512x64xf32>
    %41 = arith.select %39, %37, %40 : vector<512x64xi1>, vector<512x64xf32>
    %42 = arith.mulf %41, %41 : vector<512x64xf32>
    %cst_18 = arith.constant dense<0.000000e+00> : vector<64xf32>
    %43 = vector.multi_reduction <add>, %42, %cst_18 [0] : vector<512x64xf32> to vector<64xf32>
    %44 = vector.shape_cast %43 : vector<64xf32> to vector<1x64xf32>
    %c0_19 = arith.constant 0 : index
    %c0_20 = arith.constant 0 : index
    %c0_21 = arith.constant 0 : index
    %c0_22 = arith.constant 0 : index
    %45 = vector.load %arg7[%c0_19, %c0_20, %c0_21, %c0_22] : memref<1x1x1x64xf32, #tpu.memory_space<vmem>>, vector<1x1x1x64xf32>
    %46 = vector.shape_cast %45 : vector<1x1x1x64xf32> to vector<1x64xf32>
    %47 = vector.shape_cast %33 : vector<1x64xf32> to vector<1x1x1x64xf32>
    tpu.vector_store %arg7[%c0_19, %c0_20, %c0_21, %c0_22], %47 {strides = array<i32>} : memref<1x1x1x64xf32, #tpu.memory_space<vmem>>, vector<1x1x1x64xf32>,
    %c0_23 = arith.constant 0 : index
    %c0_24 = arith.constant 0 : index
    %c0_25 = arith.constant 0 : index
    %c0_26 = arith.constant 0 : index
    %48 = vector.load %arg8[%c0_23, %c0_24, %c0_25, %c0_26] : memref<1x1x1x64xf32, #tpu.memory_space<vmem>>, vector<1x1x1x64xf32>
    %49 = vector.shape_cast %48 : vector<1x1x1x64xf32> to vector<1x64xf32>
    %50 = vector.shape_cast %44 : vector<1x64xf32> to vector<1x1x1x64xf32>
    tpu.vector_store %arg8[%c0_23, %c0_24, %c0_25, %c0_26], %50 {strides = array<i32>} : memref<1x1x1x64xf32, #tpu.memory_space<vmem>>, vector<1x1x1x64xf32>,
    return
  }
  func.func @transform_0(%arg0: i32, %arg1: i32) -> (i32, i32, i32) {
    %c0_i32 = arith.constant 0 : i32
    %c0_i32_0 = arith.constant 0 : i32
    return %arg0, %arg1, %c0_i32 : i32, i32, i32
  }
  func.func @transform_1(%arg0: i32, %arg1: i32) -> (i32, i32) {
    %c0_i32 = arith.constant 0 : i32
    %c0_i32_0 = arith.constant 0 : i32
    %c0_i32_1 = arith.constant 0 : i32
    return %c0_i32, %c0_i32_0 : i32, i32
  }
  func.func @transform_2(%arg0: i32, %arg1: i32) -> (i32, i32) {
    %c0_i32 = arith.constant 0 : i32
    %c0_i32_0 = arith.constant 0 : i32
    %c0_i32_1 = arith.constant 0 : i32
    return %c0_i32, %c0_i32_0 : i32, i32
  }
  func.func @transform_3(%arg0: i32, %arg1: i32) -> (i32, i32) {
    %c0_i32 = arith.constant 0 : i32
    %c0_i32_0 = arith.constant 0 : i32
    %c0_i32_1 = arith.constant 0 : i32
    return %c0_i32, %c0_i32_0 : i32, i32
  }
  func.func @transform_4(%arg0: i32, %arg1: i32) -> (i32, i32, i32) {
    %c0_i32 = arith.constant 0 : i32
    %c0_i32_0 = arith.constant 0 : i32
    return %arg0, %arg1, %c0_i32 : i32, i32, i32
  }
  func.func @transform_5(%arg0: i32, %arg1: i32) -> (i32, i32, i32, i32) {
    %c0_i32 = arith.constant 0 : i32
    %c0_i32_0 = arith.constant 0 : i32
    %c0_i32_1 = arith.constant 0 : i32
    return %arg0, %arg1, %c0_i32, %c0_i32_0 : i32, i32, i32, i32
  }
  func.func @transform_6(%arg0: i32, %arg1: i32) -> (i32, i32, i32, i32) {
    %c0_i32 = arith.constant 0 : i32
    %c0_i32_0 = arith.constant 0 : i32
    %c0_i32_1 = arith.constant 0 : i32
    return %arg0, %arg1, %c0_i32, %c0_i32_0 : i32, i32, i32, i32
  }
}

module attributes {stable_mosaic.version = 11 : i64} {
  func.func @_mid_layer_kernel(%arg0: i32, %arg1: i32, %arg2: memref<1x512x64xbf16, #tpu.memory_space<vmem>>, %arg3: memref<1x64xf32, #tpu.memory_space<vmem>>, %arg4: memref<1x64xf32, #tpu.memory_space<vmem>>, %arg5: memref<64x32xbf16, #tpu.memory_space<vmem>>, %arg6: memref<1x512x32xbf16, #tpu.memory_space<vmem>>, %arg7: memref<1x1x1x32xf32, #tpu.memory_space<vmem>>, %arg8: memref<1x1x1x32xf32, #tpu.memory_space<vmem>>) attributes {dimension_semantics = [#tpu.dimension_semantics<parallel>, #tpu.dimension_semantics<parallel>], iteration_bounds = array<i64: 2, 1>, scalar_prefetch = 0 : i64, scratch_operands = 0 : i64, tpu.core_type = #tpu.core_type<tc>, window_params = [{transform_indices = @transform_0, window_bounds = array<i64: 1, 512, 64>}, {pipeline_mode = #tpu.pipeline_mode<synchronous>, transform_indices = @transform_1, window_bounds = array<i64: 1, 64>}, {pipeline_mode = #tpu.pipeline_mode<synchronous>, transform_indices = @transform_2, window_bounds = array<i64: 1, 64>}, {pipeline_mode = #tpu.pipeline_mode<synchronous>, transform_indices = @transform_3, window_bounds = array<i64: 64, 32>}, {transform_indices = @transform_4, window_bounds = array<i64: 1, 512, 32>}, {transform_indices = @transform_5, window_bounds = array<i64: 1, 1, 1, 32>}, {transform_indices = @transform_6, window_bounds = array<i64: 1, 1, 1, 32>}]} {
    %c0 = arith.constant 0 : index
    %c0_0 = arith.constant 0 : index
    %c0_1 = arith.constant 0 : index
    %0 = vector.load %arg2[%c0, %c0_0, %c0_1] : memref<1x512x64xbf16, #tpu.memory_space<vmem>>, vector<1x512x64xbf16>
    %1 = vector.shape_cast %0 : vector<1x512x64xbf16> to vector<512x64xbf16>
    %c0_2 = arith.constant 0 : index
    %c0_3 = arith.constant 0 : index
    %2 = vector.load %arg3[%c0_2, %c0_3] : memref<1x64xf32, #tpu.memory_space<vmem>>, vector<1x64xf32>
    %3 = arith.extf %1 : vector<512x64xbf16> to vector<512x64xf32>
    %4 = vector.broadcast %2 : vector<1x64xf32> to vector<512x64xf32>
    %5 = arith.mulf %3, %4 : vector<512x64xf32>
    %c0_4 = arith.constant 0 : index
    %c0_5 = arith.constant 0 : index
    %6 = vector.load %arg4[%c0_4, %c0_5] : memref<1x64xf32, #tpu.memory_space<vmem>>, vector<1x64xf32>
    %7 = vector.broadcast %6 : vector<1x64xf32> to vector<512x64xf32>
    %8 = arith.addf %5, %7 : vector<512x64xf32>
    %cst = arith.constant 0.000000e+00 : f32
    %9 = vector.broadcast %cst : f32 to vector<512x64xf32>
    %10 = arith.maximumf %8, %9 : vector<512x64xf32>
    %11 = arith.truncf %10 : vector<512x64xf32> to vector<512x64xbf16>
    %c0_6 = arith.constant 0 : index
    %c0_7 = arith.constant 0 : index
    %12 = vector.load %arg5[%c0_6, %c0_7] : memref<64x32xbf16, #tpu.memory_space<vmem>>, vector<64x32xbf16>
    %cst_8 = arith.constant dense<0.000000e+00> : vector<512x32xf32>
    %13 = tpu.matmul %11, %12, %cst_8 {dimension_numbers = #tpu.dot_dimension_numbers<[1], [0], [0], [1], [0, 0, 1, 1], [], []>} : vector<512x64xbf16>, vector<64x32xbf16>, vector<512x32xf32> -> vector<512x32xf32>
    %14 = arith.truncf %13 : vector<512x32xf32> to vector<512x32xbf16>
    %c0_9 = arith.constant 0 : index
    %c0_10 = arith.constant 0 : index
    %c0_11 = arith.constant 0 : index
    %15 = vector.load %arg6[%c0_9, %c0_10, %c0_11] : memref<1x512x32xbf16, #tpu.memory_space<vmem>>, vector<1x512x32xbf16>
    %16 = vector.shape_cast %15 : vector<1x512x32xbf16> to vector<512x32xbf16>
    %17 = vector.shape_cast %14 : vector<512x32xbf16> to vector<1x512x32xbf16>
    tpu.vector_store %arg6[%c0_9, %c0_10, %c0_11], %17 {strides = array<i32>} : memref<1x512x32xbf16, #tpu.memory_space<vmem>>, vector<1x512x32xbf16>,
    %c512_i32 = arith.constant 512 : i32
    %18 = arith.muli %arg1, %c512_i32 : i32
    %19 = tpu.iota {dimensions = array<i32: 0>} : vector<512x1xi32>
    %20 = vector.broadcast %18 : i32 to vector<512x1xi32>
    %21 = arith.addi %20, %19 : vector<512x1xi32>
    %c500_i32 = arith.constant 500 : i32
    %22 = vector.broadcast %c500_i32 : i32 to vector<512x1xi32>
    %23 = arith.cmpi slt, %21, %22 : vector<512x1xi32>
    %c512_i32_12 = arith.constant 512 : i32
    %24 = arith.muli %arg1, %c512_i32_12 : i32
    %c500_i32_13 = arith.constant 500 : i32
    %25 = arith.subi %c500_i32_13, %24 : i32
    %c512_i32_14 = arith.constant 512 : i32
    %26 = arith.minsi %25, %c512_i32_14 : i32
    %27 = arith.sitofp %26 : i32 to f32
    %cst_15 = arith.constant 0.000000e+00 : f32
    %28 = vector.shape_cast %23 : vector<512x1xi1> to vector<512x1xi1>
    %29 = vector.broadcast %28 : vector<512x1xi1> to vector<512x32xi1>
    %30 = vector.broadcast %cst_15 : f32 to vector<512x32xf32>
    %31 = arith.select %29, %13, %30 : vector<512x32xi1>, vector<512x32xf32>
    %cst_16 = arith.constant dense<0.000000e+00> : vector<32xf32>
    %32 = vector.multi_reduction <add>, %31, %cst_16 [0] : vector<512x32xf32> to vector<32xf32>
    %33 = vector.shape_cast %32 : vector<32xf32> to vector<1x32xf32>
    %34 = vector.broadcast %27 : f32 to vector<1x32xf32>
    %35 = arith.divf %33, %34 : vector<1x32xf32>
    %36 = vector.broadcast %35 : vector<1x32xf32> to vector<512x32xf32>
    %37 = arith.subf %13, %36 : vector<512x32xf32>
    %cst_17 = arith.constant 0.000000e+00 : f32
    %38 = vector.shape_cast %23 : vector<512x1xi1> to vector<512x1xi1>
    %39 = vector.broadcast %38 : vector<512x1xi1> to vector<512x32xi1>
    %40 = vector.broadcast %cst_17 : f32 to vector<512x32xf32>
    %41 = arith.select %39, %37, %40 : vector<512x32xi1>, vector<512x32xf32>
    %42 = arith.mulf %41, %41 : vector<512x32xf32>
    %cst_18 = arith.constant dense<0.000000e+00> : vector<32xf32>
    %43 = vector.multi_reduction <add>, %42, %cst_18 [0] : vector<512x32xf32> to vector<32xf32>
    %44 = vector.shape_cast %43 : vector<32xf32> to vector<1x32xf32>
    %c0_19 = arith.constant 0 : index
    %c0_20 = arith.constant 0 : index
    %c0_21 = arith.constant 0 : index
    %c0_22 = arith.constant 0 : index
    %45 = vector.load %arg7[%c0_19, %c0_20, %c0_21, %c0_22] : memref<1x1x1x32xf32, #tpu.memory_space<vmem>>, vector<1x1x1x32xf32>
    %46 = vector.shape_cast %45 : vector<1x1x1x32xf32> to vector<1x32xf32>
    %47 = vector.shape_cast %33 : vector<1x32xf32> to vector<1x1x1x32xf32>
    tpu.vector_store %arg7[%c0_19, %c0_20, %c0_21, %c0_22], %47 {strides = array<i32>} : memref<1x1x1x32xf32, #tpu.memory_space<vmem>>, vector<1x1x1x32xf32>,
    %c0_23 = arith.constant 0 : index
    %c0_24 = arith.constant 0 : index
    %c0_25 = arith.constant 0 : index
    %c0_26 = arith.constant 0 : index
    %48 = vector.load %arg8[%c0_23, %c0_24, %c0_25, %c0_26] : memref<1x1x1x32xf32, #tpu.memory_space<vmem>>, vector<1x1x1x32xf32>
    %49 = vector.shape_cast %48 : vector<1x1x1x32xf32> to vector<1x32xf32>
    %50 = vector.shape_cast %44 : vector<1x32xf32> to vector<1x1x1x32xf32>
    tpu.vector_store %arg8[%c0_23, %c0_24, %c0_25, %c0_26], %50 {strides = array<i32>} : memref<1x1x1x32xf32, #tpu.memory_space<vmem>>, vector<1x1x1x32xf32>,
    return
  }
  func.func @transform_0(%arg0: i32, %arg1: i32) -> (i32, i32, i32) {
    %c0_i32 = arith.constant 0 : i32
    %c0_i32_0 = arith.constant 0 : i32
    return %arg0, %arg1, %c0_i32 : i32, i32, i32
  }
  func.func @transform_1(%arg0: i32, %arg1: i32) -> (i32, i32) {
    %c0_i32 = arith.constant 0 : i32
    %c0_i32_0 = arith.constant 0 : i32
    %c0_i32_1 = arith.constant 0 : i32
    return %c0_i32, %c0_i32_0 : i32, i32
  }
  func.func @transform_2(%arg0: i32, %arg1: i32) -> (i32, i32) {
    %c0_i32 = arith.constant 0 : i32
    %c0_i32_0 = arith.constant 0 : i32
    %c0_i32_1 = arith.constant 0 : i32
    return %c0_i32, %c0_i32_0 : i32, i32
  }
  func.func @transform_3(%arg0: i32, %arg1: i32) -> (i32, i32) {
    %c0_i32 = arith.constant 0 : i32
    %c0_i32_0 = arith.constant 0 : i32
    %c0_i32_1 = arith.constant 0 : i32
    return %c0_i32, %c0_i32_0 : i32, i32
  }
  func.func @transform_4(%arg0: i32, %arg1: i32) -> (i32, i32, i32) {
    %c0_i32 = arith.constant 0 : i32
    %c0_i32_0 = arith.constant 0 : i32
    return %arg0, %arg1, %c0_i32 : i32, i32, i32
  }
  func.func @transform_5(%arg0: i32, %arg1: i32) -> (i32, i32, i32, i32) {
    %c0_i32 = arith.constant 0 : i32
    %c0_i32_0 = arith.constant 0 : i32
    %c0_i32_1 = arith.constant 0 : i32
    return %arg0, %arg1, %c0_i32, %c0_i32_0 : i32, i32, i32, i32
  }
  func.func @transform_6(%arg0: i32, %arg1: i32) -> (i32, i32, i32, i32) {
    %c0_i32 = arith.constant 0 : i32
    %c0_i32_0 = arith.constant 0 : i32
    %c0_i32_1 = arith.constant 0 : i32
    return %arg0, %arg1, %c0_i32, %c0_i32_0 : i32, i32, i32, i32
  }
}

module attributes {stable_mosaic.version = 11 : i64} {
  func.func @_last_layer_kernel(%arg0: i32, %arg1: i32, %arg2: memref<1x512x32xbf16, #tpu.memory_space<vmem>>, %arg3: memref<1x32xf32, #tpu.memory_space<vmem>>, %arg4: memref<1x32xf32, #tpu.memory_space<vmem>>, %arg5: memref<32x3xbf16, #tpu.memory_space<vmem>>, %arg6: memref<1x3xf32, #tpu.memory_space<vmem>>, %arg7: memref<1x512x3xf32, #tpu.memory_space<vmem>>) attributes {dimension_semantics = [#tpu.dimension_semantics<parallel>, #tpu.dimension_semantics<parallel>], iteration_bounds = array<i64: 2, 1>, scalar_prefetch = 0 : i64, scratch_operands = 0 : i64, tpu.core_type = #tpu.core_type<tc>, window_params = [{transform_indices = @transform_0, window_bounds = array<i64: 1, 512, 32>}, {pipeline_mode = #tpu.pipeline_mode<synchronous>, transform_indices = @transform_1, window_bounds = array<i64: 1, 32>}, {pipeline_mode = #tpu.pipeline_mode<synchronous>, transform_indices = @transform_2, window_bounds = array<i64: 1, 32>}, {pipeline_mode = #tpu.pipeline_mode<synchronous>, transform_indices = @transform_3, window_bounds = array<i64: 32, 3>}, {pipeline_mode = #tpu.pipeline_mode<synchronous>, transform_indices = @transform_4, window_bounds = array<i64: 1, 3>}, {transform_indices = @transform_5, window_bounds = array<i64: 1, 512, 3>}]} {
    %c0 = arith.constant 0 : index
    %c0_0 = arith.constant 0 : index
    %c0_1 = arith.constant 0 : index
    %0 = vector.load %arg2[%c0, %c0_0, %c0_1] : memref<1x512x32xbf16, #tpu.memory_space<vmem>>, vector<1x512x32xbf16>
    %1 = vector.shape_cast %0 : vector<1x512x32xbf16> to vector<512x32xbf16>
    %c0_2 = arith.constant 0 : index
    %c0_3 = arith.constant 0 : index
    %2 = vector.load %arg3[%c0_2, %c0_3] : memref<1x32xf32, #tpu.memory_space<vmem>>, vector<1x32xf32>
    %3 = arith.extf %1 : vector<512x32xbf16> to vector<512x32xf32>
    %4 = vector.broadcast %2 : vector<1x32xf32> to vector<512x32xf32>
    %5 = arith.mulf %3, %4 : vector<512x32xf32>
    %c0_4 = arith.constant 0 : index
    %c0_5 = arith.constant 0 : index
    %6 = vector.load %arg4[%c0_4, %c0_5] : memref<1x32xf32, #tpu.memory_space<vmem>>, vector<1x32xf32>
    %7 = vector.broadcast %6 : vector<1x32xf32> to vector<512x32xf32>
    %8 = arith.addf %5, %7 : vector<512x32xf32>
    %cst = arith.constant 0.000000e+00 : f32
    %9 = vector.broadcast %cst : f32 to vector<512x32xf32>
    %10 = arith.maximumf %8, %9 : vector<512x32xf32>
    %11 = arith.truncf %10 : vector<512x32xf32> to vector<512x32xbf16>
    %c0_6 = arith.constant 0 : index
    %c0_7 = arith.constant 0 : index
    %12 = vector.load %arg5[%c0_6, %c0_7] : memref<32x3xbf16, #tpu.memory_space<vmem>>, vector<32x3xbf16>
    %cst_8 = arith.constant dense<0.000000e+00> : vector<512x3xf32>
    %13 = tpu.matmul %11, %12, %cst_8 {dimension_numbers = #tpu.dot_dimension_numbers<[1], [0], [0], [1], [0, 0, 1, 1], [], []>} : vector<512x32xbf16>, vector<32x3xbf16>, vector<512x3xf32> -> vector<512x3xf32>
    %c0_9 = arith.constant 0 : index
    %c0_10 = arith.constant 0 : index
    %14 = vector.load %arg6[%c0_9, %c0_10] : memref<1x3xf32, #tpu.memory_space<vmem>>, vector<1x3xf32>
    %15 = vector.broadcast %14 : vector<1x3xf32> to vector<512x3xf32>
    %16 = arith.addf %13, %15 : vector<512x3xf32>
    %17 = math.tanh %16 : vector<512x3xf32>
    %cst_11 = arith.constant 5.000000e-01 : f32
    %18 = vector.broadcast %cst_11 : f32 to vector<512x3xf32>
    %19 = arith.mulf %18, %17 : vector<512x3xf32>
    %c0_12 = arith.constant 0 : index
    %c0_13 = arith.constant 0 : index
    %c0_14 = arith.constant 0 : index
    %20 = vector.load %arg7[%c0_12, %c0_13, %c0_14] : memref<1x512x3xf32, #tpu.memory_space<vmem>>, vector<1x512x3xf32>
    %21 = vector.shape_cast %20 : vector<1x512x3xf32> to vector<512x3xf32>
    %22 = vector.shape_cast %19 : vector<512x3xf32> to vector<1x512x3xf32>
    tpu.vector_store %arg7[%c0_12, %c0_13, %c0_14], %22 {strides = array<i32>} : memref<1x512x3xf32, #tpu.memory_space<vmem>>, vector<1x512x3xf32>,
    return
  }
  func.func @transform_0(%arg0: i32, %arg1: i32) -> (i32, i32, i32) {
    %c0_i32 = arith.constant 0 : i32
    %c0_i32_0 = arith.constant 0 : i32
    return %arg0, %arg1, %c0_i32 : i32, i32, i32
  }
  func.func @transform_1(%arg0: i32, %arg1: i32) -> (i32, i32) {
    %c0_i32 = arith.constant 0 : i32
    %c0_i32_0 = arith.constant 0 : i32
    %c0_i32_1 = arith.constant 0 : i32
    return %c0_i32, %c0_i32_0 : i32, i32
  }
  func.func @transform_2(%arg0: i32, %arg1: i32) -> (i32, i32) {
    %c0_i32 = arith.constant 0 : i32
    %c0_i32_0 = arith.constant 0 : i32
    %c0_i32_1 = arith.constant 0 : i32
    return %c0_i32, %c0_i32_0 : i32, i32
  }
  func.func @transform_3(%arg0: i32, %arg1: i32) -> (i32, i32) {
    %c0_i32 = arith.constant 0 : i32
    %c0_i32_0 = arith.constant 0 : i32
    %c0_i32_1 = arith.constant 0 : i32
    return %c0_i32, %c0_i32_0 : i32, i32
  }
  func.func @transform_4(%arg0: i32, %arg1: i32) -> (i32, i32) {
    %c0_i32 = arith.constant 0 : i32
    %c0_i32_0 = arith.constant 0 : i32
    %c0_i32_1 = arith.constant 0 : i32
    return %c0_i32, %c0_i32_0 : i32, i32
  }
  func.func @transform_5(%arg0: i32, %arg1: i32) -> (i32, i32, i32) {
    %c0_i32 = arith.constant 0 : i32
    %c0_i32_0 = arith.constant 0 : i32
    return %arg0, %arg1, %c0_i32 : i32, i32, i32
  }
}

</mosaic_0001>

<bundles_post_ra>
// kernel: tpu_custom_call.1
= control target key start
LH: loop header
LB: loop body
LE: loop exit
PB: predicated region body
PF: predicated region fallthrough
CT: control target
= control target key end

     0   :  { %7 = vsyncpa [#allocation3], 0  ;;  %s692_s0 = inlined_call_operand.hbm [shape: f32[8,128], index: 0, kind: input, shape index: {}]   ;;  %s693_s1 = inlined_call_operand.hbm [shape: f32[16,128], index: 1, kind: input, shape index: {}]   ;;  %s694_s2 = inlined_call_operand.hbm [shape: f32[16,128], index: 2, kind: output, shape index: {}]  }
   0x1   :  { %8 = vsyncpa [#allocation6], 0 }
   0x2   :  { %10 = vsyncpa [#allocation6 + $0x1], 0 }
   0x3   :  { %11 = vsyncpa [#allocation4], 0 }
   0x4   :  { %13 = vsyncpa [#allocation4 + $0x1], 0  ;;  %s491_s9 = smov 0   ;;  %s493_s10 = smov 0  }
   0x5   :  { %s495_s11 = smov 0   ;;  %s497_s12 = smov 0  }
   0x6 LB: > { %s512_s13 = sadd.s32 4294967295, %s471_s12   ;;  %s272_s14 = sadd.s32 4294967294, %s471_s12   ;;  %s471_s12 = sphi %s497_s12, %s718_s12   ;;  %s467_s11 = sphi %s495_s11, %s717_s11   ;;  %s463_s10 = sphi %s493_s10, %s716_s10   ;;  %s459_s9 = sphi %s491_s9, %s715_s9  }
   0x7   : > { %p60_p0 = scmp.ne.s32.totalorder %s463_s10, %s459_s9  ;;  %p695_p1 = scmp.eq.s32.totalorder %s512_s13, 0 }
   0x8   : > { %p90_p3 = scmp.eq.s32.totalorder %s272_s14, 1  ;;  %p273_p5 = scmp.ge.s32.totalorder %s471_s12, 1 }
   0x9   : > { %p521_p4 = por %p695_p1, %p60_p0  ;;  %p97_p7 = scmp.lt.s32.totalorder %s471_s12, 3 }
   0xa   : > { %p526_p6 = por %p90_p3, %p60_p0  ;;  %s473_s18 = smov [#allocation2]  }
   0xb   : > { %s698_s15 = scalar_select %p521_p4, 1, 0 }
   0xc   : > { %s699_s16 = scalar_select %p526_p6, 1, 0 }
   0xd   : > { %p531_p8 = pnand %p273_p5, %p97_p7  ;;  %s110_s19 = sshll.u32 %s473_s18, 4  ;;  %s111_s19 = int_to_ptr.vmem [resolvable:$true] %s110_s19 }
   0xe   : > { %s539_s20 = sadd.s32 1, %s471_s12   ;;  %s47_s24 = sadd.s32 1, %s467_s11 }
   0xf   : > { %s700_s17 = scalar_select %p531_p8, 1, 0 }
  0x10   : > { %p294_p10 = pneg %p531_p8  ;;  %s44_s22 = ssub.s32 %s471_s12, %s539_s20 }
  0x11   : > { %p549_p12 = scmp.eq.s32.totalorder %s44_s22, 0  ;;  %s343_s27 = scalar_lea.hbm %s692_s0, 128 }
  0x12   : > { %p543_p11 = pnand %p294_p10, %p695_p1  ;;  %p344_p0 = scmp.ne.s32.totalorder %s692_s0, %s343_s27 }
  0x13   : > { %s702_s23 = scalar_select %p549_p12, 1, 0 }
  0x14   : > { %p345_p3 = pneg %p543_p11  ;;  %p350_p10 = scmp.lt.u32.totalorder %s343_s27, %s692_s0 }
  0x16   : > { %p346_p5 = pnand %p345_p3, %p344_p0 }
  0x18   : > { %p347_p7 = pneg %p346_p5 }
  0x1a   : > { %p352_p9 = pnand %p350_p10, %p347_p7 }
  0x1c   : > { %355 = shalt.err (!%p352_p9)
}
  0x1d   : > { %s356_s4 = scalar_lea.vmem %s111_s19, 128  ;;  %p364_p6 = scmp.lt.s32.totalorder %s111_s19, %s111_s19 }
  0x1e   : > { %p357_p1 = scmp.ne.s32.totalorder %s111_s19, %s356_s4  ;;  %p365_p4 = scmp.lt.s32.totalorder %s356_s4, %s356_s4 }
  0x20   : > { %p359_p2 = pnand %p357_p1, %p345_p3  ;;  %p366_p8 = por %p365_p4, %p364_p6 }
  0x22   : > { %p360_p13 = pneg %p359_p2 }
  0x24   : > { %p367_p12 = pnand %p366_p8, %p360_p13 }
  0x26   : > { %370 = shalt.err (!%p367_p12)
}
  0x27   : > { %297 = dma.hbm_to_vmem [thread:$0]  (!%p543_p11), %s692_s0, 128, %s111_s19, [#allocation3]  }
  0x28   : > { %p703_p1 = scmp.ne.s32.totalorder %s702_s23, 0  ;;  %p55_p2 = scmp.eq.s32.totalorder %s471_s12, 0 }
  0x29   : > { %p704_p4 = scmp.ne.s32.totalorder %s467_s11, %s463_s10  ;;  %p705_p6 = scmp.eq.s32.totalorder %s512_s13, 1 }
  0x2a   : > { %s575_s7 = scalar_select %p703_p1, %s467_s11, %s47_s24  }
  0x2b   : > { %p583_p8 = por %p705_p6, %p704_p4  ;;  %p307_p9 = scmp.lt.s32.totalorder %s471_s12, 2 }
  0x2c   : > { %s121_s14 = sand.u32 1, %s467_s11   ;;  %p707_p12 = pmov %p704_p4 }
  0x2d   : > { %s276_s18 = sshll.u32 %s121_s14, 3  ;;  %s277_s21 = sshll.u32 %s471_s12, 7 }
  0x2e   : > { %p56_p13 = por %p55_p2, %p707_p12  ;;  %s596_s19 = scalar_lea.hbm %s693_s1, %s277_s21 }
  0x2f   : > { %s125_s23 = scalar_lea.vmem [#allocation5], %s276_s18  ;;  %s122_s27 = scalar_lea.sflag [#allocation6], %s121_s14 }
  0x30   : > { %s132_s24 = sshll.u32 %s125_s23, 4  ;;  %p598_p11 = pnand %p307_p9, %p56_p13  ;;  %s602_s24 = int_to_ptr.vmem [resolvable:$true] %s132_s24 }
  0x31   : > { %s371_s28 = scalar_lea.hbm %s596_s19, 128  ;;  %s376_s3 = scalar_lea.hbm %s693_s1, 256 }
  0x32   : > { %p372_p0 = scmp.ne.s32.totalorder %s596_s19, %s371_s28  ;;  %p373_p3 = pneg %p598_p11 }
  0x33   : > { %p377_p10 = scmp.lt.u32.totalorder %s596_s19, %s693_s1  ;;  %p378_p1 = scmp.lt.u32.totalorder %s376_s3, %s371_s28 }
  0x34   : > { %p374_p5 = pnand %p373_p3, %p372_p0  ;;  %p380_p4 = scmp.lt.u32.totalorder %s371_s28, %s596_s19 }
  0x35   : > { %p379_p2 = por %p378_p1, %p377_p10 }
  0x36   : > { %p375_p7 = pneg %p374_p5 }
  0x37   : > { %p381_p6 = por %p380_p4, %p379_p2 }
  0x39   : > { %p382_p9 = pnand %p381_p6, %p375_p7 }
  0x3b   : > { %385 = shalt.err (!%p382_p9)
}
  0x3c   : > { %s386_s6 = scalar_lea.vmem %s602_s24, 128  ;;  %s474_s14 = smov [#allocation5]  }
  0x3d   : > { %p387_p12 = scmp.ne.s32.totalorder %s602_s24, %s386_s6  ;;  %s391_s18 = sshll.u32 %s474_s14, 4  ;;  %s392_s18 = int_to_ptr.vmem [resolvable:$false] %s391_s18 }
  0x3e   : > { %s393_s21 = scalar_lea.vmem %s392_s18, 256  ;;  %p394_p5 = scmp.lt.s32.totalorder %s602_s24, %s392_s18 }
  0x3f   : > { %p389_p13 = pnand %p387_p12, %p373_p3  ;;  %p395_p10 = scmp.lt.s32.totalorder %s393_s21, %s386_s6 }
  0x41   : > { %p390_p0 = pneg %p389_p13  ;;  %p396_p1 = por %p395_p10, %p394_p5 }
  0x43   : > { %p397_p2 = pnand %p396_p1, %p390_p0 }
  0x45   : > { %400 = shalt.err (!%p397_p2)
}
  0x46   : > { %301 = dma.hbm_to_vmem [thread:$0]  (!%p598_p11), %s596_s19, 128, %s602_s24, %s122_s27  }
  0x47   : > { %p709_p7 = scmp.ne.s32.totalorder %s700_s17, 0 }
  0x48   : > { %p710_p3 = scmp.eq.s32.totalorder (!%p709_p7), %s512_s13, 0 }
  0x49   : > { %141 = sbr.rel (%p709_p7) target bundleno = 110 (0x6e), region = 28 }
  0x50   : > { %446 = dma.done.wait (%p710_p3), [#allocation3], 128   ;;  %p711_p4 = pmov %p710_p3 }
  0x51   : > { %s636_s22 = sand.u32 1, %s463_s10   ;;  %p712_p6 = scmp.ne.s32.totalorder %s698_s15, 0 }
  0x52   : > { %448 = vsyncadd (%p711_p4), [#allocation3], 4294967168  ;;  %s280_s25 = sshll.u32 %s636_s22, 3  ;;  %s148_s23 = scalar_lea.sflag [#allocation6], %s636_s22 }
  0x53   : > { %s151_s26 = scalar_lea.vmem [#allocation5], %s280_s25 }
  0x54   : > { %450 = dma.done.wait (%p712_p6), %s148_s23, 128  }
  0x55   : > { %452 = vsyncadd (%p712_p6), %s148_s23, 4294967168  ;;  %s171_s17 = scalar_lea.vmem [#allocation7], %s280_s25  ;;  %s283_s24 = sshll.u32 %s512_s13, 7  ;;  %v172_v0 = vld [vmem:[%s151_s26] sm:$0xff]  ;;  %v173_v1 = vld [vmem:[#allocation2] sm:$0xff] }
  0x56   : > { %s190_s19 = sshll.u32 %s171_s17, 4  ;;  %v174_v2 = vadd.f32 %v173_v1, %v172_v0  ;;  %s650_s29 = scalar_lea.hbm %s694_s2, %s283_s24  ;;  %s645_s19 = int_to_ptr.vmem [resolvable:$true] %s190_s19 }
  0x57   : > { %s177_s15 = scalar_lea.sflag [#allocation4], %s636_s22  ;;  %s401_s30 = scalar_lea.vmem %s645_s19, 128 }
  0x58   : > { %175 = vst [vmem:[%s171_s17] sm:$0xff] %v174_v2  ;;  %p402_p11 = scmp.ne.s32.totalorder %s645_s19, %s401_s30  ;;  %s475_s13 = smov [#allocation7]  }
  0x59   : > { %s405_s3 = sshll.u32 %s475_s13, 4  ;;  %s406_s3 = int_to_ptr.vmem [resolvable:$false] %s405_s3 }
  0x5a   : > { %p403_p9 = pnand %p402_p11, %p583_p8  ;;  %s407_s4 = scalar_lea.vmem %s406_s3, 256 }
  0x5b   : > { %p408_p13 = scmp.lt.s32.totalorder %s645_s19, %s406_s3  ;;  %p409_p0 = scmp.lt.s32.totalorder %s407_s4, %s401_s30 }
  0x5c   : > { %p404_p12 = pneg %p403_p9 }
  0x5d   : > { %p410_p5 = por %p409_p0, %p408_p13 }
  0x5f   : > { %p411_p10 = pnand %p410_p5, %p404_p12 }
  0x61   : > { %414 = shalt.err (!%p411_p10)
}
  0x62   : > { %s415_s5 = scalar_lea.hbm %s650_s29, 128  ;;  %s419_s18 = scalar_lea.hbm %s694_s2, 256 }
  0x63   : > { %p416_p1 = scmp.ne.s32.totalorder %s650_s29, %s415_s5  ;;  %p420_p3 = scmp.lt.u32.totalorder %s650_s29, %s694_s2 }
  0x64   : > { %p421_p4 = scmp.lt.u32.totalorder %s419_s18, %s415_s5  ;;  %p423_p11 = scmp.lt.u32.totalorder %s415_s5, %s650_s29 }
  0x65   : > { %p417_p2 = pnand %p416_p1, %p583_p8 }
  0x66   : > { %p422_p6 = por %p421_p4, %p420_p3 }
  0x67   : > { %p418_p7 = pneg %p417_p2 }
  0x68   : > { %p424_p9 = por %p423_p11, %p422_p6 }
  0x6a   : > { %p425_p12 = pnand %p424_p9, %p418_p7 }
  0x6c   : > { %428 = shalt.err (!%p425_p12)
}
  0x6d   : > { %292 = dma.vmem_to_hbm [thread:$0]  (%p583_p8), %s645_s19, 128, %s650_s29, %s177_s15  }
  0x6e PF: > { %s202_s25 = sand.u32 1, %s459_s9   ;;  %p713_p13 = scmp.ne.s32.totalorder %s699_s16, 0 }
  0x6f   : > { %p714_p0 = scmp.ge.s32.totalorder %s471_s12, 2  ;;  %s203_s23 = scalar_lea.sflag [#allocation4], %s202_s25 }
  0x71   : > { %p303_p5 = pnand %p714_p0, %p713_p13 }
  0x73   : > { %454 = dma.done.wait (!%p303_p5), %s203_s23, 128  }
  0x74   : > { %456 = vsyncadd (!%p303_p5), %s203_s23, 4294967168  ;;  %p16_p10 = scmp.ge.s32.totalorder %s539_s20, 4   ;;  %s715_s9 = smov %s463_s10 }
  0x75   : > { %s716_s10 = smov %s467_s11  ;;  %s717_s11 = smov %s575_s7 }
  0x76   : > { %s718_s12 = smov %s539_s20  ;;  %18 = sbr.rel (!%p16_p10) target bundleno = 6 (0x6), region = 78 }
  0x7d   :  { %208 = vsyncpa [#allocation3], 1 }
  0x7e   :  { %210 = vsyncpa [#allocation3 + $0x1], 1 }
  0x7f   :  { %211 = vsyncpa [#allocation6], 1 }
  0x80   :  { %213 = vsyncpa [#allocation6 + $0x1], 1 }
  0x81   :  { %214 = vsyncpa [#allocation4], 1 }
  0x82   :  { %216 = vsyncpa [#allocation4 + $0x1], 1 }

// kernel: _forward_impl.4
= control target key start
LH: loop header
LB: loop body
LE: loop exit
PB: predicated region body
PF: predicated region fallthrough
CT: control target
= control target key end

     0   :  { %s2332_s15 = smov 0   ;;  %s2334_s16 = smov 0   ;;  %s3777_s0 = inlined_call_operand.vmem [shape: f32[2,256,512], index: 0, kind: input, shape index: {}]   ;;  %s3778_s1 = inlined_call_operand.vmem [shape: bf16[256,256], index: 1, kind: input, shape index: {}]   ;;  %s3779_s2 = inlined_call_operand.vmem [shape: bf16[2,512,256], index: 2, kind: output, shape index: {0}]   ;;  %s3780_s3 = inlined_call_operand.vmem [shape: f32[2,2,1,256], index: 3, kind: output, shape index: {1}]   ;;  %s3781_s4 = inlined_call_operand.vmem [shape: f32[2,2,1,256], index: 4, kind: output, shape index: {2}]  }
   0x1   :  { %s2336_s17 = smov 0   ;;  %s2338_s18 = smov 0  }
   0x2   :  { %s2340_s19 = smov 0   ;;  %s2342_s20 = smov 0  }
   0x3   :  { %s2344_s21 = smov 0  }
   0x4 LB: > { %s24_s22 = sadd.s32 1, %s2296_s19  ;;  %s27_s23 = sadd.s32 1, %s2300_s20  ;;  %s2304_s21 = sphi %s2344_s21, %s15_s21   ;;  %s2300_s20 = sphi %s2342_s20, %s4138_s20   ;;  %s2296_s19 = sphi %s2340_s19, %s4137_s19   ;;  %s2292_s18 = sphi %s2338_s18, %s4136_s18   ;;  %s2288_s17 = sphi %s2336_s17, %s4135_s17   ;;  %s2284_s16 = sphi %s2334_s16, %s4134_s16   ;;  %s2280_s15 = sphi %s2332_s15, %s4133_s15  }
   0x5   : > { %p25_p0 = scmp.ge.s32.totalorder %s24_s22, 2  ;;  %p43_p1 = scmp.ne.s32.totalorder %s2284_s16, %s2280_s15 }
   0x6   : > { %p44_p2 = scmp.eq.s32.totalorder %s2304_s21, 0  ;;  %s36_s27 = sadd.s32 1, %s2284_s16 }
   0x7   : > { %s4140_s22 = smov (%p25_p0, %s24_s22), 0  ;;  %s4142_s23 = smov (!%p25_p0, %s27_s23), %s2300_s20 }
   0x8   : > { %p45_p3 = por %p44_p2, %p43_p1  ;;  %p29_p4 = scmp.ge.s32.totalorder %s4142_s23, 2 }
   0x9   : > { %s32_s24 = ssub.s32 %s2296_s19, %s4140_s22  ;;  %p1997_p6 = scmp.ge.s32.totalorder %s2304_s21, 4 }
   0xa   : > { %s4144_s23 = smov (%p29_p4, %s4142_s23), 0 }
   0xb   : > { %s31_s25 = ssub.s32 %s2300_s20, %s4144_s23  ;;  %177 = sbr.rel (%p1997_p6) target bundleno = 57 (0x39), region = 20 }
   0xc   : > { %s33_s26 = sor.u32 %s32_s24, %s31_s25 }
   0xd   : > { %p34_p5 = scmp.eq.s32.totalorder %s33_s26, 0 }
   0xf   : > { %s2383_s28 = scalar_select %p34_p5, %s2284_s16, %s36_s27  }
  0x12   : > { %180 = sbr.rel (!%p45_p3) target bundleno = 57 (0x39), region = 24  ;;  %s182_s29 = sand.u32 (%p45_p3), 1, %s2284_s16  }
  0x13   : > { %s1999_s30 = sshll.u32 (%p45_p3), %s2296_s19, 1  ;;  %s1998_s5 = sshll.u32 (%p45_p3), %s182_s29, 9 }
  0x14   : > { %s2000_s6 = sshll.u32 (%p45_p3), %s2300_s20, 7  ;;  %s2397_s12 = scalar_lea.vmem (%p45_p3), [#allocation2], %s1998_s5 }
  0x15   : > { %s187_s7 = sadd.s32 (%p45_p3), %s2000_s6, %s1999_s30 }
  0x16   : > { %s2001_s8 = sshll.u32 (%p45_p3), %s187_s7, 3 }
  0x17   : > { %s2392_s11 = scalar_lea.vmem (%p45_p3), %s3777_s0, %s2001_s8 }
  0x18   : > { %v202_v0 = vld [vmem:[%s2392_s11] sm:$0xff] (%p45_p3)  ;;  %v204_v1 = vld [vmem:[%s2392_s11 + $0x8] sm:$0xff] (%p45_p3) }
  0x19   : > { %v206_v2 = vld [vmem:[%s2392_s11 + $0x20] sm:$0xff]  ;;  %203 = vst [vmem:[%s2397_s12] sm:$0xff] %v202_v0  ;;  %205 = vst [vmem:[%s2397_s12 + $0x8] sm:$0xff] %v204_v1  ;;  %v208_v3 = vld [vmem:[%s2392_s11 + $0x28] sm:$0xff] }
  0x1a   : > { %207 = vst [vmem:[%s2397_s12 + $0x10] sm:$0xff] %v206_v2  ;;  %v210_v4 = vld [vmem:[%s2392_s11 + $0x40] sm:$0xff]  ;;  %v212_v5 = vld [vmem:[%s2392_s11 + $0x48] sm:$0xff]  ;;  %209 = vst [vmem:[%s2397_s12 + $0x18] sm:$0xff] %v208_v3 }
  0x1b   : > { %211 = vst [vmem:[%s2397_s12 + $0x20] sm:$0xff] %v210_v4  ;;  %213 = vst [vmem:[%s2397_s12 + $0x28] sm:$0xff] %v212_v5  ;;  %v214_v6 = vld [vmem:[%s2392_s11 + $0x60] sm:$0xff]  ;;  %v216_v7 = vld [vmem:[%s2392_s11 + $0x68] sm:$0xff] }
  0x1c   : > { %v218_v8 = vld [vmem:[%s2392_s11 + $0x80] sm:$0xff]  ;;  %215 = vst [vmem:[%s2397_s12 + $0x30] sm:$0xff] %v214_v6  ;;  %217 = vst [vmem:[%s2397_s12 + $0x38] sm:$0xff] %v216_v7  ;;  %v220_v9 = vld [vmem:[%s2392_s11 + $0x88] sm:$0xff] }
  0x1d   : > { %219 = vst [vmem:[%s2397_s12 + $0x40] sm:$0xff] %v218_v8  ;;  %v222_v10 = vld [vmem:[%s2392_s11 + $0xa0] sm:$0xff]  ;;  %v224_v11 = vld [vmem:[%s2392_s11 + $0xa8] sm:$0xff]  ;;  %221 = vst [vmem:[%s2397_s12 + $0x48] sm:$0xff] %v220_v9 }
  0x1e   : > { %223 = vst [vmem:[%s2397_s12 + $0x50] sm:$0xff] %v222_v10  ;;  %225 = vst [vmem:[%s2397_s12 + $0x58] sm:$0xff] %v224_v11  ;;  %v226_v12 = vld [vmem:[%s2392_s11 + $0xc0] sm:$0xff]  ;;  %v228_v13 = vld [vmem:[%s2392_s11 + $0xc8] sm:$0xff] }
  0x1f   : > { %v230_v14 = vld [vmem:[%s2392_s11 + $0xe0] sm:$0xff]  ;;  %227 = vst [vmem:[%s2397_s12 + $0x60] sm:$0xff] %v226_v12  ;;  %229 = vst [vmem:[%s2397_s12 + $0x68] sm:$0xff] %v228_v13  ;;  %v232_v15 = vld [vmem:[%s2392_s11 + $0xe8] sm:$0xff] }
  0x20   : > { %231 = vst [vmem:[%s2397_s12 + $0x70] sm:$0xff] %v230_v14  ;;  %v234_v16 = vld [vmem:[%s2392_s11 + $0x100] sm:$0xff]  ;;  %v236_v17 = vld [vmem:[%s2392_s11 + $0x108] sm:$0xff]  ;;  %233 = vst [vmem:[%s2397_s12 + $0x78] sm:$0xff] %v232_v15 }
  0x21   : > { %235 = vst [vmem:[%s2397_s12 + $0x80] sm:$0xff] %v234_v16  ;;  %237 = vst [vmem:[%s2397_s12 + $0x88] sm:$0xff] %v236_v17  ;;  %v238_v18 = vld [vmem:[%s2392_s11 + $0x120] sm:$0xff]  ;;  %v240_v19 = vld [vmem:[%s2392_s11 + $0x128] sm:$0xff] }
  0x22   : > { %v242_v20 = vld [vmem:[%s2392_s11 + $0x140] sm:$0xff]  ;;  %239 = vst [vmem:[%s2397_s12 + $0x90] sm:$0xff] %v238_v18  ;;  %241 = vst [vmem:[%s2397_s12 + $0x98] sm:$0xff] %v240_v19  ;;  %v244_v21 = vld [vmem:[%s2392_s11 + $0x148] sm:$0xff] }
  0x23   : > { %243 = vst [vmem:[%s2397_s12 + $0xa0] sm:$0xff] %v242_v20  ;;  %v246_v22 = vld [vmem:[%s2392_s11 + $0x160] sm:$0xff]  ;;  %v248_v23 = vld [vmem:[%s2392_s11 + $0x168] sm:$0xff]  ;;  %245 = vst [vmem:[%s2397_s12 + $0xa8] sm:$0xff] %v244_v21 }
  0x24   : > { %247 = vst [vmem:[%s2397_s12 + $0xb0] sm:$0xff] %v246_v22  ;;  %249 = vst [vmem:[%s2397_s12 + $0xb8] sm:$0xff] %v248_v23  ;;  %v250_v24 = vld [vmem:[%s2392_s11 + $0x180] sm:$0xff]  ;;  %v252_v25 = vld [vmem:[%s2392_s11 + $0x188] sm:$0xff] }
  0x25   : > { %v254_v26 = vld [vmem:[%s2392_s11 + $0x1a0] sm:$0xff]  ;;  %251 = vst [vmem:[%s2397_s12 + $0xc0] sm:$0xff] %v250_v24  ;;  %253 = vst [vmem:[%s2397_s12 + $0xc8] sm:$0xff] %v252_v25  ;;  %v256_v27 = vld [vmem:[%s2392_s11 + $0x1a8] sm:$0xff] }
  0x26   : > { %255 = vst [vmem:[%s2397_s12 + $0xd0] sm:$0xff] %v254_v26  ;;  %v258_v28 = vld [vmem:[%s2392_s11 + $0x1c0] sm:$0xff]  ;;  %v260_v29 = vld [vmem:[%s2392_s11 + $0x1c8] sm:$0xff]  ;;  %257 = vst [vmem:[%s2397_s12 + $0xd8] sm:$0xff] %v256_v27 }
  0x27   : > { %259 = vst [vmem:[%s2397_s12 + $0xe0] sm:$0xff] %v258_v28  ;;  %261 = vst [vmem:[%s2397_s12 + $0xe8] sm:$0xff] %v260_v29  ;;  %v262_v30 = vld [vmem:[%s2392_s11 + $0x1e0] sm:$0xff]  ;;  %v264_v31 = vld [vmem:[%s2392_s11 + $0x1e8] sm:$0xff] }
  0x28   : > { %v266_v32 = vld [vmem:[%s2392_s11 + $0x200] sm:$0xff]  ;;  %263 = vst [vmem:[%s2397_s12 + $0xf0] sm:$0xff] %v262_v30  ;;  %265 = vst [vmem:[%s2397_s12 + $0xf8] sm:$0xff] %v264_v31  ;;  %v268_v33 = vld [vmem:[%s2392_s11 + $0x208] sm:$0xff] }
  0x29   : > { %267 = vst [vmem:[%s2397_s12 + $0x100] sm:$0xff] %v266_v32  ;;  %v270_v34 = vld [vmem:[%s2392_s11 + $0x220] sm:$0xff]  ;;  %v272_v35 = vld [vmem:[%s2392_s11 + $0x228] sm:$0xff]  ;;  %269 = vst [vmem:[%s2397_s12 + $0x108] sm:$0xff] %v268_v33 }
  0x2a   : > { %271 = vst [vmem:[%s2397_s12 + $0x110] sm:$0xff] %v270_v34  ;;  %273 = vst [vmem:[%s2397_s12 + $0x118] sm:$0xff] %v272_v35  ;;  %v274_v36 = vld [vmem:[%s2392_s11 + $0x240] sm:$0xff]  ;;  %v276_v37 = vld [vmem:[%s2392_s11 + $0x248] sm:$0xff] }
  0x2b   : > { %v278_v38 = vld [vmem:[%s2392_s11 + $0x260] sm:$0xff]  ;;  %275 = vst [vmem:[%s2397_s12 + $0x120] sm:$0xff] %v274_v36  ;;  %277 = vst [vmem:[%s2397_s12 + $0x128] sm:$0xff] %v276_v37  ;;  %v280_v39 = vld [vmem:[%s2392_s11 + $0x268] sm:$0xff] }
  0x2c   : > { %279 = vst [vmem:[%s2397_s12 + $0x130] sm:$0xff] %v278_v38  ;;  %v282_v40 = vld [vmem:[%s2392_s11 + $0x280] sm:$0xff]  ;;  %v284_v41 = vld [vmem:[%s2392_s11 + $0x288] sm:$0xff]  ;;  %281 = vst [vmem:[%s2397_s12 + $0x138] sm:$0xff] %v280_v39 }
  0x2d   : > { %283 = vst [vmem:[%s2397_s12 + $0x140] sm:$0xff] %v282_v40  ;;  %285 = vst [vmem:[%s2397_s12 + $0x148] sm:$0xff] %v284_v41  ;;  %v286_v42 = vld [vmem:[%s2392_s11 + $0x2a0] sm:$0xff]  ;;  %v288_v43 = vld [vmem:[%s2392_s11 + $0x2a8] sm:$0xff] }
  0x2e   : > { %v290_v44 = vld [vmem:[%s2392_s11 + $0x2c0] sm:$0xff]  ;;  %287 = vst [vmem:[%s2397_s12 + $0x150] sm:$0xff] %v286_v42  ;;  %289 = vst [vmem:[%s2397_s12 + $0x158] sm:$0xff] %v288_v43  ;;  %v292_v45 = vld [vmem:[%s2392_s11 + $0x2c8] sm:$0xff] }
  0x2f   : > { %291 = vst [vmem:[%s2397_s12 + $0x160] sm:$0xff] %v290_v44  ;;  %v294_v46 = vld [vmem:[%s2392_s11 + $0x2e0] sm:$0xff]  ;;  %v296_v47 = vld [vmem:[%s2392_s11 + $0x2e8] sm:$0xff]  ;;  %293 = vst [vmem:[%s2397_s12 + $0x168] sm:$0xff] %v292_v45 }
  0x30   : > { %295 = vst [vmem:[%s2397_s12 + $0x170] sm:$0xff] %v294_v46  ;;  %297 = vst [vmem:[%s2397_s12 + $0x178] sm:$0xff] %v296_v47  ;;  %v298_v48 = vld [vmem:[%s2392_s11 + $0x300] sm:$0xff]  ;;  %v300_v49 = vld [vmem:[%s2392_s11 + $0x308] sm:$0xff] }
  0x31   : > { %v302_v50 = vld [vmem:[%s2392_s11 + $0x320] sm:$0xff]  ;;  %299 = vst [vmem:[%s2397_s12 + $0x180] sm:$0xff] %v298_v48  ;;  %301 = vst [vmem:[%s2397_s12 + $0x188] sm:$0xff] %v300_v49  ;;  %v304_v51 = vld [vmem:[%s2392_s11 + $0x328] sm:$0xff] }
  0x32   : > { %303 = vst [vmem:[%s2397_s12 + $0x190] sm:$0xff] %v302_v50  ;;  %v306_v52 = vld [vmem:[%s2392_s11 + $0x340] sm:$0xff]  ;;  %v308_v53 = vld [vmem:[%s2392_s11 + $0x348] sm:$0xff]  ;;  %305 = vst [vmem:[%s2397_s12 + $0x198] sm:$0xff] %v304_v51 }
  0x33   : > { %307 = vst [vmem:[%s2397_s12 + $0x1a0] sm:$0xff] %v306_v52  ;;  %309 = vst [vmem:[%s2397_s12 + $0x1a8] sm:$0xff] %v308_v53  ;;  %v310_v54 = vld [vmem:[%s2392_s11 + $0x360] sm:$0xff]  ;;  %v312_v55 = vld [vmem:[%s2392_s11 + $0x368] sm:$0xff] }
  0x34   : > { %v314_v56 = vld [vmem:[%s2392_s11 + $0x380] sm:$0xff]  ;;  %311 = vst [vmem:[%s2397_s12 + $0x1b0] sm:$0xff] %v310_v54  ;;  %313 = vst [vmem:[%s2397_s12 + $0x1b8] sm:$0xff] %v312_v55  ;;  %v316_v57 = vld [vmem:[%s2392_s11 + $0x388] sm:$0xff] }
  0x35   : > { %315 = vst [vmem:[%s2397_s12 + $0x1c0] sm:$0xff] %v314_v56  ;;  %v318_v58 = vld [vmem:[%s2392_s11 + $0x3a0] sm:$0xff]  ;;  %v320_v59 = vld [vmem:[%s2392_s11 + $0x3a8] sm:$0xff]  ;;  %317 = vst [vmem:[%s2397_s12 + $0x1c8] sm:$0xff] %v316_v57 }
  0x36   : > { %319 = vst [vmem:[%s2397_s12 + $0x1d0] sm:$0xff] %v318_v58  ;;  %321 = vst [vmem:[%s2397_s12 + $0x1d8] sm:$0xff] %v320_v59  ;;  %v322_v60 = vld [vmem:[%s2392_s11 + $0x3c0] sm:$0xff]  ;;  %v324_v61 = vld [vmem:[%s2392_s11 + $0x3c8] sm:$0xff] }
  0x37   : > { %v326_v62 = vld [vmem:[%s2392_s11 + $0x3e0] sm:$0xff]  ;;  %323 = vst [vmem:[%s2397_s12 + $0x1e0] sm:$0xff] %v322_v60  ;;  %325 = vst [vmem:[%s2397_s12 + $0x1e8] sm:$0xff] %v324_v61  ;;  %v328_v63 = vld [vmem:[%s2392_s11 + $0x3e8] sm:$0xff] }
  0x38   : > { %327 = vst [vmem:[%s2397_s12 + $0x1f0] sm:$0xff] %v326_v62  ;;  %329 = vst [vmem:[%s2397_s12 + $0x1f8] sm:$0xff] %v328_v63 }
  0x39 PF: > { %p2002_p7 = scmp.ge.s32.totalorder %s2304_s21, 1  ;;  %p334_p8 = scmp.lt.s32.totalorder %s2304_s21, 5 }
  0x3b   : > { %p335_p9 = pnand %p2002_p7, %p334_p8 }
  0x3d   : > { %338 = sbr.rel (%p335_p9) target bundleno = 609 (0x261), region = 47 }
  0x44   : > { %s341_s13 = sand.u32 1, %s2280_s15   ;;  %v2200_v0 = vld [vmem:[%s3778_s1 + $0x4] ss:$8 sps:$4 sm:$0xff]   ;;  %v2202_v1 = vld [vmem:[%s3778_s1] ss:$8 sps:$4 sm:$0xff]   ;;  %s2004_s14 = sshll.u32 %s2288_s17, 5 }
  0x45   : > { %s2003_s25 = sshll.u32 %s341_s13, 9  ;;  %767 = vmatprep.subr.bf16.mxu0 %v2200_v0  ;;  %v2203_v2 = vld [vmem:[%s3778_s1 + $0x14] ss:$8 sps:$4 sm:$0xff]   ;;  %v2205_v3 = vld [vmem:[%s3778_s1 + $0x10] ss:$8 sps:$4 sm:$0xff]   ;;  %2111 = vmatprep.subr.bf16.mxu1 %v2200_v0  ;;  %p389_p10 = scmp.lt.s32.totalorder %s2292_s18, 1 }
  0x46   : > { %s2539_s15 = scalar_lea.vmem [#allocation2], %s2003_s25  ;;  %768 = vmatpush1.bf16.msra.mxu0 %v2202_v1  ;;  %2127 = vmatpush1.bf16.msra.mxu1 %v2202_v1  ;;  %v2206_v36 = vld [vmem:[%s3778_s1 + $0x24] ss:$8 sps:$4 sm:$0xff]   ;;  %v2208_v39 = vld [vmem:[%s3778_s1 + $0x20] ss:$8 sps:$4 sm:$0xff]   ;;  %p391_p11 = scmp.lt.s32.totalorder %s2004_s14, 63 }
  0x47   : > { %v447_v4 = vld [vmem:[%s2539_s15 + $0x100] sm:$0xff]  ;;  %v449_v5 = vld [vmem:[%s2539_s15 + $0x110] sm:$0xff]  ;;  %769 = vmatprep.subr.bf16.mxu0 %v2203_v2  ;;  %2112 = vmatprep.subr.bf16.mxu1 %v2203_v2  ;;  %v448_v57 = vld [vmem:[%s2539_s15 + $0x108] sm:$0xff]  ;;  %s4146_s18 = smov (!%p389_p10, %s2292_s18), 1  ;;  %s2076_s24 = sshll.u32 %s2288_s17, 8 }
  0x48   : > { %v415_v6 = vld [vmem:[%s2539_s15] sm:$0xff]  ;;  %v495_v7 = vpack.c.bf16 %v449_v5, %v447_v4  ;;  %v417_v8 = vld [vmem:[%s2539_s15 + $0x10] sm:$0xff]  ;;  %v450_v59 = vld [vmem:[%s2539_s15 + $0x118] sm:$0xff]  ;;  %s4148_s14 = smov (!%p391_p11, %s2004_s14), 63  ;;  %s2006_s26 = sshll.u32 %s4146_s18, 7 }
  0x49   : > { %v451_v9 = vld [vmem:[%s2539_s15 + $0x120] sm:$0xff]  ;;  %v453_v10 = vld [vmem:[%s2539_s15 + $0x130] sm:$0xff]  ;;  %v479_v11 = vpack.c.bf16 %v417_v8, %v415_v6  ;;  %v416_v62 = vld [vmem:[%s2539_s15 + $0x8] sm:$0xff]  ;;  %v496_v2 = vpack.c.bf16 %v450_v59, %v448_v57  ;;  %s2005_s25 = sshll.u32 %s4148_s14, 1  ;;  %s3180_s7 = ssub.s32 500, %s2076_s24 }
  0x4a   : > { %v419_v12 = vld [vmem:[%s2539_s15 + $0x20] sm:$0xff]  ;;  %v421_v13 = vld [vmem:[%s2539_s15 + $0x30] sm:$0xff]  ;;  %543 = vxpose.xlu0.c.b16.start [1/8] %v495_v7, 128  ;;  %v497_v14 = vpack.c.bf16 %v453_v10, %v451_v9  ;;  %770 = vmatpush1.bf16.msra.mxu0 %v2205_v3  ;;  %v418_v0 = vld [vmem:[%s2539_s15 + $0x18] sm:$0xff]  ;;  %s395_s27 = sadd.s32 %s2006_s26, %s2005_s25  ;;  %p1284_p12 = scmp.lt.s32.totalorder %s3180_s7, 256 }
  0x4b   : > { %511 = vxpose.xlu1.c.b16.start [1/8] %v479_v11, 128  ;;  %v481_v15 = vpack.c.bf16 %v421_v13, %v419_v12  ;;  %v455_v16 = vld [vmem:[%s2539_s15 + $0x140] sm:$0xff]  ;;  %v457_v17 = vld [vmem:[%s2539_s15 + $0x150] sm:$0xff]  ;;  %2128 = vmatpush1.bf16.msra.mxu1 %v2205_v3  ;;  %v452_v1 = vld [vmem:[%s2539_s15 + $0x128] sm:$0xff]  ;;  %v480_v5 = vpack.c.bf16 %v418_v0, %v416_v62  ;;  %s2007_s29 = sshll.u32 %s395_s27, 2  ;;  %p401_p13 = scmp.lt.s32.totalorder %s2288_s17, 1 }
  0x4c   : > { %v423_v18 = vld [vmem:[%s2539_s15 + $0x40] sm:$0xff]  ;;  %v425_v19 = vld [vmem:[%s2539_s15 + $0x50] sm:$0xff]  ;;  %v499_v20 = vpack.c.bf16 %v457_v17, %v455_v16  ;;  %771 = vmatprep.subr.bf16.mxu0 %v2206_v36  ;;  %2113 = vmatprep.subr.bf16.mxu1 %v2206_v36  ;;  %v454_v3 = vld [vmem:[%s2539_s15 + $0x138] sm:$0xff]  ;;  %s2720_s6 = scalar_lea.vmem %s3779_s2, %s2007_s29  ;;  %s4150_s7 = smov (!%p1284_p12, %s3180_s7), 256 }
  0x4d   : > { %v483_v21 = vpack.c.bf16 %v425_v19, %v423_v18  ;;  %v459_v22 = vld [vmem:[%s2539_s15 + $0x160] sm:$0xff]  ;;  %v461_v23 = vld [vmem:[%s2539_s15 + $0x170] sm:$0xff]  ;;  %v420_v6 = vld [vmem:[%s2539_s15 + $0x28] sm:$0xff]  ;;  %v498_v10 = vpack.c.bf16 %v454_v3, %v452_v1  ;;  %s1286_s8 = scvt.s32.f32 %s4150_s7  ;;  %s4152_s17 = smov (!%p401_p13, %s2288_s17), 1 }
  0x4e   : > { %544 = vxpose.xlu0.c.b16.cont [2/8] %v497_v14, 128  ;;  %v427_v24 = vld [vmem:[%s2539_s15 + $0x60] sm:$0xff]  ;;  %v429_v25 = vld [vmem:[%s2539_s15 + $0x70] sm:$0xff]  ;;  %v501_v26 = vpack.c.bf16 %v461_v23, %v459_v22  ;;  %772 = vmatpush1.bf16.msra.mxu0 %v2208_v39  ;;  %v422_v8 = vld [vmem:[%s2539_s15 + $0x38] sm:$0xff]  ;;  %s2009_s9 = sshll.u32 %s4146_s18, 2 }
  0x4f   : > { %512 = vxpose.xlu1.c.b16.cont [2/8] %v481_v15, 128  ;;  %v485_v27 = vpack.c.bf16 %v429_v25, %v427_v24  ;;  %v463_v28 = vld [vmem:[%s2539_s15 + $0x180] sm:$0xff]  ;;  %v465_v29 = vld [vmem:[%s2539_s15 + $0x190] sm:$0xff]  ;;  %2129 = vmatpush1.bf16.msra.mxu1 %v2208_v39  ;;  %v456_v9 = vld [vmem:[%s2539_s15 + $0x148] sm:$0xff]  ;;  %v482_v13 = vpack.c.bf16 %v422_v8, %v420_v6 }
  0x50   : > { %v431_v30 = vld [vmem:[%s2539_s15 + $0x80] sm:$0xff]  ;;  %v433_v31 = vld [vmem:[%s2539_s15 + $0x90] sm:$0xff]  ;;  %v503_v32 = vpack.c.bf16 %v465_v29, %v463_v28  ;;  %v458_v11 = vld [vmem:[%s2539_s15 + $0x158] sm:$0xff] }
  0x51   : > { %v467_v33 = vld [vmem:[%s2539_s15 + $0x1a0] sm:$0xff]  ;;  %v487_v34 = vpack.c.bf16 %v433_v31, %v431_v30  ;;  %v469_v35 = vld [vmem:[%s2539_s15 + $0x1b0] sm:$0xff]  ;;  %v424_v14 = vld [vmem:[%s2539_s15 + $0x48] sm:$0xff]  ;;  %v500_v17 = vpack.c.bf16 %v458_v11, %v456_v9 }
  0x52   : > { %545 = vxpose.xlu0.c.b16.cont [3/8] %v499_v20, 128  ;;  %v435_v37 = vld [vmem:[%s2539_s15 + $0xa0] sm:$0xff]  ;;  %v437_v38 = vld [vmem:[%s2539_s15 + $0xb0] sm:$0xff]  ;;  %v505_v40 = vpack.c.bf16 %v469_v35, %v467_v33  ;;  %v426_v16 = vld [vmem:[%s2539_s15 + $0x58] sm:$0xff] }
  0x53   : > { %513 = vxpose.xlu1.c.b16.cont [3/8] %v483_v21, 128  ;;  %v471_v41 = vld [vmem:[%s2539_s15 + $0x1c0] sm:$0xff]  ;;  %v473_v42 = vld [vmem:[%s2539_s15 + $0x1d0] sm:$0xff]  ;;  %v489_v44 = vpack.c.bf16 %v437_v38, %v435_v37  ;;  %v484_v19 = vpack.c.bf16 %v426_v16, %v424_v14  ;;  %v460_v20 = vld [vmem:[%s2539_s15 + $0x168] sm:$0xff] }
  0x54   : > { %v2209_v43 = vld [vmem:[%s3778_s1 + $0x34] ss:$8 sps:$4 sm:$0xff]   ;;  %v439_v45 = vld [vmem:[%s2539_s15 + $0xc0] sm:$0xff]  ;;  %v2211_v47 = vld [vmem:[%s3778_s1 + $0x30] ss:$8 sps:$4 sm:$0xff]   ;;  %v507_v49 = vpack.c.bf16 %v473_v42, %v471_v41 }
  0x55   : > { %v441_v46 = vld [vmem:[%s2539_s15 + $0xd0] sm:$0xff]  ;;  %773 = vmatprep.subr.bf16.mxu0 %v2209_v43  ;;  %v2212_v48 = vld [vmem:[%s3778_s1 + $0x44] ss:$8 sps:$4 sm:$0xff]   ;;  %2114 = vmatprep.subr.bf16.mxu1 %v2209_v43  ;;  %v2214_v51 = vld [vmem:[%s3778_s1 + $0x40] ss:$8 sps:$4 sm:$0xff]  }
  0x56   : > { %546 = vxpose.xlu0.c.b16.cont [4/8] %v501_v26, 128  ;;  %v475_v50 = vld [vmem:[%s2539_s15 + $0x1e0] sm:$0xff]  ;;  %774 = vmatpush1.bf16.msra.mxu0 %v2211_v47  ;;  %v491_v52 = vpack.c.bf16 %v441_v46, %v439_v45  ;;  %v477_v53 = vld [vmem:[%s2539_s15 + $0x1f0] sm:$0xff]  ;;  %v462_v21 = vld [vmem:[%s2539_s15 + $0x178] sm:$0xff] }
  0x57   : > { %514 = vxpose.xlu1.c.b16.cont [4/8] %v485_v27, 128  ;;  %775 = vmatprep.subr.bf16.mxu0 %v2212_v48  ;;  %v2215_v54 = vld [vmem:[%s3778_s1 + $0x54] ss:$8 sps:$4 sm:$0xff]   ;;  %v443_v55 = vld [vmem:[%s2539_s15 + $0xe0] sm:$0xff]  ;;  %v509_v58 = vpack.c.bf16 %v477_v53, %v475_v50  ;;  %v2217_v60 = vld [vmem:[%s3778_s1 + $0x50] ss:$8 sps:$4 sm:$0xff]   ;;  %v502_v25 = vpack.c.bf16 %v462_v21, %v460_v20 }
  0x58   : > { %v445_v56 = vld [vmem:[%s2539_s15 + $0xf0] sm:$0xff]  ;;  %2130 = vmatpush1.bf16.msra.mxu1 %v2211_v47  ;;  %v2218_v63 = vld [vmem:[%s3778_s1 + $0x64] ss:$8 sps:$4 sm:$0xff]   ;;  %v2220_v4 = vld [vmem:[%s3778_s1 + $0x60] ss:$8 sps:$4 sm:$0xff]  }
  0x59   : > { %2115 = vmatprep.subr.bf16.mxu1 %v2212_v48  ;;  %v493_v61 = vpack.c.bf16 %v445_v56, %v443_v55  ;;  %v2221_v7 = vld [vmem:[%s3778_s1 + $0x74] ss:$8 sps:$4 sm:$0xff]   ;;  %v2223_v12 = vld [vmem:[%s3778_s1 + $0x70] ss:$8 sps:$4 sm:$0xff]   ;;  %v2224_v15 = vld [vmem:[%s3778_s1 + $0x84] ss:$8 sps:$4 sm:$0xff]  }
  0x5a   : > { %547 = vxpose.xlu0.c.b16.cont [5/8] %v503_v32, 128  ;;  %776 = vmatpush1.bf16.msra.mxu0 %v2214_v51  ;;  %v2226_v18 = vld [vmem:[%s3778_s1 + $0x80] ss:$8 sps:$4 sm:$0xff]   ;;  %v2227_v22 = vld [vmem:[%s3778_s1 + $0x94] ss:$8 sps:$4 sm:$0xff]   ;;  %v2229_v26 = vld [vmem:[%s3778_s1 + $0x90] ss:$8 sps:$4 sm:$0xff]  }
  0x5b   : > { %515 = vxpose.xlu1.c.b16.cont [5/8] %v487_v34, 128  ;;  %777 = vmatprep.subr.bf16.mxu0 %v2215_v54  ;;  %v428_v23 = vld [vmem:[%s2539_s15 + $0x68] sm:$0xff]  ;;  %v430_v24 = vld [vmem:[%s2539_s15 + $0x78] sm:$0xff] }
  0x5c   : > { %2131 = vmatpush1.bf16.msra.mxu1 %v2214_v51  ;;  %v486_v27 = vpack.c.bf16 %v430_v24, %v428_v23  ;;  %v464_v28 = vld [vmem:[%s2539_s15 + $0x188] sm:$0xff]  ;;  %v466_v29 = vld [vmem:[%s2539_s15 + $0x198] sm:$0xff] }
  0x5d   : > { %2116 = vmatprep.subr.bf16.mxu1 %v2215_v54  ;;  %v2230_v30 = vld [vmem:[%s3778_s1 + $0xa4] ss:$8 sps:$4 sm:$0xff]   ;;  %v434_v32 = vld [vmem:[%s2539_s15 + $0x98] sm:$0xff]  ;;  %v504_v33 = vpack.c.bf16 %v466_v29, %v464_v28  ;;  %v2232_v34 = vld [vmem:[%s3778_s1 + $0xa0] ss:$8 sps:$4 sm:$0xff]  }
  0x5e   : > { %548 = vxpose.xlu0.c.b16.cont [6/8] %v505_v40, 128  ;;  %778 = vmatpush1.bf16.msra.mxu0 %v2217_v60  ;;  %v432_v31 = vld [vmem:[%s2539_s15 + $0x88] sm:$0xff]  ;;  %v470_v37 = vld [vmem:[%s2539_s15 + $0x1b8] sm:$0xff] }
  0x5f   : > { %516 = vxpose.xlu1.c.b16.cont [6/8] %v489_v44, 128  ;;  %779 = vmatprep.subr.bf16.mxu0 %v2218_v63  ;;  %v488_v35 = vpack.c.bf16 %v434_v32, %v432_v31  ;;  %v468_v36 = vld [vmem:[%s2539_s15 + $0x1a8] sm:$0xff]  ;;  %v2233_v38 = vld [vmem:[%s3778_s1 + $0xb4] ss:$8 sps:$4 sm:$0xff]   ;;  %v2235_v42 = vld [vmem:[%s3778_s1 + $0xb0] ss:$8 sps:$4 sm:$0xff]   ;;  %v3782_v32 = vlaneseq }
  0x60   : > { %2132 = vmatpush1.bf16.msra.mxu1 %v2217_v60  ;;  %v436_v39 = vld [vmem:[%s2539_s15 + $0xa8] sm:$0xff]  ;;  %v438_v40 = vld [vmem:[%s2539_s15 + $0xb8] sm:$0xff]  ;;  %v506_v41 = vpack.c.bf16 %v470_v37, %v468_v36 }
  0x61   : > { %2117 = vmatprep.subr.bf16.mxu1 %v2218_v63  ;;  %v490_v43 = vpack.c.bf16 %v438_v40, %v436_v39  ;;  %v472_v44 = vld [vmem:[%s2539_s15 + $0x1c8] sm:$0xff]  ;;  %v474_v45 = vld [vmem:[%s2539_s15 + $0x1d8] sm:$0xff] }
  0x62   : > { %549 = vxpose.xlu0.c.b16.cont [7/8] %v507_v49, 128  ;;  %780 = vmatpush1.bf16.msra.mxu0 %v2220_v4  ;;  %v2236_v46 = vld [vmem:[%s3778_s1 + $0xc4] ss:$8 sps:$4 sm:$0xff]   ;;  %v442_v48 = vld [vmem:[%s2539_s15 + $0xd8] sm:$0xff]  ;;  %v508_v49 = vpack.c.bf16 %v474_v45, %v472_v44  ;;  %v2238_v50 = vld [vmem:[%s3778_s1 + $0xc0] ss:$8 sps:$4 sm:$0xff]  }
  0x63   : > { %517 = vxpose.xlu1.c.b16.cont [7/8] %v491_v52, 128  ;;  %781 = vmatprep.subr.bf16.mxu0 %v2221_v7  ;;  %v440_v47 = vld [vmem:[%s2539_s15 + $0xc8] sm:$0xff]  ;;  %v478_v53 = vld [vmem:[%s2539_s15 + $0x1f8] sm:$0xff] }
  0x64   : > { %2133 = vmatpush1.bf16.msra.mxu1 %v2220_v4  ;;  %v492_v51 = vpack.c.bf16 %v442_v48, %v440_v47  ;;  %v476_v52 = vld [vmem:[%s2539_s15 + $0x1e8] sm:$0xff]  ;;  %v2239_v54 = vld [vmem:[%s3778_s1 + $0xd4] ss:$8 sps:$4 sm:$0xff]   ;;  %v2247_v63 = vld [vmem:[%s3778_s1 + $0xf0] ss:$8 sps:$4 sm:$0xff]  }
  0x65   : > { %2118 = vmatprep.subr.bf16.mxu1 %v2221_v7  ;;  %v444_v55 = vld [vmem:[%s2539_s15 + $0xe8] sm:$0xff]  ;;  %v446_v56 = vld [vmem:[%s2539_s15 + $0xf8] sm:$0xff]  ;;  %v510_v57 = vpack.c.bf16 %v478_v53, %v476_v52  ;;  %s2008_s15 = sshll.u32 %s4152_s17, 1 }
  0x66   : > { %550 = vxpose.xlu0.c.b16.end [8/8] %v509_v58, 128  ;;  %782 = vmatpush1.bf16.msra.mxu0 %v2223_v12  ;;  %v2241_v58 = vld [vmem:[%s3778_s1 + $0xd0] ss:$8 sps:$4 sm:$0xff]   ;;  %v494_v59 = vpack.c.bf16 %v446_v56, %v444_v55  ;;  %v2242_v60 = vld [vmem:[%s3778_s1 + $0xe4] ss:$8 sps:$4 sm:$0xff]   ;;  %v2245_v62 = vld [vmem:[%s3778_s1 + $0xf4] ss:$8 sps:$4 sm:$0xff]   ;;  %s3522_s17 = sadd.s32 %s2009_s9, %s2008_s15 }
  0x67   : > { %518 = vxpose.xlu1.c.b16.end [8/8] %v493_v61, 128  ;;  %783 = vmatprep.subr.bf16.mxu0 %v2224_v15  ;;  %v2244_v61 = vld [vmem:[%s3778_s1 + $0xe0] ss:$8 sps:$4 sm:$0xff]   ;;  %s406_s11 = scalar_lea.vmem %s3780_s3, %s3522_s17  ;;  %s414_s14 = scalar_lea.vmem %s3781_s4, %s3522_s17 }
  0x68   : > { %2134 = vmatpush1.bf16.msra.mxu1 %v2223_v12 }
  0x69   : > { %2119 = vmatprep.subr.bf16.mxu1 %v2224_v15 }
  0x6a   : > { %559 = vxpose.xlu0.c.b16.start [1/8] %v496_v2, 128  ;;  %784 = vmatpush1.bf16.msra.mxu0 %v2226_v18 }
  0x6b   : > { %527 = vxpose.xlu1.c.b16.start [1/8] %v480_v5, 128  ;;  %785 = vmatprep.subr.bf16.mxu0 %v2227_v22 }
  0x6c   : > { %2135 = vmatpush1.bf16.msra.mxu1 %v2226_v18 }
  0x6d   : > { %2120 = vmatprep.subr.bf16.mxu1 %v2227_v22 }
  0x6e   : > { %560 = vxpose.xlu0.c.b16.cont [2/8] %v498_v10, 128  ;;  %786 = vmatpush1.bf16.msra.mxu0 %v2229_v26 }
  0x6f   : > { %528 = vxpose.xlu1.c.b16.cont [2/8] %v482_v13, 128  ;;  %787 = vmatprep.subr.bf16.mxu0 %v2230_v30 }
  0x70   : > { %2136 = vmatpush1.bf16.msra.mxu1 %v2229_v26 }
  0x71   : > { %2121 = vmatprep.subr.bf16.mxu1 %v2230_v30 }
  0x72   : > { %561 = vxpose.xlu0.c.b16.cont [3/8] %v500_v17, 128  ;;  %788 = vmatpush1.bf16.msra.mxu0 %v2232_v34 }
  0x73   : > { %529 = vxpose.xlu1.c.b16.cont [3/8] %v484_v19, 128  ;;  %789 = vmatprep.subr.bf16.mxu0 %v2233_v38 }
  0x74   : > { %2137 = vmatpush1.bf16.msra.mxu1 %v2232_v34 }
  0x75   : > { %2122 = vmatprep.subr.bf16.mxu1 %v2233_v38 }
  0x76   : > { %562 = vxpose.xlu0.c.b16.cont [4/8] %v502_v25, 128  ;;  %790 = vmatpush1.bf16.msra.mxu0 %v2235_v42 }
  0x77   : > { %530 = vxpose.xlu1.c.b16.cont [4/8] %v486_v27, 128  ;;  %791 = vmatprep.subr.bf16.mxu0 %v2236_v46 }
  0x78   : > { %2138 = vmatpush1.bf16.msra.mxu1 %v2235_v42 }
  0x79   : > { %2123 = vmatprep.subr.bf16.mxu1 %v2236_v46 }
  0x7a   : > { %563 = vxpose.xlu0.c.b16.cont [5/8] %v504_v33, 128  ;;  %792 = vmatpush1.bf16.msra.mxu0 %v2238_v50  ;;  %v2695_v33 = vshrl.u32 %v3782_v32, 7 }
  0x7b   : > { %531 = vxpose.xlu1.c.b16.cont [5/8] %v488_v35, 128  ;;  %793 = vmatprep.subr.bf16.mxu0 %v2239_v54  ;;  %v2702_v35 = vstv %s2076_s24 }
  0x7c   : > { %2139 = vmatpush1.bf16.msra.mxu1 %v2238_v50  ;;  %3909 = vst [vmem:[#allocation3_spill] sm:$0xff] %v2695_v33  ;;  %v1187_v34 = vadd.s32 8, %v2695_v33  ;;  %v2706_v36 = vadd.s32 %v2702_v35, %v2695_v33  ;;  %v1188_v38 = vadd.s32 16, %v2695_v33  ;;  %v1189_v39 = vadd.s32 24, %v2695_v33 }
  0x7d   : > { %2124 = vmatprep.subr.bf16.mxu1 %v2239_v54  ;;  %v1190_v54 = vadd.s32 32, %v2695_v33  ;;  %v1191_v56 = vadd.s32 40, %v2695_v33 }
  0x7e   : > { %564 = vxpose.xlu0.c.b16.cont [6/8] %v506_v41, 128  ;;  %794 = vmatpush1.bf16.msra.mxu0 %v2241_v58  ;;  %v2709_v37 = vadd.s32 %v2702_v35, %v1187_v34  ;;  %vm1251_vm0 = vcmp.lt.s32.totalorder %v2706_v36, 500  ;;  %v2729_v44 = vadd.s32 %v2702_v35, %v1188_v38  ;;  %v2740_v48 = vadd.s32 %v2702_v35, %v1189_v39 }
  0x7f   : > { %532 = vxpose.xlu1.c.b16.cont [6/8] %v490_v43, 128  ;;  %795 = vmatprep.subr.bf16.mxu0 %v2242_v60 }
  0x80   : > { %2140 = vmatpush1.bf16.msra.mxu1 %v2241_v58  ;;  %vm1252_vm1 = vcmp.lt.s32.totalorder %v2709_v37, 500  ;;  %vm1253_vm2 = vcmp.lt.s32.totalorder %v2729_v44, 500  ;;  %vm1254_vm3 = vcmp.lt.s32.totalorder %v2740_v48, 500 }
  0x81   : > { %2125 = vmatprep.subr.bf16.mxu1 %v2242_v60 }
  0x82   : > { %565 = vxpose.xlu0.c.b16.cont [7/8] %v508_v49, 128  ;;  %796 = vmatpush1.bf16.msra.mxu0 %v2244_v61 }
  0x83   : > { %533 = vxpose.xlu1.c.b16.cont [7/8] %v492_v51, 128  ;;  %797 = vmatprep.subr.bf16.mxu0 %v2245_v62  ;;  %v4019_v37 = vld [vmem:[#allocation3_spill] sm:$0xff] }
  0x84   : > { %2141 = vmatpush1.bf16.msra.mxu1 %v2244_v61 }
  0x85   : > { %2126 = vmatprep.subr.bf16.mxu1 %v2245_v62 }
  0x86   : > { %566 = vxpose.xlu0.c.b16.end [8/8] %v510_v57, 128  ;;  %798 = vmatpush1.bf16.msra.mxu0 %v2247_v63 }
  0x87   : > { %534 = vxpose.xlu1.c.b16.end [8/8] %v494_v59, 128 }
  0x88   : > { %2142 = vmatpush1.bf16.msra.mxu1 %v2247_v63  ;;  %v2771_v63 = vadd.s32 %v2702_v35, %v1190_v54 }
  0x8a   : > { %vm1255_vm4 = vcmp.lt.s32.totalorder %v2771_v63, 500 }
  0xb0   : > { %v551_v0 = vpop.trf.xlu0 }
  0xb1   : > { %799 = vmatprep.mubr.bf16.mxu0 %v551_v0  ;;  %v519_v1 = vpop.trf.xlu1 }
  0xb2   : > { %800 = vmatmul.mubr.bf16.vlgmr.msra.gmra.mrb[0].mxu0 %v519_v1 }
  0xb4   : > { %v552_v2 = vpop.trf.xlu0 }
  0xb5   : > { %809 = vmatprep.mubr.bf16.mxu0 %v552_v2  ;;  %v520_v3 = vpop.trf.xlu1 }
  0xb8   : > { %v553_v4 = vpop.trf.xlu0 }
  0xb9   : > { %v521_v5 = vpop.trf.xlu1 }
  0xba   : > { %810 = vmatmul.mubr.bf16.gmra.mrb[4].mxu0 %v520_v3 }
  0xbb   : > { %819 = vmatprep.mubr.bf16.mxu0 %v553_v4 }
  0xbc   : > { %v554_v6 = vpop.trf.xlu0 }
  0xbd   : > { %v522_v7 = vpop.trf.xlu1 }
  0xc0   : > { %v555_v8 = vpop.trf.xlu0 }
  0xc1   : > { %v523_v9 = vpop.trf.xlu1 }
  0xc2   : > { %820 = vmatmul.mubr.bf16.gmra.mrb[8].mxu0 %v521_v5 }
  0xc3   : > { %829 = vmatprep.mubr.bf16.mxu0 %v554_v6  ;;  %v2785_v6 = vadd.s32 %v2702_v35, %v1191_v56  ;;  %v1196_v56 = vadd.s32 80, %v2695_v33 }
  0xc4   : > { %v556_v10 = vpop.trf.xlu0 }
  0xc5   : > { %v524_v11 = vpop.trf.xlu1  ;;  %vm1256_vm5 = vcmp.lt.s32.totalorder %v2785_v6, 500 }
  0xc8   : > { %v557_v12 = vpop.trf.xlu0 }
  0xc9   : > { %v525_v13 = vpop.trf.xlu1 }
  0xca   : > { %830 = vmatmul.mubr.bf16.gmra.mrb[12].mxu0 %v522_v7 }
  0xcb   : > { %839 = vmatprep.mubr.bf16.mxu0 %v555_v8  ;;  %v1192_v8 = vadd.s32 48, %v2695_v33 }
  0xcc   : > { %v558_v14 = vpop.trf.xlu0 }
  0xcd   : > { %v526_v15 = vpop.trf.xlu1 }
  0xd0   : > { %v567_v16 = vpop.trf.xlu0 }
  0xd1   : > { %879 = vmatprep.mubr.bf16.mxu1 %v567_v16  ;;  %v535_v17 = vpop.trf.xlu1 }
  0xd2   : > { %840 = vmatmul.mubr.bf16.gmra.mrb[16].mxu0 %v523_v9  ;;  %880 = vmatmul.mubr.bf16.vlgmr.msra.gmra.mrb[0].mxu1 %v535_v17  ;;  %v2807_v17 = vadd.s32 %v2702_v35, %v1192_v8 }
  0xd3   : > { %849 = vmatprep.mubr.bf16.mxu0 %v556_v10  ;;  %v1193_v10 = vadd.s32 56, %v2695_v33 }
  0xd4   : > { %v568_v18 = vpop.trf.xlu0  ;;  %vm1257_vm6 = vcmp.lt.s32.totalorder %v2807_v17, 500 }
  0xd5   : > { %889 = vmatprep.mubr.bf16.mxu1 %v568_v18  ;;  %v536_v19 = vpop.trf.xlu1 }
  0xd8   : > { %v569_v20 = vpop.trf.xlu0 }
  0xd9   : > { %v537_v21 = vpop.trf.xlu1 }
  0xda   : > { %850 = vmatmul.mubr.bf16.gmra.mrb[20].mxu0 %v524_v11  ;;  %890 = vmatmul.mubr.bf16.gmra.mrb[4].mxu1 %v536_v19 }
  0xdb   : > { %859 = vmatprep.mubr.bf16.mxu0 %v557_v12  ;;  %899 = vmatprep.mubr.bf16.mxu1 %v569_v20 }
  0xdc   : > { %v570_v22 = vpop.trf.xlu0 }
  0xdd   : > { %v538_v23 = vpop.trf.xlu1 }
  0xe0   : > { %v571_v24 = vpop.trf.xlu0 }
  0xe1   : > { %v539_v25 = vpop.trf.xlu1 }
  0xe2   : > { %860 = vmatmul.mubr.bf16.gmra.mrb[24].mxu0 %v525_v13  ;;  %900 = vmatmul.mubr.bf16.gmra.mrb[8].mxu1 %v537_v21 }
  0xe3   : > { %869 = vmatprep.mubr.bf16.mxu0 %v558_v14  ;;  %909 = vmatprep.mubr.bf16.mxu1 %v570_v22 }
  0xe4   : > { %v572_v26 = vpop.trf.xlu0 }
  0xe5   : > { %v540_v27 = vpop.trf.xlu1 }
  0xe8   : > { %v573_v28 = vpop.trf.xlu0 }
  0xe9   : > { %v541_v29 = vpop.trf.xlu1 }
  0xea   : > { %870 = vmatmul.mubr.bf16.gmra.mrb[28].mxu0 %v526_v15  ;;  %910 = vmatmul.mubr.bf16.gmra.mrb[12].mxu1 %v538_v23 }
  0xeb   : > { %919 = vmatprep.mubr.bf16.mxu1 %v571_v24  ;;  %v2821_v24 = vadd.s32 %v2702_v35, %v1193_v10 }
  0xec   : > { %v574_v30 = vpop.trf.xlu0 }
  0xed   : > { %v542_v31 = vpop.trf.xlu1  ;;  %vm1258_vm7 = vcmp.lt.s32.totalorder %v2821_v24, 500 }
  0xf2   : > { %920 = vmatmul.mubr.bf16.gmra.mrb[16].mxu1 %v539_v25 }
  0xf3   : > { %929 = vmatprep.mubr.bf16.mxu1 %v572_v26  ;;  %v1194_v26 = vadd.s32 64, %v2695_v33 }
  0xfa   : > { %930 = vmatmul.mubr.bf16.gmra.mrb[20].mxu1 %v540_v27 }
  0xfb   : > { %939 = vmatprep.mubr.bf16.mxu1 %v573_v28  ;;  %v1195_v28 = vadd.s32 72, %v2695_v33 }
 0x102   : > { %940 = vmatmul.mubr.bf16.gmra.mrb[24].mxu1 %v541_v29 }
 0x103   : > { %949 = vmatprep.mubr.bf16.mxu1 %v574_v30 }
 0x10a   : > { %950 = vmatmul.mubr.bf16.gmra.mrb[28].mxu1 %v542_v31 }
 0x185   : > { %v2713_v40 = vpop.f32.mrb[0].mxu0 }
 0x186   : > { %v2722_v41 = vpop.f32.mrb[1].mxu0  ;;  %v1351_v45 = vsel %vm1251_vm0, %v2713_v40, 0.0 }
 0x187   : > { %v2079_v42 = vpack.c.bf16 %v2722_v41, %v2713_v40  ;;  %v2726_v43 = vpop.f32.mrb[2].mxu0  ;;  %v1352_v49 = vsel %vm1251_vm0, %v2722_v41, 0.0 }
 0x188   : > { %v1353_v46 = vsel %vm1252_vm1, %v2726_v43, 0.0  ;;  %v2737_v47 = vpop.f32.mrb[3].mxu0 }
 0x189   : > { %1152 = vst [vmem:[%s2720_s6] sm:$0xff] %v2079_v42  ;;  %v1415_v50 = vadd.f32 %v1353_v46, %v1351_v45  ;;  %v2080_v51 = vpack.c.bf16 %v2737_v47, %v2726_v43  ;;  %v1354_v52 = vsel %vm1252_vm1, %v2737_v47, 0.0  ;;  %v2843_v42 = vadd.s32 %v2702_v35, %v1194_v26 }
 0x18a   : > { %v1452_v53 = vadd.f32 %v1354_v52, %v1352_v49 }
 0x18b   : > { %1153 = vst [vmem:[%s2720_s6 + $0x8] sm:$0xff] %v2080_v51  ;;  %3915 = vst [vmem:[#allocation9_spill] sm:$0xff] %v2843_v42  ;;  %vm1259_vm8 = vcmp.lt.s32.totalorder %v2843_v42, 500 }
 0x18d   : > { %v2754_v55 = vpop.f32.mrb[4].mxu0 }
 0x18e   : > { %v1355_v57 = vsel %vm1253_vm2, %v2754_v55, 0.0  ;;  %v2761_v58 = vpop.f32.mrb[5].mxu0 }
 0x18f   : > { %3910 = vst [vmem:[#allocation4_spill] sm:$0xff] %v2761_v58  ;;  %v1416_v59 = vadd.f32 %v1415_v50, %v1355_v57  ;;  %v2081_v60 = vpack.c.bf16 %v2761_v58, %v2754_v55  ;;  %v1356_v61 = vsel %vm1253_vm2, %v2761_v58, 0.0  ;;  %v2768_v62 = vpop.f32.mrb[6].mxu0  ;;  %v1197_v57 = vadd.s32 88, %v2695_v33 }
 0x190   : > { %v1453_v0 = vadd.f32 %v1452_v53, %v1356_v61  ;;  %v1357_v1 = vsel %vm1254_vm3, %v2768_v62, 0.0  ;;  %v2776_v2 = vpop.f32.mrb[7].mxu0  ;;  %v2857_v53 = vadd.s32 %v2702_v35, %v1195_v28  ;;  %v1198_v28 = vadd.s32 96, %v2695_v33 }
 0x191   : > { %3911 = vst [vmem:[#allocation5_spill] sm:$0xff] %v2776_v2  ;;  %1154 = vst [vmem:[%s2720_s6 + $0x10] sm:$0xff] %v2081_v60  ;;  %v1417_v3 = vadd.f32 %v1416_v59, %v1357_v1  ;;  %v2082_v4 = vpack.c.bf16 %v2776_v2, %v2768_v62  ;;  %v1358_v5 = vsel %vm1254_vm3, %v2776_v2, 0.0 }
 0x192   : > { %v1454_v7 = vadd.f32 %v1453_v0, %v1358_v5  ;;  %3917 = vst [vmem:[#allocation11_spill] sm:$0xff] %v2857_v53  ;;  %vm1260_vm9 = vcmp.lt.s32.totalorder %v2857_v53, 500 }
 0x193   : > { %1155 = vst [vmem:[%s2720_s6 + $0x18] sm:$0xff] %v2082_v4 }
 0x195   : > { %v2790_v9 = vpop.f32.mrb[8].mxu0 }
 0x196   : > { %v1359_v11 = vsel %vm1255_vm4, %v2790_v9, 0.0  ;;  %v2797_v12 = vpop.f32.mrb[9].mxu0 }
 0x197   : > { %3912 = vst [vmem:[#allocation6_spill] sm:$0xff] %v2797_v12  ;;  %v1418_v13 = vadd.f32 %v1417_v3, %v1359_v11  ;;  %v2083_v14 = vpack.c.bf16 %v2797_v12, %v2790_v9  ;;  %v1360_v15 = vsel %vm1255_vm4, %v2797_v12, 0.0  ;;  %v2804_v16 = vpop.f32.mrb[10].mxu0  ;;  %v2876_v3 = vadd.s32 %v2702_v35, %v1196_v56 }
 0x198   : > { %v1455_v18 = vadd.f32 %v1454_v7, %v1360_v15  ;;  %v1361_v19 = vsel %vm1256_vm5, %v2804_v16, 0.0  ;;  %v2812_v20 = vpop.f32.mrb[11].mxu0 }
 0x199   : > { %3913 = vst [vmem:[#allocation7_spill] sm:$0xff] %v2812_v20  ;;  %1156 = vst [vmem:[%s2720_s6 + $0x20] sm:$0xff] %v2083_v14  ;;  %v1419_v21 = vadd.f32 %v1418_v13, %v1361_v19  ;;  %v2084_v22 = vpack.c.bf16 %v2812_v20, %v2804_v16  ;;  %v1362_v23 = vsel %vm1256_vm5, %v2812_v20, 0.0  ;;  %v2897_v19 = vadd.s32 %v2702_v35, %v1197_v57 }
 0x19a   : > { %v1456_v25 = vadd.f32 %v1455_v18, %v1362_v23  ;;  %3920 = vst [vmem:[#allocation14_spill] sm:$0xff] %v2876_v3  ;;  %vm1261_vm10 = vcmp.lt.s32.totalorder %v2876_v3, 500 }
 0x19b   : > { %1157 = vst [vmem:[%s2720_s6 + $0x28] sm:$0xff] %v2084_v22  ;;  %3923 = vst [vmem:[#allocation17_spill] sm:$0xff] %v2897_v19  ;;  %vm1262_vm11 = vcmp.lt.s32.totalorder %v2897_v19, 500 }
 0x19d   : > { %v2826_v27 = vpop.f32.mrb[12].mxu0 }
 0x19e   : > { %v1363_v29 = vsel %vm1257_vm6, %v2826_v27, 0.0  ;;  %v2833_v30 = vpop.f32.mrb[13].mxu0 }
 0x19f   : > { %3914 = vst [vmem:[#allocation8_spill] sm:$0xff] %v2833_v30  ;;  %v1420_v31 = vadd.f32 %v1419_v21, %v1363_v29  ;;  %v2085_v34 = vpack.c.bf16 %v2833_v30, %v2826_v27  ;;  %v1364_v38 = vsel %vm1257_vm6, %v2833_v30, 0.0  ;;  %v2840_v39 = vpop.f32.mrb[14].mxu0  ;;  %v1199_v29 = vadd.s32 104, %v2695_v33 }
 0x1a0   : > { %v1457_v45 = vadd.f32 %v1456_v25, %v1364_v38  ;;  %v1365_v46 = vsel %vm1258_vm7, %v2840_v39, 0.0  ;;  %v2848_v49 = vpop.f32.mrb[15].mxu0  ;;  %v1207_v30 = vadd.s32 168, %v2695_v33 }
 0x1a1   : > { %3916 = vst [vmem:[#allocation10_spill] sm:$0xff] %v2848_v49  ;;  %1158 = vst [vmem:[%s2720_s6 + $0x30] sm:$0xff] %v2085_v34  ;;  %v1421_v50 = vadd.f32 %v1420_v31, %v1365_v46  ;;  %v2086_v51 = vpack.c.bf16 %v2848_v49, %v2840_v39  ;;  %v1366_v52 = vsel %vm1258_vm7, %v2848_v49, 0.0 }
 0x1a2   : > { %v1458_v54 = vadd.f32 %v1457_v45, %v1366_v52 }
 0x1a3   : > { %1159 = vst [vmem:[%s2720_s6 + $0x38] sm:$0xff] %v2086_v51 }
 0x1a5   : > { %v2863_v59 = vpop.f32.mrb[16].mxu0  ;;  %v2865_v60 = vpop.f32.mrb[0].mxu1 }
 0x1a6   : > { %v1367_v61 = vsel %vm1259_vm8, %v2863_v59, 0.0  ;;  %v2871_v0 = vpop.f32.mrb[17].mxu0  ;;  %v2873_v1 = vpop.f32.mrb[1].mxu1 }
 0x1a7   : > { %3918 = vst [vmem:[#allocation12_spill] sm:$0xff] %v2871_v0  ;;  %3919 = vst [vmem:[#allocation13_spill] sm:$0xff] %v2873_v1  ;;  %v1422_v4 = vadd.f32 %v1421_v50, %v1367_v61  ;;  %v2087_v5 = vpack.c.bf16 %v2871_v0, %v2863_v59  ;;  %v1368_v7 = vsel %vm1259_vm8, %v2871_v0, 0.0  ;;  %v2095_v8 = vpack.c.bf16 %v2873_v1, %v2865_v60  ;;  %v2885_v10 = vpop.f32.mrb[18].mxu0  ;;  %v2887_v11 = vpop.f32.mrb[2].mxu1 }
 0x1a8   : > { %v1459_v13 = vadd.f32 %v1458_v54, %v1368_v7  ;;  %v1369_v14 = vsel %vm1260_vm9, %v2885_v10, 0.0  ;;  %v2892_v15 = vpop.f32.mrb[19].mxu0  ;;  %v2894_v18 = vpop.f32.mrb[3].mxu1  ;;  %v2926_v50 = vadd.s32 %v2702_v35, %v1198_v28  ;;  %v1202_v28 = vadd.s32 128, %v2695_v33 }
 0x1a9   : > { %3921 = vst [vmem:[#allocation15_spill] sm:$0xff] %v2892_v15  ;;  %3922 = vst [vmem:[#allocation16_spill] sm:$0xff] %v2894_v18  ;;  %v1423_v21 = vadd.f32 %v1422_v4, %v1369_v14  ;;  %v2088_v22 = vpack.c.bf16 %v2892_v15, %v2885_v10  ;;  %v1370_v23 = vsel %vm1260_vm9, %v2892_v15, 0.0  ;;  %v2096_v25 = vpack.c.bf16 %v2894_v18, %v2887_v11 }
 0x1aa   : > { %1160 = vst [vmem:[%s2720_s6 + $0x40] sm:$0xff] %v2087_v5  ;;  %1168 = vst [vmem:[%s2720_s6 + $0x80] sm:$0xff] %v2095_v8  ;;  %v1460_v26 = vadd.f32 %v1459_v13, %v1370_v23  ;;  %v2947_v13 = vadd.s32 %v2702_v35, %v1199_v29  ;;  %vm3800_vm12 = vcmp.lt.s32.totalorder %v2926_v50, 500  ;;  %v1201_v29 = vadd.s32 120, %v2695_v33 }
 0x1ab   : > { %1161 = vst [vmem:[%s2720_s6 + $0x48] sm:$0xff] %v2088_v22  ;;  %1169 = vst [vmem:[%s2720_s6 + $0x88] sm:$0xff] %v2096_v25  ;;  %v2992_v53 = vadd.s32 %v2702_v35, %v1202_v28 }
 0x1ac   : > { %3926 = vst [vmem:[#allocation20_spill] sm:$0xff] %v2926_v50  ;;  %3929 = vst [vmem:[#allocation23_spill] sm:$0xff] %v2947_v13  ;;  %vm3799_vm13 = vcmp.lt.s32.totalorder %v2947_v13, 500  ;;  %v3002_v42 = vadd.s32 %v2702_v35, %v1201_v29 }
 0x1ad   : > { %v2913_v31 = vpop.f32.mrb[20].mxu0  ;;  %v2915_v34 = vpop.f32.mrb[4].mxu1  ;;  %3933 = vst [vmem:[#allocation27_spill] sm:$0xff] %v2992_v53  ;;  %vm3828_vm15 = vcmp.lt.s32.totalorder %v2992_v53, 500  ;;  %v1209_v53 = vadd.s32 184, %v2695_v33 }
 0x1ae   : > { %v1371_v38 = vsel %vm1261_vm10, %v2913_v31, 0.0  ;;  %v2921_v45 = vpop.f32.mrb[21].mxu0  ;;  %v2923_v46 = vpop.f32.mrb[5].mxu1  ;;  %3936 = vst [vmem:[#allocation30_spill] sm:$0xff] %v3002_v42  ;;  %v1383_v12 = vsel %vm3828_vm15, %v2865_v60, 0.0 }
 0x1af   : > { %3924 = vst [vmem:[#allocation18_spill] sm:$0xff] %v2921_v45  ;;  %3925 = vst [vmem:[#allocation19_spill] sm:$0xff] %v2923_v46  ;;  %v1424_v51 = vadd.f32 %v1423_v21, %v1371_v38  ;;  %v2089_v52 = vpack.c.bf16 %v2921_v45, %v2913_v31  ;;  %v1372_v54 = vsel %vm1261_vm10, %v2921_v45, 0.0  ;;  %v2097_v56 = vpack.c.bf16 %v2923_v46, %v2915_v34  ;;  %v2935_v57 = vpop.f32.mrb[22].mxu0  ;;  %v2937_v61 = vpop.f32.mrb[6].mxu1 }
 0x1b0   : > { %v1461_v4 = vadd.f32 %v1460_v26, %v1372_v54  ;;  %v1373_v5 = vsel %vm1262_vm11, %v2935_v57, 0.0  ;;  %v2942_v7 = vpop.f32.mrb[23].mxu0  ;;  %v2944_v8 = vpop.f32.mrb[7].mxu1  ;;  %v1200_v26 = vadd.s32 112, %v2695_v33  ;;  %v1204_v45 = vadd.s32 144, %v2695_v33 }
 0x1b1   : > { %3927 = vst [vmem:[#allocation21_spill] sm:$0xff] %v2942_v7  ;;  %3928 = vst [vmem:[#allocation22_spill] sm:$0xff] %v2944_v8  ;;  %v1425_v14 = vadd.f32 %v1424_v51, %v1373_v5  ;;  %v2090_v21 = vpack.c.bf16 %v2942_v7, %v2935_v57  ;;  %v1374_v22 = vsel %vm1262_vm11, %v2942_v7, 0.0  ;;  %v2098_v23 = vpack.c.bf16 %v2944_v8, %v2937_v61 }
 0x1b2   : > { %1162 = vst [vmem:[%s2720_s6 + $0x50] sm:$0xff] %v2089_v52  ;;  %1170 = vst [vmem:[%s2720_s6 + $0x90] sm:$0xff] %v2097_v56  ;;  %v1462_v25 = vadd.f32 %v1461_v4, %v1374_v22  ;;  %v1203_v52 = vadd.s32 136, %v2695_v33  ;;  %v2978_v5 = vadd.s32 %v2702_v35, %v1200_v26 }
 0x1b3   : > { %1163 = vst [vmem:[%s2720_s6 + $0x58] sm:$0xff] %v2090_v21  ;;  %1171 = vst [vmem:[%s2720_s6 + $0x98] sm:$0xff] %v2098_v23 }
 0x1b4   : > { %3932 = vst [vmem:[#allocation26_spill] sm:$0xff] %v2978_v5  ;;  %v3014_v7 = vadd.s32 %v2702_v35, %v1203_v52  ;;  %vm3823_vm14 = vcmp.lt.s32.totalorder %v2978_v5, 500  ;;  %v3029_v52 = vadd.s32 %v2702_v35, %v1204_v45 }
 0x1b5   : > { %v2964_v38 = vpop.f32.mrb[24].mxu0  ;;  %v2966_v51 = vpop.f32.mrb[8].mxu1 }
 0x1b6   : > { %v1375_v54 = vsel %vm3800_vm12, %v2964_v38, 0.0  ;;  %v2973_v56 = vpop.f32.mrb[25].mxu0  ;;  %v2975_v4 = vpop.f32.mrb[9].mxu1  ;;  %3937 = vst [vmem:[#allocation31_spill] sm:$0xff] %v3014_v7  ;;  %3938 = vst [vmem:[#allocation32_spill] sm:$0xff] %v3029_v52 }
 0x1b7   : > { %3930 = vst [vmem:[#allocation24_spill] sm:$0xff] %v2973_v56  ;;  %3931 = vst [vmem:[#allocation25_spill] sm:$0xff] %v2975_v4  ;;  %v1426_v21 = vadd.f32 %v1425_v14, %v1375_v54  ;;  %v2091_v22 = vpack.c.bf16 %v2973_v56, %v2964_v38  ;;  %v1376_v23 = vsel %vm3800_vm12, %v2973_v56, 0.0  ;;  %v2099_v32 = vpack.c.bf16 %v2975_v4, %v2966_v51  ;;  %v2987_v19 = vpop.f32.mrb[26].mxu0  ;;  %v2989_v3 = vpop.f32.mrb[10].mxu1 }
 0x1b8   : > { %v1463_v14 = vadd.f32 %v1462_v25, %v1376_v23  ;;  %v1377_v26 = vsel %vm3799_vm13, %v2987_v19, 0.0  ;;  %v2997_v54 = vpop.f32.mrb[27].mxu0  ;;  %v2999_v50 = vpop.f32.mrb[11].mxu1  ;;  %vm3834_vm12 = vcmp.lt.s32.totalorder %v3014_v7, 500 }
 0x1b9   : > { %3934 = vst [vmem:[#allocation28_spill] sm:$0xff] %v2997_v54  ;;  %3935 = vst [vmem:[#allocation29_spill] sm:$0xff] %v2999_v50  ;;  %v1427_v56 = vadd.f32 %v1426_v21, %v1377_v26  ;;  %v2092_v28 = vpack.c.bf16 %v2997_v54, %v2987_v19  ;;  %v1378_v25 = vsel %vm3799_vm13, %v2997_v54, 0.0  ;;  %v2100_v23 = vpack.c.bf16 %v2999_v50, %v2989_v3 }
 0x1ba   : > { %1164 = vst [vmem:[%s2720_s6 + $0x60] sm:$0xff] %v2091_v22  ;;  %1172 = vst [vmem:[%s2720_s6 + $0xa0] sm:$0xff] %v2099_v32  ;;  %v1464_v29 = vadd.f32 %v1463_v14, %v1378_v25  ;;  %v1205_v32 = vadd.s32 152, %v2695_v33  ;;  %vm3831_vm13 = vcmp.lt.s32.totalorder %v3002_v42, 500  ;;  %v1206_v14 = vadd.s32 160, %v2695_v33 }
 0x1bb   : > { %1165 = vst [vmem:[%s2720_s6 + $0x68] sm:$0xff] %v2092_v28  ;;  %1173 = vst [vmem:[%s2720_s6 + $0xa8] sm:$0xff] %v2100_v23  ;;  %v1385_v42 = vsel %vm3834_vm12, %v2887_v11, 0.0 }
 0x1bc   : > { %v3051_v49 = vadd.s32 %v2702_v35, %v1205_v32  ;;  %v3074_v2 = vadd.s32 %v2702_v35, %v1206_v14 }
 0x1bd   : > { %v3022_v21 = vpop.f32.mrb[28].mxu0  ;;  %v3024_v22 = vpop.f32.mrb[12].mxu1 }
 0x1be   : > { %v1379_v26 = vsel %vm3823_vm14, %v3022_v21, 0.0  ;;  %v3035_v28 = vpop.f32.mrb[29].mxu0  ;;  %v3037_v25 = vpop.f32.mrb[13].mxu1  ;;  %3941 = vst [vmem:[#allocation35_spill] sm:$0xff] %v3051_v49  ;;  %3944 = vst [vmem:[#allocation38_spill] sm:$0xff] %v3074_v2 }
 0x1bf   : > { %3939 = vst [vmem:[#allocation33_spill] sm:$0xff] %v3035_v28  ;;  %3940 = vst [vmem:[#allocation34_spill] sm:$0xff] %v3037_v25  ;;  %v1428_v23 = vadd.f32 %v1427_v56, %v1379_v26  ;;  %v2093_v13 = vpack.c.bf16 %v3035_v28, %v3022_v21  ;;  %v1380_v45 = vsel %vm3823_vm14, %v3035_v28, 0.0  ;;  %v2101_v54 = vpack.c.bf16 %v3037_v25, %v3024_v22  ;;  %v3046_v15 = vpop.f32.mrb[30].mxu0  ;;  %v3048_v0 = vpop.f32.mrb[14].mxu1 }
 0x1c0   : > { %v1465_v56 = vadd.f32 %v1464_v29, %v1380_v45  ;;  %v1381_v26 = vsel %vm3831_vm13, %v3046_v15, 0.0  ;;  %v3057_v5 = vpop.f32.mrb[31].mxu0  ;;  %v3059_v28 = vpop.f32.mrb[15].mxu1  ;;  %vm3849_vm14 = vcmp.lt.s32.totalorder %v3029_v52, 500  ;;  %v1211_v52 = vadd.s32 200, %v2695_v33 }
 0x1c1   : > { %3942 = vst [vmem:[#allocation36_spill] sm:$0xff] %v3057_v5  ;;  %3943 = vst [vmem:[#allocation37_spill] sm:$0xff] %v3059_v28  ;;  %v1429_v20 = vadd.f32 %v1428_v23, %v1381_v26  ;;  %v2094_v32 = vpack.c.bf16 %v3057_v5, %v3046_v15  ;;  %v1382_v29 = vsel %vm3831_vm13, %v3057_v5, 0.0  ;;  %v2102_v45 = vpack.c.bf16 %v3059_v28, %v3048_v0 }
 0x1c2   : > { %1166 = vst [vmem:[%s2720_s6 + $0x70] sm:$0xff] %v2093_v13  ;;  %1174 = vst [vmem:[%s2720_s6 + $0xb0] sm:$0xff] %v2101_v54  ;;  %v1466_v13 = vadd.f32 %v1465_v56, %v1382_v29  ;;  %v1384_v54 = vsel %vm3828_vm15, %v2873_v1, 0.0  ;;  %v1208_v23 = vadd.s32 176, %v2695_v33  ;;  %v3087_v5 = vadd.s32 %v2702_v35, %v1207_v30 }
 0x1c3   : > { %v1430_v26 = vadd.f32 %v1429_v20, %v1383_v12  ;;  %1167 = vst [vmem:[%s2720_s6 + $0x78] sm:$0xff] %v2094_v32  ;;  %1175 = vst [vmem:[%s2720_s6 + $0xb8] sm:$0xff] %v2102_v45  ;;  %v1386_v56 = vsel %vm3834_vm12, %v2894_v18, 0.0  ;;  %vm3845_vm15 = vcmp.lt.s32.totalorder %v3051_v49, 500  ;;  %v1387_v20 = vsel %vm3849_vm14, %v2915_v34, 0.0 }
 0x1c4   : > { %3945 = vst [vmem:[#allocation39_spill] sm:$0xff] %v3087_v5  ;;  %v1467_v14 = vadd.f32 %v1466_v13, %v1384_v54  ;;  %vm3846_vm13 = vcmp.lt.s32.totalorder %v3074_v2, 500  ;;  %v1210_v32 = vadd.s32 192, %v2695_v33  ;;  %v3107_v13 = vadd.s32 %v2702_v35, %v1208_v23 }
 0x1c5   : > { %v1431_v29 = vadd.f32 %v1430_v26, %v1385_v42  ;;  %v3094_v12 = vpop.f32.mrb[16].mxu1  ;;  %v1388_v42 = vsel %vm3849_vm14, %v2923_v46, 0.0  ;;  %vm3854_vm12 = vcmp.lt.s32.totalorder %v3087_v5, 500  ;;  %v1390_v23 = vsel %vm3845_vm15, %v2944_v8, 0.0 }
 0x1c6   : > { %v1468_v30 = vadd.f32 %v1467_v14, %v1386_v56  ;;  %v3101_v45 = vpop.f32.mrb[17].mxu1  ;;  %3947 = vst [vmem:[#allocation41_spill] sm:$0xff] %v3107_v13  ;;  %v1389_v14 = vsel %vm3845_vm15, %v2937_v61, 0.0  ;;  %v3133_v1 = vadd.s32 %v2702_v35, %v1210_v32  ;;  %v1392_v49 = vsel %vm3846_vm13, %v2975_v4, 0.0 }
 0x1c7   : > { %3946 = vst [vmem:[#allocation40_spill] sm:$0xff] %v3101_v45  ;;  %v1432_v54 = vadd.f32 %v1431_v29, %v1387_v20  ;;  %v2103_v26 = vpack.c.bf16 %v3101_v45, %v3094_v12  ;;  %v3111_v7 = vpop.f32.mrb[18].mxu1  ;;  %v3124_v29 = vadd.s32 %v2702_v35, %v1209_v53  ;;  %vm3865_vm15 = vcmp.lt.s32.totalorder %v3107_v13, 500 }
 0x1c8   : > { %3948 = vst [vmem:[#allocation42_spill] sm:$0xff] %v3111_v7  ;;  %v1469_v56 = vadd.f32 %v1468_v30, %v1388_v42  ;;  %v3118_v46 = vpop.f32.mrb[19].mxu1  ;;  %v1391_v30 = vsel %vm3846_vm13, %v2966_v51, 0.0  ;;  %3951 = vst [vmem:[#allocation45_spill] sm:$0xff] %v3133_v1  ;;  %v1394_v32 = vsel %vm3854_vm12, %v2999_v50, 0.0  ;;  %vm3864_vm14 = vcmp.lt.s32.totalorder %v3133_v1, 500 }
 0x1c9   : > { %3949 = vst [vmem:[#allocation43_spill] sm:$0xff] %v3118_v46  ;;  %3950 = vst [vmem:[#allocation44_spill] sm:$0xff] %v3124_v29  ;;  %v1433_v20 = vadd.f32 %v1432_v54, %v1389_v14  ;;  %v2104_v18 = vpack.c.bf16 %v3118_v46, %v3111_v7  ;;  %v1212_v54 = vadd.s32 208, %v2695_v33  ;;  %vm3863_vm13 = vcmp.lt.s32.totalorder %v3124_v29, 500 }
 0x1ca   : > { %1176 = vst [vmem:[%s2720_s6 + $0xc0] sm:$0xff] %v2103_v26  ;;  %v1470_v42 = vadd.f32 %v1469_v56, %v1390_v23  ;;  %v1393_v26 = vsel %vm3854_vm12, %v2989_v3, 0.0  ;;  %v3145_v56 = vadd.s32 %v2702_v35, %v1211_v52 }
 0x1cb   : > { %v1434_v53 = vadd.f32 %v1433_v20, %v1391_v30  ;;  %1177 = vst [vmem:[%s2720_s6 + $0xc8] sm:$0xff] %v2104_v18  ;;  %v1213_v18 = vadd.s32 216, %v2695_v33  ;;  %v1395_v20 = vsel %vm3865_vm15, %v3024_v22, 0.0  ;;  %v1214_v30 = vadd.s32 224, %v2695_v33 }
 0x1cc   : > { %v1471_v14 = vadd.f32 %v1470_v42, %v1392_v49  ;;  %3952 = vst [vmem:[#allocation46_spill] sm:$0xff] %v3145_v56  ;;  %v1396_v42 = vsel %vm3865_vm15, %v3037_v25, 0.0  ;;  %vm3879_vm12 = vcmp.lt.s32.totalorder %v3145_v56, 500  ;;  %v1399_v25 = vsel %vm3864_vm14, %v3094_v12, 0.0 }
 0x1cd   : > { %v1435_v23 = vadd.f32 %v1434_v53, %v1393_v26  ;;  %v3151_v2 = vpop.f32.mrb[20].mxu1  ;;  %v3165_v26 = vadd.s32 %v2702_v35, %v1212_v54  ;;  %v3187_v13 = vadd.s32 %v2702_v35, %v1213_v18  ;;  %v3195_v8 = vadd.s32 %v2702_v35, %v1214_v30 }
 0x1ce   : > { %3953 = vst [vmem:[#allocation47_spill] sm:$0xff] %v3151_v2  ;;  %v1472_v49 = vadd.f32 %v1471_v14, %v1394_v32  ;;  %v3158_v52 = vpop.f32.mrb[21].mxu1  ;;  %v1397_v14 = vsel %vm3863_vm13, %v3048_v0, 0.0 }
 0x1cf   : > { %3954 = vst [vmem:[#allocation48_spill] sm:$0xff] %v3158_v52  ;;  %v1436_v53 = vadd.f32 %v1435_v23, %v1395_v20  ;;  %3955 = vst [vmem:[#allocation49_spill] sm:$0xff] %v3165_v26  ;;  %v2105_v5 = vpack.c.bf16 %v3158_v52, %v3151_v2  ;;  %v3169_v50 = vpop.f32.mrb[22].mxu1  ;;  %v1215_v23 = vadd.s32 232, %v2695_v33  ;;  %v1398_v20 = vsel %vm3863_vm13, %v3059_v28, 0.0 }
 0x1d0   : > { %3956 = vst [vmem:[#allocation50_spill] sm:$0xff] %v3169_v50  ;;  %v1473_v32 = vadd.f32 %v1472_v49, %v1396_v42  ;;  %v3175_v4 = vpop.f32.mrb[23].mxu1  ;;  %3958 = vst [vmem:[#allocation52_spill] sm:$0xff] %v3187_v13  ;;  %vm3870_vm13 = vcmp.lt.s32.totalorder %v3165_v26, 500  ;;  %vm3908_vm15 = vcmp.lt.s32.totalorder %v3195_v8, 500 }
 0x1d1   : > { %3957 = vst [vmem:[#allocation51_spill] sm:$0xff] %v3175_v4  ;;  %v1437_v54 = vadd.f32 %v1436_v53, %v1397_v14  ;;  %1178 = vst [vmem:[%s2720_s6 + $0xd0] sm:$0xff] %v2105_v5  ;;  %v2106_v49 = vpack.c.bf16 %v3175_v4, %v3169_v50  ;;  %v1400_v14 = vsel %vm3864_vm14, %v3101_v45, 0.0  ;;  %v1216_v5 = vadd.s32 240, %v2695_v33 }
 0x1d2   : > { %v1474_v42 = vadd.f32 %v1473_v32, %v1398_v20  ;;  %3959 = vst [vmem:[#allocation53_spill] sm:$0xff] %v3195_v8  ;;  %v1401_v32 = vsel %vm3879_vm12, %v3111_v7, 0.0  ;;  %v3208_v30 = vadd.s32 %v2702_v35, %v1215_v23  ;;  %vm3878_vm14 = vcmp.lt.s32.totalorder %v3187_v13, 500 }
 0x1d3   : > { %v1438_v53 = vadd.f32 %v1437_v54, %v1399_v25  ;;  %1179 = vst [vmem:[%s2720_s6 + $0xd8] sm:$0xff] %v2106_v49  ;;  %v1402_v54 = vsel %vm3879_vm12, %v3118_v46, 0.0  ;;  %v1217_v49 = vadd.s32 248, %v2695_v33  ;;  %v1406_v29 = vsel %vm3878_vm14, %v3175_v4, 0.0 }
 0x1d4   : > { %v1475_v18 = vadd.f32 %v1474_v42, %v1400_v14  ;;  %3960 = vst [vmem:[#allocation54_spill] sm:$0xff] %v3208_v30  ;;  %v1403_v14 = vsel %vm3870_vm13, %v3151_v2, 0.0 }
 0x1d5   : > { %v1439_v25 = vadd.f32 %v1438_v53, %v1401_v32  ;;  %v3214_v20 = vpop.f32.mrb[24].mxu1  ;;  %v1404_v32 = vsel %vm3870_vm13, %v3158_v52, 0.0  ;;  %vm3907_vm13 = vcmp.lt.s32.totalorder %v3208_v30, 500  ;;  %v3251_v33 = vadd.s32 %v2702_v35, %v1217_v49 }
 0x1d6   : > { %3961 = vst [vmem:[#allocation55_spill] sm:$0xff] %v3214_v20  ;;  %v1476_v42 = vadd.f32 %v1475_v18, %v1402_v54  ;;  %v3221_v23 = vpop.f32.mrb[25].mxu1  ;;  %v3231_v18 = vadd.s32 %v2702_v35, %v1216_v5 }
 0x1d7   : > { %3962 = vst [vmem:[#allocation56_spill] sm:$0xff] %v3221_v23  ;;  %v1440_v53 = vadd.f32 %v1439_v25, %v1403_v14  ;;  %v2107_v56 = vpack.c.bf16 %v3221_v23, %v3214_v20  ;;  %v3228_v1 = vpop.f32.mrb[26].mxu1  ;;  %v1405_v25 = vsel %vm3878_vm14, %v3169_v50, 0.0  ;;  %vm1282_vm12 = vcmp.lt.s32.totalorder %v3251_v33, 500 }
 0x1d8   : > { %3963 = vst [vmem:[#allocation57_spill] sm:$0xff] %v3228_v1  ;;  %v1477_v54 = vadd.f32 %v1476_v42, %v1404_v32  ;;  %v3242_v14 = vpop.f32.mrb[27].mxu1  ;;  %v1407_v32 = vsel %vm3908_vm15, %v3214_v20, 0.0  ;;  %vm1281_vm14 = vcmp.lt.s32.totalorder %v3231_v18, 500  ;;  %v1409_v35 = vsel %vm3907_vm13, %v3228_v1, 0.0 }
 0x1d9   : > { %3964 = vst [vmem:[#allocation58_spill] sm:$0xff] %v3242_v14  ;;  %v1441_v26 = vadd.f32 %v1440_v53, %v1405_v25  ;;  %1180 = vst [vmem:[%s2720_s6 + $0xe0] sm:$0xff] %v2107_v56  ;;  %v2108_v5 = vpack.c.bf16 %v3242_v14, %v3228_v1  ;;  %v1408_v53 = vsel %vm3908_vm15, %v3221_v23, 0.0  ;;  %v1410_v49 = vsel %vm3907_vm13, %v3242_v14, 0.0 }
 0x1da   : > { %v1478_v42 = vadd.f32 %v1477_v54, %v1406_v29 }
 0x1db   : > { %v1442_v52 = vadd.f32 %v1441_v26, %v1407_v32  ;;  %1181 = vst [vmem:[%s2720_s6 + $0xe8] sm:$0xff] %v2108_v5 }
 0x1dc   : > { %v1479_v56 = vadd.f32 %v1478_v42, %v1408_v53 }
 0x1dd   : > { %v1443_v29 = vadd.f32 %v1442_v52, %v1409_v35  ;;  %v3268_v26 = vpop.f32.mrb[28].mxu1  ;;  %v1489_v35 = vstv %s1286_s8 }
 0x1de   : > { %v1480_v54 = vadd.f32 %v1479_v56, %v1410_v49  ;;  %v1411_v25 = vsel %vm1281_vm14, %v3268_v26, 0.0  ;;  %v3274_v5 = vpop.f32.mrb[29].mxu1  ;;  %2248 = vrcp.f32 %v1489_v35 }
 0x1df   : > { %3965 = vst [vmem:[#allocation59_spill] sm:$0xff] %v3274_v5  ;;  %v1444_v42 = vadd.f32 %v1443_v29, %v1411_v25  ;;  %v2109_v52 = vpack.c.bf16 %v3274_v5, %v3268_v26  ;;  %v1412_v32 = vsel %vm1281_vm14, %v3274_v5, 0.0  ;;  %v955_v53 = vpop.f32.mrb[30].mxu1 }
 0x1e0   : > { %v1481_v30 = vadd.f32 %v1480_v54, %v1412_v32  ;;  %v1413_v56 = vsel %vm1282_vm12, %v955_v53, 0.0  ;;  %v3283_v49 = vpop.f32.mrb[31].mxu1 }
 0x1e1   : > { %3966 = vst [vmem:[#allocation60_spill] sm:$0xff] %v3283_v49  ;;  %1182 = vst [vmem:[%s2720_s6 + $0xf0] sm:$0xff] %v2109_v52  ;;  %v1445_v8 = vadd.f32 %v1444_v42, %v1413_v56  ;;  %v2110_v13 = vpack.c.bf16 %v3283_v49, %v955_v53  ;;  %v1414_v29 = vsel %vm1282_vm12, %v3283_v49, 0.0 }
 0x1e2   : > { %v1482_v25 = vadd.f32 %v1481_v30, %v1414_v29 }
 0x1e3   : > { %v1446_v14 = vrot.slane %v1445_v8, 4  ;;  %1183 = vst [vmem:[%s2720_s6 + $0xf8] sm:$0xff] %v2110_v13 }
 0x1e4   : > { %v1483_v5 = vrot.slane %v1482_v25, 4 }
 0x1e5   : > { %v1447_v23 = vadd.f32 %v1446_v14, %v1445_v8 }
 0x1e6   : > { %v1484_v54 = vadd.f32 %v1483_v5, %v1482_v25  ;;  %v3997_v50 = vld [vmem:[#allocation59_spill] sm:$0xff] }
 0x1e7   : > { %v1448_v32 = vrot.slane %v1447_v23, 2 }
 0x1e8   : > { %v1485_v4 = vrot.slane %v1484_v54, 2  ;;  %v2249_v52 = vpop.eup %2248 }
 0x1e9   : > { %v1449_v46 = vadd.f32 %v1448_v32, %v1447_v23 }
 0x1ea   : > { %v1486_v45 = vadd.f32 %v1485_v4, %v1484_v54 }
 0x1eb   : > { %v1450_v28 = vrot.slane %v1449_v46, 1 }
 0x1ec   : > { %v1487_v42 = vrot.slane %v1486_v45, 1 }
 0x1ed   : > { %v3291_v56 = vadd.f32 %v1450_v28, %v1449_v46 }
 0x1ee   : > { %v3293_v58 = vadd.f32 %v1487_v42, %v1486_v45 }
 0x1ef   : > { %v3296_v49 = vmul.f32 %v2249_v52, %v3291_v56 }
 0x1f1   : > { %v1493_v8 = vsub.f32 %v2713_v40, %v3296_v49  ;;  %v1495_v30 = vsub.f32 %v2726_v43, %v3296_v49  ;;  %v1497_v4 = vsub.f32 %v2754_v55, %v3296_v49  ;;  %v1499_v46 = vsub.f32 %v2768_v62, %v3296_v49 }
 0x1f2   : > { %v1501_v28 = vsub.f32 %v2790_v9, %v3296_v49  ;;  %v1503_v45 = vsub.f32 %v2804_v16, %v3296_v49  ;;  %v1505_v23 = vsub.f32 %v2826_v27, %v3296_v49  ;;  %v1507_v40 = vsub.f32 %v2840_v39, %v3296_v49  ;;  %v3969_v9 = vld [vmem:[#allocation4_spill] sm:$0xff] }
 0x1f3   : > { %v1553_v13 = vsub.f32 %v3268_v26, %v3296_v49  ;;  %v1555_v35 = vsub.f32 %v955_v53, %v3296_v49  ;;  %v1557_v54 = vsel %vm1251_vm0, %v1493_v8, 0.0  ;;  %v1559_v32 = vsel %vm1252_vm1, %v1495_v30, 0.0 }
 0x1f4   : > { %v1561_v42 = vsel %vm1253_vm2, %v1497_v4, 0.0  ;;  %v1563_v26 = vsel %vm1254_vm3, %v1499_v46, 0.0  ;;  %v1565_v53 = vsel %vm1255_vm4, %v1501_v28, 0.0  ;;  %v1569_v8 = vsel %vm1257_vm6, %v1505_v23, 0.0  ;;  %v3976_v23 = vld [vmem:[#allocation15_spill] sm:$0xff] }
 0x1f5   : > { %v3365_v29 = vsel %vm1281_vm14, %v1553_v13, 0.0  ;;  %v3369_v25 = vsel %vm1282_vm12, %v1555_v35, 0.0  ;;  %v3382_v13 = vmul.f32 %v2249_v52, %v3293_v58  ;;  %v1567_v35 = vsel %vm1256_vm5, %v1503_v45, 0.0 }
 0x1f6   : > { %3967 = vst [vmem:[#allocation61_spill] sm:$0xff] %v3365_v29  ;;  %3968 = vst [vmem:[#allocation62_spill] sm:$0xff] %v3369_v25  ;;  %v1621_v5 = vmul.f32 %v1557_v54, %v1557_v54  ;;  %v1623_v30 = vmul.f32 %v1559_v32, %v1559_v32  ;;  %v1571_v4 = vsel %vm1258_vm7, %v1507_v40, 0.0  ;;  %v1625_v14 = vmul.f32 %v1561_v42, %v1561_v42  ;;  %v3970_v54 = vld [vmem:[#allocation5_spill] sm:$0xff]  ;;  %v3971_v40 = vld [vmem:[#allocation6_spill] sm:$0xff] }
 0x1f7   : > { %v1627_v39 = vmul.f32 %v1563_v26, %v1563_v26  ;;  %v1629_v46 = vmul.f32 %v1565_v53, %v1565_v53  ;;  %v1631_v27 = vmul.f32 %v1567_v35, %v1567_v35  ;;  %v1633_v16 = vmul.f32 %v1569_v8, %v1569_v8  ;;  %v3972_v26 = vld [vmem:[#allocation7_spill] sm:$0xff]  ;;  %v3977_v32 = vld [vmem:[#allocation18_spill] sm:$0xff]  ;;  %v3978_v42 = vld [vmem:[#allocation21_spill] sm:$0xff] }
 0x1f8   : > { %v1685_v28 = vadd.f32 %v1623_v30, %v1621_v5  ;;  %v1494_v52 = vsub.f32 %v2722_v41, %v3382_v13  ;;  %v1496_v45 = vsub.f32 %v2737_v47, %v3382_v13  ;;  %v3973_v5 = vld [vmem:[#allocation8_spill] sm:$0xff]  ;;  %v3974_v41 = vld [vmem:[#allocation10_spill] sm:$0xff]  ;;  %v1554_v43 = vsub.f32 %v3997_v50, %v3382_v13 }
 0x1f9   : > { %v3975_v47 = vld [vmem:[#allocation12_spill] sm:$0xff]  ;;  %v3998_v25 = vsub.f32 %v2863_v59, %v3296_v49  ;;  %v4003_v59 = vsub.f32 %v2913_v31, %v3296_v49  ;;  %v4013_v33 = vsub.f32 %v3022_v21, %v3296_v49  ;;  %v4025_v44 = vsub.f32 %v2887_v11, %v3296_v49 }
 0x1fa   : > { %v1686_v8 = vadd.f32 %v1685_v28, %v1625_v14  ;;  %v3980_v14 = vld [vmem:[#allocation28_spill] sm:$0xff]  ;;  %v1558_v18 = vsel %vm1251_vm0, %v1494_v52, 0.0  ;;  %v4029_v48 = vsub.f32 %v3971_v40, %v3382_v13  ;;  %v4036_v63 = vsub.f32 %v3972_v26, %v3382_v13 }
 0x1fb   : > { %v1573_v29 = vsel %vm1259_vm8, %v3998_v25, 0.0  ;;  %v4000_v53 = vld [vmem:[#allocation60_spill] sm:$0xff]  ;;  %v1577_v25 = vsel %vm1261_vm10, %v4003_v59, 0.0  ;;  %v1622_v52 = vmul.f32 %v1558_v18, %v1558_v18  ;;  %v4041_v26 = vsub.f32 %v2966_v51, %v3296_v49 }
 0x1fc   : > { %v1687_v35 = vadd.f32 %v1686_v8, %v1627_v39  ;;  %v3987_v39 = vld [vmem:[#allocation25_spill] sm:$0xff]  ;;  %v1556_v2 = vsub.f32 %v4000_v53, %v3382_v13  ;;  %v1637_v20 = vmul.f32 %v1573_v29, %v1573_v29  ;;  %v2306_v53 = vmov 1966171168   ;;  %v4008_v31 = vld [vmem:[#allocation20_spill] sm:$0xff] }
 0x1fd   : > { %vm4009_vm13 = vcmp.lt.s32.totalorder %v4008_v31, 500  ;;  %v1566_v11 = vsel %vm1255_vm4, %v4029_v48, 0.0  ;;  %v4045_v17 = vsub.f32 %v2989_v3, %v3296_v49  ;;  %v4049_v24 = vsub.f32 %v3024_v22, %v3296_v49 }
 0x1fe   : > { %v1688_v28 = vadd.f32 %v1687_v35, %v1629_v46  ;;  %v1635_v35 = vmul.f32 %v1571_v4, %v1571_v4  ;;  %v4053_v7 = vsub.f32 %v3048_v0, %v3296_v49  ;;  %v4057_v62 = vsub.f32 %v3094_v12, %v3296_v49 }
 0x200   : > { %v1689_v30 = vadd.f32 %v1688_v28, %v1631_v27  ;;  %v4001_v28 = vsub.f32 %v2885_v10, %v3296_v49 }
 0x202   : > { %v1690_v27 = vadd.f32 %v1689_v30, %v1633_v16  ;;  %v1575_v55 = vsel %vm1260_vm9, %v4001_v28, 0.0  ;;  %v4005_v16 = vsub.f32 %v2935_v57, %v3296_v49  ;;  %v1763_v30 = vunpack.c.l.s4 %v2306_v53 }
 0x203   : > { %v1639_v46 = vmul.f32 %v1575_v55, %v1575_v55  ;;  %v1641_v28 = vmul.f32 %v1577_v25, %v1577_v25 }
 0x204   : > { %v1691_v50 = vadd.f32 %v1690_v27, %v1635_v35  ;;  %v1579_v10 = vsel %vm1262_vm11, %v4005_v16, 0.0  ;;  %v4007_v35 = vsub.f32 %v2964_v38, %v3296_v49  ;;  %v1764_v59 = vunpack.c.0.s8 %v1763_v30 }
 0x205   : > { %v1643_v55 = vmul.f32 %v1579_v10, %v1579_v10  ;;  %v4016_v30 = vsub.f32 %v3046_v15, %v3296_v49  ;;  %v4022_v15 = vld [vmem:[#allocation27_spill] sm:$0xff] }
 0x206   : > { %v1692_v1 = vadd.f32 %v1691_v50, %v1637_v20  ;;  %v1581_v27 = vsel %vm4009_vm13, %v4007_v35, 0.0  ;;  %v3482_v20 = vsel %vm1281_vm14, %v1554_v43, 0.0  ;;  %v3487_v50 = vsel %vm1282_vm12, %v1556_v2, 0.0  ;;  %v4014_v2 = vld [vmem:[#allocation26_spill] sm:$0xff] }
 0x207   : > { %v1645_v25 = vmul.f32 %v1581_v27, %v1581_v27  ;;  %v1560_v43 = vsel %vm1252_vm1, %v1496_v45, 0.0  ;;  %vm4015_vm12 = vcmp.lt.s32.totalorder %v4014_v2, 500  ;;  %v3510_v45 = vsub.s32 %v1764_v59, %v4019_v37 }
 0x208   : > { %v1693_v29 = vadd.f32 %v1692_v1, %v1639_v46  ;;  %v4010_v1 = vsub.f32 %v2987_v19, %v3296_v49  ;;  %v4011_v46 = vld [vmem:[#allocation23_spill] sm:$0xff]  ;;  %v1585_v10 = vsel %vm4015_vm12, %v4013_v33, 0.0  ;;  %v4020_v27 = vsub.f32 %v3969_v9, %v3382_v13 }
 0x209   : > { %vm4012_vm15 = vcmp.lt.s32.totalorder %v4011_v46, 500  ;;  %v1649_v35 = vmul.f32 %v1585_v10, %v1585_v10  ;;  %vm4023_vm0 = vcmp.lt.s32.totalorder %v4022_v15, 500  ;;  %v4028_v33 = vcombine.low %v3291_v56, %v3293_v58  ;;  %v4034_v56 = vld [vmem:[#allocation32_spill] sm:$0xff] }
 0x20a   : > { %v1694_v57 = vadd.f32 %v1693_v29, %v1641_v28  ;;  %v1583_v38 = vsel %vm4012_vm15, %v4010_v1, 0.0  ;;  %v4017_v28 = vld [vmem:[#allocation30_spill] sm:$0xff]  ;;  %v1624_v29 = vmul.f32 %v1560_v43, %v1560_v43  ;;  %v4033_v58 = vsub.f32 %v2915_v34, %v3296_v49 }
 0x20b   : > { %v1647_v53 = vmul.f32 %v1583_v38, %v1583_v38  ;;  %vm4018_vm13 = vcmp.lt.s32.totalorder %v4017_v28, 500  ;;  %v1768_v10 = vrot.slane %v4028_v33, %v3510_v45  ;;  %v4044_v33 = vsub.f32 %v3974_v41, %v3382_v13  ;;  %v4050_v41 = vld [vmem:[#allocation41_spill] sm:$0xff] }
 0x20c   : > { %v1695_v16 = vadd.f32 %v1694_v57, %v1643_v55  ;;  %v1587_v36 = vsel %vm4018_vm13, %v4016_v30, 0.0  ;;  %v1562_v55 = vsel %vm1253_vm2, %v4020_v27, 0.0  ;;  %v4021_v57 = vsub.f32 %v2865_v60, %v3296_v49 }
 0x20d   : > { %v1651_v38 = vmul.f32 %v1587_v36, %v1587_v36  ;;  %v1626_v18 = vmul.f32 %v1562_v55, %v1562_v55  ;;  %v1722_v43 = vadd.f32 %v1624_v29, %v1622_v52  ;;  %v1775_v37 = vrot.slane %v1768_v10, %v3510_v45  ;;  %v4038_v55 = vld [vmem:[#allocation35_spill] sm:$0xff] }
 0x20e   : > { %v1696_v19 = vadd.f32 %v1695_v16, %v1645_v25  ;;  %v1589_v1 = vsel %vm4023_vm0, %v4021_v57, 0.0  ;;  %v4024_v25 = vsub.f32 %v3970_v54, %v3382_v13  ;;  %v4026_v16 = vld [vmem:[#allocation31_spill] sm:$0xff]  ;;  %v4030_v54 = vlaneseq }
 0x20f   : > { %vm4027_vm1 = vcmp.lt.s32.totalorder %v4026_v16, 500  ;;  %v1723_v29 = vadd.f32 %v1722_v43, %v1626_v18  ;;  %v4037_v27 = vsub.f32 %v2937_v61, %v3296_v49  ;;  %vm4039_vm4 = vcmp.lt.s32.totalorder %v4038_v55, 500  ;;  %v4042_v61 = vld [vmem:[#allocation38_spill] sm:$0xff] }
 0x210   : > { %v1697_v21 = vadd.f32 %v1696_v19, %v1647_v53  ;;  %v1564_v9 = vsel %vm1254_vm3, %v4024_v25, 0.0  ;;  %v1591_v60 = vsel %vm4027_vm1, %v4025_v44, 0.0  ;;  %v1653_v53 = vmul.f32 %v1589_v1, %v1589_v1 }
 0x211   : > { %vm3548_vm2 = vcmp.lt.s32.totalorder %v4030_v54, 256  ;;  %vm4035_vm3 = vcmp.lt.s32.totalorder %v4034_v56, 500  ;;  %v1628_v52 = vmul.f32 %v1564_v9, %v1564_v9  ;;  %v1595_v34 = vsel %vm4039_vm4, %v4037_v27, 0.0 }
 0x212   : > { %v1698_v59 = vadd.f32 %v1697_v21, %v1649_v35  ;;  %v1593_v36 = vsel %vm4035_vm3, %v4033_v58, 0.0  ;;  %v1655_v35 = vmul.f32 %v1591_v60, %v1591_v60  ;;  %v1568_v21 = vsel %vm1256_vm5, %v4036_v63, 0.0  ;;  %1781 = vst.msk [vmem:[%s406_s11] sm:$0x3] %vm3548_vm2, %v1775_v37 }
 0x213   : > { %v1630_v57 = vmul.f32 %v1566_v11, %v1566_v11  ;;  %v1724_v1 = vadd.f32 %v1723_v29, %v1628_v52  ;;  %v4040_v25 = vsub.f32 %v3973_v5, %v3382_v13  ;;  %vm4043_vm5 = vcmp.lt.s32.totalorder %v4042_v61, 500  ;;  %v4046_v5 = vld [vmem:[#allocation39_spill] sm:$0xff] }
 0x214   : > { %v1699_v19 = vadd.f32 %v1698_v59, %v1651_v38  ;;  %v1657_v38 = vmul.f32 %v1593_v36, %v1593_v36  ;;  %v1597_v9 = vsel %vm4043_vm5, %v4041_v26, 0.0  ;;  %v1632_v44 = vmul.f32 %v1568_v21, %v1568_v21 }
 0x215   : > { %v1570_v6 = vsel %vm1257_vm6, %v4040_v25, 0.0  ;;  %v1725_v60 = vadd.f32 %v1724_v1, %v1630_v57  ;;  %v1659_v18 = vmul.f32 %v1595_v34, %v1595_v34  ;;  %v1572_v10 = vsel %vm1258_vm7, %v4044_v33, 0.0 }
 0x216   : > { %v1700_v40 = vadd.f32 %v1699_v19, %v1653_v53  ;;  %vm4047_vm6 = vcmp.lt.s32.totalorder %v4046_v5, 500  ;;  %v1634_v51 = vmul.f32 %v1570_v6, %v1570_v6  ;;  %v1661_v48 = vmul.f32 %v1597_v9, %v1597_v9 }
 0x217   : > { %v1599_v53 = vsel %vm4047_vm6, %v4045_v17, 0.0  ;;  %v1726_v19 = vadd.f32 %v1725_v60, %v1632_v44  ;;  %v4048_v54 = vsub.f32 %v3975_v47, %v3382_v13  ;;  %vm4051_vm7 = vcmp.lt.s32.totalorder %v4050_v41, 500  ;;  %v4054_v47 = vld [vmem:[#allocation44_spill] sm:$0xff]  ;;  %v4063_v44 = vld [vmem:[#allocation46_spill] sm:$0xff] }
 0x218   : > { %v1701_v59 = vadd.f32 %v1700_v40, %v1655_v35  ;;  %v1601_v36 = vsel %vm4051_vm7, %v4049_v24, 0.0  ;;  %v1636_v3 = vmul.f32 %v1572_v10, %v1572_v10  ;;  %v1663_v29 = vmul.f32 %v1599_v53, %v1599_v53  ;;  %v4065_v10 = vld [vmem:[#allocation24_spill] sm:$0xff] }
 0x219   : > { %v1574_v58 = vsel %vm1259_vm8, %v4048_v54, 0.0  ;;  %v1727_v52 = vadd.f32 %v1726_v19, %v1634_v51  ;;  %v4052_v35 = vsub.f32 %v3976_v23, %v3382_v13  ;;  %vm4055_vm8 = vcmp.lt.s32.totalorder %v4054_v47, 500  ;;  %v4058_v23 = vld [vmem:[#allocation45_spill] sm:$0xff] }
 0x21a   : > { %v1702_v43 = vadd.f32 %v1701_v59, %v1657_v38  ;;  %v1603_v63 = vsel %vm4055_vm8, %v4053_v7, 0.0  ;;  %v1638_v22 = vmul.f32 %v1574_v58, %v1574_v58  ;;  %v1665_v27 = vmul.f32 %v1601_v36, %v1601_v36  ;;  %v4070_v51 = vld [vmem:[#allocation49_spill] sm:$0xff] }
 0x21b   : > { %v1576_v40 = vsel %vm1260_vm9, %v4052_v35, 0.0  ;;  %v1728_v21 = vadd.f32 %v1727_v52, %v1636_v3  ;;  %v4056_v57 = vsub.f32 %v3977_v32, %v3382_v13  ;;  %vm4059_vm9 = vcmp.lt.s32.totalorder %v4058_v23, 500  ;;  %v4061_v32 = vld [vmem:[#allocation42_spill] sm:$0xff]  ;;  %v4075_v52 = vld [vmem:[#allocation52_spill] sm:$0xff] }
 0x21c   : > { %v1703_v11 = vadd.f32 %v1702_v43, %v1659_v18  ;;  %v1605_v38 = vsel %vm4059_vm9, %v4057_v62, 0.0  ;;  %v1640_v0 = vmul.f32 %v1576_v40, %v1576_v40  ;;  %v1667_v25 = vmul.f32 %v1603_v63, %v1603_v63  ;;  %v4073_v3 = vld [vmem:[#allocation50_spill] sm:$0xff]  ;;  %v4077_v63 = vld [vmem:[#allocation33_spill] sm:$0xff] }
 0x21d   : > { %v1578_v1 = vsel %vm1261_vm10, %v4056_v57, 0.0  ;;  %v1729_v59 = vadd.f32 %v1728_v21, %v1638_v22  ;;  %v4060_v26 = vsub.f32 %v3978_v42, %v3382_v13  ;;  %v4062_v8 = vsub.f32 %v4061_v32, %v3296_v49  ;;  %v4068_v42 = vld [vmem:[#allocation47_spill] sm:$0xff] }
 0x21e   : > { %v1704_v37 = vadd.f32 %v1703_v11, %v1661_v48  ;;  %vm4064_vm10 = vcmp.lt.s32.totalorder %v4063_v44, 500  ;;  %v1642_v12 = vmul.f32 %v1578_v1, %v1578_v1  ;;  %v1669_v43 = vmul.f32 %v1605_v38, %v1605_v38 }
 0x21f   : > { %v1580_v9 = vsel %vm1262_vm11, %v4060_v26, 0.0  ;;  %v1607_v60 = vsel %vm4064_vm10, %v4062_v8, 0.0  ;;  %v1730_v18 = vadd.f32 %v1729_v59, %v1640_v0  ;;  %v4066_v17 = vsub.f32 %v4065_v10, %v3382_v13  ;;  %v4084_v0 = vld [vmem:[#allocation36_spill] sm:$0xff]  ;;  %v4089_v26 = vld [vmem:[#allocation54_spill] sm:$0xff] }
 0x220   : > { %v1705_v34 = vadd.f32 %v1704_v37, %v1663_v29  ;;  %vm4067_vm14 = vcmp.lt.s32.totalorder %v4008_v31, 500  ;;  %v4069_v4 = vsub.f32 %v4068_v42, %v3296_v49  ;;  %vm4071_vm11 = vcmp.lt.s32.totalorder %v4070_v51, 500  ;;  %v4094_v42 = vld [vmem:[#allocation16_spill] sm:$0xff] }
 0x221   : > { %v1582_v53 = vsel %vm4067_vm14, %v4066_v17, 0.0  ;;  %v1644_v48 = vmul.f32 %v1580_v9, %v1580_v9  ;;  %v1731_v11 = vadd.f32 %v1730_v18, %v1642_v12  ;;  %v1671_v54 = vmul.f32 %v1607_v60, %v1607_v60  ;;  %v4091_v18 = vld [vmem:[#allocation13_spill] sm:$0xff] }
 0x222   : > { %v1706_v6 = vadd.f32 %v1705_v34, %v1665_v27  ;;  %v1609_v19 = vsel %vm4071_vm11, %v4069_v4, 0.0  ;;  %v4072_v24 = vsub.f32 %v3980_v14, %v3382_v13  ;;  %v4074_v31 = vsub.f32 %v4073_v3, %v3296_v49  ;;  %v4080_v14 = vld [vmem:[#allocation55_spill] sm:$0xff]  ;;  %v4082_v27 = vld [vmem:[#allocation53_spill] sm:$0xff] }
 0x223   : > { %vm4076_vm12 = vcmp.lt.s32.totalorder %v4075_v52, 500  ;;  %v1646_v37 = vmul.f32 %v1582_v53, %v1582_v53  ;;  %v1732_v35 = vadd.f32 %v1731_v11, %v1644_v48  ;;  %v1673_v40 = vmul.f32 %v1609_v19, %v1609_v19  ;;  %v4097_v11 = vld [vmem:[#allocation61_spill] sm:$0xff] }
 0x224   : > { %v1707_v33 = vadd.f32 %v1706_v6, %v1667_v25  ;;  %v1584_v36 = vsel %vm4012_vm15, %v4072_v24, 0.0  ;;  %v1611_v29 = vsel %vm4076_vm12, %v4074_v31, 0.0  ;;  %v4078_v22 = vsub.f32 %v4077_v63, %v3382_v13  ;;  %v4087_v6 = vld [vmem:[#allocation57_spill] sm:$0xff]  ;;  %v4098_v24 = vld [vmem:[#allocation19_spill] sm:$0xff] }
 0x225   : > { %vm4079_vm13 = vcmp.lt.s32.totalorder %v4014_v2, 500  ;;  %v4081_v46 = vsub.f32 %v4080_v14, %v3296_v49  ;;  %vm4083_vm0 = vcmp.lt.s32.totalorder %v4082_v27, 500  ;;  %v1648_v57 = vmul.f32 %v1584_v36, %v1584_v36 }
 0x226   : > { %v1708_v58 = vadd.f32 %v1707_v33, %v1669_v43  ;;  %v1586_v21 = vsel %vm4079_vm13, %v4078_v22, 0.0  ;;  %v1733_v1 = vadd.f32 %v1732_v35, %v1646_v37  ;;  %v1675_v62 = vmul.f32 %v1611_v29, %v1611_v29  ;;  %v4101_v29 = vld [vmem:[#allocation62_spill] sm:$0xff] }
 0x227   : > { %v1613_v34 = vsel %vm4083_vm0, %v4081_v46, 0.0  ;;  %v4085_v59 = vsub.f32 %v4084_v0, %v3382_v13  ;;  %vm4086_vm1 = vcmp.lt.s32.totalorder %v4017_v28, 500  ;;  %v4088_v2 = vsub.f32 %v4087_v6, %v3296_v49  ;;  %v4110_v0 = vld [vmem:[#allocation34_spill] sm:$0xff] }
 0x228   : > { %v1709_v7 = vadd.f32 %v1708_v58, %v1671_v54  ;;  %vm4090_vm3 = vcmp.lt.s32.totalorder %v4089_v26, 500  ;;  %v1650_v32 = vmul.f32 %v1586_v21, %v1586_v21  ;;  %v1734_v8 = vadd.f32 %v1733_v1, %v1648_v57  ;;  %v4107_v57 = vld [vmem:[#allocation29_spill] sm:$0xff] }
 0x229   : > { %v1588_v25 = vsel %vm4086_vm1, %v4085_v59, 0.0  ;;  %v1615_v9 = vsel %vm4090_vm3, %v4088_v2, 0.0  ;;  %v1677_v60 = vmul.f32 %v1613_v34, %v1613_v34  ;;  %v4092_v43 = vsub.f32 %v4091_v18, %v3382_v13  ;;  %vm4132_vm1 = vmmov %vm4090_vm3 }
 0x22a   : > { %v1710_v38 = vadd.f32 %v1709_v7, %v1673_v40  ;;  %vm4093_vm4 = vcmp.lt.s32.totalorder %v4022_v15, 500  ;;  %v1652_v10 = vmul.f32 %v1588_v25, %v1588_v25  ;;  %v1735_v17 = vadd.f32 %v1734_v8, %v1650_v32 }
 0x22b   : > { %v1590_v33 = vsel %vm4093_vm4, %v4092_v43, 0.0  ;;  %v1679_v28 = vmul.f32 %v1615_v9, %v1615_v9  ;;  %v4095_v49 = vsub.f32 %v4094_v42, %v3382_v13  ;;  %vm4096_vm5 = vcmp.lt.s32.totalorder %v4026_v16, 500  ;;  %v4102_v16 = vld [vmem:[#allocation22_spill] sm:$0xff] }
 0x22c   : > { %v1711_v12 = vadd.f32 %v1710_v38, %v1675_v62  ;;  %v1654_v19 = vmul.f32 %v1590_v33, %v1590_v33  ;;  %v1736_v48 = vadd.f32 %v1735_v17, %v1652_v10  ;;  %v1681_v54 = vmul.f32 %v4097_v11, %v4097_v11 }
 0x22d   : > { %v1592_v4 = vsel %vm4096_vm5, %v4095_v49, 0.0  ;;  %v4099_v15 = vsub.f32 %v4098_v24, %v3382_v13  ;;  %vm4100_vm6 = vcmp.lt.s32.totalorder %v4034_v56, 500  ;;  %v1683_v37 = vmul.f32 %v4101_v29, %v4101_v29 }
 0x22e   : > { %v1712_v53 = vadd.f32 %v1711_v12, %v1677_v60  ;;  %v1656_v3 = vmul.f32 %v1592_v4, %v1592_v4  ;;  %v1737_v31 = vadd.f32 %v1736_v48, %v1654_v19  ;;  %v4103_v40 = vsub.f32 %v4102_v16, %v3382_v13 }
 0x22f   : > { %v1594_v36 = vsel %vm4100_vm6, %v4099_v15, 0.0  ;;  %vm4104_vm7 = vcmp.lt.s32.totalorder %v4038_v55, 500  ;;  %v4105_v14 = vsub.f32 %v3987_v39, %v3382_v13  ;;  %vm4106_vm8 = vcmp.lt.s32.totalorder %v4042_v61, 500  ;;  %v4113_v61 = vld [vmem:[#allocation37_spill] sm:$0xff] }
 0x230   : > { %v1713_v58 = vadd.f32 %v1712_v53, %v1679_v28  ;;  %v1596_v7 = vsel %vm4104_vm7, %v4103_v40, 0.0  ;;  %v1658_v63 = vmul.f32 %v1594_v36, %v1594_v36  ;;  %v1738_v22 = vadd.f32 %v1737_v31, %v1656_v3  ;;  %v4130_v3 = vld [vmem:[#allocation58_spill] sm:$0xff] }
 0x231   : > { %v1598_v56 = vsel %vm4106_vm8, %v4105_v14, 0.0  ;;  %v1660_v46 = vmul.f32 %v1596_v7, %v1596_v7  ;;  %v4108_v1 = vsub.f32 %v4107_v57, %v3382_v13  ;;  %vm4109_vm9 = vcmp.lt.s32.totalorder %v4046_v5, 500  ;;  %v4116_v5 = vld [vmem:[#allocation40_spill] sm:$0xff] }
 0x232   : > { %v1714_v35 = vadd.f32 %v1713_v58, %v1681_v54  ;;  %v1739_v34 = vadd.f32 %v1738_v22, %v1658_v63  ;;  %v1662_v38 = vmul.f32 %v1598_v56, %v1598_v56  ;;  %v4111_v59 = vsub.f32 %v4110_v0, %v3382_v13 }
 0x233   : > { %v1600_v62 = vsel %vm4109_vm9, %v4108_v1, 0.0  ;;  %vm4112_vm10 = vcmp.lt.s32.totalorder %v4050_v41, 500  ;;  %v4114_v2 = vsub.f32 %v4113_v61, %v3382_v13  ;;  %vm4115_vm14 = vcmp.lt.s32.totalorder %v4054_v47, 500  ;;  %v4119_v41 = vld [vmem:[#allocation43_spill] sm:$0xff]  ;;  %v4122_v47 = vld [vmem:[#allocation48_spill] sm:$0xff] }
 0x234   : > { %v1715_v21 = vadd.f32 %v1714_v35, %v1683_v37  ;;  %v1740_v55 = vadd.f32 %v1739_v34, %v1660_v46  ;;  %v1602_v25 = vsel %vm4112_vm10, %v4111_v59, 0.0  ;;  %v1664_v39 = vmul.f32 %v1600_v62, %v1600_v62 }
 0x235   : > { %v1604_v9 = vsel %vm4115_vm14, %v4114_v2, 0.0  ;;  %v1666_v32 = vmul.f32 %v1602_v25, %v1602_v25  ;;  %v4117_v60 = vsub.f32 %v4116_v5, %v3382_v13  ;;  %vm4118_vm11 = vcmp.lt.s32.totalorder %v4058_v23, 500  ;;  %v4125_v23 = vld [vmem:[#allocation51_spill] sm:$0xff] }
 0x236   : > { %v1741_v6 = vadd.f32 %v1740_v55, %v1662_v38  ;;  %v1668_v18 = vmul.f32 %v1604_v9, %v1604_v9  ;;  %v4120_v33 = vsub.f32 %v4119_v41, %v3382_v13  ;;  %vm4121_vm15 = vcmp.lt.s32.totalorder %v4063_v44, 500  ;;  %v4128_v44 = vld [vmem:[#allocation56_spill] sm:$0xff] }
 0x237   : > { %v1606_v12 = vsel %vm4118_vm11, %v4117_v60, 0.0  ;;  %v4123_v53 = vsub.f32 %v4122_v47, %v3382_v13  ;;  %vm4124_vm12 = vcmp.lt.s32.totalorder %v4070_v51, 500  ;;  %v4126_v19 = vsub.f32 %v4125_v23, %v3382_v13 }
 0x238   : > { %v1742_v8 = vadd.f32 %v1741_v6, %v1664_v39  ;;  %v1608_v10 = vsel %vm4121_vm15, %v4120_v33, 0.0  ;;  %v1670_v17 = vmul.f32 %v1606_v12, %v1606_v12  ;;  %vm4127_vm13 = vcmp.lt.s32.totalorder %v4075_v52, 500 }
 0x239   : > { %v1610_v42 = vsel %vm4124_vm12, %v4123_v53, 0.0  ;;  %v1672_v49 = vmul.f32 %v1608_v10, %v1608_v10  ;;  %v1612_v48 = vsel %vm4127_vm13, %v4126_v19, 0.0  ;;  %v4129_v58 = vsub.f32 %v4128_v44, %v3382_v13 }
 0x23a   : > { %v1743_v43 = vadd.f32 %v1742_v8, %v1666_v32  ;;  %v1674_v11 = vmul.f32 %v1610_v42, %v1610_v42  ;;  %v1716_v15 = vrot.slane %v1715_v21, 4  ;;  %v1676_v36 = vmul.f32 %v1612_v48, %v1612_v48 }
 0x23b   : > { %v1614_v24 = vsel %vm4083_vm0, %v4129_v58, 0.0  ;;  %v4131_v31 = vsub.f32 %v4130_v3, %v3382_v13  ;;  %v1682_v7 = vmul.f32 %v3482_v20, %v3482_v20  ;;  %v1684_v22 = vmul.f32 %v3487_v50, %v3487_v50 }
 0x23c   : > { %v1744_v28 = vadd.f32 %v1743_v43, %v1668_v18  ;;  %v1678_v37 = vmul.f32 %v1614_v24, %v1614_v24  ;;  %v1717_v35 = vadd.f32 %v1716_v15, %v1715_v21 }
 0x23d   : > { %v1616_v29 = vsel %vm4132_vm1, %v4131_v31, 0.0 }
 0x23e   : > { %v1745_v4 = vadd.f32 %v1744_v28, %v1670_v17  ;;  %v1680_v16 = vmul.f32 %v1616_v29, %v1616_v29  ;;  %v1718_v27 = vrot.slane %v1717_v35, 2 }
 0x240   : > { %v1746_v54 = vadd.f32 %v1745_v4, %v1672_v49  ;;  %v1719_v13 = vadd.f32 %v1718_v27, %v1717_v35 }
 0x242   : > { %v1747_v51 = vadd.f32 %v1746_v54, %v1674_v11  ;;  %v1720_v34 = vrot.slane %v1719_v13, 1 }
 0x244   : > { %v1748_v52 = vadd.f32 %v1747_v51, %v1676_v36  ;;  %v1721_v21 = vadd.f32 %v1720_v34, %v1719_v13 }
 0x246   : > { %v1749_v40 = vadd.f32 %v1748_v52, %v1678_v37 }
 0x248   : > { %v1750_v63 = vadd.f32 %v1749_v40, %v1680_v16 }
 0x24a   : > { %v1751_v14 = vadd.f32 %v1750_v63, %v1682_v7 }
 0x24c   : > { %v1752_v56 = vadd.f32 %v1751_v14, %v1684_v22 }
 0x24e   : > { %v1753_v46 = vrot.slane %v1752_v56, 4 }
 0x250   : > { %v1754_v26 = vadd.f32 %v1753_v46, %v1752_v56 }
 0x252   : > { %v1755_v57 = vrot.slane %v1754_v26, 2 }
 0x254   : > { %v1756_v1 = vadd.f32 %v1755_v57, %v1754_v26 }
 0x256   : > { %v1757_v62 = vrot.slane %v1756_v1, 1 }
 0x258   : > { %v1758_v38 = vadd.f32 %v1757_v62, %v1756_v1 }
 0x25a   : > { %v1784_v55 = vcombine.low %v1721_v21, %v1758_v38 }
 0x25c   : > { %v1791_v20 = vrot.slane %v1784_v55, %v3510_v45 }
 0x25e   : > { %v1798_v50 = vrot.slane %v1791_v20, %v3510_v45 }
 0x260   : > { %1800 = vst.msk [vmem:[%s414_s14] sm:$0x3] %vm3548_vm2, %v1798_v50 }
 0x261 PF: > { %s15_s21 = sadd.s32 1, %s2304_s21   ;;  %s4133_s15 = smov %s2284_s16 }
 0x262   : > { %p12_p0 = scmp.ge.s32.totalorder %s15_s21, 6   ;;  %s4134_s16 = smov %s2383_s28 }
 0x263   : > { %s4135_s17 = smov %s2296_s19  ;;  %s4136_s18 = smov %s2300_s20 }
 0x264   : > { %s4137_s19 = smov %s4140_s22  ;;  %s4138_s20 = smov %s4144_s23 }
 0x265   :  { %14 = sbr.rel (!%p12_p0) target bundleno = 4 (0x4), region = 110 }

// kernel: _forward_impl.6
= control target key start
LH: loop header
LB: loop body
LE: loop exit
PB: predicated region body
PF: predicated region fallthrough
CT: control target
= control target key end

     0   :  { %s2984_s21 = smov 0   ;;  %s2986_s22 = smov 0   ;;  %s4237_s0 = inlined_call_operand.vmem [shape: bf16[2,512,64], index: 0, kind: input, shape index: {}]   ;;  %s4238_s1 = inlined_call_operand.vmem [shape: f32[1,64], index: 1, kind: input, shape index: {}]   ;;  %s4239_s2 = inlined_call_operand.vmem [shape: f32[1,64], index: 2, kind: input, shape index: {}]   ;;  %s4240_s3 = inlined_call_operand.vmem [shape: bf16[64,32], index: 3, kind: input, shape index: {}]   ;;  %s4241_s4 = inlined_call_operand.vmem [shape: bf16[2,512,32], index: 4, kind: output, shape index: {0}]   ;;  %s4242_s5 = inlined_call_operand.vmem [shape: f32[2,1,1,32], index: 5, kind: output, shape index: {1}]   ;;  %s4243_s6 = inlined_call_operand.vmem [shape: f32[2,1,1,32], index: 6, kind: output, shape index: {2}]  }
   0x1   :  { %s2988_s23 = smov 0  }
   0x2 LB: > { %s29_s24 = sadd.s32 1, %s2943_s22  ;;  %p2447_p0 = scmp.ge.s32.totalorder %s2947_s23, 1  ;;  %s2947_s23 = sphi %s2988_s23, %s17_s23   ;;  %s2943_s22 = sphi %s2986_s22, %s4318_s22   ;;  %s2939_s21 = sphi %s2984_s21, %s4317_s21  }
   0x3   : > { %p31_p1 = scmp.ge.s32.totalorder %s29_s24, 2  ;;  %p242_p2 = scmp.lt.s32.totalorder %s2947_s23, 3 }
   0x5   : > { %s4320_s24 = smov (%p31_p1, %s29_s24), 0  ;;  %p243_p3 = pnand %p2447_p0, %p242_p2 }
   0x7   : > { %246 = sbr.rel (%p243_p3) target bundleno = 543 (0x21f), region = 36 }
   0xe   : > { %v2921_v0 = vld [vmem:[%s4240_s3] sm:$0xff]   ;;  %p293_p4 = scmp.lt.s32.totalorder %s2939_s21, 1  ;;  %v2922_v1 = vld [vmem:[%s4240_s3 + $0x8] sm:$0xff]   ;;  %v2923_v2 = vld [vmem:[%s4240_s3 + $0x10] sm:$0xff]   ;;  %vm723_vm0 = vcmask 523264   ;;  %vm1365_vm1 = vcmask 257024  }
   0xf   : > { %2817 = vmatprep.subr.bf16.mxu0 %v2921_v0  ;;  %2889 = vmatprep.subr.bf16.mxu1 %v2921_v0  ;;  %v3024_v3 = vld [vmem:[%s4238_s1] ss:$0 sm:$0xff]  ;;  %v2924_v12 = vld [vmem:[%s4240_s3 + $0x18] sm:$0xff]   ;;  %vm1821_vm2 = vcmask 261120   ;;  %vm2283_vm4 = vcmask 253952  }
  0x10   : > { %s4322_s21 = smov (!%p293_p4, %s2939_s21), 1  ;;  %2818 = vmatpush3.bf16.msra.mxu0 %v2921_v0  ;;  %2893 = vmatpush3.bf16.msra.mxu1 %v2921_v0  ;;  %v3036_v13 = vld [vmem:[%s4239_s2] ss:$0 sm:$0xff] }
  0x11   : > { %2819 = vmatprep.subr.bf16.mxu0 %v2922_v1  ;;  %s2556_s7 = sshll.u32 %s4322_s21, 8  ;;  %2890 = vmatprep.subr.bf16.mxu1 %v2922_v1  ;;  %s317_s26 = scalar_lea.vmem %s4242_s5, %s4322_s21 }
  0x12   : > { %s3019_s10 = scalar_lea.vmem %s4237_s0, %s2556_s7  ;;  %s3261_s19 = scalar_lea.vmem %s4241_s4, %s2556_s7 }
  0x13   : > { %v2623_v4 = vld [vmem:[%s3019_s10] sm:$0xff]   ;;  %v2750_v5 = vld [vmem:[%s3019_s10 + $0x8] sm:$0xff]   ;;  %v2751_v6 = vld [vmem:[%s3019_s10 + $0x10] sm:$0xff]   ;;  %s323_s29 = scalar_lea.vmem %s4243_s6, %s4322_s21 }
  0x14   : > { %2820 = vmatpush3.bf16.msra.mxu0 %v2922_v1  ;;  %v2624_v7 = vunpack.c.l.bf16 %v2623_v4  ;;  %v2625_v8 = vunpack.c.h.bf16 %v2623_v4  ;;  %v2628_v9 = vunpack.c.l.bf16 %v2750_v5  ;;  %v2629_v10 = vunpack.c.h.bf16 %v2750_v5  ;;  %v2752_v11 = vld [vmem:[%s3019_s10 + $0x18] sm:$0xff]   ;;  %2894 = vmatpush3.bf16.msra.mxu1 %v2922_v1  ;;  %v2753_v33 = vld [vmem:[%s3019_s10 + $0x20] sm:$0xff]   ;;  %v2754_v38 = vld [vmem:[%s3019_s10 + $0x28] sm:$0xff]  }
  0x15   : > { %2821 = vmatprep.subr.bf16.mxu0 %v2923_v2  ;;  %v2632_v14 = vunpack.c.l.bf16 %v2751_v6  ;;  %v2633_v15 = vunpack.c.h.bf16 %v2751_v6  ;;  %v2636_v16 = vunpack.c.l.bf16 %v2752_v11  ;;  %v2637_v17 = vunpack.c.h.bf16 %v2752_v11  ;;  %2891 = vmatprep.subr.bf16.mxu1 %v2923_v2  ;;  %v2755_v42 = vld [vmem:[%s3019_s10 + $0x30] sm:$0xff]   ;;  %v2756_v47 = vld [vmem:[%s3019_s10 + $0x38] sm:$0xff]   ;;  %v2757_v4 = vld [vmem:[%s3019_s10 + $0x40] sm:$0xff]  }
  0x16   : > { %v460_v18 = vmul.f32 %v2624_v7, %v3024_v3  ;;  %v461_v19 = vmul.f32 %v2625_v8, %v3024_v3  ;;  %v462_v20 = vmul.f32 %v2628_v9, %v3024_v3  ;;  %v463_v21 = vmul.f32 %v2629_v10, %v3024_v3  ;;  %v2758_v10 = vld [vmem:[%s3019_s10 + $0x48] sm:$0xff]  }
  0x17   : > { %v464_v22 = vmul.f32 %v2632_v14, %v3024_v3  ;;  %v465_v23 = vmul.f32 %v2633_v15, %v3024_v3  ;;  %v466_v24 = vmul.f32 %v2636_v16, %v3024_v3  ;;  %v467_v25 = vmul.f32 %v2637_v17, %v3024_v3  ;;  %v2759_v15 = vld [vmem:[%s3019_s10 + $0x50] sm:$0xff]  }
  0x18   : > { %2822 = vmatpush3.bf16.msra.mxu0 %v2923_v2  ;;  %v531_v26 = vadd.f32 %v3036_v13, %v460_v18  ;;  %v532_v27 = vadd.f32 %v3036_v13, %v461_v19  ;;  %v533_v28 = vadd.f32 %v3036_v13, %v462_v20  ;;  %v534_v29 = vadd.f32 %v3036_v13, %v463_v21  ;;  %v2760_v20 = vld [vmem:[%s3019_s10 + $0x58] sm:$0xff]  }
  0x19   : > { %2823 = vmatprep.subr.bf16.mxu0 %v2924_v12  ;;  %v535_v30 = vadd.f32 %v3036_v13, %v464_v22  ;;  %v536_v31 = vadd.f32 %v3036_v13, %v465_v23  ;;  %v537_v32 = vadd.f32 %v3036_v13, %v466_v24  ;;  %2895 = vmatpush3.bf16.msra.mxu1 %v2923_v2  ;;  %v2640_v45 = vunpack.c.l.bf16 %v2753_v33 }
  0x1a   : > { %v595_v34 = vmax.f32 %v531_v26, 0.0  ;;  %v596_v35 = vmax.f32 %v532_v27, 0.0  ;;  %v597_v36 = vmax.f32 %v533_v28, 0.0  ;;  %v598_v37 = vmax.f32 %v534_v29, 0.0  ;;  %2892 = vmatprep.subr.bf16.mxu1 %v2924_v12 }
  0x1b   : > { %v599_v39 = vmax.f32 %v535_v30, 0.0  ;;  %v600_v40 = vmax.f32 %v536_v31, 0.0  ;;  %v538_v41 = vadd.f32 %v3036_v13, %v467_v25  ;;  %v2641_v46 = vunpack.c.h.bf16 %v2753_v33 }
  0x1c   : > { %2824 = vmatpush3.bf16.msra.mxu0 %v2924_v12  ;;  %v659_v43 = vpack.c.bf16 %v596_v35, %v595_v34  ;;  %v660_v44 = vpack.c.bf16 %v598_v37, %v597_v36  ;;  %v601_v49 = vmax.f32 %v537_v32, 0.0  ;;  %v2644_v50 = vunpack.c.l.bf16 %v2754_v38  ;;  %v2761_v35 = vld [vmem:[%s3019_s10 + $0x60] sm:$0xff]  }
  0x1d   : > { %v661_v48 = vpack.c.bf16 %v600_v40, %v599_v39  ;;  %v2645_v51 = vunpack.c.h.bf16 %v2754_v38  ;;  %v468_v52 = vmul.f32 %v2640_v45, %v3024_v3  ;;  %v469_v53 = vmul.f32 %v2641_v46, %v3024_v3  ;;  %2896 = vmatpush3.bf16.msra.mxu1 %v2924_v12 }
  0x1e   : > { %2825 = vmatprep.mubr.msk.bf16.mxu0 %vm723_vm0, %v659_v43  ;;  %v2648_v54 = vunpack.c.l.bf16 %v2755_v42  ;;  %v2649_v55 = vunpack.c.h.bf16 %v2755_v42  ;;  %v602_v56 = vmax.f32 %v538_v41, 0.0  ;;  %v470_v57 = vmul.f32 %v2644_v50, %v3024_v3 }
  0x1f   : > { %2826 = vmatmul.mubr.msk.bf16.vlgmr.msra.gmra.mrb[0].mxu0 %vm723_vm0, %v660_v44  ;;  %v471_v58 = vmul.f32 %v2645_v51, %v3024_v3  ;;  %v2652_v59 = vunpack.c.l.bf16 %v2756_v47  ;;  %v539_v60 = vadd.f32 %v3036_v13, %v468_v52  ;;  %v540_v61 = vadd.f32 %v3036_v13, %v469_v53 }
  0x20   : > { %2829 = vmatprep.mubr.msk.bf16.mxu0 %vm723_vm0, %v661_v48  ;;  %v472_v62 = vmul.f32 %v2648_v54, %v3024_v3  ;;  %v473_v63 = vmul.f32 %v2649_v55, %v3024_v3  ;;  %v541_v0 = vadd.f32 %v3036_v13, %v470_v57  ;;  %v2653_v2 = vunpack.c.h.bf16 %v2756_v47  ;;  %v2762_v48 = vld [vmem:[%s3019_s10 + $0x68] sm:$0xff]  }
  0x21   : > { %v542_v1 = vadd.f32 %v3036_v13, %v471_v58  ;;  %v603_v5 = vmax.f32 %v539_v60, 0.0  ;;  %v604_v6 = vmax.f32 %v540_v61, 0.0  ;;  %v662_v9 = vpack.c.bf16 %v602_v56, %v601_v49  ;;  %v2763_v56 = vld [vmem:[%s3019_s10 + $0x70] sm:$0xff]  }
  0x22   : > { %v543_v7 = vadd.f32 %v3036_v13, %v472_v62  ;;  %v544_v8 = vadd.f32 %v3036_v13, %v473_v63  ;;  %v474_v12 = vmul.f32 %v2652_v59, %v3024_v3  ;;  %v2656_v14 = vunpack.c.l.bf16 %v2757_v4 }
  0x23   : > { %v663_v11 = vpack.c.bf16 %v604_v6, %v603_v5  ;;  %v605_v16 = vmax.f32 %v541_v0, 0.0  ;;  %v606_v17 = vmax.f32 %v542_v1, 0.0  ;;  %v475_v18 = vmul.f32 %v2653_v2, %v3024_v3  ;;  %v3107_v1 = vld [vmem:[%s3019_s10 + $0x78] sm:$0xff]  }
  0x24   : > { %v2657_v19 = vunpack.c.h.bf16 %v2757_v4  ;;  %v607_v21 = vmax.f32 %v543_v7, 0.0  ;;  %v608_v22 = vmax.f32 %v544_v8, 0.0  ;;  %v2660_v23 = vunpack.c.l.bf16 %v2758_v10  ;;  %v2765_v7 = vld [vmem:[%s3019_s10 + $0x80] sm:$0xff]  }
  0x25   : > { %v2661_v24 = vunpack.c.h.bf16 %v2758_v10  ;;  %v476_v25 = vmul.f32 %v2656_v14, %v3024_v3  ;;  %v2664_v27 = vunpack.c.l.bf16 %v2759_v15  ;;  %v2665_v28 = vunpack.c.h.bf16 %v2759_v15 }
  0x26   : > { %v477_v26 = vmul.f32 %v2657_v19, %v3024_v3  ;;  %v478_v29 = vmul.f32 %v2660_v23, %v3024_v3  ;;  %v2668_v31 = vunpack.c.l.bf16 %v2760_v20  ;;  %v2669_v34 = vunpack.c.h.bf16 %v2760_v20 }
  0x27   : > { %2830 = vmatmul.mubr.msk.bf16.gmra.mrb[4].mxu0 %vm723_vm0, %v662_v9  ;;  %v479_v30 = vmul.f32 %v2661_v24, %v3024_v3  ;;  %v480_v32 = vmul.f32 %v2664_v27, %v3024_v3  ;;  %v481_v33 = vmul.f32 %v2665_v28, %v3024_v3  ;;  %v664_v36 = vpack.c.bf16 %v606_v17, %v605_v16  ;;  %v2767_v27 = vld [vmem:[%s3019_s10 + $0x90] sm:$0xff]  }
  0x28   : > { %2833 = vmatprep.mubr.msk.bf16.mxu0 %vm723_vm0, %v663_v11  ;;  %v545_v37 = vadd.f32 %v3036_v13, %v474_v12  ;;  %v546_v38 = vadd.f32 %v3036_v13, %v475_v18  ;;  %v482_v39 = vmul.f32 %v2668_v31, %v3024_v3  ;;  %v665_v40 = vpack.c.bf16 %v608_v22, %v607_v21  ;;  %v2766_v22 = vld [vmem:[%s3019_s10 + $0x88] sm:$0xff]  }
  0x29   : > { %v547_v41 = vadd.f32 %v3036_v13, %v476_v25  ;;  %v548_v42 = vadd.f32 %v3036_v13, %v477_v26  ;;  %v483_v43 = vmul.f32 %v2669_v34, %v3024_v3  ;;  %v549_v44 = vadd.f32 %v3036_v13, %v478_v29 }
  0x2a   : > { %v550_v45 = vadd.f32 %v3036_v13, %v479_v30  ;;  %v551_v46 = vadd.f32 %v3036_v13, %v480_v32  ;;  %v2672_v47 = vunpack.c.l.bf16 %v2761_v35  ;;  %v552_v49 = vadd.f32 %v3036_v13, %v481_v33  ;;  %v2768_v32 = vld [vmem:[%s3019_s10 + $0x98] sm:$0xff]  }
  0x2b   : > { %v553_v50 = vadd.f32 %v3036_v13, %v482_v39  ;;  %v554_v51 = vadd.f32 %v3036_v13, %v483_v43  ;;  %v609_v52 = vmax.f32 %v545_v37, 0.0  ;;  %v610_v53 = vmax.f32 %v546_v38, 0.0 }
  0x2c   : > { %v2673_v54 = vunpack.c.h.bf16 %v2761_v35  ;;  %v484_v55 = vmul.f32 %v2672_v47, %v3024_v3  ;;  %v611_v57 = vmax.f32 %v547_v41, 0.0  ;;  %v612_v58 = vmax.f32 %v548_v42, 0.0 }
  0x2d   : > { %v2676_v59 = vunpack.c.l.bf16 %v2762_v48  ;;  %v2677_v60 = vunpack.c.h.bf16 %v2762_v48  ;;  %v613_v61 = vmax.f32 %v549_v44, 0.0  ;;  %v614_v62 = vmax.f32 %v550_v45, 0.0  ;;  %v2769_v45 = vld [vmem:[%s3019_s10 + $0xa0] sm:$0xff]  }
  0x2e   : > { %v615_v63 = vmax.f32 %v551_v46, 0.0  ;;  %v485_v0 = vmul.f32 %v2673_v54, %v3024_v3  ;;  %v616_v2 = vmax.f32 %v552_v49, 0.0  ;;  %v617_v4 = vmax.f32 %v553_v50, 0.0 }
  0x2f   : > { %2834 = vmatmul.mubr.msk.bf16.gmra.mrb[8].mxu0 %vm723_vm0, %v664_v36  ;;  %v618_v5 = vmax.f32 %v554_v51, 0.0  ;;  %v2680_v6 = vunpack.c.l.bf16 %v2763_v56  ;;  %v3111_v8 = vadd.f32 %v3036_v13, %v484_v55  ;;  %v486_v9 = vmul.f32 %v2676_v59, %v3024_v3 }
  0x30   : > { %2837 = vmatprep.mubr.msk.bf16.mxu0 %vm723_vm0, %v665_v40  ;;  %v2681_v10 = vunpack.c.h.bf16 %v2763_v56  ;;  %v666_v11 = vpack.c.bf16 %v610_v53, %v609_v52  ;;  %v487_v12 = vmul.f32 %v2677_v60, %v3024_v3  ;;  %v2684_v14 = vunpack.c.l.bf16 %v3107_v1 }
  0x31   : > { %v667_v15 = vpack.c.bf16 %v612_v58, %v611_v57  ;;  %v3117_v16 = vadd.f32 %v3036_v13, %v485_v0  ;;  %v2688_v17 = vunpack.c.l.bf16 %v2765_v7  ;;  %v668_v18 = vpack.c.bf16 %v614_v62, %v613_v61  ;;  %v2770_v58 = vld [vmem:[%s3019_s10 + $0xa8] sm:$0xff]  }
  0x32   : > { %v669_v19 = vpack.c.bf16 %v616_v2, %v615_v63  ;;  %v3119_v20 = vpack.c.bf16 %v618_v5, %v617_v4  ;;  %v488_v21 = vmul.f32 %v2680_v6, %v3024_v3  ;;  %v619_v23 = vmax.f32 %v3111_v8, 0.0  ;;  %v2771_v4 = vld [vmem:[%s3019_s10 + $0xb0] sm:$0xff]  }
  0x33   : > { %v3125_v24 = vadd.f32 %v3036_v13, %v486_v9  ;;  %v489_v25 = vmul.f32 %v2681_v10, %v3024_v3  ;;  %v2689_v26 = vunpack.c.h.bf16 %v2765_v7  ;;  %v3131_v28 = vadd.f32 %v3036_v13, %v487_v12 }
  0x34   : > { %v2685_v29 = vunpack.c.h.bf16 %v3107_v1  ;;  %v3135_v30 = vmul.f32 %v2684_v14, %v3024_v3  ;;  %v492_v31 = vmul.f32 %v2688_v17, %v3024_v3  ;;  %v620_v33 = vmax.f32 %v3117_v16, 0.0 }
  0x35   : > { %v493_v34 = vmul.f32 %v2689_v26, %v3024_v3  ;;  %v2692_v35 = vunpack.c.l.bf16 %v2766_v22  ;;  %v2693_v36 = vunpack.c.h.bf16 %v2766_v22  ;;  %v3143_v37 = vadd.f32 %v3036_v13, %v488_v21 }
  0x36   : > { %v563_v38 = vadd.f32 %v3036_v13, %v492_v31  ;;  %v2696_v39 = vunpack.c.l.bf16 %v2767_v27  ;;  %v2697_v40 = vunpack.c.h.bf16 %v2767_v27  ;;  %v2700_v44 = vunpack.c.l.bf16 %v2768_v32  ;;  %v2773_v27 = vld [vmem:[%s3019_s10 + $0xc0] sm:$0xff]  }
  0x37   : > { %2838 = vmatmul.mubr.msk.bf16.gmra.mrb[12].mxu0 %vm723_vm0, %v666_v11  ;;  %v564_v41 = vadd.f32 %v3036_v13, %v493_v34  ;;  %v494_v42 = vmul.f32 %v2692_v35, %v3024_v3  ;;  %v495_v43 = vmul.f32 %v2693_v36, %v3024_v3  ;;  %v3151_v46 = vadd.f32 %v3036_v13, %v489_v25 }
  0x38   : > { %2841 = vmatprep.mubr.msk.bf16.mxu0 %vm723_vm0, %v667_v15  ;;  %v627_v47 = vmax.f32 %v563_v38, 0.0  ;;  %v496_v48 = vmul.f32 %v2696_v39, %v3024_v3  ;;  %v497_v49 = vmul.f32 %v2697_v40, %v3024_v3  ;;  %v2701_v53 = vunpack.c.h.bf16 %v2768_v32  ;;  %v2772_v15 = vld [vmem:[%s3019_s10 + $0xb8] sm:$0xff]  }
  0x39   : > { %v628_v50 = vmax.f32 %v564_v41, 0.0  ;;  %v565_v51 = vadd.f32 %v3036_v13, %v494_v42  ;;  %v566_v52 = vadd.f32 %v3036_v13, %v495_v43  ;;  %v498_v56 = vmul.f32 %v2700_v44, %v3024_v3 }
  0x3a   : > { %v567_v54 = vadd.f32 %v3036_v13, %v496_v48  ;;  %v568_v55 = vadd.f32 %v3036_v13, %v497_v49  ;;  %v2704_v57 = vunpack.c.l.bf16 %v2769_v45  ;;  %v499_v62 = vmul.f32 %v2701_v53, %v3024_v3 }
  0x3b   : > { %v675_v59 = vpack.c.bf16 %v628_v50, %v627_v47  ;;  %v629_v60 = vmax.f32 %v565_v51, 0.0  ;;  %v630_v61 = vmax.f32 %v566_v52, 0.0  ;;  %v569_v1 = vadd.f32 %v3036_v13, %v498_v56  ;;  %v2775_v56 = vld [vmem:[%s3019_s10 + $0xd0] sm:$0xff]  }
  0x3c   : > { %v631_v63 = vmax.f32 %v567_v54, 0.0  ;;  %v632_v0 = vmax.f32 %v568_v55, 0.0  ;;  %v2705_v2 = vunpack.c.h.bf16 %v2769_v45  ;;  %v570_v6 = vadd.f32 %v3036_v13, %v499_v62  ;;  %v2774_v54 = vld [vmem:[%s3019_s10 + $0xc8] sm:$0xff]  }
  0x3d   : > { %2857 = vmatprep.mubr.msk.bf16.mxu1 %vm723_vm0, %v675_v59  ;;  %v676_v5 = vpack.c.bf16 %v630_v61, %v629_v60  ;;  %v500_v7 = vmul.f32 %v2704_v57, %v3024_v3  ;;  %v2708_v9 = vunpack.c.l.bf16 %v2770_v58  ;;  %v633_v11 = vmax.f32 %v569_v1, 0.0 }
  0x3e   : > { %v677_v10 = vpack.c.bf16 %v632_v0, %v631_v63  ;;  %v501_v12 = vmul.f32 %v2705_v2, %v3024_v3  ;;  %v2709_v14 = vunpack.c.h.bf16 %v2770_v58  ;;  %v634_v16 = vmax.f32 %v570_v6, 0.0 }
  0x3f   : > { %2842 = vmatmul.mubr.msk.bf16.gmra.mrb[16].mxu0 %vm723_vm0, %v668_v18  ;;  %2858 = vmatmul.mubr.msk.bf16.vlgmr.msra.gmra.mrb[0].mxu1 %vm723_vm0, %v676_v5  ;;  %v571_v17 = vadd.f32 %v3036_v13, %v500_v7  ;;  %v502_v18 = vmul.f32 %v2708_v9, %v3024_v3  ;;  %v491_v21 = vmul.f32 %v2685_v29, %v3024_v3  ;;  %v2713_v26 = vunpack.c.h.bf16 %v2771_v4 }
  0x40   : > { %2845 = vmatprep.mubr.msk.bf16.mxu0 %vm723_vm0, %v669_v19  ;;  %v2712_v19 = vunpack.c.l.bf16 %v2771_v4  ;;  %2861 = vmatprep.mubr.msk.bf16.mxu1 %vm723_vm0, %v677_v10  ;;  %v572_v22 = vadd.f32 %v3036_v13, %v501_v12  ;;  %v503_v25 = vmul.f32 %v2709_v14, %v3024_v3  ;;  %v671_v31 = vpack.c.bf16 %v620_v33, %v619_v23  ;;  %v2776_v12 = vld [vmem:[%s3019_s10 + $0xd8] sm:$0xff]  }
  0x41   : > { %v635_v32 = vmax.f32 %v571_v17, 0.0  ;;  %v2716_v35 = vunpack.c.l.bf16 %v2772_v15  ;;  %v573_v38 = vadd.f32 %v3036_v13, %v502_v18  ;;  %v505_v39 = vmul.f32 %v2713_v26, %v3024_v3  ;;  %v2777_v18 = vld [vmem:[%s3019_s10 + $0xe0] sm:$0xff]  }
  0x42   : > { %v504_v34 = vmul.f32 %v2712_v19, %v3024_v3  ;;  %v636_v36 = vmax.f32 %v572_v22, 0.0  ;;  %v574_v29 = vadd.f32 %v3036_v13, %v503_v25  ;;  %v621_v40 = vmax.f32 %v3125_v24, 0.0 }
  0x43   : > { %v678_v41 = vpack.c.bf16 %v634_v16, %v633_v11  ;;  %v2717_v42 = vunpack.c.h.bf16 %v2772_v15  ;;  %v2720_v43 = vunpack.c.l.bf16 %v2773_v27  ;;  %v622_v8 = vmax.f32 %v3131_v28, 0.0 }
  0x44   : > { %v679_v23 = vpack.c.bf16 %v636_v36, %v635_v32  ;;  %v575_v33 = vadd.f32 %v3036_v13, %v504_v34  ;;  %v576_v44 = vadd.f32 %v3036_v13, %v505_v39  ;;  %v623_v45 = vmax.f32 %v3143_v37, 0.0 }
  0x45   : > { %v624_v24 = vmax.f32 %v3151_v46, 0.0  ;;  %v561_v47 = vadd.f32 %v3036_v13, %v3135_v30  ;;  %v2721_v48 = vunpack.c.h.bf16 %v2773_v27  ;;  %v637_v28 = vmax.f32 %v573_v38, 0.0 }
  0x46   : > { %v638_v49 = vmax.f32 %v574_v29, 0.0  ;;  %v506_v50 = vmul.f32 %v2716_v35, %v3024_v3  ;;  %v507_v51 = vmul.f32 %v2717_v42, %v3024_v3  ;;  %v508_v37 = vmul.f32 %v2720_v43, %v3024_v3 }
  0x47   : > { %2846 = vmatmul.mubr.msk.bf16.gmra.mrb[20].mxu0 %vm723_vm0, %v3119_v20  ;;  %v562_v20 = vadd.f32 %v3036_v13, %v491_v21  ;;  %2862 = vmatmul.mubr.msk.bf16.gmra.mrb[4].mxu1 %vm723_vm0, %v678_v41  ;;  %v672_v52 = vpack.c.bf16 %v622_v8, %v621_v40  ;;  %v639_v46 = vmax.f32 %v575_v33, 0.0  ;;  %v640_v53 = vmax.f32 %v576_v44, 0.0  ;;  %v2778_v8 = vld [vmem:[%s3019_s10 + $0xe8] sm:$0xff]  }
  0x48   : > { %2849 = vmatprep.mubr.msk.bf16.mxu0 %vm723_vm0, %v671_v31  ;;  %2865 = vmatprep.mubr.msk.bf16.mxu1 %vm723_vm0, %v679_v23  ;;  %v509_v30 = vmul.f32 %v2721_v48, %v3024_v3  ;;  %v673_v55 = vpack.c.bf16 %v624_v24, %v623_v45  ;;  %v625_v57 = vmax.f32 %v561_v47, 0.0  ;;  %v680_v59 = vpack.c.bf16 %v638_v49, %v637_v28  ;;  %v2779_v23 = vld [vmem:[%s3019_s10 + $0xf0] sm:$0xff]  }
  0x49   : > { %v626_v58 = vmax.f32 %v562_v20, 0.0  ;;  %v577_v60 = vadd.f32 %v3036_v13, %v506_v50  ;;  %v578_v61 = vadd.f32 %v3036_v13, %v507_v51  ;;  %v579_v62 = vadd.f32 %v3036_v13, %v508_v37 }
  0x4a   : > { %v2724_v63 = vunpack.c.l.bf16 %v2774_v54  ;;  %v2725_v0 = vunpack.c.h.bf16 %v2774_v54  ;;  %v681_v1 = vpack.c.bf16 %v640_v53, %v639_v46  ;;  %v580_v2 = vadd.f32 %v3036_v13, %v509_v30 }
  0x4b   : > { %v2728_v4 = vunpack.c.l.bf16 %v2775_v56  ;;  %v2729_v5 = vunpack.c.h.bf16 %v2775_v56  ;;  %v674_v6 = vpack.c.bf16 %v626_v58, %v625_v57  ;;  %v641_v7 = vmax.f32 %v577_v60, 0.0  ;;  %v2780_v56 = vld [vmem:[%s3019_s10 + $0xf8] sm:$0xff]  }
  0x4c   : > { %v642_v9 = vmax.f32 %v578_v61, 0.0  ;;  %v510_v10 = vmul.f32 %v2724_v63, %v3024_v3  ;;  %v511_v11 = vmul.f32 %v2725_v0, %v3024_v3  ;;  %v643_v14 = vmax.f32 %v579_v62, 0.0 }
  0x4d   : > { %v644_v15 = vmax.f32 %v580_v2, 0.0  ;;  %v512_v16 = vmul.f32 %v2728_v4, %v3024_v3  ;;  %v513_v17 = vmul.f32 %v2729_v5, %v3024_v3  ;;  %v2732_v19 = vunpack.c.l.bf16 %v2776_v12 }
  0x4e   : > { %v2733_v21 = vunpack.c.h.bf16 %v2776_v12  ;;  %v682_v22 = vpack.c.bf16 %v642_v9, %v641_v7  ;;  %v581_v25 = vadd.f32 %v3036_v13, %v510_v10  ;;  %v582_v26 = vadd.f32 %v3036_v13, %v511_v11 }
  0x4f   : > { %2850 = vmatmul.mubr.msk.bf16.gmra.mrb[24].mxu0 %vm723_vm0, %v672_v52  ;;  %2866 = vmatmul.mubr.msk.bf16.gmra.mrb[8].mxu1 %vm723_vm0, %v680_v59  ;;  %v2736_v27 = vunpack.c.l.bf16 %v2777_v18  ;;  %v683_v31 = vpack.c.bf16 %v644_v15, %v643_v14  ;;  %v583_v32 = vadd.f32 %v3036_v13, %v512_v16  ;;  %v584_v34 = vadd.f32 %v3036_v13, %v513_v17 }
  0x50   : > { %2853 = vmatprep.mubr.msk.bf16.mxu0 %vm723_vm0, %v673_v55  ;;  %2869 = vmatprep.mubr.msk.bf16.mxu1 %vm723_vm0, %v681_v1  ;;  %v2737_v35 = vunpack.c.h.bf16 %v2777_v18  ;;  %v514_v36 = vmul.f32 %v2732_v19, %v3024_v3  ;;  %v515_v38 = vmul.f32 %v2733_v21, %v3024_v3  ;;  %v645_v29 = vmax.f32 %v581_v25, 0.0 }
  0x51   : > { %v646_v39 = vmax.f32 %v582_v26, 0.0  ;;  %v516_v40 = vmul.f32 %v2736_v27, %v3024_v3  ;;  %v647_v41 = vmax.f32 %v583_v32, 0.0  ;;  %v648_v42 = vmax.f32 %v584_v34, 0.0 }
  0x52   : > { %v517_v43 = vmul.f32 %v2737_v35, %v3024_v3  ;;  %v585_v33 = vadd.f32 %v3036_v13, %v514_v36  ;;  %v586_v44 = vadd.f32 %v3036_v13, %v515_v38  ;;  %v2740_v47 = vunpack.c.l.bf16 %v2778_v8 }
  0x53   : > { %v684_v45 = vpack.c.bf16 %v646_v39, %v645_v29  ;;  %v587_v24 = vadd.f32 %v3036_v13, %v516_v40  ;;  %v2741_v48 = vunpack.c.h.bf16 %v2778_v8  ;;  %v685_v20 = vpack.c.bf16 %v648_v42, %v647_v41 }
  0x54   : > { %v588_v28 = vadd.f32 %v3036_v13, %v517_v43  ;;  %v2744_v49 = vunpack.c.l.bf16 %v2779_v23  ;;  %v2745_v50 = vunpack.c.h.bf16 %v2779_v23  ;;  %v649_v51 = vmax.f32 %v585_v33, 0.0 }
  0x55   : > { %v650_v37 = vmax.f32 %v586_v44, 0.0  ;;  %v518_v52 = vmul.f32 %v2740_v47, %v3024_v3  ;;  %v519_v46 = vmul.f32 %v2741_v48, %v3024_v3  ;;  %v651_v53 = vmax.f32 %v587_v24, 0.0 }
  0x56   : > { %v652_v30 = vmax.f32 %v588_v28, 0.0  ;;  %v520_v54 = vmul.f32 %v2744_v49, %v3024_v3  ;;  %v521_v55 = vmul.f32 %v2745_v50, %v3024_v3  ;;  %v2748_v60 = vunpack.c.l.bf16 %v2780_v56 }
  0x57   : > { %2854 = vmatmul.mubr.msk.bf16.gmra.mrb[28].mxu0 %vm723_vm0, %v674_v6  ;;  %2870 = vmatmul.mubr.msk.bf16.gmra.mrb[12].mxu1 %vm723_vm0, %v682_v22  ;;  %v686_v57 = vpack.c.bf16 %v650_v37, %v649_v51  ;;  %v589_v58 = vadd.f32 %v3036_v13, %v518_v52  ;;  %v590_v59 = vadd.f32 %v3036_v13, %v519_v46  ;;  %v2749_v61 = vunpack.c.h.bf16 %v2780_v56 }
  0x58   : > { %2873 = vmatprep.mubr.msk.bf16.mxu1 %vm723_vm0, %v683_v31  ;;  %v687_v62 = vpack.c.bf16 %v652_v30, %v651_v53  ;;  %v591_v63 = vadd.f32 %v3036_v13, %v520_v54  ;;  %v592_v0 = vadd.f32 %v3036_v13, %v521_v55  ;;  %v522_v4 = vmul.f32 %v2748_v60, %v3024_v3 }
  0x59   : > { %v653_v1 = vmax.f32 %v589_v58, 0.0  ;;  %v654_v2 = vmax.f32 %v590_v59, 0.0  ;;  %v523_v5 = vmul.f32 %v2749_v61, %v3024_v3 }
  0x5a   : > { %v655_v6 = vmax.f32 %v591_v63, 0.0  ;;  %v656_v7 = vmax.f32 %v592_v0, 0.0  ;;  %v593_v10 = vadd.f32 %v3036_v13, %v522_v4 }
  0x5b   : > { %v688_v9 = vpack.c.bf16 %v654_v2, %v653_v1  ;;  %v594_v11 = vadd.f32 %v3036_v13, %v523_v5 }
  0x5c   : > { %v689_v12 = vpack.c.bf16 %v656_v7, %v655_v6  ;;  %v657_v14 = vmax.f32 %v593_v10, 0.0 }
  0x5d   : > { %v658_v15 = vmax.f32 %v594_v11, 0.0 }
  0x5f   : > { %2874 = vmatmul.mubr.msk.bf16.gmra.mrb[16].mxu1 %vm723_vm0, %v684_v45  ;;  %v690_v16 = vpack.c.bf16 %v658_v15, %v657_v14 }
  0x60   : > { %2877 = vmatprep.mubr.msk.bf16.mxu1 %vm723_vm0, %v685_v20 }
  0x67   : > { %2878 = vmatmul.mubr.msk.bf16.gmra.mrb[20].mxu1 %vm723_vm0, %v686_v57 }
  0x68   : > { %2881 = vmatprep.mubr.msk.bf16.mxu1 %vm723_vm0, %v687_v62 }
  0x6f   : > { %2882 = vmatmul.mubr.msk.bf16.gmra.mrb[24].mxu1 %vm723_vm0, %v688_v9 }
  0x70   : > { %2885 = vmatprep.mubr.msk.bf16.mxu1 %vm723_vm0, %v689_v12 }
  0x77   : > { %2886 = vmatmul.mubr.msk.bf16.gmra.mrb[28].mxu1 %vm723_vm0, %v690_v16 }
  0xf2   : > { %v3263_v3 = vpop.f32.mrb[0].mxu0 }
  0xf3   : > { %v2560_v13 = vpack.c.bf16 %v3263_v3, %v3263_v3  ;;  %v3267_v17 = vpop.f32.mrb[1].mxu0  ;;  %v1825_v32 = vsel %vm1821_vm2, %v3263_v3, 0.0 }
  0xf4   : > { %v2558_v18 = vpack.c.bf16 %v3267_v17, %v3267_v17  ;;  %v3271_v19 = vpop.f32.mrb[2].mxu0  ;;  %v1822_v25 = vsel %vm1821_vm2, %v3267_v17, 0.0 }
  0xf5   : > { %1368 = vst.msk [vmem:[%s3261_s19 + $0x8] sm:$0xf] %vm1365_vm1, %v2560_v13  ;;  %v2561_v21 = vpack.c.bf16 %v3271_v19, %v3271_v19  ;;  %v3277_v22 = vpop.f32.mrb[3].mxu0  ;;  %v1827_v35 = vsel %vm1821_vm2, %v3271_v19, 0.0 }
  0xf6   : > { %1366 = vst.msk [vmem:[%s3261_s19] sm:$0xf] %vm1365_vm1, %v2558_v18  ;;  %v2559_v26 = vpack.c.bf16 %v3277_v22, %v3277_v22  ;;  %v1823_v27 = vsel %vm1821_vm2, %v3277_v22, 0.0 }
  0xf7   : > { %1369 = vst.msk [vmem:[%s3261_s19 + $0xc] sm:$0xf] %vm1365_vm1, %v2561_v21  ;;  %v1824_v31 = vadd.f32 %v1823_v27, %v1822_v25 }
  0xf8   : > { %1367 = vst.msk [vmem:[%s3261_s19 + $0x4] sm:$0xf] %vm1365_vm1, %v2559_v26 }
  0xf9   : > { %v1826_v34 = vadd.f32 %v1825_v32, %v1824_v31 }
  0xfa   : > { %v3295_v36 = vpop.f32.mrb[4].mxu0 }
  0xfb   : > { %v2564_v38 = vpack.c.bf16 %v3295_v36, %v3295_v36  ;;  %v3299_v29 = vpop.f32.mrb[5].mxu0  ;;  %v1828_v39 = vadd.f32 %v1827_v35, %v1826_v34  ;;  %v1833_v24 = vsel %vm1821_vm2, %v3295_v36, 0.0 }
  0xfc   : > { %v2562_v40 = vpack.c.bf16 %v3299_v29, %v3299_v29  ;;  %v1829_v41 = vsel %vm1821_vm2, %v3299_v29, 0.0  ;;  %v3305_v42 = vpop.f32.mrb[6].mxu0 }
  0xfd   : > { %1372 = vst.msk [vmem:[%s3261_s19 + $0x18] sm:$0xf] %vm1365_vm1, %v2564_v38  ;;  %v1830_v43 = vadd.f32 %v1829_v41, %v1828_v39  ;;  %v2565_v8 = vpack.c.bf16 %v3305_v42, %v3305_v42  ;;  %v3311_v23 = vpop.f32.mrb[7].mxu0  ;;  %v1835_v48 = vsel %vm1821_vm2, %v3305_v42, 0.0 }
  0xfe   : > { %1370 = vst.msk [vmem:[%s3261_s19 + $0x10] sm:$0xf] %vm1365_vm1, %v2562_v40  ;;  %v2563_v33 = vpack.c.bf16 %v3311_v23, %v3311_v23  ;;  %v1831_v44 = vsel %vm1821_vm2, %v3311_v23, 0.0 }
  0xff   : > { %1373 = vst.msk [vmem:[%s3261_s19 + $0x1c] sm:$0xf] %vm1365_vm1, %v2565_v8  ;;  %v1832_v45 = vadd.f32 %v1831_v44, %v1830_v43 }
 0x100   : > { %1371 = vst.msk [vmem:[%s3261_s19 + $0x14] sm:$0xf] %vm1365_vm1, %v2563_v33 }
 0x101   : > { %v1834_v47 = vadd.f32 %v1833_v24, %v1832_v45 }
 0x102   : > { %v3327_v20 = vpop.f32.mrb[8].mxu0 }
 0x103   : > { %v2568_v28 = vpack.c.bf16 %v3327_v20, %v3327_v20  ;;  %v3331_v49 = vpop.f32.mrb[9].mxu0  ;;  %v1836_v50 = vadd.f32 %v1835_v48, %v1834_v47  ;;  %v1841_v57 = vsel %vm1821_vm2, %v3327_v20, 0.0 }
 0x104   : > { %v2566_v51 = vpack.c.bf16 %v3331_v49, %v3331_v49  ;;  %v1837_v37 = vsel %vm1821_vm2, %v3331_v49, 0.0  ;;  %v3337_v52 = vpop.f32.mrb[10].mxu0 }
 0x105   : > { %1376 = vst.msk [vmem:[%s3261_s19 + $0x28] sm:$0xf] %vm1365_vm1, %v2568_v28  ;;  %v1838_v46 = vadd.f32 %v1837_v37, %v1836_v50  ;;  %v2569_v53 = vpack.c.bf16 %v3337_v52, %v3337_v52  ;;  %v3343_v30 = vpop.f32.mrb[11].mxu0  ;;  %v1843_v59 = vsel %vm1821_vm2, %v3337_v52, 0.0 }
 0x106   : > { %1374 = vst.msk [vmem:[%s3261_s19 + $0x20] sm:$0xf] %vm1365_vm1, %v2566_v51  ;;  %v2567_v54 = vpack.c.bf16 %v3343_v30, %v3343_v30  ;;  %v1839_v55 = vsel %vm1821_vm2, %v3343_v30, 0.0 }
 0x107   : > { %1377 = vst.msk [vmem:[%s3261_s19 + $0x2c] sm:$0xf] %vm1365_vm1, %v2569_v53  ;;  %v1840_v56 = vadd.f32 %v1839_v55, %v1838_v46 }
 0x108   : > { %1375 = vst.msk [vmem:[%s3261_s19 + $0x24] sm:$0xf] %vm1365_vm1, %v2567_v54 }
 0x109   : > { %v1842_v58 = vadd.f32 %v1841_v57, %v1840_v56 }
 0x10a   : > { %v3359_v60 = vpop.f32.mrb[12].mxu0 }
 0x10b   : > { %v2572_v61 = vpack.c.bf16 %v3359_v60, %v3359_v60  ;;  %v3363_v62 = vpop.f32.mrb[13].mxu0  ;;  %v1844_v63 = vadd.f32 %v1843_v59, %v1842_v58  ;;  %v1849_v11 = vsel %vm1821_vm2, %v3359_v60, 0.0 }
 0x10c   : > { %v2570_v0 = vpack.c.bf16 %v3363_v62, %v3363_v62  ;;  %v1845_v1 = vsel %vm1821_vm2, %v3363_v62, 0.0  ;;  %v3369_v2 = vpop.f32.mrb[14].mxu0 }
 0x10d   : > { %1380 = vst.msk [vmem:[%s3261_s19 + $0x38] sm:$0xf] %vm1365_vm1, %v2572_v61  ;;  %v1846_v4 = vadd.f32 %v1845_v1, %v1844_v63  ;;  %v2573_v5 = vpack.c.bf16 %v3369_v2, %v3369_v2  ;;  %v3375_v6 = vpop.f32.mrb[15].mxu0  ;;  %v1851_v14 = vsel %vm1821_vm2, %v3369_v2, 0.0 }
 0x10e   : > { %1378 = vst.msk [vmem:[%s3261_s19 + $0x30] sm:$0xf] %vm1365_vm1, %v2570_v0  ;;  %v2571_v7 = vpack.c.bf16 %v3375_v6, %v3375_v6  ;;  %v1847_v9 = vsel %vm1821_vm2, %v3375_v6, 0.0 }
 0x10f   : > { %1381 = vst.msk [vmem:[%s3261_s19 + $0x3c] sm:$0xf] %vm1365_vm1, %v2573_v5  ;;  %v1848_v10 = vadd.f32 %v1847_v9, %v1846_v4 }
 0x110   : > { %1379 = vst.msk [vmem:[%s3261_s19 + $0x34] sm:$0xf] %vm1365_vm1, %v2571_v7 }
 0x111   : > { %v1850_v12 = vadd.f32 %v1849_v11, %v1848_v10 }
 0x112   : > { %v3391_v15 = vpop.f32.mrb[16].mxu0  ;;  %v3409_v34 = vpop.f32.mrb[0].mxu1 }
 0x113   : > { %v2576_v16 = vpack.c.bf16 %v3391_v15, %v3391_v15  ;;  %v3395_v13 = vpop.f32.mrb[17].mxu0  ;;  %v1852_v18 = vadd.f32 %v1851_v14, %v1850_v12  ;;  %v2592_v39 = vpack.c.bf16 %v3409_v34, %v3409_v34  ;;  %v3419_v40 = vpop.f32.mrb[1].mxu1  ;;  %v1857_v33 = vsel %vm1821_vm2, %v3391_v15, 0.0 }
 0x114   : > { %v2574_v21 = vpack.c.bf16 %v3395_v13, %v3395_v13  ;;  %v1853_v25 = vsel %vm1821_vm2, %v3395_v13, 0.0  ;;  %v3401_v26 = vpop.f32.mrb[18].mxu0  ;;  %v2590_v43 = vpack.c.bf16 %v3419_v40, %v3419_v40  ;;  %v3425_v8 = vpop.f32.mrb[2].mxu1 }
 0x115   : > { %1384 = vst.msk [vmem:[%s3261_s19 + $0x48] sm:$0xf] %vm1365_vm1, %v2576_v16  ;;  %v1854_v27 = vadd.f32 %v1853_v25, %v1852_v18  ;;  %v2577_v31 = vpack.c.bf16 %v3401_v26, %v3401_v26  ;;  %v3407_v32 = vpop.f32.mrb[19].mxu0  ;;  %1400 = vst.msk [vmem:[%s3261_s19 + $0x88] sm:$0xf] %vm1365_vm1, %v2592_v39  ;;  %v2593_v44 = vpack.c.bf16 %v3425_v8, %v3425_v8  ;;  %v3435_v45 = vpop.f32.mrb[3].mxu1 }
 0x116   : > { %1382 = vst.msk [vmem:[%s3261_s19 + $0x40] sm:$0xf] %vm1365_vm1, %v2574_v21  ;;  %v2575_v35 = vpack.c.bf16 %v3407_v32, %v3407_v32  ;;  %v1855_v38 = vsel %vm1821_vm2, %v3407_v32, 0.0  ;;  %1398 = vst.msk [vmem:[%s3261_s19 + $0x80] sm:$0xf] %vm1365_vm1, %v2590_v43  ;;  %v2591_v47 = vpack.c.bf16 %v3435_v45, %v3435_v45  ;;  %v1859_v48 = vsel %vm1821_vm2, %v3401_v26, 0.0 }
 0x117   : > { %1385 = vst.msk [vmem:[%s3261_s19 + $0x4c] sm:$0xf] %vm1365_vm1, %v2577_v31  ;;  %v1856_v41 = vadd.f32 %v1855_v38, %v1854_v27  ;;  %1401 = vst.msk [vmem:[%s3261_s19 + $0x8c] sm:$0xf] %vm1365_vm1, %v2593_v44 }
 0x118   : > { %1383 = vst.msk [vmem:[%s3261_s19 + $0x44] sm:$0xf] %vm1365_vm1, %v2575_v35  ;;  %1399 = vst.msk [vmem:[%s3261_s19 + $0x84] sm:$0xf] %vm1365_vm1, %v2591_v47 }
 0x119   : > { %v1858_v24 = vadd.f32 %v1857_v33, %v1856_v41 }
 0x11a   : > { %v3443_v28 = vpop.f32.mrb[20].mxu0  ;;  %v3465_v58 = vpop.f32.mrb[4].mxu1 }
 0x11b   : > { %v2580_v50 = vpack.c.bf16 %v3443_v28, %v3443_v28  ;;  %v3449_v51 = vpop.f32.mrb[21].mxu0  ;;  %v1860_v37 = vadd.f32 %v1859_v48, %v1858_v24  ;;  %4262 = vst [vmem:[#allocation2_spill] sm:$0xff] %v3465_v58  ;;  %v2596_v63 = vpack.c.bf16 %v3465_v58, %v3465_v58  ;;  %v3475_v0 = vpop.f32.mrb[5].mxu1  ;;  %v1865_v7 = vsel %vm1821_vm2, %v3443_v28, 0.0 }
 0x11c   : > { %v2578_v46 = vpack.c.bf16 %v3449_v51, %v3449_v51  ;;  %v1861_v53 = vsel %vm1821_vm2, %v3449_v51, 0.0  ;;  %v3457_v54 = vpop.f32.mrb[22].mxu0  ;;  %4263 = vst [vmem:[#allocation3_spill] sm:$0xff] %v3475_v0  ;;  %v2594_v4 = vpack.c.bf16 %v3475_v0, %v3475_v0  ;;  %v3481_v5 = vpop.f32.mrb[6].mxu1 }
 0x11d   : > { %1388 = vst.msk [vmem:[%s3261_s19 + $0x58] sm:$0xf] %vm1365_vm1, %v2580_v50  ;;  %v1862_v55 = vadd.f32 %v1861_v53, %v1860_v37  ;;  %v2581_v56 = vpack.c.bf16 %v3457_v54, %v3457_v54  ;;  %v3463_v57 = vpop.f32.mrb[23].mxu0  ;;  %4264 = vst [vmem:[#allocation4_spill] sm:$0xff] %v3481_v5  ;;  %v2597_v9 = vpack.c.bf16 %v3481_v5, %v3481_v5  ;;  %v3491_v10 = vpop.f32.mrb[7].mxu1  ;;  %v1867_v14 = vsel %vm1821_vm2, %v3457_v54, 0.0 }
 0x11e   : > { %1386 = vst.msk [vmem:[%s3261_s19 + $0x50] sm:$0xf] %vm1365_vm1, %v2578_v46  ;;  %v2579_v59 = vpack.c.bf16 %v3463_v57, %v3463_v57  ;;  %v1863_v61 = vsel %vm1821_vm2, %v3463_v57, 0.0  ;;  %1404 = vst.msk [vmem:[%s3261_s19 + $0x98] sm:$0xf] %vm1365_vm1, %v2596_v63  ;;  %v2595_v12 = vpack.c.bf16 %v3491_v10, %v3491_v10 }
 0x11f   : > { %1389 = vst.msk [vmem:[%s3261_s19 + $0x5c] sm:$0xf] %vm1365_vm1, %v2581_v56  ;;  %v1864_v1 = vadd.f32 %v1863_v61, %v1862_v55  ;;  %4265 = vst [vmem:[#allocation5_spill] sm:$0xff] %v3491_v10 }
 0x120   : > { %1387 = vst.msk [vmem:[%s3261_s19 + $0x54] sm:$0xf] %vm1365_vm1, %v2579_v59  ;;  %1402 = vst.msk [vmem:[%s3261_s19 + $0x90] sm:$0xf] %vm1365_vm1, %v2594_v4 }
 0x121   : > { %v1866_v11 = vadd.f32 %v1865_v7, %v1864_v1  ;;  %1405 = vst.msk [vmem:[%s3261_s19 + $0x9c] sm:$0xf] %vm1365_vm1, %v2597_v9  ;;  %1403 = vst.msk [vmem:[%s3261_s19 + $0x94] sm:$0xf] %vm1365_vm1, %v2595_v12 }
 0x122   : > { %v3499_v16 = vpop.f32.mrb[24].mxu0  ;;  %v3521_v43 = vpop.f32.mrb[8].mxu1 }
 0x123   : > { %v2584_v18 = vpack.c.bf16 %v3499_v16, %v3499_v16  ;;  %v3505_v21 = vpop.f32.mrb[25].mxu0  ;;  %v1868_v25 = vadd.f32 %v1867_v14, %v1866_v11  ;;  %4266 = vst [vmem:[#allocation6_spill] sm:$0xff] %v3521_v43  ;;  %v2600_v24 = vpack.c.bf16 %v3521_v43, %v3521_v43  ;;  %v3531_v47 = vpop.f32.mrb[9].mxu1  ;;  %v1873_v46 = vsel %vm1821_vm2, %v3499_v16, 0.0 }
 0x124   : > { %v2582_v27 = vpack.c.bf16 %v3505_v21, %v3505_v21  ;;  %v1869_v31 = vsel %vm1821_vm2, %v3505_v21, 0.0  ;;  %v3513_v35 = vpop.f32.mrb[26].mxu0  ;;  %4267 = vst [vmem:[#allocation7_spill] sm:$0xff] %v3531_v47  ;;  %v2598_v50 = vpack.c.bf16 %v3531_v47, %v3531_v47  ;;  %v3537_v37 = vpop.f32.mrb[10].mxu1 }
 0x125   : > { %1392 = vst.msk [vmem:[%s3261_s19 + $0x68] sm:$0xf] %vm1365_vm1, %v2584_v18  ;;  %v1870_v38 = vadd.f32 %v1869_v31, %v1868_v25  ;;  %v2585_v39 = vpack.c.bf16 %v3513_v35, %v3513_v35  ;;  %v3519_v41 = vpop.f32.mrb[27].mxu0  ;;  %4268 = vst [vmem:[#allocation8_spill] sm:$0xff] %v3537_v37  ;;  %v2601_v53 = vpack.c.bf16 %v3537_v37, %v3537_v37  ;;  %v3547_v55 = vpop.f32.mrb[11].mxu1  ;;  %v1875_v61 = vsel %vm1821_vm2, %v3513_v35, 0.0 }
 0x126   : > { %1390 = vst.msk [vmem:[%s3261_s19 + $0x60] sm:$0xf] %vm1365_vm1, %v2582_v27  ;;  %v2583_v33 = vpack.c.bf16 %v3519_v41, %v3519_v41  ;;  %v1871_v44 = vsel %vm1821_vm2, %v3519_v41, 0.0  ;;  %1408 = vst.msk [vmem:[%s3261_s19 + $0xa8] sm:$0xf] %vm1365_vm1, %v2600_v24  ;;  %v2599_v59 = vpack.c.bf16 %v3547_v55, %v3547_v55 }
 0x127   : > { %1393 = vst.msk [vmem:[%s3261_s19 + $0x6c] sm:$0xf] %vm1365_vm1, %v2585_v39  ;;  %v1872_v48 = vadd.f32 %v1871_v44, %v1870_v38  ;;  %4269 = vst [vmem:[#allocation9_spill] sm:$0xff] %v3547_v55 }
 0x128   : > { %1391 = vst.msk [vmem:[%s3261_s19 + $0x64] sm:$0xf] %vm1365_vm1, %v2583_v33  ;;  %1406 = vst.msk [vmem:[%s3261_s19 + $0xa0] sm:$0xf] %vm1365_vm1, %v2598_v50 }
 0x129   : > { %v1874_v56 = vadd.f32 %v1873_v46, %v1872_v48  ;;  %1409 = vst.msk [vmem:[%s3261_s19 + $0xac] sm:$0xf] %vm1365_vm1, %v2601_v53  ;;  %1407 = vst.msk [vmem:[%s3261_s19 + $0xa4] sm:$0xf] %vm1365_vm1, %v2599_v59 }
 0x12a   : > { %v3555_v63 = vpop.f32.mrb[28].mxu0  ;;  %v3577_v27 = vpop.f32.mrb[12].mxu1 }
 0x12b   : > { %v2588_v1 = vpack.c.bf16 %v3555_v63, %v3555_v63  ;;  %v3561_v4 = vpop.f32.mrb[29].mxu0  ;;  %v1876_v7 = vadd.f32 %v1875_v61, %v1874_v56  ;;  %4270 = vst [vmem:[#allocation10_spill] sm:$0xff] %v3577_v27  ;;  %v2604_v39 = vpack.c.bf16 %v3577_v27, %v3577_v27  ;;  %v3587_v33 = vpop.f32.mrb[13].mxu1  ;;  %v1881_v50 = vsel %vm1821_vm2, %v3555_v63, 0.0 }
 0x12c   : > { %v2586_v9 = vpack.c.bf16 %v3561_v4, %v3561_v4  ;;  %v1877_v11 = vsel %vm1821_vm2, %v3561_v4, 0.0  ;;  %v3569_v12 = vpop.f32.mrb[30].mxu0  ;;  %4271 = vst [vmem:[#allocation11_spill] sm:$0xff] %v3587_v33  ;;  %v2602_v24 = vpack.c.bf16 %v3587_v33, %v3587_v33  ;;  %v3593_v48 = vpop.f32.mrb[14].mxu1 }
 0x12d   : > { %1396 = vst.msk [vmem:[%s3261_s19 + $0x78] sm:$0xf] %vm1365_vm1, %v2588_v1  ;;  %v1878_v14 = vadd.f32 %v1877_v11, %v1876_v7  ;;  %v2589_v18 = vpack.c.bf16 %v3569_v12, %v3569_v12  ;;  %v3575_v25 = vpop.f32.mrb[31].mxu0  ;;  %4272 = vst [vmem:[#allocation12_spill] sm:$0xff] %v3593_v48  ;;  %v2605_v46 = vpack.c.bf16 %v3593_v48, %v3593_v48  ;;  %v3603_v53 = vpop.f32.mrb[15].mxu1  ;;  %v1883_v61 = vsel %vm1821_vm2, %v3569_v12, 0.0 }
 0x12e   : > { %1394 = vst.msk [vmem:[%s3261_s19 + $0x70] sm:$0xf] %vm1365_vm1, %v2586_v9  ;;  %v2587_v31 = vpack.c.bf16 %v3575_v25, %v3575_v25  ;;  %v1879_v38 = vsel %vm1821_vm2, %v3575_v25, 0.0  ;;  %1412 = vst.msk [vmem:[%s3261_s19 + $0xb8] sm:$0xf] %vm1365_vm1, %v2604_v39  ;;  %v2603_v59 = vpack.c.bf16 %v3603_v53, %v3603_v53  ;;  %v1885_v1 = vsel %vm1821_vm2, %v3419_v40, 0.0 }
 0x12f   : > { %1397 = vst.msk [vmem:[%s3261_s19 + $0x7c] sm:$0xf] %vm1365_vm1, %v2589_v18  ;;  %v1880_v44 = vadd.f32 %v1879_v38, %v1878_v14  ;;  %4273 = vst [vmem:[#allocation13_spill] sm:$0xff] %v3603_v53  ;;  %v1887_v14 = vsel %vm1821_vm2, %v3435_v45, 0.0 }
 0x130   : > { %1395 = vst.msk [vmem:[%s3261_s19 + $0x74] sm:$0xf] %vm1365_vm1, %v2587_v31  ;;  %1410 = vst.msk [vmem:[%s3261_s19 + $0xb0] sm:$0xf] %vm1365_vm1, %v2602_v24  ;;  %v1889_v24 = vsel %vm1821_vm2, %v3409_v34, 0.0 }
 0x131   : > { %v1882_v56 = vadd.f32 %v1881_v50, %v1880_v44  ;;  %1413 = vst.msk [vmem:[%s3261_s19 + $0xbc] sm:$0xf] %vm1365_vm1, %v2605_v46  ;;  %1411 = vst.msk [vmem:[%s3261_s19 + $0xb4] sm:$0xf] %vm1365_vm1, %v2603_v59 }
 0x132   : > { %v3617_v11 = vpop.f32.mrb[16].mxu1 }
 0x133   : > { %v1884_v7 = vadd.f32 %v1883_v61, %v1882_v56  ;;  %v2608_v18 = vpack.c.bf16 %v3617_v11, %v3617_v11  ;;  %v3623_v31 = vpop.f32.mrb[17].mxu1  ;;  %v1891_v61 = vsel %vm1821_vm2, %v3425_v8, 0.0 }
 0x134   : > { %4274 = vst [vmem:[#allocation14_spill] sm:$0xff] %v3623_v31  ;;  %v2606_v39 = vpack.c.bf16 %v3623_v31, %v3623_v31  ;;  %v3627_v44 = vpop.f32.mrb[18].mxu1 }
 0x135   : > { %v1886_v9 = vadd.f32 %v1885_v1, %v1884_v7  ;;  %1416 = vst.msk [vmem:[%s3261_s19 + $0xc8] sm:$0xf] %vm1365_vm1, %v2608_v18  ;;  %v2609_v50 = vpack.c.bf16 %v3627_v44, %v3627_v44  ;;  %v3635_v46 = vpop.f32.mrb[19].mxu1  ;;  %v1893_v1 = vsel %vm1821_vm2, %v3475_v0, 0.0  ;;  %v1895_v18 = vsel %vm1821_vm2, %v3491_v10, 0.0 }
 0x136   : > { %1414 = vst.msk [vmem:[%s3261_s19 + $0xc0] sm:$0xf] %vm1365_vm1, %v2606_v39  ;;  %v2607_v59 = vpack.c.bf16 %v3635_v46, %v3635_v46 }
 0x137   : > { %v1888_v38 = vadd.f32 %v1887_v14, %v1886_v9  ;;  %1417 = vst.msk [vmem:[%s3261_s19 + $0xcc] sm:$0xf] %vm1365_vm1, %v2609_v50 }
 0x138   : > { %1415 = vst.msk [vmem:[%s3261_s19 + $0xc4] sm:$0xf] %vm1365_vm1, %v2607_v59  ;;  %v1897_v59 = vsel %vm1821_vm2, %v3465_v58, 0.0  ;;  %v1901_v58 = vsel %vm1821_vm2, %v3531_v47, 0.0 }
 0x139   : > { %v1890_v56 = vadd.f32 %v1889_v24, %v1888_v38 }
 0x13a   : > { %v3649_v14 = vpop.f32.mrb[20].mxu1 }
 0x13b   : > { %v1892_v7 = vadd.f32 %v1891_v61, %v1890_v56  ;;  %v2612_v38 = vpack.c.bf16 %v3649_v14, %v3649_v14  ;;  %v3655_v39 = vpop.f32.mrb[21].mxu1 }
 0x13c   : > { %4275 = vst [vmem:[#allocation15_spill] sm:$0xff] %v3655_v39  ;;  %v2610_v50 = vpack.c.bf16 %v3655_v39, %v3655_v39  ;;  %v3659_v56 = vpop.f32.mrb[22].mxu1 }
 0x13d   : > { %v1894_v9 = vadd.f32 %v1893_v1, %v1892_v7  ;;  %1420 = vst.msk [vmem:[%s3261_s19 + $0xd8] sm:$0xf] %vm1365_vm1, %v2612_v38  ;;  %v2613_v61 = vpack.c.bf16 %v3659_v56, %v3659_v56  ;;  %v3667_v1 = vpop.f32.mrb[23].mxu1 }
 0x13e   : > { %1418 = vst.msk [vmem:[%s3261_s19 + $0xd0] sm:$0xf] %vm1365_vm1, %v2610_v50  ;;  %v1903_v50 = vsel %vm1821_vm2, %v3547_v55, 0.0 }
 0x13f   : > { %v1896_v24 = vadd.f32 %v1895_v18, %v1894_v9  ;;  %v2611_v9 = vpack.c.bf16 %v3667_v1, %v3667_v1  ;;  %v1899_v18 = vsel %vm1821_vm2, %v3481_v5, 0.0  ;;  %1421 = vst.msk [vmem:[%s3261_s19 + $0xdc] sm:$0xf] %vm1365_vm1, %v2613_v61 }
 0x141   : > { %v1898_v7 = vadd.f32 %v1897_v59, %v1896_v24  ;;  %1419 = vst.msk [vmem:[%s3261_s19 + $0xd4] sm:$0xf] %vm1365_vm1, %v2611_v9 }
 0x142   : > { %v3681_v24 = vpop.f32.mrb[24].mxu1 }
 0x143   : > { %v1900_v38 = vadd.f32 %v1899_v18, %v1898_v7  ;;  %v2616_v59 = vpack.c.bf16 %v3681_v24, %v3681_v24  ;;  %v3687_v5 = vpop.f32.mrb[25].mxu1 }
 0x144   : > { %v2614_v61 = vpack.c.bf16 %v3687_v5, %v3687_v5  ;;  %v3691_v7 = vpop.f32.mrb[26].mxu1 }
 0x145   : > { %v1902_v10 = vadd.f32 %v1901_v58, %v1900_v38  ;;  %4276 = vst [vmem:[#allocation16_spill] sm:$0xff] %v3691_v7  ;;  %v1905_v58 = vsel %vm1821_vm2, %v3521_v43, 0.0  ;;  %1424 = vst.msk [vmem:[%s3261_s19 + $0xe8] sm:$0xf] %vm1365_vm1, %v2616_v59  ;;  %v2617_v9 = vpack.c.bf16 %v3691_v7, %v3691_v7  ;;  %v3699_v18 = vpop.f32.mrb[27].mxu1  ;;  %v1909_v43 = vsel %vm1821_vm2, %v3587_v33, 0.0 }
 0x146   : > { %1422 = vst.msk [vmem:[%s3261_s19 + $0xe0] sm:$0xf] %vm1365_vm1, %v2614_v61  ;;  %v1911_v61 = vsel %vm1821_vm2, %v3603_v53, 0.0 }
 0x147   : > { %v1904_v47 = vadd.f32 %v1903_v50, %v1902_v10  ;;  %v2615_v10 = vpack.c.bf16 %v3699_v18, %v3699_v18  ;;  %v1907_v50 = vsel %vm1821_vm2, %v3537_v37, 0.0  ;;  %1425 = vst.msk [vmem:[%s3261_s19 + $0xec] sm:$0xf] %vm1365_vm1, %v2617_v9 }
 0x149   : > { %v1906_v38 = vadd.f32 %v1905_v58, %v1904_v47  ;;  %1423 = vst.msk [vmem:[%s3261_s19 + $0xe4] sm:$0xf] %vm1365_vm1, %v2615_v10 }
 0x14a   : > { %v3713_v47 = vpop.f32.mrb[28].mxu1 }
 0x14b   : > { %v1908_v59 = vadd.f32 %v1907_v50, %v1906_v38  ;;  %4277 = vst [vmem:[#allocation17_spill] sm:$0xff] %v3713_v47  ;;  %v2620_v58 = vpack.c.bf16 %v3713_v47, %v3713_v47  ;;  %v3719_v37 = vpop.f32.mrb[29].mxu1 }
 0x14c   : > { %v2618_v9 = vpack.c.bf16 %v3719_v37, %v3719_v37  ;;  %v2888_v38 = vpop.f32.mrb[30].mxu1 }
 0x14d   : > { %v1910_v55 = vadd.f32 %v1909_v43, %v1908_v59  ;;  %v1913_v43 = vsel %vm1821_vm2, %v3577_v27, 0.0  ;;  %1428 = vst.msk [vmem:[%s3261_s19 + $0xf8] sm:$0xf] %vm1365_vm1, %v2620_v58  ;;  %v2621_v10 = vpack.c.bf16 %v2888_v38, %v2888_v38  ;;  %v3727_v50 = vpop.f32.mrb[31].mxu1 }
 0x14e   : > { %1426 = vst.msk [vmem:[%s3261_s19 + $0xf0] sm:$0xf] %vm1365_vm1, %v2618_v9  ;;  %v2619_v53 = vpack.c.bf16 %v3727_v50, %v3727_v50  ;;  %v1921_v9 = vsel %vm1821_vm2, %v3617_v11, 0.0 }
 0x14f   : > { %v1912_v33 = vadd.f32 %v1911_v61, %v1910_v55  ;;  %v1915_v55 = vsel %vm1821_vm2, %v3593_v48, 0.0  ;;  %v1917_v61 = vsel %vm1821_vm2, %v3623_v31, 0.0  ;;  %1429 = vst.msk [vmem:[%s3261_s19 + $0xfc] sm:$0xf] %vm1365_vm1, %v2621_v10  ;;  %v1923_v48 = vsel %vm1821_vm2, %v3627_v44, 0.0 }
 0x150   : > { %1427 = vst.msk [vmem:[%s3261_s19 + $0xf4] sm:$0xf] %vm1365_vm1, %v2619_v53  ;;  %v1925_v31 = vsel %vm1821_vm2, %v3655_v39, 0.0  ;;  %v1927_v53 = vsel %vm1821_vm2, %v3667_v1, 0.0 }
 0x151   : > { %v1914_v59 = vadd.f32 %v1913_v43, %v1912_v33  ;;  %v1919_v33 = vsel %vm1821_vm2, %v3635_v46, 0.0 }
 0x153   : > { %v1916_v27 = vadd.f32 %v1915_v55, %v1914_v59  ;;  %v1929_v55 = vsel %vm1821_vm2, %v3649_v14, 0.0 }
 0x155   : > { %v1918_v58 = vadd.f32 %v1917_v61, %v1916_v27  ;;  %v1431_v27 = vlaneseq }
 0x157   : > { %v1920_v38 = vadd.f32 %v1919_v33, %v1918_v58  ;;  %v1931_v58 = vsel %vm1821_vm2, %v3659_v56, 0.0  ;;  %v1933_v33 = vsel %vm1821_vm2, %v3687_v5, 0.0 }
 0x159   : > { %v1922_v43 = vadd.f32 %v1921_v9, %v1920_v38  ;;  %v1432_v38 = vshrl.u32 %v1431_v27, 7  ;;  %v1941_v27 = vsel %vm1821_vm2, %v3719_v37, 0.0 }
 0x15b   : > { %v1924_v0 = vadd.f32 %v1923_v48, %v1922_v43  ;;  %v3759_v48 = vadd.s32 496, %v1432_v38  ;;  %v1937_v43 = vsel %vm1821_vm2, %v3681_v24, 0.0 }
 0x15d   : > { %v1926_v10 = vadd.f32 %v1925_v31, %v1924_v0  ;;  %v1935_v0 = vsel %vm1821_vm2, %v3699_v18, 0.0  ;;  %4278 = vst [vmem:[#allocation18_spill] sm:$0xff] %v3759_v48  ;;  %vm1623_vm3 = vcmp.lt.s32.totalorder %v3759_v48, 500  ;;  %v4292_v48 = vld [vmem:[#allocation13_spill] sm:$0xff] }
 0x15f   : > { %v1928_v59 = vadd.f32 %v1927_v53, %v1926_v10  ;;  %v1939_v53 = vsel %vm1821_vm2, %v3691_v7, 0.0 }
 0x161   : > { %v1930_v61 = vadd.f32 %v1929_v55, %v1928_v59  ;;  %v1819_v55 = vsel %vm1623_vm3, %v3713_v47, 0.0 }
 0x163   : > { %v1932_v9 = vadd.f32 %v1931_v58, %v1930_v61 }
 0x165   : > { %v1934_v39 = vadd.f32 %v1933_v33, %v1932_v9  ;;  %v1945_v33 = vsel %vm1821_vm2, %v1819_v55, 0.0 }
 0x167   : > { %v1936_v31 = vadd.f32 %v1935_v0, %v1934_v39  ;;  %v1943_v39 = vsel %vm1821_vm2, %v3727_v50, 0.0 }
 0x169   : > { %v1938_v10 = vadd.f32 %v1937_v43, %v1936_v31 }
 0x16b   : > { %v1940_v59 = vadd.f32 %v1939_v53, %v1938_v10 }
 0x16d   : > { %v1942_v61 = vadd.f32 %v1941_v27, %v1940_v59 }
 0x16f   : > { %v1944_v58 = vadd.f32 %v1943_v39, %v1942_v61  ;;  %v4280_v39 = vld [vmem:[#allocation3_spill] sm:$0xff] }
 0x171   : > { %v1946_v38 = vadd.f32 %v1945_v33, %v1944_v58  ;;  %v4281_v58 = vld [vmem:[#allocation5_spill] sm:$0xff]  ;;  %v4282_v33 = vld [vmem:[#allocation2_spill] sm:$0xff] }
 0x173   : > { %v1949_v9 = vrot.slane %v1946_v38, 4 }
 0x175   : > { %v1950_v0 = vadd.f32 %v1949_v9, %v1946_v38  ;;  %v4283_v38 = vld [vmem:[#allocation4_spill] sm:$0xff]  ;;  %v4284_v9 = vld [vmem:[#allocation7_spill] sm:$0xff] }
 0x177   : > { %v1951_v31 = vrot.slane %v1950_v0, 2 }
 0x179   : > { %v1952_v43 = vadd.f32 %v1951_v31, %v1950_v0  ;;  %v4286_v0 = vld [vmem:[#allocation9_spill] sm:$0xff] }
 0x17b   : > { %v1953_v7 = vrot.slane %v1952_v43, 1 }
 0x17d   : > { %v1954_v10 = vadd.f32 %v1953_v7, %v1952_v43  ;;  %v4288_v43 = vld [vmem:[#allocation6_spill] sm:$0xff] }
 0x17f   : > { %v3778_v53 = vmul.f32 0.002, %v1954_v10  ;;  %2284 = vst.msk [vmem:[%s317_s26] sm:$0x1] %vm2283_vm4, %v1954_v10 }
 0x181   : > { %4279 = vst [vmem:[#allocation19_spill] sm:$0xff] %v3778_v53  ;;  %v3783_v27 = vsub.f32 %v3267_v17, %v3778_v53  ;;  %v3787_v59 = vsub.f32 %v3277_v22, %v3778_v53  ;;  %v3791_v55 = vsub.f32 %v3263_v3, %v3778_v53  ;;  %v3795_v61 = vsub.f32 %v3271_v19, %v3778_v53 }
 0x182   : > { %v3799_v7 = vsub.f32 %v3299_v29, %v3778_v53  ;;  %v3803_v17 = vsub.f32 %v3311_v23, %v3778_v53  ;;  %v3807_v22 = vsub.f32 %v3295_v36, %v3778_v53  ;;  %v3811_v3 = vsub.f32 %v3305_v42, %v3778_v53 }
 0x183   : > { %v3815_v19 = vsub.f32 %v3331_v49, %v3778_v53  ;;  %v3819_v29 = vsub.f32 %v3343_v30, %v3778_v53  ;;  %v3823_v23 = vsub.f32 %v3327_v20, %v3778_v53  ;;  %v3827_v36 = vsub.f32 %v3337_v52, %v3778_v53 }
 0x184   : > { %v3831_v42 = vsub.f32 %v3363_v62, %v3778_v53  ;;  %v3835_v49 = vsub.f32 %v3375_v6, %v3778_v53  ;;  %v3839_v30 = vsub.f32 %v3359_v60, %v3778_v53  ;;  %v3843_v20 = vsub.f32 %v3369_v2, %v3778_v53 }
 0x185   : > { %v3847_v52 = vsub.f32 %v3395_v13, %v3778_v53  ;;  %v3851_v62 = vsub.f32 %v3407_v32, %v3778_v53  ;;  %v3855_v6 = vsub.f32 %v3391_v15, %v3778_v53  ;;  %v3859_v60 = vsub.f32 %v3401_v26, %v3778_v53 }
 0x186   : > { %v3863_v2 = vsub.f32 %v3449_v51, %v3778_v53  ;;  %v3867_v13 = vsub.f32 %v3463_v57, %v3778_v53  ;;  %v3871_v32 = vsub.f32 %v3443_v28, %v3778_v53  ;;  %v3875_v15 = vsub.f32 %v3457_v54, %v3778_v53 }
 0x187   : > { %v3879_v26 = vsub.f32 %v3505_v21, %v3778_v53  ;;  %v3883_v51 = vsub.f32 %v3519_v41, %v3778_v53  ;;  %v3887_v57 = vsub.f32 %v3499_v16, %v3778_v53  ;;  %v3891_v28 = vsub.f32 %v3513_v35, %v3778_v53 }
 0x188   : > { %v3895_v54 = vsub.f32 %v3561_v4, %v3778_v53  ;;  %v3899_v21 = vsub.f32 %v3575_v25, %v3778_v53  ;;  %v3903_v41 = vsub.f32 %v3555_v63, %v3778_v53  ;;  %v3907_v16 = vsub.f32 %v3569_v12, %v3778_v53 }
 0x189   : > { %v3911_v35 = vsub.f32 %v3419_v40, %v3778_v53  ;;  %v3915_v4 = vsub.f32 %v3435_v45, %v3778_v53  ;;  %v3919_v25 = vsub.f32 %v3409_v34, %v3778_v53  ;;  %v3923_v63 = vsub.f32 %v3425_v8, %v3778_v53 }
 0x18a   : > { %v3927_v12 = vsub.f32 %v4280_v39, %v3778_v53  ;;  %v3931_v40 = vsub.f32 %v4281_v58, %v3778_v53  ;;  %v3935_v45 = vsub.f32 %v4282_v33, %v3778_v53  ;;  %v3939_v34 = vsub.f32 %v4283_v38, %v3778_v53  ;;  %v4290_v39 = vld [vmem:[#allocation8_spill] sm:$0xff]  ;;  %v4291_v33 = vld [vmem:[#allocation11_spill] sm:$0xff] }
 0x18b   : > { %v3943_v8 = vsub.f32 %v4284_v9, %v3778_v53  ;;  %v3947_v31 = vsub.f32 %v4286_v0, %v3778_v53  ;;  %v3951_v10 = vsub.f32 %v4288_v43, %v3778_v53  ;;  %v3955_v58 = vsub.f32 %v4290_v39, %v3778_v53 }
 0x18c   : > { %v3959_v38 = vsub.f32 %v4291_v33, %v3778_v53  ;;  %v3963_v9 = vsub.f32 %v4292_v48, %v3778_v53  ;;  %v3979_v33 = vsub.f32 %v3635_v46, %v3778_v53  ;;  %v3983_v48 = vsub.f32 %v3617_v11, %v3778_v53 }
 0x18d   : > { %4285 = vst [vmem:[#allocation3_spill] sm:$0xff] %v3943_v8  ;;  %4287 = vst [vmem:[#allocation5_spill] sm:$0xff] %v3947_v31  ;;  %v4293_v8 = vld [vmem:[#allocation10_spill] sm:$0xff]  ;;  %v4295_v31 = vld [vmem:[#allocation12_spill] sm:$0xff]  ;;  %v3999_v46 = vsub.f32 %v3649_v14, %v3778_v53  ;;  %v4003_v11 = vsub.f32 %v3659_v56, %v3778_v53  ;;  %v4023_v56 = vsub.f32 %v3719_v37, %v3778_v53 }
 0x18e   : > { %4289 = vst [vmem:[#allocation2_spill] sm:$0xff] %v3951_v10  ;;  %v3967_v0 = vsub.f32 %v4293_v8, %v3778_v53  ;;  %v3971_v43 = vsub.f32 %v4295_v31, %v3778_v53  ;;  %v4296_v10 = vld [vmem:[#allocation14_spill] sm:$0xff]  ;;  %v3987_v8 = vsub.f32 %v3627_v44, %v3778_v53  ;;  %v4007_v44 = vsub.f32 %v3687_v5, %v3778_v53 }
 0x18f   : > { %v3975_v39 = vsub.f32 %v4296_v10, %v3778_v53  ;;  %v3995_v10 = vsub.f32 %v3667_v1, %v3778_v53  ;;  %v4015_v1 = vsub.f32 %v3681_v24, %v3778_v53  ;;  %4302 = vst [vmem:[#allocation8_spill] sm:$0xff] %v4023_v56  ;;  %v4027_v5 = vsub.f32 %v3727_v50, %v3778_v53 }
 0x190   : > { %4294 = vst [vmem:[#allocation4_spill] sm:$0xff] %v3967_v0  ;;  %v4297_v0 = vld [vmem:[#allocation15_spill] sm:$0xff]  ;;  %v2087_v24 = vmul.f32 %v3787_v59, %v3787_v59  ;;  %v2089_v37 = vmul.f32 %v3795_v61, %v3795_v61  ;;  %v2091_v59 = vmul.f32 %v3803_v17, %v3803_v17 }
 0x191   : > { %v3991_v31 = vsub.f32 %v4297_v0, %v3778_v53  ;;  %4298 = vst [vmem:[#allocation7_spill] sm:$0xff] %v3995_v10  ;;  %v4011_v0 = vsub.f32 %v3699_v18, %v3778_v53  ;;  %v4300_v10 = vld [vmem:[#allocation16_spill] sm:$0xff]  ;;  %4303 = vst [vmem:[#allocation11_spill] sm:$0xff] %v4027_v5  ;;  %v2090_v18 = vmul.f32 %v3799_v7, %v3799_v7 }
 0x192   : > { %v4019_v14 = vsub.f32 %v4300_v10, %v3778_v53  ;;  %v2088_v10 = vmul.f32 %v3791_v55, %v3791_v55  ;;  %v2151_v50 = vsel %vm1821_vm2, %v2087_v24, 0.0  ;;  %v2155_v47 = vsel %vm1821_vm2, %v2089_v37, 0.0 }
 0x193   : > { %4299 = vst [vmem:[#allocation9_spill] sm:$0xff] %v4011_v0  ;;  %v2086_v0 = vmul.f32 %v3783_v27, %v3783_v27  ;;  %v2157_v61 = vsel %vm1821_vm2, %v2090_v18, 0.0  ;;  %v2159_v7 = vsel %vm1821_vm2, %v2091_v59, 0.0  ;;  %v2096_v18 = vmul.f32 %v3823_v23, %v3823_v23 }
 0x194   : > { %4301 = vst [vmem:[#allocation6_spill] sm:$0xff] %v4019_v14  ;;  %v2153_v53 = vsel %vm1821_vm2, %v2088_v10, 0.0 }
 0x195   : > { %v2150_v14 = vsel %vm1821_vm2, %v2086_v0, 0.0  ;;  %v2092_v0 = vmul.f32 %v3807_v22, %v3807_v22 }
 0x196   : > { %v2152_v5 = vadd.f32 %v2151_v50, %v2150_v14  ;;  %v2093_v14 = vmul.f32 %v3811_v3, %v3811_v3 }
 0x197   : > { %v2161_v17 = vsel %vm1821_vm2, %v2092_v0, 0.0 }
 0x198   : > { %v2154_v27 = vadd.f32 %v2153_v53, %v2152_v5  ;;  %v2094_v53 = vmul.f32 %v3815_v19, %v3815_v19  ;;  %v2163_v22 = vsel %vm1821_vm2, %v2093_v14, 0.0 }
 0x19a   : > { %v2156_v55 = vadd.f32 %v2155_v47, %v2154_v27  ;;  %v2095_v47 = vmul.f32 %v3819_v29, %v3819_v29  ;;  %v2165_v3 = vsel %vm1821_vm2, %v2094_v53, 0.0  ;;  %v2098_v27 = vmul.f32 %v3831_v42, %v3831_v42 }
 0x19b   : > { %v2169_v29 = vsel %vm1821_vm2, %v2096_v18, 0.0  ;;  %v2102_v53 = vmul.f32 %v3847_v52, %v3847_v52  ;;  %v2105_v18 = vmul.f32 %v3859_v60, %v3859_v60 }
 0x19c   : > { %v2158_v56 = vadd.f32 %v2157_v61, %v2156_v55  ;;  %v2167_v19 = vsel %vm1821_vm2, %v2095_v47, 0.0  ;;  %v2099_v55 = vmul.f32 %v3835_v49, %v3835_v49  ;;  %v2100_v61 = vmul.f32 %v3839_v30, %v3839_v30 }
 0x19e   : > { %v2160_v24 = vadd.f32 %v2159_v7, %v2158_v56  ;;  %v2097_v56 = vmul.f32 %v3827_v36, %v3827_v36  ;;  %v2173_v36 = vsel %vm1821_vm2, %v2098_v27, 0.0  ;;  %v2101_v7 = vmul.f32 %v3843_v20, %v3843_v20 }
 0x19f   : > { %v2175_v42 = vsel %vm1821_vm2, %v2099_v55, 0.0  ;;  %v2177_v49 = vsel %vm1821_vm2, %v2100_v61, 0.0  ;;  %v2181_v20 = vsel %vm1821_vm2, %v2102_v53, 0.0  ;;  %v2108_v27 = vmul.f32 %v3871_v32, %v3871_v32 }
 0x1a0   : > { %v2162_v5 = vadd.f32 %v2161_v17, %v2160_v24  ;;  %v2171_v23 = vsel %vm1821_vm2, %v2097_v56, 0.0  ;;  %v2179_v30 = vsel %vm1821_vm2, %v2101_v7, 0.0  ;;  %v2111_v61 = vmul.f32 %v3883_v51, %v3883_v51 }
 0x1a1   : > { %v2114_v53 = vmul.f32 %v3895_v54, %v3895_v54 }
 0x1a2   : > { %v2164_v10 = vadd.f32 %v2163_v22, %v2162_v5  ;;  %v2103_v5 = vmul.f32 %v3851_v62, %v3851_v62  ;;  %v2104_v22 = vmul.f32 %v3855_v6, %v3855_v6  ;;  %v2187_v6 = vsel %vm1821_vm2, %v2105_v18, 0.0 }
 0x1a4   : > { %v2166_v37 = vadd.f32 %v2165_v3, %v2164_v10  ;;  %v2183_v52 = vsel %vm1821_vm2, %v2103_v5, 0.0  ;;  %v2185_v62 = vsel %vm1821_vm2, %v2104_v22, 0.0  ;;  %v2117_v22 = vmul.f32 %v3907_v16, %v3907_v16 }
 0x1a6   : > { %v2168_v50 = vadd.f32 %v2167_v19, %v2166_v37  ;;  %v2106_v37 = vmul.f32 %v3863_v2, %v3863_v2  ;;  %v2107_v19 = vmul.f32 %v3867_v13, %v3867_v13  ;;  %v2193_v13 = vsel %vm1821_vm2, %v2108_v27, 0.0 }
 0x1a7   : > { %v2123_v27 = vmul.f32 %v3931_v40, %v3931_v40 }
 0x1a8   : > { %v2170_v59 = vadd.f32 %v2169_v29, %v2168_v50  ;;  %v2189_v60 = vsel %vm1821_vm2, %v2106_v37, 0.0  ;;  %v2191_v2 = vsel %vm1821_vm2, %v2107_v19, 0.0  ;;  %v2120_v37 = vmul.f32 %v3919_v25, %v3919_v25 }
 0x1aa   : > { %v2172_v0 = vadd.f32 %v2171_v23, %v2170_v59  ;;  %v2109_v59 = vmul.f32 %v3875_v15, %v3875_v15  ;;  %v2110_v23 = vmul.f32 %v3879_v26, %v3879_v26  ;;  %v2199_v26 = vsel %vm1821_vm2, %v2111_v61, 0.0  ;;  %v4305_v61 = vld [vmem:[#allocation5_spill] sm:$0xff] }
 0x1ac   : > { %v2174_v14 = vadd.f32 %v2173_v36, %v2172_v0  ;;  %v2195_v32 = vsel %vm1821_vm2, %v2109_v59, 0.0  ;;  %v2197_v15 = vsel %vm1821_vm2, %v2110_v23, 0.0  ;;  %v4304_v23 = vld [vmem:[#allocation3_spill] sm:$0xff] }
 0x1ae   : > { %v2176_v24 = vadd.f32 %v2175_v42, %v2174_v14  ;;  %v2112_v14 = vmul.f32 %v3887_v57, %v3887_v57  ;;  %v2113_v42 = vmul.f32 %v3891_v28, %v3891_v28  ;;  %v2205_v28 = vsel %vm1821_vm2, %v2114_v53, 0.0 }
 0x1af   : > { %v2130_v53 = vmul.f32 %v3959_v38, %v3959_v38 }
 0x1b0   : > { %v2178_v17 = vadd.f32 %v2177_v49, %v2176_v24  ;;  %v2201_v51 = vsel %vm1821_vm2, %v2112_v14, 0.0  ;;  %v2203_v57 = vsel %vm1821_vm2, %v2113_v42, 0.0  ;;  %v4306_v14 = vld [vmem:[#allocation2_spill] sm:$0xff]  ;;  %v2129_v42 = vmul.f32 %v3955_v58, %v3955_v58 }
 0x1b1   : > { %v2237_v58 = vsel %vm1821_vm2, %v2130_v53, 0.0 }
 0x1b2   : > { %v2180_v47 = vadd.f32 %v2179_v30, %v2178_v17  ;;  %v2115_v17 = vmul.f32 %v3899_v21, %v3899_v21  ;;  %v2116_v30 = vmul.f32 %v3903_v41, %v3903_v41  ;;  %v2211_v41 = vsel %vm1821_vm2, %v2117_v22, 0.0 }
 0x1b3   : > { %v2133_v22 = vmul.f32 %v3971_v43, %v3971_v43 }
 0x1b4   : > { %v2182_v10 = vadd.f32 %v2181_v20, %v2180_v47  ;;  %v2207_v54 = vsel %vm1821_vm2, %v2115_v17, 0.0  ;;  %v2209_v21 = vsel %vm1821_vm2, %v2116_v30, 0.0  ;;  %v2131_v17 = vmul.f32 %v3963_v9, %v3963_v9  ;;  %v4307_v30 = vld [vmem:[#allocation4_spill] sm:$0xff] }
 0x1b6   : > { %v2184_v3 = vadd.f32 %v2183_v52, %v2182_v10  ;;  %v2118_v10 = vmul.f32 %v3911_v35, %v3911_v35  ;;  %v2119_v52 = vmul.f32 %v3915_v4, %v3915_v4  ;;  %v2217_v4 = vsel %vm1821_vm2, %v2120_v37, 0.0 }
 0x1b7   : > { %v2239_v38 = vsel %vm1821_vm2, %v2131_v17, 0.0  ;;  %v2137_v37 = vmul.f32 %v3987_v8, %v3987_v8 }
 0x1b8   : > { %v2186_v56 = vadd.f32 %v2185_v62, %v2184_v3  ;;  %v2213_v16 = vsel %vm1821_vm2, %v2118_v10, 0.0  ;;  %v2215_v35 = vsel %vm1821_vm2, %v2119_v52, 0.0 }
 0x1ba   : > { %v2188_v50 = vadd.f32 %v2187_v6, %v2186_v56  ;;  %v2121_v56 = vmul.f32 %v3923_v63, %v3923_v63  ;;  %v2122_v6 = vmul.f32 %v3927_v12, %v3927_v12  ;;  %v2223_v12 = vsel %vm1821_vm2, %v2123_v27, 0.0 }
 0x1bb   : > { %v2141_v27 = vmul.f32 %v4003_v11, %v4003_v11 }
 0x1bc   : > { %v2190_v29 = vadd.f32 %v2189_v60, %v2188_v50  ;;  %v2219_v25 = vsel %vm1821_vm2, %v2121_v56, 0.0  ;;  %v2221_v63 = vsel %vm1821_vm2, %v2122_v6, 0.0 }
 0x1be   : > { %v2192_v55 = vadd.f32 %v2191_v2, %v2190_v29  ;;  %v2124_v29 = vmul.f32 %v3935_v45, %v3935_v45  ;;  %v2125_v2 = vmul.f32 %v3939_v34, %v3939_v34 }
 0x1c0   : > { %v2194_v0 = vadd.f32 %v2193_v13, %v2192_v55  ;;  %v2126_v13 = vmul.f32 %v4304_v23, %v4304_v23  ;;  %v2225_v40 = vsel %vm1821_vm2, %v2124_v29, 0.0  ;;  %v2227_v45 = vsel %vm1821_vm2, %v2125_v2, 0.0 }
 0x1c2   : > { %v2196_v36 = vadd.f32 %v2195_v32, %v2194_v0  ;;  %v2127_v32 = vmul.f32 %v4305_v61, %v4305_v61  ;;  %v2229_v34 = vsel %vm1821_vm2, %v2126_v13, 0.0  ;;  %v4310_v13 = vld [vmem:[#allocation6_spill] sm:$0xff]  ;;  %v4311_v61 = vld [vmem:[#allocation8_spill] sm:$0xff] }
 0x1c4   : > { %v2198_v7 = vadd.f32 %v2197_v15, %v2196_v36  ;;  %v2128_v15 = vmul.f32 %v4306_v14, %v4306_v14  ;;  %v4313_v14 = vld [vmem:[#allocation19_spill] sm:$0xff] }
 0x1c6   : > { %v2200_v24 = vadd.f32 %v2199_v26, %v2198_v7  ;;  %v2231_v26 = vsel %vm1821_vm2, %v2127_v32, 0.0  ;;  %v2146_v32 = vmul.f32 %v4311_v61, %v4311_v61 }
 0x1c8   : > { %v2202_v49 = vadd.f32 %v2201_v51, %v2200_v24  ;;  %v2233_v51 = vsel %vm1821_vm2, %v2128_v15, 0.0 }
 0x1ca   : > { %v2204_v5 = vadd.f32 %v2203_v57, %v2202_v49  ;;  %v2235_v57 = vsel %vm1821_vm2, %v2129_v42, 0.0  ;;  %v4316_v42 = vld [vmem:[#allocation11_spill] sm:$0xff] }
 0x1cc   : > { %v2206_v47 = vadd.f32 %v2205_v28, %v2204_v5  ;;  %v2132_v28 = vmul.f32 %v4307_v30, %v4307_v30 }
 0x1ce   : > { %v2208_v20 = vadd.f32 %v2207_v54, %v2206_v47  ;;  %v2241_v9 = vsel %vm1821_vm2, %v2132_v28, 0.0 }
 0x1d0   : > { %v2210_v18 = vadd.f32 %v2209_v21, %v2208_v20  ;;  %v2134_v20 = vmul.f32 %v3975_v39, %v3975_v39  ;;  %v2135_v21 = vmul.f32 %v3979_v33, %v3979_v33 }
 0x1d2   : > { %v2212_v3 = vadd.f32 %v2211_v41, %v2210_v18  ;;  %v2243_v18 = vsel %vm1821_vm2, %v2133_v22, 0.0  ;;  %v2136_v41 = vmul.f32 %v3983_v48, %v3983_v48  ;;  %v2245_v43 = vsel %vm1821_vm2, %v2134_v20, 0.0 }
 0x1d3   : > { %v2247_v39 = vsel %vm1821_vm2, %v2135_v21, 0.0  ;;  %v2251_v48 = vsel %vm1821_vm2, %v2137_v37, 0.0 }
 0x1d4   : > { %v2214_v62 = vadd.f32 %v2213_v16, %v2212_v3  ;;  %v2249_v33 = vsel %vm1821_vm2, %v2136_v41, 0.0 }
 0x1d6   : > { %v2216_v19 = vadd.f32 %v2215_v35, %v2214_v62  ;;  %v2138_v62 = vmul.f32 %v3991_v31, %v3991_v31  ;;  %v4308_v35 = vld [vmem:[#allocation7_spill] sm:$0xff] }
 0x1d8   : > { %v2218_v50 = vadd.f32 %v2217_v4, %v2216_v19  ;;  %v2139_v19 = vmul.f32 %v4308_v35, %v4308_v35  ;;  %v2140_v4 = vmul.f32 %v3999_v46, %v3999_v46  ;;  %v2253_v8 = vsel %vm1821_vm2, %v2138_v62, 0.0 }
 0x1d9   : > { %v2259_v46 = vsel %vm1821_vm2, %v2141_v27, 0.0 }
 0x1da   : > { %v2220_v60 = vadd.f32 %v2219_v25, %v2218_v50  ;;  %v2255_v31 = vsel %vm1821_vm2, %v2139_v19, 0.0  ;;  %v2257_v29 = vsel %vm1821_vm2, %v2140_v4, 0.0 }
 0x1dc   : > { %v2222_v59 = vadd.f32 %v2221_v63, %v2220_v60  ;;  %v2142_v60 = vmul.f32 %v4007_v44, %v4007_v44 }
 0x1de   : > { %v2224_v55 = vadd.f32 %v2223_v12, %v2222_v59  ;;  %v4309_v59 = vld [vmem:[#allocation9_spill] sm:$0xff]  ;;  %v2261_v11 = vsel %vm1821_vm2, %v2142_v60, 0.0 }
 0x1df   : > { %v2143_v2 = vmul.f32 %v4309_v59, %v4309_v59 }
 0x1e0   : > { %v2226_v0 = vadd.f32 %v2225_v40, %v2224_v55  ;;  %v2144_v55 = vmul.f32 %v4015_v1, %v4015_v1  ;;  %v2145_v40 = vmul.f32 %v4310_v13, %v4310_v13 }
 0x1e1   : > { %v2263_v44 = vsel %vm1821_vm2, %v2143_v2, 0.0 }
 0x1e2   : > { %v2228_v36 = vadd.f32 %v2227_v45, %v2226_v0  ;;  %v2265_v45 = vsel %vm1821_vm2, %v2144_v55, 0.0 }
 0x1e4   : > { %v2230_v7 = vadd.f32 %v2229_v34, %v2228_v36  ;;  %v4312_v36 = vld [vmem:[#allocation17_spill] sm:$0xff] }
 0x1e5   : > { %v4314_v15 = vsub.f32 %v4312_v36, %v4313_v14 }
 0x1e6   : > { %v2232_v24 = vadd.f32 %v2231_v26, %v2230_v7  ;;  %v2147_v26 = vmul.f32 %v4316_v42, %v4316_v42 }
 0x1e7   : > { %v2084_v1 = vsel %vm1623_vm3, %v4314_v15, 0.0 }
 0x1e8   : > { %v2234_v49 = vadd.f32 %v2233_v51, %v2232_v24  ;;  %v2267_v24 = vsel %vm1821_vm2, %v2145_v40, 0.0  ;;  %v2148_v51 = vmul.f32 %v2084_v1, %v2084_v1 }
 0x1ea   : > { %v2236_v5 = vadd.f32 %v2235_v57, %v2234_v49  ;;  %v2269_v49 = vsel %vm1821_vm2, %v2146_v32, 0.0  ;;  %v2271_v57 = vsel %vm1821_vm2, %v2147_v26, 0.0  ;;  %v2273_v30 = vsel %vm1821_vm2, %v2148_v51, 0.0 }
 0x1ec   : > { %v2238_v47 = vadd.f32 %v2237_v58, %v2236_v5 }
 0x1ee   : > { %v2240_v54 = vadd.f32 %v2239_v38, %v2238_v47 }
 0x1f0   : > { %v2242_v10 = vadd.f32 %v2241_v9, %v2240_v54 }
 0x1f2   : > { %v2244_v52 = vadd.f32 %v2243_v18, %v2242_v10 }
 0x1f4   : > { %v2246_v3 = vadd.f32 %v2245_v43, %v2244_v52 }
 0x1f6   : > { %v2248_v16 = vadd.f32 %v2247_v39, %v2246_v3 }
 0x1f8   : > { %v2250_v56 = vadd.f32 %v2249_v33, %v2248_v16 }
 0x1fa   : > { %v2252_v6 = vadd.f32 %v2251_v48, %v2250_v56 }
 0x1fc   : > { %v2254_v50 = vadd.f32 %v2253_v8, %v2252_v6 }
 0x1fe   : > { %v2256_v25 = vadd.f32 %v2255_v31, %v2254_v50 }
 0x200   : > { %v2258_v63 = vadd.f32 %v2257_v29, %v2256_v25 }
 0x202   : > { %v2260_v12 = vadd.f32 %v2259_v46, %v2258_v63 }
 0x204   : > { %v2262_v23 = vadd.f32 %v2261_v11, %v2260_v12 }
 0x206   : > { %v2264_v0 = vadd.f32 %v2263_v44, %v2262_v23 }
 0x208   : > { %v2266_v7 = vadd.f32 %v2265_v45, %v2264_v0 }
 0x20a   : > { %v2268_v53 = vadd.f32 %v2267_v24, %v2266_v7 }
 0x20c   : > { %v2270_v17 = vadd.f32 %v2269_v49, %v2268_v53 }
 0x20e   : > { %v2272_v5 = vadd.f32 %v2271_v57, %v2270_v17 }
 0x210   : > { %v2274_v28 = vadd.f32 %v2273_v30, %v2272_v5 }
 0x212   : > { %v2277_v58 = vrot.slane %v2274_v28, 4 }
 0x214   : > { %v2278_v47 = vadd.f32 %v2277_v58, %v2274_v28 }
 0x216   : > { %v2279_v22 = vrot.slane %v2278_v47, 2 }
 0x218   : > { %v2280_v38 = vadd.f32 %v2279_v22, %v2278_v47 }
 0x21a   : > { %v2281_v54 = vrot.slane %v2280_v38, 1 }
 0x21c   : > { %v2282_v20 = vadd.f32 %v2281_v54, %v2280_v38 }
 0x21e   : > { %2285 = vst.msk [vmem:[%s323_s29] sm:$0x1] %vm2283_vm4, %v2282_v20 }
 0x21f PF: > { %s17_s23 = sadd.s32 1, %s2947_s23   ;;  %s4317_s21 = smov %s2943_s22 }
 0x220   : > { %p14_p5 = scmp.ge.s32.totalorder %s17_s23, 4   ;;  %s4318_s22 = smov %s4320_s24 }
 0x222   :  { %16 = sbr.rel (!%p14_p5) target bundleno = 2 (0x2), region = 90 }

// kernel: _forward_impl.7
= control target key start
LH: loop header
LB: loop body
LE: loop exit
PB: predicated region body
PF: predicated region fallthrough
CT: control target
= control target key end

     0   :  { %s1843_s18 = smov 0   ;;  %s1845_s19 = smov 0   ;;  %s2289_s0 = inlined_call_operand.vmem [shape: bf16[2,512,32], index: 0, kind: input, shape index: {}]   ;;  %s2290_s1 = inlined_call_operand.vmem [shape: f32[1,32], index: 1, kind: input, shape index: {}]   ;;  %s2291_s2 = inlined_call_operand.vmem [shape: f32[1,32], index: 2, kind: input, shape index: {}]   ;;  %s2292_s3 = inlined_call_operand.vmem [shape: bf16[32,3], index: 3, kind: input, shape index: {}]   ;;  %s2293_s4 = inlined_call_operand.vmem [shape: f32[1,3], index: 4, kind: input, shape index: {}]   ;;  %s2294_s5 = inlined_call_operand.vmem [shape: f32[2,512,3], index: 5, kind: output, shape index: {}]  }
   0x1   :  { %s1847_s20 = smov 0  }
   0x2 LB: > { %s27_s21 = sadd.s32 1, %s1807_s19  ;;  %p1324_p0 = scmp.ge.s32.totalorder %s1811_s20, 1  ;;  %s1811_s20 = sphi %s1847_s20, %s15_s20   ;;  %s1807_s19 = sphi %s1845_s19, %s2296_s19   ;;  %s1803_s18 = sphi %s1843_s18, %s2295_s18  }
   0x3   : > { %p29_p1 = scmp.ge.s32.totalorder %s27_s21, 2  ;;  %p208_p2 = scmp.lt.s32.totalorder %s1811_s20, 3 }
   0x5   : > { %s2298_s21 = smov (%p29_p1, %s27_s21), 0  ;;  %p209_p3 = pnand %p1324_p0, %p208_p2 }
   0x6   : > { %v1659_v0 = vld [vmem:[%s2292_s3] sm:$0xff] (!%p209_p3)   ;;  %p245_p4 = scmp.lt.s32.totalorder (!%p209_p3), %s1803_s18, 1  ;;  %v1660_v1 = vld [vmem:[%s2292_s3 + $0x8] sm:$0xff] (!%p209_p3)   ;;  %vm654_vm0 = vcmask (!%p209_p3), 261120   ;;  %vm1168_vm1 = vcmask (!%p209_p3), 23552  }
   0x7   : > { %212 = sbr.rel (%p209_p3) target bundleno = 328 (0x148), region = 40  ;;  %1563 = vmatprep.subr.bf16.mxu0 (!%p209_p3), %v1659_v0  ;;  %1631 = vmatprep.subr.bf16.mxu1 (!%p209_p3), %v1659_v0  ;;  %v1878_v2 = vld [vmem:[%s2290_s1] ss:$0 sm:$0xff] (!%p209_p3) }
   0x8   : > { %1564 = vmatpush3.bf16.msra.mxu0 (!%p209_p3), %v1659_v0  ;;  %1633 = vmatpush3.bf16.msra.mxu1 (!%p209_p3), %v1659_v0  ;;  %v1887_v11 = vld [vmem:[%s2291_s2] ss:$0 sm:$0xff] (!%p209_p3) }
   0x9   : > { %1565 = vmatprep.subr.bf16.mxu0 (!%p209_p3), %v1660_v1  ;;  %1632 = vmatprep.subr.bf16.mxu1 (!%p209_p3), %v1660_v1 }
   0xc   : > { %1566 = vmatpush3.bf16.msra.mxu0 (!%p209_p3), %v1660_v1  ;;  %1634 = vmatpush3.bf16.msra.mxu1 (!%p209_p3), %v1660_v1 }
   0xe   : > { %s2300_s18 = smov (!%p245_p4, %s1803_s18), 1 }
   0xf   : > { %s1368_s26 = sshll.u32 %s2300_s18, 8  ;;  %s1369_s11 = sshll.u32 %s2300_s18, 9 }
  0x10   : > { %s1873_s29 = scalar_lea.vmem %s2289_s0, %s1368_s26  ;;  %s2099_s14 = scalar_lea.vmem %s2294_s5, %s1369_s11 }
  0x11   : > { %v1371_v3 = vld [vmem:[%s1873_s29] sm:$0xff]   ;;  %v1498_v5 = vld [vmem:[%s1873_s29 + $0x8] sm:$0xff]   ;;  %v1499_v32 = vld [vmem:[%s1873_s29 + $0x10] sm:$0xff]  }
  0x12   : > { %v1513_v4 = vld [vmem:[%s1873_s29 + $0x80] sm:$0xff]   ;;  %v1372_v6 = vunpack.c.l.bf16 %v1371_v3  ;;  %v1373_v7 = vunpack.c.h.bf16 %v1371_v3  ;;  %v1514_v10 = vld [vmem:[%s1873_s29 + $0x88] sm:$0xff]   ;;  %v1376_v12 = vunpack.c.l.bf16 %v1498_v5  ;;  %v1377_v13 = vunpack.c.h.bf16 %v1498_v5  ;;  %v1515_v37 = vld [vmem:[%s1873_s29 + $0x90] sm:$0xff]  }
  0x13   : > { %v1436_v8 = vunpack.c.l.bf16 %v1513_v4  ;;  %v1437_v9 = vunpack.c.h.bf16 %v1513_v4  ;;  %v1440_v14 = vunpack.c.l.bf16 %v1514_v10  ;;  %v1441_v15 = vunpack.c.h.bf16 %v1514_v10  ;;  %v1500_v42 = vld [vmem:[%s1873_s29 + $0x18] sm:$0xff]   ;;  %v1501_v5 = vld [vmem:[%s1873_s29 + $0x20] sm:$0xff]  }
  0x14   : > { %v400_v16 = vmul.f32 %v1372_v6, %v1878_v2  ;;  %v401_v17 = vmul.f32 %v1373_v7, %v1878_v2  ;;  %v402_v20 = vmul.f32 %v1376_v12, %v1878_v2  ;;  %v403_v21 = vmul.f32 %v1377_v13, %v1878_v2  ;;  %v1516_v47 = vld [vmem:[%s1873_s29 + $0x98] sm:$0xff]  }
  0x15   : > { %v432_v18 = vmul.f32 %v1436_v8, %v1878_v2  ;;  %v433_v19 = vmul.f32 %v1437_v9, %v1878_v2  ;;  %v434_v22 = vmul.f32 %v1440_v14, %v1878_v2  ;;  %v435_v23 = vmul.f32 %v1441_v15, %v1878_v2  ;;  %v1517_v15 = vld [vmem:[%s1873_s29 + $0xa0] sm:$0xff]  }
  0x16   : > { %v471_v24 = vadd.f32 %v1887_v11, %v400_v16  ;;  %v472_v25 = vadd.f32 %v1887_v11, %v401_v17  ;;  %v473_v28 = vadd.f32 %v1887_v11, %v402_v20  ;;  %v474_v29 = vadd.f32 %v1887_v11, %v403_v21  ;;  %v1502_v20 = vld [vmem:[%s1873_s29 + $0x28] sm:$0xff]  }
  0x17   : > { %v503_v26 = vadd.f32 %v1887_v11, %v432_v18  ;;  %v504_v27 = vadd.f32 %v1887_v11, %v433_v19  ;;  %v505_v30 = vadd.f32 %v1887_v11, %v434_v22  ;;  %v506_v31 = vadd.f32 %v1887_v11, %v435_v23 }
  0x18   : > { %v535_v33 = vmax.f32 %v471_v24, 0.0  ;;  %v536_v34 = vmax.f32 %v472_v25, 0.0  ;;  %v537_v38 = vmax.f32 %v473_v28, 0.0  ;;  %v538_v39 = vmax.f32 %v474_v29, 0.0  ;;  %v1518_v25 = vld [vmem:[%s1873_s29 + $0xa8] sm:$0xff]  }
  0x19   : > { %v567_v35 = vmax.f32 %v503_v26, 0.0  ;;  %v568_v36 = vmax.f32 %v504_v27, 0.0  ;;  %v569_v40 = vmax.f32 %v505_v30, 0.0  ;;  %v570_v41 = vmax.f32 %v506_v31, 0.0 }
  0x1a   : > { %v599_v43 = vpack.c.bf16 %v536_v34, %v535_v33  ;;  %v1380_v45 = vunpack.c.l.bf16 %v1499_v32  ;;  %v1381_v46 = vunpack.c.h.bf16 %v1499_v32  ;;  %v600_v48 = vpack.c.bf16 %v538_v39, %v537_v38 }
  0x1b   : > { %v615_v44 = vpack.c.bf16 %v568_v36, %v567_v35  ;;  %v616_v49 = vpack.c.bf16 %v570_v41, %v569_v40  ;;  %v1444_v50 = vunpack.c.l.bf16 %v1515_v37  ;;  %v1445_v51 = vunpack.c.h.bf16 %v1515_v37 }
  0x1c   : > { %1567 = vmatprep.mubr.msk.bf16.mxu0 %vm654_vm0, %v599_v43  ;;  %v404_v52 = vmul.f32 %v1380_v45, %v1878_v2  ;;  %v405_v53 = vmul.f32 %v1381_v46, %v1878_v2  ;;  %v1384_v54 = vunpack.c.l.bf16 %v1500_v42  ;;  %v1385_v55 = vunpack.c.h.bf16 %v1500_v42  ;;  %v1503_v42 = vld [vmem:[%s1873_s29 + $0x30] sm:$0xff]  }
  0x1d   : > { %1599 = vmatprep.mubr.msk.bf16.mxu1 %vm654_vm0, %v615_v44  ;;  %1568 = vmatmul.mubr.msk.bf16.vlgmr.msra.gmra.mrb[0].mxu0 %vm654_vm0, %v600_v48  ;;  %v436_v56 = vmul.f32 %v1444_v50, %v1878_v2  ;;  %v437_v57 = vmul.f32 %v1445_v51, %v1878_v2  ;;  %v1448_v58 = vunpack.c.l.bf16 %v1516_v47  ;;  %v1449_v59 = vunpack.c.h.bf16 %v1516_v47 }
  0x1e   : > { %1600 = vmatmul.mubr.msk.bf16.vlgmr.msra.gmra.mrb[0].mxu1 %vm654_vm0, %v616_v49  ;;  %v475_v60 = vadd.f32 %v1887_v11, %v404_v52  ;;  %v476_v61 = vadd.f32 %v1887_v11, %v405_v53  ;;  %v406_v62 = vmul.f32 %v1384_v54, %v1878_v2  ;;  %v407_v63 = vmul.f32 %v1385_v55, %v1878_v2  ;;  %v1519_v55 = vld [vmem:[%s1873_s29 + $0xb0] sm:$0xff]  }
  0x1f   : > { %v507_v0 = vadd.f32 %v1887_v11, %v436_v56  ;;  %v508_v1 = vadd.f32 %v1887_v11, %v437_v57  ;;  %v438_v3 = vmul.f32 %v1448_v58, %v1878_v2  ;;  %v439_v4 = vmul.f32 %v1449_v59, %v1878_v2 }
  0x20   : > { %v539_v6 = vmax.f32 %v475_v60, 0.0  ;;  %v540_v7 = vmax.f32 %v476_v61, 0.0  ;;  %v477_v8 = vadd.f32 %v1887_v11, %v406_v62  ;;  %v478_v9 = vadd.f32 %v1887_v11, %v407_v63  ;;  %v1504_v60 = vld [vmem:[%s1873_s29 + $0x38] sm:$0xff]  }
  0x21   : > { %v571_v10 = vmax.f32 %v507_v0, 0.0  ;;  %v572_v12 = vmax.f32 %v508_v1, 0.0  ;;  %v509_v13 = vadd.f32 %v1887_v11, %v438_v3  ;;  %v510_v14 = vadd.f32 %v1887_v11, %v439_v4  ;;  %v1520_v1 = vld [vmem:[%s1873_s29 + $0xb8] sm:$0xff]  }
  0x22   : > { %v601_v16 = vpack.c.bf16 %v540_v7, %v539_v6  ;;  %v541_v17 = vmax.f32 %v477_v8, 0.0  ;;  %v542_v18 = vmax.f32 %v478_v9, 0.0  ;;  %v1388_v19 = vunpack.c.l.bf16 %v1501_v5 }
  0x23   : > { %v617_v21 = vpack.c.bf16 %v572_v12, %v571_v10  ;;  %v573_v22 = vmax.f32 %v509_v13, 0.0  ;;  %v574_v23 = vmax.f32 %v510_v14, 0.0  ;;  %v1389_v24 = vunpack.c.h.bf16 %v1501_v5 }
  0x24   : > { %1571 = vmatprep.mubr.msk.bf16.mxu0 %vm654_vm0, %v601_v16  ;;  %v602_v26 = vpack.c.bf16 %v542_v18, %v541_v17  ;;  %v408_v27 = vmul.f32 %v1388_v19, %v1878_v2  ;;  %v1452_v28 = vunpack.c.l.bf16 %v1517_v15  ;;  %v1453_v29 = vunpack.c.h.bf16 %v1517_v15  ;;  %v1505_v16 = vld [vmem:[%s1873_s29 + $0x40] sm:$0xff]  }
  0x25   : > { %1603 = vmatprep.mubr.msk.bf16.mxu1 %vm654_vm0, %v617_v21  ;;  %v618_v30 = vpack.c.bf16 %v574_v23, %v573_v22  ;;  %v409_v31 = vmul.f32 %v1389_v24, %v1878_v2  ;;  %v1392_v32 = vunpack.c.l.bf16 %v1502_v20  ;;  %v1393_v33 = vunpack.c.h.bf16 %v1502_v20 }
  0x26   : > { %1572 = vmatmul.mubr.msk.bf16.gmra.mrb[4].mxu0 %vm654_vm0, %v602_v26  ;;  %v479_v34 = vadd.f32 %v1887_v11, %v408_v27  ;;  %v440_v35 = vmul.f32 %v1452_v28, %v1878_v2  ;;  %v441_v36 = vmul.f32 %v1453_v29, %v1878_v2  ;;  %v1456_v37 = vunpack.c.l.bf16 %v1518_v25 }
  0x27   : > { %1604 = vmatmul.mubr.msk.bf16.gmra.mrb[4].mxu1 %vm654_vm0, %v618_v30  ;;  %v480_v38 = vadd.f32 %v1887_v11, %v409_v31  ;;  %v410_v39 = vmul.f32 %v1392_v32, %v1878_v2  ;;  %v411_v40 = vmul.f32 %v1393_v33, %v1878_v2  ;;  %v1457_v41 = vunpack.c.h.bf16 %v1518_v25  ;;  %v1521_v33 = vld [vmem:[%s1873_s29 + $0xc0] sm:$0xff]  }
  0x28   : > { %v543_v43 = vmax.f32 %v479_v34, 0.0  ;;  %v511_v44 = vadd.f32 %v1887_v11, %v440_v35  ;;  %v512_v45 = vadd.f32 %v1887_v11, %v441_v36  ;;  %v442_v46 = vmul.f32 %v1456_v37, %v1878_v2 }
  0x29   : > { %v544_v47 = vmax.f32 %v480_v38, 0.0  ;;  %v481_v48 = vadd.f32 %v1887_v11, %v410_v39  ;;  %v482_v49 = vadd.f32 %v1887_v11, %v411_v40  ;;  %v443_v50 = vmul.f32 %v1457_v41, %v1878_v2  ;;  %v1506_v38 = vld [vmem:[%s1873_s29 + $0x48] sm:$0xff]  }
  0x2a   : > { %v575_v51 = vmax.f32 %v511_v44, 0.0  ;;  %v576_v52 = vmax.f32 %v512_v45, 0.0  ;;  %v513_v53 = vadd.f32 %v1887_v11, %v442_v46  ;;  %v1396_v54 = vunpack.c.l.bf16 %v1503_v42 }
  0x2b   : > { %v603_v56 = vpack.c.bf16 %v544_v47, %v543_v43  ;;  %v545_v57 = vmax.f32 %v481_v48, 0.0  ;;  %v546_v58 = vmax.f32 %v482_v49, 0.0  ;;  %v514_v59 = vadd.f32 %v1887_v11, %v443_v50  ;;  %v1522_v43 = vld [vmem:[%s1873_s29 + $0xc8] sm:$0xff]  }
  0x2c   : > { %v619_v61 = vpack.c.bf16 %v576_v52, %v575_v51  ;;  %v577_v62 = vmax.f32 %v513_v53, 0.0  ;;  %v1397_v63 = vunpack.c.h.bf16 %v1503_v42  ;;  %v412_v0 = vmul.f32 %v1396_v54, %v1878_v2 }
  0x2d   : > { %1575 = vmatprep.mubr.msk.bf16.mxu0 %vm654_vm0, %v603_v56  ;;  %v604_v3 = vpack.c.bf16 %v546_v58, %v545_v57  ;;  %v578_v4 = vmax.f32 %v514_v59, 0.0  ;;  %v1460_v5 = vunpack.c.l.bf16 %v1519_v55  ;;  %v1461_v6 = vunpack.c.h.bf16 %v1519_v55  ;;  %v1507_v56 = vld [vmem:[%s1873_s29 + $0x50] sm:$0xff]  }
  0x2e   : > { %1607 = vmatprep.mubr.msk.bf16.mxu1 %vm654_vm0, %v619_v61  ;;  %v413_v7 = vmul.f32 %v1397_v63, %v1878_v2  ;;  %v483_v8 = vadd.f32 %v1887_v11, %v412_v0  ;;  %v1400_v9 = vunpack.c.l.bf16 %v1504_v60  ;;  %v1401_v10 = vunpack.c.h.bf16 %v1504_v60 }
  0x2f   : > { %1576 = vmatmul.mubr.msk.bf16.gmra.mrb[8].mxu0 %vm654_vm0, %v604_v3  ;;  %v620_v12 = vpack.c.bf16 %v578_v4, %v577_v62  ;;  %v444_v13 = vmul.f32 %v1460_v5, %v1878_v2  ;;  %v445_v14 = vmul.f32 %v1461_v6, %v1878_v2  ;;  %v1464_v15 = vunpack.c.l.bf16 %v1520_v1  ;;  %v1523_v6 = vld [vmem:[%s1873_s29 + $0xd0] sm:$0xff]  }
  0x30   : > { %v484_v17 = vadd.f32 %v1887_v11, %v413_v7  ;;  %v547_v18 = vmax.f32 %v483_v8, 0.0  ;;  %v414_v19 = vmul.f32 %v1400_v9, %v1878_v2  ;;  %v415_v20 = vmul.f32 %v1401_v10, %v1878_v2 }
  0x31   : > { %1608 = vmatmul.mubr.msk.bf16.gmra.mrb[8].mxu1 %vm654_vm0, %v620_v12  ;;  %v515_v21 = vadd.f32 %v1887_v11, %v444_v13  ;;  %v516_v22 = vadd.f32 %v1887_v11, %v445_v14  ;;  %v1465_v23 = vunpack.c.h.bf16 %v1520_v1  ;;  %v446_v24 = vmul.f32 %v1464_v15, %v1878_v2 }
  0x32   : > { %v548_v25 = vmax.f32 %v484_v17, 0.0  ;;  %v485_v26 = vadd.f32 %v1887_v11, %v414_v19  ;;  %v486_v27 = vadd.f32 %v1887_v11, %v415_v20  ;;  %v1404_v28 = vunpack.c.l.bf16 %v1505_v16 }
  0x33   : > { %v579_v29 = vmax.f32 %v515_v21, 0.0  ;;  %v580_v30 = vmax.f32 %v516_v22, 0.0  ;;  %v447_v31 = vmul.f32 %v1465_v23, %v1878_v2  ;;  %v517_v32 = vadd.f32 %v1887_v11, %v446_v24  ;;  %v1524_v21 = vld [vmem:[%s1873_s29 + $0xd8] sm:$0xff]  }
  0x34   : > { %v605_v34 = vpack.c.bf16 %v548_v25, %v547_v18  ;;  %v549_v35 = vmax.f32 %v485_v26, 0.0  ;;  %v550_v36 = vmax.f32 %v486_v27, 0.0  ;;  %v1405_v37 = vunpack.c.h.bf16 %v1505_v16  ;;  %v1508_v16 = vld [vmem:[%s1873_s29 + $0x58] sm:$0xff]  }
  0x35   : > { %v621_v39 = vpack.c.bf16 %v580_v30, %v579_v29  ;;  %v518_v40 = vadd.f32 %v1887_v11, %v447_v31  ;;  %v581_v41 = vmax.f32 %v517_v32, 0.0  ;;  %v416_v42 = vmul.f32 %v1404_v28, %v1878_v2 }
  0x36   : > { %1579 = vmatprep.mubr.msk.bf16.mxu0 %vm654_vm0, %v605_v34  ;;  %v606_v44 = vpack.c.bf16 %v550_v36, %v549_v35  ;;  %v417_v45 = vmul.f32 %v1405_v37, %v1878_v2  ;;  %v1468_v46 = vunpack.c.l.bf16 %v1521_v33  ;;  %v1469_v47 = vunpack.c.h.bf16 %v1521_v33  ;;  %v1509_v34 = vld [vmem:[%s1873_s29 + $0x60] sm:$0xff]  }
  0x37   : > { %1611 = vmatprep.mubr.msk.bf16.mxu1 %vm654_vm0, %v621_v39  ;;  %v582_v48 = vmax.f32 %v518_v40, 0.0  ;;  %v487_v49 = vadd.f32 %v1887_v11, %v416_v42  ;;  %v1408_v50 = vunpack.c.l.bf16 %v1506_v38  ;;  %v1409_v51 = vunpack.c.h.bf16 %v1506_v38 }
  0x38   : > { %1580 = vmatmul.mubr.msk.bf16.gmra.mrb[12].mxu0 %vm654_vm0, %v606_v44  ;;  %v488_v52 = vadd.f32 %v1887_v11, %v417_v45  ;;  %v448_v53 = vmul.f32 %v1468_v46, %v1878_v2  ;;  %v449_v54 = vmul.f32 %v1469_v47, %v1878_v2  ;;  %v1472_v55 = vunpack.c.l.bf16 %v1522_v43  ;;  %v1525_v47 = vld [vmem:[%s1873_s29 + $0xe0] sm:$0xff]  }
  0x39   : > { %v622_v57 = vpack.c.bf16 %v582_v48, %v581_v41  ;;  %v551_v58 = vmax.f32 %v487_v49, 0.0  ;;  %v418_v59 = vmul.f32 %v1408_v50, %v1878_v2  ;;  %v419_v60 = vmul.f32 %v1409_v51, %v1878_v2 }
  0x3a   : > { %v552_v61 = vmax.f32 %v488_v52, 0.0  ;;  %v519_v62 = vadd.f32 %v1887_v11, %v448_v53  ;;  %v520_v63 = vadd.f32 %v1887_v11, %v449_v54  ;;  %v1473_v0 = vunpack.c.h.bf16 %v1522_v43 }
  0x3b   : > { %1612 = vmatmul.mubr.msk.bf16.gmra.mrb[12].mxu1 %vm654_vm0, %v622_v57  ;;  %v489_v1 = vadd.f32 %v1887_v11, %v418_v59  ;;  %v490_v3 = vadd.f32 %v1887_v11, %v419_v60  ;;  %v450_v4 = vmul.f32 %v1472_v55, %v1878_v2  ;;  %v1412_v5 = vunpack.c.l.bf16 %v1507_v56 }
  0x3c   : > { %v607_v7 = vpack.c.bf16 %v552_v61, %v551_v58  ;;  %v583_v8 = vmax.f32 %v519_v62, 0.0  ;;  %v584_v9 = vmax.f32 %v520_v63, 0.0  ;;  %v451_v10 = vmul.f32 %v1473_v0, %v1878_v2 }
  0x3d   : > { %v553_v12 = vmax.f32 %v489_v1, 0.0  ;;  %v554_v13 = vmax.f32 %v490_v3, 0.0  ;;  %v521_v14 = vadd.f32 %v1887_v11, %v450_v4  ;;  %v1413_v15 = vunpack.c.h.bf16 %v1507_v56  ;;  %v1510_v56 = vld [vmem:[%s1873_s29 + $0x68] sm:$0xff]  }
  0x3e   : > { %1583 = vmatprep.mubr.msk.bf16.mxu0 %vm654_vm0, %v607_v7  ;;  %v623_v17 = vpack.c.bf16 %v584_v9, %v583_v8  ;;  %v522_v18 = vadd.f32 %v1887_v11, %v451_v10  ;;  %v420_v19 = vmul.f32 %v1412_v5, %v1878_v2  ;;  %v1476_v20 = vunpack.c.l.bf16 %v1523_v6  ;;  %v1526_v1 = vld [vmem:[%s1873_s29 + $0xe8] sm:$0xff]  }
  0x3f   : > { %v608_v22 = vpack.c.bf16 %v554_v13, %v553_v12  ;;  %v585_v23 = vmax.f32 %v521_v14, 0.0  ;;  %v421_v24 = vmul.f32 %v1413_v15, %v1878_v2  ;;  %v1477_v25 = vunpack.c.h.bf16 %v1523_v6  ;;  %v1511_v12 = vld [vmem:[%s1873_s29 + $0x70] sm:$0xff]  }
  0x40   : > { %1615 = vmatprep.mubr.msk.bf16.mxu1 %vm654_vm0, %v623_v17  ;;  %v586_v26 = vmax.f32 %v522_v18, 0.0  ;;  %v491_v27 = vadd.f32 %v1887_v11, %v420_v19  ;;  %v452_v28 = vmul.f32 %v1476_v20, %v1878_v2  ;;  %v1416_v29 = vunpack.c.l.bf16 %v1508_v16 }
  0x41   : > { %1584 = vmatmul.mubr.msk.bf16.gmra.mrb[16].mxu0 %vm654_vm0, %v608_v22  ;;  %v492_v30 = vadd.f32 %v1887_v11, %v421_v24  ;;  %v453_v31 = vmul.f32 %v1477_v25, %v1878_v2  ;;  %v1417_v32 = vunpack.c.h.bf16 %v1508_v16  ;;  %v1480_v33 = vunpack.c.l.bf16 %v1524_v21  ;;  %v1527_v25 = vld [vmem:[%s1873_s29 + $0xf0] sm:$0xff]  }
  0x42   : > { %v624_v35 = vpack.c.bf16 %v586_v26, %v585_v23  ;;  %v555_v36 = vmax.f32 %v491_v27, 0.0  ;;  %v523_v37 = vadd.f32 %v1887_v11, %v452_v28  ;;  %v422_v38 = vmul.f32 %v1416_v29, %v1878_v2 }
  0x43   : > { %v556_v39 = vmax.f32 %v492_v30, 0.0  ;;  %v524_v40 = vadd.f32 %v1887_v11, %v453_v31  ;;  %v423_v41 = vmul.f32 %v1417_v32, %v1878_v2  ;;  %v1481_v42 = vunpack.c.h.bf16 %v1524_v21 }
  0x44   : > { %1616 = vmatmul.mubr.msk.bf16.gmra.mrb[16].mxu1 %vm654_vm0, %v624_v35  ;;  %v587_v43 = vmax.f32 %v523_v37, 0.0  ;;  %v493_v44 = vadd.f32 %v1887_v11, %v422_v38  ;;  %v454_v45 = vmul.f32 %v1480_v33, %v1878_v2  ;;  %v1420_v46 = vunpack.c.l.bf16 %v1509_v34 }
  0x45   : > { %v609_v48 = vpack.c.bf16 %v556_v39, %v555_v36  ;;  %v588_v49 = vmax.f32 %v524_v40, 0.0  ;;  %v494_v50 = vadd.f32 %v1887_v11, %v423_v41  ;;  %v455_v51 = vmul.f32 %v1481_v42, %v1878_v2 }
  0x46   : > { %v557_v52 = vmax.f32 %v493_v44, 0.0  ;;  %v525_v53 = vadd.f32 %v1887_v11, %v454_v45  ;;  %v1421_v54 = vunpack.c.h.bf16 %v1509_v34  ;;  %v424_v55 = vmul.f32 %v1420_v46, %v1878_v2  ;;  %v1512_v34 = vld [vmem:[%s1873_s29 + $0x78] sm:$0xff]  }
  0x47   : > { %1587 = vmatprep.mubr.msk.bf16.mxu0 %vm654_vm0, %v609_v48  ;;  %v625_v57 = vpack.c.bf16 %v588_v49, %v587_v43  ;;  %v558_v58 = vmax.f32 %v494_v50, 0.0  ;;  %v526_v59 = vadd.f32 %v1887_v11, %v455_v51  ;;  %v1484_v60 = vunpack.c.l.bf16 %v1525_v47  ;;  %v1528_v43 = vld [vmem:[%s1873_s29 + $0xf8] sm:$0xff]  }
  0x48   : > { %v589_v61 = vmax.f32 %v525_v53, 0.0  ;;  %v425_v62 = vmul.f32 %v1421_v54, %v1878_v2  ;;  %v495_v63 = vadd.f32 %v1887_v11, %v424_v55  ;;  %v1485_v0 = vunpack.c.h.bf16 %v1525_v47 }
  0x49   : > { %1619 = vmatprep.mubr.msk.bf16.mxu1 %vm654_vm0, %v625_v57  ;;  %v610_v3 = vpack.c.bf16 %v558_v58, %v557_v52  ;;  %v590_v4 = vmax.f32 %v526_v59, 0.0  ;;  %v456_v5 = vmul.f32 %v1484_v60, %v1878_v2  ;;  %v1424_v6 = vunpack.c.l.bf16 %v1510_v56 }
  0x4a   : > { %v496_v7 = vadd.f32 %v1887_v11, %v425_v62  ;;  %v559_v8 = vmax.f32 %v495_v63, 0.0  ;;  %v457_v9 = vmul.f32 %v1485_v0, %v1878_v2  ;;  %v1425_v10 = vunpack.c.h.bf16 %v1510_v56 }
  0x4b   : > { %1588 = vmatmul.mubr.msk.bf16.gmra.mrb[20].mxu0 %vm654_vm0, %v610_v3  ;;  %v626_v13 = vpack.c.bf16 %v590_v4, %v589_v61  ;;  %v527_v14 = vadd.f32 %v1887_v11, %v456_v5  ;;  %v426_v15 = vmul.f32 %v1424_v6, %v1878_v2  ;;  %v1488_v16 = vunpack.c.l.bf16 %v1526_v1 }
  0x4c   : > { %v560_v17 = vmax.f32 %v496_v7, 0.0  ;;  %v528_v18 = vadd.f32 %v1887_v11, %v457_v9  ;;  %v427_v19 = vmul.f32 %v1425_v10, %v1878_v2  ;;  %v1489_v20 = vunpack.c.h.bf16 %v1526_v1 }
  0x4d   : > { %1620 = vmatmul.mubr.msk.bf16.gmra.mrb[20].mxu1 %vm654_vm0, %v626_v13  ;;  %v591_v21 = vmax.f32 %v527_v14, 0.0  ;;  %v497_v22 = vadd.f32 %v1887_v11, %v426_v15  ;;  %v458_v23 = vmul.f32 %v1488_v16, %v1878_v2  ;;  %v1428_v24 = vunpack.c.l.bf16 %v1511_v12 }
  0x4e   : > { %v611_v26 = vpack.c.bf16 %v560_v17, %v559_v8  ;;  %v592_v27 = vmax.f32 %v528_v18, 0.0  ;;  %v498_v28 = vadd.f32 %v1887_v11, %v427_v19  ;;  %v459_v29 = vmul.f32 %v1489_v20, %v1878_v2 }
  0x4f   : > { %v561_v30 = vmax.f32 %v497_v22, 0.0  ;;  %v529_v31 = vadd.f32 %v1887_v11, %v458_v23  ;;  %v1429_v32 = vunpack.c.h.bf16 %v1511_v12  ;;  %v428_v33 = vmul.f32 %v1428_v24, %v1878_v2 }
  0x50   : > { %1591 = vmatprep.mubr.msk.bf16.mxu0 %vm654_vm0, %v611_v26  ;;  %v627_v35 = vpack.c.bf16 %v592_v27, %v591_v21  ;;  %v562_v36 = vmax.f32 %v498_v28, 0.0  ;;  %v530_v37 = vadd.f32 %v1887_v11, %v459_v29  ;;  %v1492_v38 = vunpack.c.l.bf16 %v1527_v25 }
  0x51   : > { %v593_v39 = vmax.f32 %v529_v31, 0.0  ;;  %v429_v40 = vmul.f32 %v1429_v32, %v1878_v2  ;;  %v499_v41 = vadd.f32 %v1887_v11, %v428_v33  ;;  %v1493_v42 = vunpack.c.h.bf16 %v1527_v25 }
  0x52   : > { %1623 = vmatprep.mubr.msk.bf16.mxu1 %vm654_vm0, %v627_v35  ;;  %v612_v44 = vpack.c.bf16 %v562_v36, %v561_v30  ;;  %v594_v45 = vmax.f32 %v530_v37, 0.0  ;;  %v460_v46 = vmul.f32 %v1492_v38, %v1878_v2  ;;  %v1432_v47 = vunpack.c.l.bf16 %v1512_v34 }
  0x53   : > { %v500_v48 = vadd.f32 %v1887_v11, %v429_v40  ;;  %v563_v49 = vmax.f32 %v499_v41, 0.0  ;;  %v461_v50 = vmul.f32 %v1493_v42, %v1878_v2  ;;  %v1433_v51 = vunpack.c.h.bf16 %v1512_v34 }
  0x54   : > { %1592 = vmatmul.mubr.msk.bf16.gmra.mrb[24].mxu0 %vm654_vm0, %v612_v44  ;;  %v628_v52 = vpack.c.bf16 %v594_v45, %v593_v39  ;;  %v531_v53 = vadd.f32 %v1887_v11, %v460_v46  ;;  %v430_v54 = vmul.f32 %v1432_v47, %v1878_v2  ;;  %v1496_v55 = vunpack.c.l.bf16 %v1528_v43 }
  0x55   : > { %v564_v56 = vmax.f32 %v500_v48, 0.0  ;;  %v532_v57 = vadd.f32 %v1887_v11, %v461_v50  ;;  %v431_v58 = vmul.f32 %v1433_v51, %v1878_v2  ;;  %v1497_v59 = vunpack.c.h.bf16 %v1528_v43 }
  0x56   : > { %1624 = vmatmul.mubr.msk.bf16.gmra.mrb[24].mxu1 %vm654_vm0, %v628_v52  ;;  %v595_v60 = vmax.f32 %v531_v53, 0.0  ;;  %v501_v61 = vadd.f32 %v1887_v11, %v430_v54  ;;  %v462_v62 = vmul.f32 %v1496_v55, %v1878_v2 }
  0x57   : > { %v613_v63 = vpack.c.bf16 %v564_v56, %v563_v49  ;;  %v596_v0 = vmax.f32 %v532_v57, 0.0  ;;  %v502_v1 = vadd.f32 %v1887_v11, %v431_v58  ;;  %v463_v3 = vmul.f32 %v1497_v59, %v1878_v2  ;;  %v2080_v2 = vld [vmem:[%s2293_s4] ss:$0 sm:$0xff] }
  0x58   : > { %v565_v4 = vmax.f32 %v501_v61, 0.0  ;;  %v533_v5 = vadd.f32 %v1887_v11, %v462_v62 }
  0x59   : > { %1595 = vmatprep.mubr.msk.bf16.mxu0 %vm654_vm0, %v613_v63  ;;  %v629_v6 = vpack.c.bf16 %v596_v0, %v595_v60  ;;  %v566_v7 = vmax.f32 %v502_v1, 0.0  ;;  %v534_v8 = vadd.f32 %v1887_v11, %v463_v3 }
  0x5a   : > { %v597_v9 = vmax.f32 %v533_v5, 0.0 }
  0x5b   : > { %1627 = vmatprep.mubr.msk.bf16.mxu1 %vm654_vm0, %v629_v6  ;;  %v614_v10 = vpack.c.bf16 %v566_v7, %v565_v4  ;;  %v598_v12 = vmax.f32 %v534_v8, 0.0 }
  0x5d   : > { %1596 = vmatmul.mubr.msk.bf16.gmra.mrb[28].mxu0 %vm654_vm0, %v614_v10  ;;  %v630_v13 = vpack.c.bf16 %v598_v12, %v597_v9 }
  0x5f   : > { %1628 = vmatmul.mubr.msk.bf16.gmra.mrb[28].mxu1 %vm654_vm0, %v630_v13 }
  0xf0   : > { %v1569_v14 = vpop.f32.mrb[0].mxu0 }
  0xf1   : > { %v1601_v15 = vpop.f32.mrb[0].mxu1  ;;  %v794_v16 = vadd.f32 %v1569_v14, %v2080_v2  ;;  %v785_v17 = vpop.f32.mrb[1].mxu0 }
  0xf2   : > { %v922_v11 = vadd.f32 %v1601_v15, %v2080_v2  ;;  %v913_v18 = vpop.f32.mrb[1].mxu1  ;;  %v786_v19 = vadd.f32 %v2080_v2, %v785_v17  ;;  %v1570_v21 = vpop.f32.mrb[2].mxu0 }
  0xf3   : > { %v914_v20 = vadd.f32 %v2080_v2, %v913_v18  ;;  %v1602_v22 = vpop.f32.mrb[2].mxu1  ;;  %1661 = vtanh.f32 %v794_v16  ;;  %v797_v23 = vadd.f32 %v1570_v21, %v2080_v2  ;;  %v788_v24 = vpop.f32.mrb[3].mxu0 }
  0xf4   : > { %v916_v25 = vpop.f32.mrb[3].mxu1  ;;  %1663 = vtanh.f32 %v922_v11  ;;  %v925_v26 = vadd.f32 %v1602_v22, %v2080_v2  ;;  %v789_v27 = vadd.f32 %v2080_v2, %v788_v24 }
  0xf5   : > { %1665 = vtanh.f32 %v786_v19  ;;  %v917_v28 = vadd.f32 %v2080_v2, %v916_v25 }
  0xf6   : > { %1667 = vtanh.f32 %v914_v20 }
  0xf7   : > { %1669 = vtanh.f32 %v797_v23 }
  0xf8   : > { %1671 = vtanh.f32 %v925_v26 }
  0xf9   : > { %1673 = vtanh.f32 %v789_v27  ;;  %v1573_v29 = vpop.f32.mrb[4].mxu0 }
  0xfa   : > { %1675 = vtanh.f32 %v917_v28  ;;  %v810_v30 = vadd.f32 %v1573_v29, %v2080_v2  ;;  %v1605_v31 = vpop.f32.mrb[4].mxu1  ;;  %v801_v32 = vpop.f32.mrb[5].mxu0 }
  0xfb   : > { %v938_v33 = vadd.f32 %v1605_v31, %v2080_v2  ;;  %v802_v34 = vadd.f32 %v2080_v2, %v801_v32  ;;  %v929_v35 = vpop.f32.mrb[5].mxu1  ;;  %v1574_v36 = vpop.f32.mrb[6].mxu0 }
  0xfc   : > { %1677 = vtanh.f32 %v810_v30  ;;  %v930_v37 = vadd.f32 %v2080_v2, %v929_v35  ;;  %v813_v38 = vadd.f32 %v1574_v36, %v2080_v2  ;;  %v1606_v39 = vpop.f32.mrb[6].mxu1  ;;  %v804_v40 = vpop.f32.mrb[7].mxu0 }
  0xfd   : > { %v1662_v41 = vpop.eup %1661  ;;  %1679 = vtanh.f32 %v938_v33  ;;  %v941_v42 = vadd.f32 %v1606_v39, %v2080_v2  ;;  %v932_v43 = vpop.f32.mrb[7].mxu1  ;;  %v805_v46 = vadd.f32 %v2080_v2, %v804_v40 }
  0xfe   : > { %v1664_v44 = vpop.eup %1663  ;;  %v1106_v45 = vmul.f32 0.5, %v1662_v41  ;;  %1681 = vtanh.f32 %v802_v34  ;;  %v933_v49 = vadd.f32 %v2080_v2, %v932_v43 }
  0xff   : > { %v1666_v47 = vpop.eup %1665  ;;  %v1138_v48 = vmul.f32 0.5, %v1664_v44  ;;  %1683 = vtanh.f32 %v930_v37 }
 0x100   : > { %v1668_v50 = vpop.eup %1667  ;;  %1171 = vst.msk [vmem:[%s2099_s14 + $0x10] sm:$0xff] %vm1168_vm1, %v1106_v45  ;;  %v1104_v51 = vmul.f32 0.5, %v1666_v47  ;;  %1685 = vtanh.f32 %v813_v38 }
 0x101   : > { %v1670_v52 = vpop.eup %1669  ;;  %1203 = vst.msk [vmem:[%s2099_s14 + $0x110] sm:$0xff] %vm1168_vm1, %v1138_v48  ;;  %v1136_v53 = vmul.f32 0.5, %v1668_v50  ;;  %1687 = vtanh.f32 %v941_v42 }
 0x102   : > { %v1672_v54 = vpop.eup %1671  ;;  %1169 = vst.msk [vmem:[%s2099_s14] sm:$0xff] %vm1168_vm1, %v1104_v51  ;;  %v1107_v55 = vmul.f32 0.5, %v1670_v52  ;;  %1689 = vtanh.f32 %v805_v46  ;;  %v1577_v56 = vpop.f32.mrb[8].mxu0 }
 0x103   : > { %v1674_v57 = vpop.eup %1673  ;;  %1201 = vst.msk [vmem:[%s2099_s14 + $0x100] sm:$0xff] %vm1168_vm1, %v1136_v53  ;;  %v1139_v58 = vmul.f32 0.5, %v1672_v54  ;;  %1691 = vtanh.f32 %v933_v49  ;;  %v826_v59 = vadd.f32 %v1577_v56, %v2080_v2  ;;  %v817_v60 = vpop.f32.mrb[9].mxu0 }
 0x104   : > { %v1676_v61 = vpop.eup %1675  ;;  %1172 = vst.msk [vmem:[%s2099_s14 + $0x18] sm:$0xff] %vm1168_vm1, %v1107_v55  ;;  %v1105_v62 = vmul.f32 0.5, %v1674_v57  ;;  %v1609_v63 = vpop.f32.mrb[8].mxu1  ;;  %v818_v0 = vadd.f32 %v2080_v2, %v817_v60 }
 0x105   : > { %v1578_v1 = vpop.f32.mrb[10].mxu0  ;;  %1204 = vst.msk [vmem:[%s2099_s14 + $0x118] sm:$0xff] %vm1168_vm1, %v1139_v58  ;;  %v1137_v3 = vmul.f32 0.5, %v1676_v61  ;;  %1693 = vtanh.f32 %v826_v59  ;;  %v954_v4 = vadd.f32 %v1609_v63, %v2080_v2  ;;  %v945_v5 = vpop.f32.mrb[9].mxu1 }
 0x106   : > { %v829_v6 = vadd.f32 %v1578_v1, %v2080_v2  ;;  %v820_v7 = vpop.f32.mrb[11].mxu0  ;;  %v1678_v8 = vpop.eup %1677  ;;  %1170 = vst.msk [vmem:[%s2099_s14 + $0x8] sm:$0xff] %vm1168_vm1, %v1105_v62  ;;  %1695 = vtanh.f32 %v818_v0  ;;  %v946_v9 = vadd.f32 %v2080_v2, %v945_v5 }
 0x107   : > { %v1610_v10 = vpop.f32.mrb[10].mxu1  ;;  %v1680_v12 = vpop.eup %1679  ;;  %1202 = vst.msk [vmem:[%s2099_s14 + $0x108] sm:$0xff] %vm1168_vm1, %v1137_v3  ;;  %v1110_v13 = vmul.f32 0.5, %v1678_v8  ;;  %1697 = vtanh.f32 %v954_v4  ;;  %v821_v15 = vadd.f32 %v2080_v2, %v820_v7 }
 0x108   : > { %v957_v14 = vadd.f32 %v1610_v10, %v2080_v2  ;;  %v948_v16 = vpop.f32.mrb[11].mxu1  ;;  %v1682_v11 = vpop.eup %1681  ;;  %v1142_v17 = vmul.f32 0.5, %v1680_v12  ;;  %1699 = vtanh.f32 %v946_v9 }
 0x109   : > { %v949_v18 = vadd.f32 %v2080_v2, %v948_v16  ;;  %v1684_v19 = vpop.eup %1683  ;;  %1175 = vst.msk [vmem:[%s2099_s14 + $0x30] sm:$0xff] %vm1168_vm1, %v1110_v13  ;;  %v1108_v20 = vmul.f32 0.5, %v1682_v11  ;;  %1701 = vtanh.f32 %v829_v6 }
 0x10a   : > { %v1686_v21 = vpop.eup %1685  ;;  %1207 = vst.msk [vmem:[%s2099_s14 + $0x130] sm:$0xff] %vm1168_vm1, %v1142_v17  ;;  %v1140_v22 = vmul.f32 0.5, %v1684_v19  ;;  %1703 = vtanh.f32 %v957_v14 }
 0x10b   : > { %v1688_v23 = vpop.eup %1687  ;;  %1173 = vst.msk [vmem:[%s2099_s14 + $0x20] sm:$0xff] %vm1168_vm1, %v1108_v20  ;;  %v1111_v24 = vmul.f32 0.5, %v1686_v21  ;;  %1705 = vtanh.f32 %v821_v15  ;;  %v1581_v25 = vpop.f32.mrb[12].mxu0 }
 0x10c   : > { %v1690_v26 = vpop.eup %1689  ;;  %1205 = vst.msk [vmem:[%s2099_s14 + $0x120] sm:$0xff] %vm1168_vm1, %v1140_v22  ;;  %v1143_v27 = vmul.f32 0.5, %v1688_v23  ;;  %1707 = vtanh.f32 %v949_v18  ;;  %v842_v28 = vadd.f32 %v1581_v25, %v2080_v2  ;;  %v833_v29 = vpop.f32.mrb[13].mxu0 }
 0x10d   : > { %v1692_v30 = vpop.eup %1691  ;;  %1176 = vst.msk [vmem:[%s2099_s14 + $0x38] sm:$0xff] %vm1168_vm1, %v1111_v24  ;;  %v1109_v31 = vmul.f32 0.5, %v1690_v26  ;;  %v834_v32 = vadd.f32 %v2080_v2, %v833_v29  ;;  %v1582_v33 = vpop.f32.mrb[14].mxu0 }
 0x10e   : > { %1208 = vst.msk [vmem:[%s2099_s14 + $0x138] sm:$0xff] %vm1168_vm1, %v1143_v27  ;;  %v1141_v34 = vmul.f32 0.5, %v1692_v30  ;;  %1709 = vtanh.f32 %v842_v28  ;;  %v1613_v35 = vpop.f32.mrb[12].mxu1  ;;  %v845_v36 = vadd.f32 %v1582_v33, %v2080_v2  ;;  %v836_v37 = vpop.f32.mrb[15].mxu0 }
 0x10f   : > { %v1694_v38 = vpop.eup %1693  ;;  %1174 = vst.msk [vmem:[%s2099_s14 + $0x28] sm:$0xff] %vm1168_vm1, %v1109_v31  ;;  %v970_v39 = vadd.f32 %v1613_v35, %v2080_v2  ;;  %1711 = vtanh.f32 %v834_v32  ;;  %v961_v40 = vpop.f32.mrb[13].mxu1  ;;  %v837_v45 = vadd.f32 %v2080_v2, %v836_v37 }
 0x110   : > { %v1696_v41 = vpop.eup %1695  ;;  %1206 = vst.msk [vmem:[%s2099_s14 + $0x128] sm:$0xff] %vm1168_vm1, %v1141_v34  ;;  %v1114_v42 = vmul.f32 0.5, %v1694_v38  ;;  %v962_v43 = vadd.f32 %v2080_v2, %v961_v40  ;;  %1713 = vtanh.f32 %v845_v36  ;;  %v1614_v44 = vpop.f32.mrb[14].mxu1 }
 0x111   : > { %v1698_v46 = vpop.eup %1697  ;;  %v1112_v47 = vmul.f32 0.5, %v1696_v41  ;;  %1715 = vtanh.f32 %v970_v39  ;;  %v973_v48 = vadd.f32 %v1614_v44, %v2080_v2  ;;  %v964_v49 = vpop.f32.mrb[15].mxu1 }
 0x112   : > { %v1700_v50 = vpop.eup %1699  ;;  %1179 = vst.msk [vmem:[%s2099_s14 + $0x50] sm:$0xff] %vm1168_vm1, %v1114_v42  ;;  %v1146_v51 = vmul.f32 0.5, %v1698_v46  ;;  %1717 = vtanh.f32 %v962_v43  ;;  %v965_v52 = vadd.f32 %v2080_v2, %v964_v49 }
 0x113   : > { %v1702_v53 = vpop.eup %1701  ;;  %1177 = vst.msk [vmem:[%s2099_s14 + $0x40] sm:$0xff] %vm1168_vm1, %v1112_v47  ;;  %v1144_v54 = vmul.f32 0.5, %v1700_v50  ;;  %1719 = vtanh.f32 %v973_v48 }
 0x114   : > { %v1704_v55 = vpop.eup %1703  ;;  %1211 = vst.msk [vmem:[%s2099_s14 + $0x150] sm:$0xff] %vm1168_vm1, %v1146_v51  ;;  %v1115_v56 = vmul.f32 0.5, %v1702_v53  ;;  %1721 = vtanh.f32 %v837_v45  ;;  %v1585_v57 = vpop.f32.mrb[16].mxu0 }
 0x115   : > { %v1706_v58 = vpop.eup %1705  ;;  %1209 = vst.msk [vmem:[%s2099_s14 + $0x140] sm:$0xff] %vm1168_vm1, %v1144_v54  ;;  %v1147_v59 = vmul.f32 0.5, %v1704_v55  ;;  %1723 = vtanh.f32 %v965_v52  ;;  %v858_v60 = vadd.f32 %v1585_v57, %v2080_v2  ;;  %v849_v61 = vpop.f32.mrb[17].mxu0 }
 0x116   : > { %v1708_v62 = vpop.eup %1707  ;;  %1180 = vst.msk [vmem:[%s2099_s14 + $0x58] sm:$0xff] %vm1168_vm1, %v1115_v56  ;;  %v1113_v63 = vmul.f32 0.5, %v1706_v58  ;;  %v850_v0 = vadd.f32 %v2080_v2, %v849_v61  ;;  %v1586_v1 = vpop.f32.mrb[18].mxu0 }
 0x117   : > { %1212 = vst.msk [vmem:[%s2099_s14 + $0x158] sm:$0xff] %vm1168_vm1, %v1147_v59  ;;  %v1145_v3 = vmul.f32 0.5, %v1708_v62  ;;  %1725 = vtanh.f32 %v858_v60  ;;  %v1617_v4 = vpop.f32.mrb[16].mxu1  ;;  %v861_v5 = vadd.f32 %v1586_v1, %v2080_v2  ;;  %v852_v6 = vpop.f32.mrb[19].mxu0 }
 0x118   : > { %v1710_v7 = vpop.eup %1709  ;;  %1178 = vst.msk [vmem:[%s2099_s14 + $0x48] sm:$0xff] %vm1168_vm1, %v1113_v63  ;;  %v986_v8 = vadd.f32 %v1617_v4, %v2080_v2  ;;  %1727 = vtanh.f32 %v850_v0  ;;  %v977_v9 = vpop.f32.mrb[17].mxu1  ;;  %v853_v15 = vadd.f32 %v2080_v2, %v852_v6 }
 0x119   : > { %v1712_v10 = vpop.eup %1711  ;;  %1210 = vst.msk [vmem:[%s2099_s14 + $0x148] sm:$0xff] %vm1168_vm1, %v1145_v3  ;;  %v1118_v12 = vmul.f32 0.5, %v1710_v7  ;;  %v978_v13 = vadd.f32 %v2080_v2, %v977_v9  ;;  %1729 = vtanh.f32 %v861_v5  ;;  %v1618_v14 = vpop.f32.mrb[18].mxu1 }
 0x11a   : > { %v1714_v16 = vpop.eup %1713  ;;  %v1116_v11 = vmul.f32 0.5, %v1712_v10  ;;  %1731 = vtanh.f32 %v986_v8  ;;  %v989_v17 = vadd.f32 %v1618_v14, %v2080_v2  ;;  %v980_v18 = vpop.f32.mrb[19].mxu1 }
 0x11b   : > { %v1716_v19 = vpop.eup %1715  ;;  %1183 = vst.msk [vmem:[%s2099_s14 + $0x70] sm:$0xff] %vm1168_vm1, %v1118_v12  ;;  %v1119_v20 = vmul.f32 0.5, %v1714_v16  ;;  %1733 = vtanh.f32 %v978_v13  ;;  %v981_v21 = vadd.f32 %v2080_v2, %v980_v18 }
 0x11c   : > { %v1718_v22 = vpop.eup %1717  ;;  %v1150_v23 = vmul.f32 0.5, %v1716_v19  ;;  %1181 = vst.msk [vmem:[%s2099_s14 + $0x60] sm:$0xff] %vm1168_vm1, %v1116_v11  ;;  %1735 = vtanh.f32 %v989_v17 }
 0x11d   : > { %v1720_v24 = vpop.eup %1719  ;;  %v1148_v25 = vmul.f32 0.5, %v1718_v22  ;;  %1184 = vst.msk [vmem:[%s2099_s14 + $0x78] sm:$0xff] %vm1168_vm1, %v1119_v20  ;;  %1737 = vtanh.f32 %v853_v15 }
 0x11e   : > { %v1722_v26 = vpop.eup %1721  ;;  %1215 = vst.msk [vmem:[%s2099_s14 + $0x170] sm:$0xff] %vm1168_vm1, %v1150_v23  ;;  %v1151_v27 = vmul.f32 0.5, %v1720_v24  ;;  %1739 = vtanh.f32 %v981_v21  ;;  %v1589_v28 = vpop.f32.mrb[20].mxu0 }
 0x11f   : > { %v1724_v29 = vpop.eup %1723  ;;  %1213 = vst.msk [vmem:[%s2099_s14 + $0x160] sm:$0xff] %vm1168_vm1, %v1148_v25  ;;  %v1117_v30 = vmul.f32 0.5, %v1722_v26  ;;  %v874_v31 = vadd.f32 %v1589_v28, %v2080_v2  ;;  %v865_v32 = vpop.f32.mrb[21].mxu0 }
 0x120   : > { %1216 = vst.msk [vmem:[%s2099_s14 + $0x178] sm:$0xff] %vm1168_vm1, %v1151_v27  ;;  %v1149_v33 = vmul.f32 0.5, %v1724_v29  ;;  %v1621_v34 = vpop.f32.mrb[20].mxu1  ;;  %v866_v35 = vadd.f32 %v2080_v2, %v865_v32  ;;  %v1590_v36 = vpop.f32.mrb[22].mxu0 }
 0x121   : > { %v1726_v37 = vpop.eup %1725  ;;  %1182 = vst.msk [vmem:[%s2099_s14 + $0x68] sm:$0xff] %vm1168_vm1, %v1117_v30  ;;  %1741 = vtanh.f32 %v874_v31  ;;  %v1002_v38 = vadd.f32 %v1621_v34, %v2080_v2  ;;  %v993_v39 = vpop.f32.mrb[21].mxu1  ;;  %v877_v40 = vadd.f32 %v1590_v36, %v2080_v2 }
 0x122   : > { %v868_v41 = vpop.f32.mrb[23].mxu0  ;;  %v1728_v42 = vpop.eup %1727  ;;  %1214 = vst.msk [vmem:[%s2099_s14 + $0x168] sm:$0xff] %vm1168_vm1, %v1149_v33  ;;  %v1122_v43 = vmul.f32 0.5, %v1726_v37  ;;  %1743 = vtanh.f32 %v866_v35  ;;  %v994_v44 = vadd.f32 %v2080_v2, %v993_v39 }
 0x123   : > { %v1622_v45 = vpop.f32.mrb[22].mxu1  ;;  %v1730_v46 = vpop.eup %1729  ;;  %v1120_v47 = vmul.f32 0.5, %v1728_v42  ;;  %1745 = vtanh.f32 %v1002_v38  ;;  %v869_v49 = vadd.f32 %v2080_v2, %v868_v41 }
 0x124   : > { %v1005_v48 = vadd.f32 %v1622_v45, %v2080_v2  ;;  %v996_v50 = vpop.f32.mrb[23].mxu1  ;;  %v1732_v51 = vpop.eup %1731  ;;  %1187 = vst.msk [vmem:[%s2099_s14 + $0x90] sm:$0xff] %vm1168_vm1, %v1122_v43  ;;  %v1123_v52 = vmul.f32 0.5, %v1730_v46  ;;  %1747 = vtanh.f32 %v994_v44 }
 0x125   : > { %v997_v53 = vadd.f32 %v2080_v2, %v996_v50  ;;  %v1734_v54 = vpop.eup %1733  ;;  %v1154_v55 = vmul.f32 0.5, %v1732_v51  ;;  %1185 = vst.msk [vmem:[%s2099_s14 + $0x80] sm:$0xff] %vm1168_vm1, %v1120_v47  ;;  %1749 = vtanh.f32 %v877_v40 }
 0x126   : > { %v1736_v56 = vpop.eup %1735  ;;  %v1152_v57 = vmul.f32 0.5, %v1734_v54  ;;  %1188 = vst.msk [vmem:[%s2099_s14 + $0x98] sm:$0xff] %vm1168_vm1, %v1123_v52  ;;  %1751 = vtanh.f32 %v1005_v48 }
 0x127   : > { %v1738_v58 = vpop.eup %1737  ;;  %1219 = vst.msk [vmem:[%s2099_s14 + $0x190] sm:$0xff] %vm1168_vm1, %v1154_v55  ;;  %v1155_v59 = vmul.f32 0.5, %v1736_v56  ;;  %1753 = vtanh.f32 %v869_v49  ;;  %v1593_v60 = vpop.f32.mrb[24].mxu0 }
 0x128   : > { %v1740_v61 = vpop.eup %1739  ;;  %1217 = vst.msk [vmem:[%s2099_s14 + $0x180] sm:$0xff] %vm1168_vm1, %v1152_v57  ;;  %v1121_v62 = vmul.f32 0.5, %v1738_v58  ;;  %1755 = vtanh.f32 %v997_v53  ;;  %v890_v63 = vadd.f32 %v1593_v60, %v2080_v2  ;;  %v881_v0 = vpop.f32.mrb[25].mxu0 }
 0x129   : > { %1220 = vst.msk [vmem:[%s2099_s14 + $0x198] sm:$0xff] %vm1168_vm1, %v1155_v59  ;;  %v1153_v1 = vmul.f32 0.5, %v1740_v61  ;;  %v1625_v3 = vpop.f32.mrb[24].mxu1  ;;  %v882_v4 = vadd.f32 %v2080_v2, %v881_v0  ;;  %v1594_v5 = vpop.f32.mrb[26].mxu0 }
 0x12a   : > { %1186 = vst.msk [vmem:[%s2099_s14 + $0x88] sm:$0xff] %vm1168_vm1, %v1121_v62  ;;  %1757 = vtanh.f32 %v890_v63  ;;  %v1018_v6 = vadd.f32 %v1625_v3, %v2080_v2  ;;  %v1009_v7 = vpop.f32.mrb[25].mxu1  ;;  %v893_v8 = vadd.f32 %v1594_v5, %v2080_v2  ;;  %v884_v9 = vpop.f32.mrb[27].mxu0 }
 0x12b   : > { %v1742_v10 = vpop.eup %1741  ;;  %1218 = vst.msk [vmem:[%s2099_s14 + $0x188] sm:$0xff] %vm1168_vm1, %v1153_v1  ;;  %1759 = vtanh.f32 %v882_v4  ;;  %v1010_v12 = vadd.f32 %v2080_v2, %v1009_v7  ;;  %v1626_v13 = vpop.f32.mrb[26].mxu1  ;;  %v885_v11 = vadd.f32 %v2080_v2, %v884_v9 }
 0x12c   : > { %v1744_v14 = vpop.eup %1743  ;;  %v1126_v15 = vmul.f32 0.5, %v1742_v10  ;;  %1761 = vtanh.f32 %v1018_v6  ;;  %v1021_v16 = vadd.f32 %v1626_v13, %v2080_v2  ;;  %v1012_v17 = vpop.f32.mrb[27].mxu1 }
 0x12d   : > { %v1746_v18 = vpop.eup %1745  ;;  %v1124_v19 = vmul.f32 0.5, %v1744_v14  ;;  %1763 = vtanh.f32 %v1010_v12  ;;  %v1013_v20 = vadd.f32 %v2080_v2, %v1012_v17 }
 0x12e   : > { %v1748_v21 = vpop.eup %1747  ;;  %1191 = vst.msk [vmem:[%s2099_s14 + $0xb0] sm:$0xff] %vm1168_vm1, %v1126_v15  ;;  %v1158_v22 = vmul.f32 0.5, %v1746_v18  ;;  %1765 = vtanh.f32 %v893_v8 }
 0x12f   : > { %v1750_v23 = vpop.eup %1749  ;;  %1189 = vst.msk [vmem:[%s2099_s14 + $0xa0] sm:$0xff] %vm1168_vm1, %v1124_v19  ;;  %v1156_v24 = vmul.f32 0.5, %v1748_v21  ;;  %1767 = vtanh.f32 %v1021_v16 }
 0x130   : > { %v1752_v25 = vpop.eup %1751  ;;  %1223 = vst.msk [vmem:[%s2099_s14 + $0x1b0] sm:$0xff] %vm1168_vm1, %v1158_v22  ;;  %v1127_v26 = vmul.f32 0.5, %v1750_v23  ;;  %1769 = vtanh.f32 %v885_v11  ;;  %v1597_v27 = vpop.f32.mrb[28].mxu0 }
 0x131   : > { %v1754_v28 = vpop.eup %1753  ;;  %1221 = vst.msk [vmem:[%s2099_s14 + $0x1a0] sm:$0xff] %vm1168_vm1, %v1156_v24  ;;  %v1159_v29 = vmul.f32 0.5, %v1752_v25  ;;  %1771 = vtanh.f32 %v1013_v20  ;;  %v906_v30 = vadd.f32 %v1597_v27, %v2080_v2  ;;  %v897_v31 = vpop.f32.mrb[29].mxu0 }
 0x132   : > { %v1756_v32 = vpop.eup %1755  ;;  %1192 = vst.msk [vmem:[%s2099_s14 + $0xb8] sm:$0xff] %vm1168_vm1, %v1127_v26  ;;  %v1125_v33 = vmul.f32 0.5, %v1754_v28  ;;  %v1629_v34 = vpop.f32.mrb[28].mxu1  ;;  %v898_v35 = vadd.f32 %v2080_v2, %v897_v31 }
 0x133   : > { %v1598_v36 = vpop.f32.mrb[30].mxu0  ;;  %1224 = vst.msk [vmem:[%s2099_s14 + $0x1b8] sm:$0xff] %vm1168_vm1, %v1159_v29  ;;  %v1157_v37 = vmul.f32 0.5, %v1756_v32  ;;  %1773 = vtanh.f32 %v906_v30  ;;  %v1034_v38 = vadd.f32 %v1629_v34, %v2080_v2  ;;  %v1025_v39 = vpop.f32.mrb[29].mxu1 }
 0x134   : > { %v909_v40 = vadd.f32 %v1598_v36, %v2080_v2  ;;  %v900_v41 = vpop.f32.mrb[31].mxu0  ;;  %v1758_v42 = vpop.eup %1757  ;;  %1190 = vst.msk [vmem:[%s2099_s14 + $0xa8] sm:$0xff] %vm1168_vm1, %v1125_v33  ;;  %1775 = vtanh.f32 %v898_v35  ;;  %v1026_v43 = vadd.f32 %v2080_v2, %v1025_v39 }
 0x135   : > { %v1630_v44 = vpop.f32.mrb[30].mxu1  ;;  %v1760_v45 = vpop.eup %1759  ;;  %1222 = vst.msk [vmem:[%s2099_s14 + $0x1a8] sm:$0xff] %vm1168_vm1, %v1157_v37  ;;  %v1130_v46 = vmul.f32 0.5, %v1758_v42  ;;  %1777 = vtanh.f32 %v1034_v38  ;;  %v901_v48 = vadd.f32 %v2080_v2, %v900_v41 }
 0x136   : > { %v1037_v47 = vadd.f32 %v1630_v44, %v2080_v2  ;;  %v1028_v49 = vpop.f32.mrb[31].mxu1  ;;  %v1762_v50 = vpop.eup %1761  ;;  %v1128_v51 = vmul.f32 0.5, %v1760_v45  ;;  %1779 = vtanh.f32 %v1026_v43 }
 0x137   : > { %v1029_v52 = vadd.f32 %v2080_v2, %v1028_v49  ;;  %v1764_v53 = vpop.eup %1763  ;;  %1195 = vst.msk [vmem:[%s2099_s14 + $0xd0] sm:$0xff] %vm1168_vm1, %v1130_v46  ;;  %v1162_v54 = vmul.f32 0.5, %v1762_v50  ;;  %1781 = vtanh.f32 %v909_v40 }
 0x138   : > { %v1766_v55 = vpop.eup %1765  ;;  %1193 = vst.msk [vmem:[%s2099_s14 + $0xc0] sm:$0xff] %vm1168_vm1, %v1128_v51  ;;  %v1160_v56 = vmul.f32 0.5, %v1764_v53  ;;  %1783 = vtanh.f32 %v1037_v47 }
 0x139   : > { %v1768_v57 = vpop.eup %1767  ;;  %1227 = vst.msk [vmem:[%s2099_s14 + $0x1d0] sm:$0xff] %vm1168_vm1, %v1162_v54  ;;  %v1131_v58 = vmul.f32 0.5, %v1766_v55  ;;  %1785 = vtanh.f32 %v901_v48 }
 0x13a   : > { %v1770_v2 = vpop.eup %1769  ;;  %1225 = vst.msk [vmem:[%s2099_s14 + $0x1c0] sm:$0xff] %vm1168_vm1, %v1160_v56  ;;  %v1163_v59 = vmul.f32 0.5, %v1768_v57  ;;  %1787 = vtanh.f32 %v1029_v52 }
 0x13b   : > { %v1772_v60 = vpop.eup %1771  ;;  %1196 = vst.msk [vmem:[%s2099_s14 + $0xd8] sm:$0xff] %vm1168_vm1, %v1131_v58  ;;  %v1129_v61 = vmul.f32 0.5, %v1770_v2 }
 0x13c   : > { %1228 = vst.msk [vmem:[%s2099_s14 + $0x1d8] sm:$0xff] %vm1168_vm1, %v1163_v59  ;;  %v1161_v62 = vmul.f32 0.5, %v1772_v60 }
 0x13d   : > { %v1774_v63 = vpop.eup %1773  ;;  %1194 = vst.msk [vmem:[%s2099_s14 + $0xc8] sm:$0xff] %vm1168_vm1, %v1129_v61 }
 0x13e   : > { %v1776_v0 = vpop.eup %1775  ;;  %1226 = vst.msk [vmem:[%s2099_s14 + $0x1c8] sm:$0xff] %vm1168_vm1, %v1161_v62  ;;  %v1134_v1 = vmul.f32 0.5, %v1774_v63 }
 0x13f   : > { %v1778_v3 = vpop.eup %1777  ;;  %v1132_v4 = vmul.f32 0.5, %v1776_v0 }
 0x140   : > { %v1780_v5 = vpop.eup %1779  ;;  %1199 = vst.msk [vmem:[%s2099_s14 + $0xf0] sm:$0xff] %vm1168_vm1, %v1134_v1  ;;  %v1166_v6 = vmul.f32 0.5, %v1778_v3 }
 0x141   : > { %v1782_v7 = vpop.eup %1781  ;;  %1197 = vst.msk [vmem:[%s2099_s14 + $0xe0] sm:$0xff] %vm1168_vm1, %v1132_v4  ;;  %v1164_v8 = vmul.f32 0.5, %v1780_v5 }
 0x142   : > { %v1784_v9 = vpop.eup %1783  ;;  %1231 = vst.msk [vmem:[%s2099_s14 + $0x1f0] sm:$0xff] %vm1168_vm1, %v1166_v6  ;;  %v1135_v10 = vmul.f32 0.5, %v1782_v7 }
 0x143   : > { %v1786_v12 = vpop.eup %1785  ;;  %1229 = vst.msk [vmem:[%s2099_s14 + $0x1e0] sm:$0xff] %vm1168_vm1, %v1164_v8  ;;  %v1167_v13 = vmul.f32 0.5, %v1784_v9 }
 0x144   : > { %v1788_v14 = vpop.eup %1787  ;;  %1200 = vst.msk [vmem:[%s2099_s14 + $0xf8] sm:$0xff] %vm1168_vm1, %v1135_v10  ;;  %v1133_v15 = vmul.f32 0.5, %v1786_v12 }
 0x145   : > { %1232 = vst.msk [vmem:[%s2099_s14 + $0x1f8] sm:$0xff] %vm1168_vm1, %v1167_v13  ;;  %v1165_v16 = vmul.f32 0.5, %v1788_v14 }
 0x146   : > { %1198 = vst.msk [vmem:[%s2099_s14 + $0xe8] sm:$0xff] %vm1168_vm1, %v1133_v15 }
 0x147   : > { %1230 = vst.msk [vmem:[%s2099_s14 + $0x1e8] sm:$0xff] %vm1168_vm1, %v1165_v16 }
 0x148 PF: > { %s15_s20 = sadd.s32 1, %s1811_s20   ;;  %s2295_s18 = smov %s1807_s19 }
 0x149   : > { %p12_p5 = scmp.ge.s32.totalorder %s15_s20, 4   ;;  %s2296_s19 = smov %s2298_s21 }
 0x14b   :  { %14 = sbr.rel (!%p12_p5) target bundleno = 2 (0x2), region = 70 }

// kernel: _forward_impl.5
= control target key start
LH: loop header
LB: loop body
LE: loop exit
PB: predicated region body
PF: predicated region fallthrough
CT: control target
= control target key end

     0   :  { %s3036_s21 = smov 0   ;;  %s3038_s22 = smov 0   ;;  %s4576_s0 = inlined_call_operand.vmem [shape: bf16[2,512,256], index: 0, kind: input, shape index: {}]   ;;  %s4577_s1 = inlined_call_operand.vmem [shape: f32[1,256], index: 1, kind: input, shape index: {}]   ;;  %s4578_s2 = inlined_call_operand.vmem [shape: f32[1,256], index: 2, kind: input, shape index: {}]   ;;  %s4579_s3 = inlined_call_operand.vmem [shape: bf16[256,64], index: 3, kind: input, shape index: {}]   ;;  %s4580_s4 = inlined_call_operand.vmem [shape: bf16[2,512,64], index: 4, kind: output, shape index: {0}]   ;;  %s4581_s5 = inlined_call_operand.vmem [shape: f32[2,1,1,64], index: 5, kind: output, shape index: {1}]   ;;  %s4582_s6 = inlined_call_operand.vmem [shape: f32[2,1,1,64], index: 6, kind: output, shape index: {2}]  }
   0x1   :  { %s3040_s23 = smov 0  }
   0x2 LB: > { %s29_s24 = sadd.s32 1, %s2994_s22  ;;  %p2750_p0 = scmp.ge.s32.totalorder %s2998_s23, 1  ;;  %s2998_s23 = sphi %s3040_s23, %s17_s23   ;;  %s2994_s22 = sphi %s3038_s22, %s4654_s22   ;;  %s2990_s21 = sphi %s3036_s21, %s4653_s21  }
   0x3   : > { %p31_p1 = scmp.ge.s32.totalorder %s29_s24, 2  ;;  %p243_p2 = scmp.lt.s32.totalorder %s2998_s23, 3 }
   0x5   : > { %s4656_s24 = smov (%p31_p1, %s29_s24), 0  ;;  %p244_p3 = pnand %p2750_p0, %p243_p2 }
   0x7   : > { %247 = sbr.rel (%p244_p3) target bundleno = 648 (0x288), region = 36 }
   0xe   : > { %v2960_v0 = vld [vmem:[%s4579_s3] sm:$0xff]   ;;  %v3000_v1 = vmov 0   ;;  %v2961_v2 = vld [vmem:[%s4579_s3 + $0x8] sm:$0xff]   ;;  %p295_p4 = scmp.lt.s32.totalorder %s2990_s21, 1  ;;  %v522_v3 = vlaneseq  ;;  %v2962_v4 = vld [vmem:[%s4579_s3 + $0x10] sm:$0xff]   ;;  %vm1665_vm0 = vcmask 519168  }
   0xf   : > { %1120 = vmatprep.subr.bf16.mxu0 %v3000_v1  ;;  %2903 = vmatprep.subr.bf16.mxu1 %v3000_v1  ;;  %v2963_v6 = vld [vmem:[%s4579_s3 + $0x18] sm:$0xff]   ;;  %v2964_v7 = vld [vmem:[%s4579_s3 + $0x20] sm:$0xff]   ;;  %v2965_v15 = vld [vmem:[%s4579_s3 + $0x28] sm:$0xff]   ;;  %vm2121_vm1 = vcmask 523264   ;;  %vm2583_vm3 = vcmask 516096  }
  0x10   : > { %1121 = vmatpush1.bf16.msra.mxu0 %v2960_v0  ;;  %2919 = vmatpush1.bf16.msra.mxu1 %v2960_v0  ;;  %s4658_s21 = smov (!%p295_p4, %s2990_s21), 1  ;;  %v3071_v5 = vshrl.u32 %v522_v3, 7  ;;  %v392_v11 = vld [vmem:[%s4577_s1] sm:$0x3]  ;;  %v2966_v20 = vld [vmem:[%s4579_s3 + $0x30] sm:$0xff]   ;;  %v2967_v25 = vld [vmem:[%s4579_s3 + $0x38] sm:$0xff]  }
  0x11   : > { %1122 = vmatprep.subr.bf16.mxu0 %v3000_v1  ;;  %2904 = vmatprep.subr.bf16.mxu1 %v3000_v1  ;;  %s2837_s9 = sshll.u32 %s4658_s21, 9  ;;  %v660_v14 = vld [vmem:[%s4578_s2] sm:$0x3]  ;;  %v2969_v38 = vld [vmem:[%s4579_s3 + $0x48] sm:$0xff]   ;;  %v2970_v54 = vld [vmem:[%s4579_s3 + $0x50] sm:$0xff]   ;;  %s320_s7 = scalar_lea.vmem %s4581_s5, %s4658_s21 }
  0x12   : > { %s3082_s12 = scalar_lea.vmem %s4576_s0, %s2837_s9  ;;  %v528_v8 = vsub.s32 1, %v3071_v5  ;;  %v524_v27 = vsub.s32 0, %v3071_v5  ;;  %v2968_v28 = vld [vmem:[%s4579_s3 + $0x40] sm:$0xff]   ;;  %s326_s10 = scalar_lea.vmem %s4582_s6, %s4658_s21 }
  0x13   : > { %v328_v9 = vld [vmem:[%s3082_s12] sm:$0xff]  ;;  %v329_v10 = vld [vmem:[%s3082_s12 + $0x8] sm:$0xff]  ;;  %v330_v29 = vld [vmem:[%s3082_s12 + $0x10] sm:$0xff] }
  0x14   : > { %1123 = vmatpush1.bf16.msra.mxu0 %v2961_v2  ;;  %2920 = vmatpush1.bf16.msra.mxu1 %v2961_v2  ;;  %v394_v12 = vunpack.c.h.bf16 %v328_v9  ;;  %v396_v13 = vunpack.c.h.bf16 %v329_v10  ;;  %v3101_v16 = vrot.slane %v392_v11, %v528_v8  ;;  %v3103_v17 = vrot.slane %v660_v14, %v528_v8  ;;  %v331_v30 = vld [vmem:[%s3082_s12 + $0x18] sm:$0xff]  ;;  %v332_v31 = vld [vmem:[%s3082_s12 + $0x20] sm:$0xff]  ;;  %v333_v32 = vld [vmem:[%s3082_s12 + $0x28] sm:$0xff] }
  0x15   : > { %1124 = vmatprep.subr.bf16.mxu0 %v3000_v1  ;;  %2905 = vmatprep.subr.bf16.mxu1 %v3000_v1  ;;  %v393_v33 = vunpack.c.l.bf16 %v328_v9  ;;  %v395_v34 = vunpack.c.l.bf16 %v329_v10  ;;  %v3130_v35 = vrot.slane %v392_v11, %v524_v27  ;;  %v398_v36 = vunpack.c.h.bf16 %v330_v29  ;;  %v334_v43 = vld [vmem:[%s3082_s12 + $0x30] sm:$0xff]  ;;  %v335_v44 = vld [vmem:[%s3082_s12 + $0x38] sm:$0xff] }
  0x16   : > { %v533_v18 = vmul.f32 %v3101_v16, %v394_v12  ;;  %v535_v19 = vmul.f32 %v3101_v16, %v396_v13  ;;  %v400_v37 = vunpack.c.h.bf16 %v331_v30  ;;  %v397_v39 = vunpack.c.l.bf16 %v330_v29 }
  0x17   : > { %v399_v40 = vunpack.c.l.bf16 %v331_v30  ;;  %v402_v41 = vunpack.c.h.bf16 %v332_v31  ;;  %v404_v42 = vunpack.c.h.bf16 %v333_v32  ;;  %v401_v45 = vunpack.c.l.bf16 %v332_v31 }
  0x18   : > { %1125 = vmatpush1.bf16.msra.mxu0 %v2962_v4  ;;  %2921 = vmatpush1.bf16.msra.mxu1 %v2962_v4  ;;  %v673_v21 = vadd.f32 %v3103_v17, %v533_v18  ;;  %v675_v22 = vadd.f32 %v3103_v17, %v535_v19  ;;  %v403_v46 = vunpack.c.l.bf16 %v333_v32  ;;  %v3139_v47 = vrot.slane %v660_v14, %v524_v27 }
  0x19   : > { %1126 = vmatprep.subr.bf16.mxu0 %v3000_v1  ;;  %2906 = vmatprep.subr.bf16.mxu1 %v3000_v1  ;;  %v532_v48 = vmul.f32 %v3130_v35, %v393_v33  ;;  %v534_v49 = vmul.f32 %v3130_v35, %v395_v34  ;;  %v537_v50 = vmul.f32 %v3101_v16, %v398_v36  ;;  %v406_v52 = vunpack.c.h.bf16 %v334_v43  ;;  %v360_v36 = vld [vmem:[%s3082_s12 + $0x100] sm:$0xff] }
  0x1a   : > { %v801_v23 = vmax.f32 %v673_v21, 0.0  ;;  %v803_v24 = vmax.f32 %v675_v22, 0.0  ;;  %v539_v51 = vmul.f32 %v3101_v16, %v400_v37  ;;  %v408_v53 = vunpack.c.h.bf16 %v335_v44  ;;  %v337_v21 = vld [vmem:[%s3082_s12 + $0x48] sm:$0xff] }
  0x1b   : > { %v536_v55 = vmul.f32 %v3130_v35, %v397_v39  ;;  %v538_v56 = vmul.f32 %v3130_v35, %v399_v40  ;;  %v541_v57 = vmul.f32 %v3101_v16, %v402_v41  ;;  %v543_v58 = vmul.f32 %v3101_v16, %v404_v42  ;;  %v338_v40 = vld [vmem:[%s3082_s12 + $0x50] sm:$0xff] }
  0x1c   : > { %1127 = vmatpush1.bf16.msra.mxu0 %v2963_v6  ;;  %2922 = vmatpush1.bf16.msra.mxu1 %v2963_v6  ;;  %v929_v26 = vpack.c.bf16 %v803_v24, %v801_v23  ;;  %v540_v59 = vmul.f32 %v3130_v35, %v401_v45  ;;  %v542_v60 = vmul.f32 %v3130_v35, %v403_v46  ;;  %v405_v63 = vunpack.c.l.bf16 %v334_v43  ;;  %v3191_v45 = vld [vmem:[%s3082_s12 + $0x58] sm:$0xff]  ;;  %v2973_v46 = vld [vmem:[%s4579_s3 + $0x68] sm:$0xff]  }
  0x1d   : > { %1128 = vmatprep.subr.bf16.mxu0 %v3000_v1  ;;  %2907 = vmatprep.subr.bf16.mxu1 %v3000_v1  ;;  %v672_v61 = vadd.f32 %v3139_v47, %v532_v48  ;;  %v674_v62 = vadd.f32 %v3139_v47, %v534_v49  ;;  %v407_v0 = vunpack.c.l.bf16 %v335_v44  ;;  %v677_v2 = vadd.f32 %v3103_v17, %v537_v50 }
  0x1e   : > { %1152 = vmatprep.mubr.bf16.mxu0 %v929_v26  ;;  %v679_v3 = vadd.f32 %v3103_v17, %v539_v51  ;;  %v545_v4 = vmul.f32 %v3101_v16, %v406_v52  ;;  %v547_v6 = vmul.f32 %v3101_v16, %v408_v53  ;;  %v676_v8 = vadd.f32 %v3139_v47, %v536_v55  ;;  %v2972_v26 = vld [vmem:[%s4579_s3 + $0x60] sm:$0xff]   ;;  %v361_v51 = vld [vmem:[%s3082_s12 + $0x108] sm:$0xff] }
  0x1f   : > { %v678_v9 = vadd.f32 %v3139_v47, %v538_v56  ;;  %v681_v10 = vadd.f32 %v3103_v17, %v541_v57  ;;  %v683_v11 = vadd.f32 %v3103_v17, %v543_v58  ;;  %v680_v12 = vadd.f32 %v3139_v47, %v540_v59 }
  0x20   : > { %1129 = vmatpush1.bf16.msra.mxu0 %v2964_v7  ;;  %2923 = vmatpush1.bf16.msra.mxu1 %v2964_v7  ;;  %v2971_v7 = vld [vmem:[%s4579_s3 + $0x58] sm:$0xff]   ;;  %v682_v13 = vadd.f32 %v3139_v47, %v542_v60  ;;  %v800_v14 = vmax.f32 %v672_v61, 0.0  ;;  %v544_v18 = vmul.f32 %v3130_v35, %v405_v63  ;;  %v546_v19 = vmul.f32 %v3130_v35, %v407_v0 }
  0x21   : > { %1130 = vmatprep.subr.bf16.mxu0 %v3000_v1  ;;  %2908 = vmatprep.subr.bf16.mxu1 %v3000_v1  ;;  %v805_v22 = vmax.f32 %v677_v2, 0.0  ;;  %v807_v23 = vmax.f32 %v679_v3, 0.0  ;;  %v685_v24 = vadd.f32 %v3103_v17, %v545_v4  ;;  %v804_v27 = vmax.f32 %v676_v8, 0.0  ;;  %v2974_v2 = vld [vmem:[%s4579_s3 + $0x70] sm:$0xff]  }
  0x22   : > { %v809_v29 = vmax.f32 %v681_v10, 0.0  ;;  %v811_v30 = vmax.f32 %v683_v11, 0.0  ;;  %v808_v31 = vmax.f32 %v680_v12, 0.0  ;;  %v810_v32 = vmax.f32 %v682_v13, 0.0 }
  0x23   : > { %v412_v34 = vunpack.c.h.bf16 %v337_v21  ;;  %v686_v39 = vadd.f32 %v3139_v47, %v546_v19  ;;  %v813_v41 = vmax.f32 %v685_v24, 0.0  ;;  %v411_v44 = vunpack.c.l.bf16 %v337_v21  ;;  %v2975_v24 = vld [vmem:[%s4579_s3 + $0x78] sm:$0xff]  }
  0x24   : > { %1131 = vmatpush1.bf16.msra.mxu0 %v2965_v15  ;;  %2924 = vmatpush1.bf16.msra.mxu1 %v2965_v15  ;;  %v802_v15 = vmax.f32 %v674_v62, 0.0  ;;  %v3197_v48 = vpack.c.bf16 %v807_v23, %v805_v22  ;;  %v3201_v50 = vpack.c.bf16 %v811_v30, %v809_v29  ;;  %v457_v52 = vunpack.c.l.bf16 %v360_v36  ;;  %v362_v22 = vld [vmem:[%s3082_s12 + $0x110] sm:$0xff]  ;;  %v363_v23 = vld [vmem:[%s3082_s12 + $0x118] sm:$0xff] }
  0x25   : > { %1132 = vmatprep.subr.bf16.mxu0 %v3000_v1  ;;  %2909 = vmatprep.subr.bf16.mxu1 %v3000_v1  ;;  %v3205_v53 = vpack.c.bf16 %v810_v32, %v808_v31  ;;  %v551_v55 = vmul.f32 %v3101_v16, %v412_v34  ;;  %v414_v56 = vunpack.c.h.bf16 %v338_v40  ;;  %v814_v58 = vmax.f32 %v686_v39, 0.0  ;;  %v340_v34 = vld [vmem:[%s3082_s12 + $0x60] sm:$0xff] }
  0x26   : > { %v3185_v37 = vpack.c.bf16 %v802_v15, %v800_v14  ;;  %v416_v59 = vunpack.c.h.bf16 %v3191_v45  ;;  %v458_v60 = vunpack.c.h.bf16 %v360_v36  ;;  %v550_v63 = vmul.f32 %v3130_v35, %v411_v44 }
  0x27   : > { %v459_v0 = vunpack.c.l.bf16 %v361_v51  ;;  %v413_v3 = vunpack.c.l.bf16 %v338_v40  ;;  %v460_v4 = vunpack.c.h.bf16 %v361_v51  ;;  %v553_v10 = vmul.f32 %v3101_v16, %v414_v56 }
  0x28   : > { %1133 = vmatpush1.bf16.msra.mxu0 %v2966_v20  ;;  %2925 = vmatpush1.bf16.msra.mxu1 %v2966_v20  ;;  %v336_v20 = vld [vmem:[%s3082_s12 + $0x40] sm:$0xff]  ;;  %v555_v12 = vmul.f32 %v3101_v16, %v416_v59  ;;  %v690_v19 = vadd.f32 %v3139_v47, %v550_v63  ;;  %v464_v39 = vunpack.c.h.bf16 %v363_v23  ;;  %v463_v56 = vunpack.c.l.bf16 %v363_v23  ;;  %v341_v59 = vld [vmem:[%s3082_s12 + $0x68] sm:$0xff] }
  0x29   : > { %1134 = vmatprep.subr.bf16.mxu0 %v3000_v1  ;;  %2910 = vmatprep.subr.bf16.mxu1 %v3000_v1  ;;  %v410_v33 = vunpack.c.h.bf16 %v336_v20  ;;  %v409_v43 = vunpack.c.l.bf16 %v336_v20  ;;  %v598_v11 = vmul.f32 %v3130_v35, %v459_v0  ;;  %v599_v13 = vmul.f32 %v3101_v16, %v460_v4 }
  0x2a   : > { %v415_v20 = vunpack.c.l.bf16 %v3191_v45  ;;  %v603_v51 = vmul.f32 %v3101_v16, %v464_v39 }
  0x2b   : > { %v548_v62 = vmul.f32 %v3130_v35, %v409_v43  ;;  %v738_v21 = vadd.f32 %v3139_v47, %v598_v11  ;;  %v343_v11 = vld [vmem:[%s3082_s12 + $0x78] sm:$0xff] }
  0x2c   : > { %1135 = vmatpush1.bf16.msra.mxu0 %v2967_v25  ;;  %2926 = vmatpush1.bf16.msra.mxu1 %v2967_v25  ;;  %v687_v25 = vadd.f32 %v3103_v17, %v547_v6  ;;  %v597_v6 = vmul.f32 %v3101_v16, %v458_v60  ;;  %v554_v43 = vmul.f32 %v3130_v35, %v415_v20 }
  0x2d   : > { %1136 = vmatprep.subr.bf16.mxu0 %v3000_v1  ;;  %2911 = vmatprep.subr.bf16.mxu1 %v3000_v1  ;;  %v866_v32 = vmax.f32 %v738_v21, 0.0  ;;  %v743_v60 = vadd.f32 %v3103_v17, %v603_v51  ;;  %v366_v51 = vld [vmem:[%s3082_s12 + $0x130] sm:$0xff] }
  0x2e   : > { %v815_v42 = vmax.f32 %v687_v25, 0.0  ;;  %v737_v14 = vadd.f32 %v3103_v17, %v597_v6  ;;  %v694_v63 = vadd.f32 %v3139_v47, %v554_v43 }
  0x30   : > { %1137 = vmatpush1.bf16.msra.mxu0 %v2968_v28  ;;  %2927 = vmatpush1.bf16.msra.mxu1 %v2968_v28  ;;  %v806_v28 = vmax.f32 %v678_v9, 0.0  ;;  %v3210_v61 = vpack.c.bf16 %v815_v42, %v813_v41  ;;  %v691_v9 = vadd.f32 %v3103_v17, %v551_v55  ;;  %v818_v41 = vmax.f32 %v690_v19, 0.0 }
  0x31   : > { %1138 = vmatprep.subr.bf16.mxu0 %v3000_v1  ;;  %2912 = vmatprep.subr.bf16.mxu1 %v3000_v1  ;;  %v695_v42 = vadd.f32 %v3103_v17, %v555_v12  ;;  %v461_v55 = vunpack.c.l.bf16 %v362_v22 }
  0x32   : > { %v3199_v49 = vpack.c.bf16 %v806_v28, %v804_v27  ;;  %v739_v27 = vadd.f32 %v3103_v17, %v599_v13  ;;  %v865_v28 = vmax.f32 %v737_v14, 0.0  ;;  %v819_v30 = vmax.f32 %v691_v9, 0.0  ;;  %v365_v14 = vld [vmem:[%s3082_s12 + $0x128] sm:$0xff] }
  0x33   : > { %v600_v0 = vmul.f32 %v3130_v35, %v461_v55  ;;  %v871_v9 = vmax.f32 %v743_v60, 0.0 }
  0x34   : > { %1139 = vmatpush1.bf16.msra.mxu0 %v2969_v38  ;;  %2928 = vmatpush1.bf16.msra.mxu1 %v2969_v38  ;;  %v684_v38 = vadd.f32 %v3139_v47, %v544_v18  ;;  %v688_v18 = vadd.f32 %v3139_v47, %v548_v62  ;;  %v867_v36 = vmax.f32 %v739_v27, 0.0  ;;  %v823_v62 = vmax.f32 %v695_v42, 0.0 }
  0x35   : > { %1140 = vmatprep.subr.bf16.mxu0 %v3000_v1  ;;  %2913 = vmatprep.subr.bf16.mxu1 %v3000_v1  ;;  %v740_v12 = vadd.f32 %v3139_v47, %v600_v0  ;;  %v468_v27 = vunpack.c.h.bf16 %v365_v14  ;;  %v470_v0 = vunpack.c.h.bf16 %v366_v51 }
  0x36   : > { %v812_v57 = vmax.f32 %v684_v38, 0.0  ;;  %v462_v38 = vunpack.c.h.bf16 %v362_v22  ;;  %v816_v40 = vmax.f32 %v688_v18, 0.0  ;;  %v961_v45 = vpack.c.bf16 %v867_v36, %v865_v28 }
  0x37   : > { %v419_v18 = vunpack.c.l.bf16 %v341_v59  ;;  %v868_v22 = vmax.f32 %v740_v12, 0.0 }
  0x38   : > { %1141 = vmatpush1.bf16.msra.mxu0 %v2970_v54  ;;  %2929 = vmatpush1.bf16.msra.mxu1 %v2970_v54  ;;  %v549_v54 = vmul.f32 %v3101_v16, %v410_v33  ;;  %v3239_v25 = vpack.c.bf16 %v814_v58, %v812_v57  ;;  %v693_v33 = vadd.f32 %v3103_v17, %v553_v10  ;;  %v420_v10 = vunpack.c.h.bf16 %v341_v59 }
  0x39   : > { %1142 = vmatprep.subr.bf16.mxu0 %v3000_v1  ;;  %2914 = vmatprep.subr.bf16.mxu1 %v3000_v1  ;;  %v3265_v4 = vpack.c.bf16 %v818_v41, %v816_v40 }
  0x3a   : > { %v689_v8 = vadd.f32 %v3103_v17, %v549_v54  ;;  %v821_v58 = vmax.f32 %v693_v33, 0.0  ;;  %1280 = vmatprep.mubr.bf16.mxu1 %v961_v45  ;;  %v558_v33 = vmul.f32 %v3130_v35, %v419_v18  ;;  %v469_v18 = vunpack.c.l.bf16 %v366_v51 }
  0x3c   : > { %1143 = vmatpush1.bf16.msra.mxu0 %v2971_v7  ;;  %2930 = vmatpush1.bf16.msra.mxu1 %v2971_v7  ;;  %v596_v7 = vmul.f32 %v3130_v35, %v457_v52  ;;  %v817_v29 = vmax.f32 %v689_v8, 0.0  ;;  %v418_v52 = vunpack.c.h.bf16 %v340_v34  ;;  %v3274_v20 = vpack.c.bf16 %v823_v62, %v821_v58 }
  0x3d   : > { %1144 = vmatprep.subr.bf16.mxu0 %v3000_v1  ;;  %2915 = vmatprep.subr.bf16.mxu1 %v3000_v1 }
  0x3e   : > { %v736_v15 = vadd.f32 %v3139_v47, %v596_v7  ;;  %v3254_v57 = vpack.c.bf16 %v819_v30, %v817_v29  ;;  %v342_v7 = vld [vmem:[%s3082_s12 + $0x70] sm:$0xff]  ;;  %v559_v29 = vmul.f32 %v3101_v16, %v420_v10  ;;  %v344_v10 = vld [vmem:[%s3082_s12 + $0x80] sm:$0xff] }
  0x3f   : > { %v422_v21 = vunpack.c.h.bf16 %v342_v7  ;;  %v421_v41 = vunpack.c.l.bf16 %v342_v7 }
  0x40   : > { %1145 = vmatpush1.bf16.msra.mxu0 %v2972_v26  ;;  %2931 = vmatpush1.bf16.msra.mxu1 %v2972_v26  ;;  %v552_v26 = vmul.f32 %v3130_v35, %v413_v3  ;;  %v864_v31 = vmax.f32 %v736_v15, 0.0  ;;  %v364_v3 = vld [vmem:[%s3082_s12 + $0x120] sm:$0xff]  ;;  %v557_v15 = vmul.f32 %v3101_v16, %v418_v52 }
  0x41   : > { %1146 = vmatprep.subr.bf16.mxu0 %v3000_v1  ;;  %2916 = vmatprep.subr.bf16.mxu1 %v3000_v1  ;;  %v466_v19 = vunpack.c.h.bf16 %v364_v3  ;;  %v561_v40 = vmul.f32 %v3101_v16, %v422_v21  ;;  %v560_v62 = vmul.f32 %v3130_v35, %v421_v41  ;;  %v369_v41 = vld [vmem:[%s3082_s12 + $0x148] sm:$0xff] }
  0x42   : > { %v3250_v44 = vadd.f32 %v3139_v47, %v552_v26  ;;  %v960_v54 = vpack.c.bf16 %v866_v32, %v864_v31  ;;  %v424_v26 = vunpack.c.h.bf16 %v343_v11  ;;  %v465_v32 = vunpack.c.l.bf16 %v364_v3 }
  0x43   : > { %v605_v28 = vmul.f32 %v3101_v16, %v466_v19  ;;  %v697_v39 = vadd.f32 %v3103_v17, %v557_v15 }
  0x44   : > { %1147 = vmatpush1.bf16.msra.mxu0 %v2973_v46  ;;  %2932 = vmatpush1.bf16.msra.mxu1 %v2973_v46  ;;  %v601_v46 = vmul.f32 %v3101_v16, %v462_v38  ;;  %v820_v6 = vmax.f32 %v3250_v44, 0.0  ;;  %v467_v38 = vunpack.c.l.bf16 %v365_v14  ;;  %v604_v42 = vmul.f32 %v3130_v35, %v465_v32  ;;  %v345_v14 = vld [vmem:[%s3082_s12 + $0x88] sm:$0xff] }
  0x45   : > { %1148 = vmatprep.subr.bf16.mxu0 %v3000_v1  ;;  %2917 = vmatprep.subr.bf16.mxu1 %v3000_v1  ;;  %v745_v36 = vadd.f32 %v3103_v17, %v605_v28  ;;  %v563_v43 = vmul.f32 %v3101_v16, %v424_v26  ;;  %v825_v60 = vmax.f32 %v697_v39, 0.0  ;;  %v426_v26 = vunpack.c.h.bf16 %v344_v10 }
  0x46   : > { %v744_v55 = vadd.f32 %v3139_v47, %v604_v42  ;;  %v428_v28 = vunpack.c.h.bf16 %v345_v14 }
  0x47   : > { %v873_v45 = vmax.f32 %v745_v36, 0.0  ;;  %v703_v3 = vadd.f32 %v3103_v17, %v563_v43  ;;  %v565_v51 = vmul.f32 %v3101_v16, %v426_v26 }
  0x48   : > { %1149 = vmatpush1.bf16.msra.mxu0 %v2974_v2  ;;  %2933 = vmatpush1.bf16.msra.mxu1 %v2974_v2  ;;  %v602_v2 = vmul.f32 %v3130_v35, %v463_v56  ;;  %v423_v56 = vunpack.c.l.bf16 %v343_v11  ;;  %v609_v11 = vmul.f32 %v3101_v16, %v470_v0 }
  0x49   : > { %1150 = vmatprep.subr.bf16.mxu0 %v3000_v1  ;;  %2918 = vmatprep.subr.bf16.mxu1 %v3000_v1  ;;  %v741_v1 = vadd.f32 %v3103_v17, %v601_v46  ;;  %v606_v46 = vmul.f32 %v3130_v35, %v467_v38  ;;  %v427_v38 = vunpack.c.l.bf16 %v345_v14 }
  0x4a   : > { %v742_v13 = vadd.f32 %v3139_v47, %v602_v2  ;;  %v701_v2 = vadd.f32 %v3103_v17, %v561_v40  ;;  %v749_v21 = vadd.f32 %v3103_v17, %v609_v11 }
  0x4b   : > { %v869_v8 = vmax.f32 %v741_v1, 0.0  ;;  %v746_v59 = vadd.f32 %v3139_v47, %v606_v46  ;;  %v367_v1 = vld [vmem:[%s3082_s12 + $0x138] sm:$0xff] }
  0x4c   : > { %1151 = vmatpush1.bf16.msra.mxu0 %v2975_v24  ;;  %2934 = vmatpush1.bf16.msra.mxu1 %v2975_v24  ;;  %v870_v23 = vmax.f32 %v742_v13, 0.0  ;;  %v822_v24 = vmax.f32 %v694_v63, 0.0  ;;  %v872_v63 = vmax.f32 %v744_v55, 0.0  ;;  %v562_v13 = vmul.f32 %v3130_v35, %v423_v56 }
  0x4d   : > { %v874_v7 = vmax.f32 %v746_v59, 0.0  ;;  %v476_v59 = vunpack.c.h.bf16 %v369_v41 }
  0x4e   : > { %v962_v31 = vpack.c.bf16 %v870_v23, %v868_v22  ;;  %v3291_v52 = vpack.c.bf16 %v822_v24, %v820_v6  ;;  %v471_v22 = vunpack.c.l.bf16 %v367_v1  ;;  %v829_v23 = vmax.f32 %v701_v2, 0.0 }
  0x4f   : > { %1153 = vmatmul.mubr.bf16.vlgmr.msra.gmra.mrb[0].mxu0 %v3185_v37  ;;  %v417_v37 = vunpack.c.l.bf16 %v340_v34  ;;  %1281 = vmatmul.mubr.bf16.vlgmr.msra.gmra.mrb[0].mxu1 %v960_v54  ;;  %v607_v34 = vmul.f32 %v3101_v16, %v468_v27  ;;  %v964_v15 = vpack.c.bf16 %v874_v7, %v872_v63  ;;  %v831_v24 = vmax.f32 %v703_v3, 0.0 }
  0x50   : > { %1160 = vmatprep.mubr.bf16.mxu0 %v3197_v48  ;;  %v963_v48 = vpack.c.bf16 %v871_v9, %v869_v8  ;;  %v608_v27 = vmul.f32 %v3130_v35, %v469_v18  ;;  %v615_v3 = vmul.f32 %v3101_v16, %v476_v59  ;;  %v475_v7 = vunpack.c.l.bf16 %v369_v41 }
  0x51   : > { %v556_v30 = vmul.f32 %v3130_v35, %v417_v37  ;;  %v747_v44 = vadd.f32 %v3103_v17, %v607_v34  ;;  %v472_v37 = vunpack.c.h.bf16 %v367_v1  ;;  %v3323_v42 = vpack.c.bf16 %v831_v24, %v829_v23  ;;  %v371_v24 = vld [vmem:[%s3082_s12 + $0x158] sm:$0xff] }
  0x52   : > { %1288 = vmatprep.mubr.bf16.mxu1 %v963_v48  ;;  %v700_v48 = vadd.f32 %v3139_v47, %v560_v62  ;;  %v748_v34 = vadd.f32 %v3139_v47, %v608_v27  ;;  %v755_v11 = vadd.f32 %v3103_v17, %v615_v3 }
  0x53   : > { %v696_v54 = vadd.f32 %v3139_v47, %v556_v30  ;;  %v875_v58 = vmax.f32 %v747_v44, 0.0  ;;  %v611_v19 = vmul.f32 %v3101_v16, %v472_v37  ;;  %v610_v30 = vmul.f32 %v3130_v35, %v471_v22  ;;  %v346_v44 = vld [vmem:[%s3082_s12 + $0x90] sm:$0xff] }
  0x54   : > { %v828_v43 = vmax.f32 %v700_v48, 0.0  ;;  %v430_v62 = vunpack.c.h.bf16 %v346_v44  ;;  %v883_v22 = vmax.f32 %v755_v11, 0.0  ;;  %v350_v11 = vld [vmem:[%s3082_s12 + $0xb0] sm:$0xff] }
  0x55   : > { %v965_v6 = vpack.c.bf16 %v875_v58, %v873_v45  ;;  %v824_v9 = vmax.f32 %v696_v54, 0.0  ;;  %v750_v40 = vadd.f32 %v3139_v47, %v610_v30  ;;  %v876_v45 = vmax.f32 %v748_v34, 0.0  ;;  %v347_v54 = vld [vmem:[%s3082_s12 + $0x98] sm:$0xff] }
  0x56   : > { %v432_v2 = vunpack.c.h.bf16 %v347_v54  ;;  %v431_v37 = vunpack.c.l.bf16 %v347_v54  ;;  %v479_v54 = vunpack.c.l.bf16 %v371_v24 }
  0x57   : > { %1161 = vmatmul.mubr.bf16.gmra.mrb[4].mxu0 %v3199_v49  ;;  %v699_v49 = vadd.f32 %v3103_v17, %v559_v29  ;;  %1289 = vmatmul.mubr.bf16.gmra.mrb[4].mxu1 %v962_v31  ;;  %v877_v29 = vmax.f32 %v749_v21, 0.0  ;;  %v368_v31 = vld [vmem:[%s3082_s12 + $0x140] sm:$0xff] }
  0x58   : > { %1168 = vmatprep.mubr.bf16.mxu0 %v3201_v50  ;;  %v698_v50 = vadd.f32 %v3139_v47, %v558_v33  ;;  %1296 = vmatprep.mubr.bf16.mxu1 %v965_v6  ;;  %v425_v33 = vunpack.c.l.bf16 %v344_v10  ;;  %v474_v46 = vunpack.c.h.bf16 %v368_v31  ;;  %v473_v0 = vunpack.c.l.bf16 %v368_v31  ;;  %v348_v31 = vld [vmem:[%s3082_s12 + $0xa0] sm:$0xff] }
  0x59   : > { %v827_v8 = vmax.f32 %v699_v49, 0.0  ;;  %v567_v49 = vmul.f32 %v3101_v16, %v428_v28  ;;  %v571_v21 = vmul.f32 %v3101_v16, %v432_v2  ;;  %v570_v30 = vmul.f32 %v3130_v35, %v431_v37 }
  0x5a   : > { %v826_v12 = vmax.f32 %v698_v50, 0.0  ;;  %v878_v50 = vmax.f32 %v750_v40, 0.0  ;;  %v564_v58 = vmul.f32 %v3130_v35, %v425_v33  ;;  %v613_v1 = vmul.f32 %v3101_v16, %v474_v46 }
  0x5b   : > { %v3315_v32 = vpack.c.bf16 %v827_v8, %v825_v60  ;;  %v566_v60 = vmul.f32 %v3130_v35, %v427_v38  ;;  %v705_v8 = vadd.f32 %v3103_v17, %v565_v51  ;;  %v612_v10 = vmul.f32 %v3130_v35, %v473_v0 }
  0x5c   : > { %v3319_v36 = vpack.c.bf16 %v826_v12, %v824_v9  ;;  %v966_v63 = vpack.c.bf16 %v878_v50, %v876_v45  ;;  %v753_v6 = vadd.f32 %v3103_v17, %v613_v1  ;;  %v707_v9 = vadd.f32 %v3103_v17, %v567_v49 }
  0x5d   : > { %v706_v18 = vadd.f32 %v3139_v47, %v566_v60  ;;  %v752_v48 = vadd.f32 %v3139_v47, %v612_v10  ;;  %v833_v26 = vmax.f32 %v705_v8, 0.0  ;;  %v434_v51 = vunpack.c.h.bf16 %v348_v31 }
  0x5e   : > { %v881_v12 = vmax.f32 %v753_v6, 0.0  ;;  %v835_v27 = vmax.f32 %v707_v9, 0.0  ;;  %v618_v60 = vmul.f32 %v3130_v35, %v479_v54  ;;  %v433_v2 = vunpack.c.l.bf16 %v348_v31 }
  0x5f   : > { %1169 = vmatmul.mubr.bf16.gmra.mrb[8].mxu0 %v3205_v53  ;;  %1297 = vmatmul.mubr.bf16.gmra.mrb[8].mxu1 %v964_v15  ;;  %v751_v53 = vadd.f32 %v3103_v17, %v611_v19  ;;  %v704_v15 = vadd.f32 %v3139_v47, %v564_v58  ;;  %v569_v19 = vmul.f32 %v3101_v16, %v430_v62  ;;  %v880_v28 = vmax.f32 %v752_v48, 0.0  ;;  %v372_v62 = vld [vmem:[%s3082_s12 + $0x160] sm:$0xff] }
  0x60   : > { %1176 = vmatprep.mubr.bf16.mxu0 %v3210_v61  ;;  %v702_v61 = vadd.f32 %v3139_v47, %v562_v13  ;;  %v370_v13 = vld [vmem:[%s3082_s12 + $0x150] sm:$0xff]  ;;  %v834_v38 = vmax.f32 %v706_v18, 0.0  ;;  %v758_v9 = vadd.f32 %v3139_v47, %v618_v60  ;;  %v351_v18 = vld [vmem:[%s3082_s12 + $0xb8] sm:$0xff] }
  0x61   : > { %v879_v39 = vmax.f32 %v751_v53, 0.0  ;;  %v478_v53 = vunpack.c.h.bf16 %v370_v13  ;;  %v832_v34 = vmax.f32 %v704_v15, 0.0  ;;  %v709_v41 = vadd.f32 %v3103_v17, %v569_v19 }
  0x62   : > { %v830_v56 = vmax.f32 %v702_v61, 0.0  ;;  %v969_v61 = vpack.c.bf16 %v883_v22, %v881_v12  ;;  %v477_v46 = vunpack.c.l.bf16 %v370_v13  ;;  %v886_v19 = vmax.f32 %v758_v9, 0.0 }
  0x63   : > { %v967_v55 = vpack.c.bf16 %v879_v39, %v877_v29  ;;  %v480_v39 = vunpack.c.h.bf16 %v371_v24  ;;  %v617_v40 = vmul.f32 %v3101_v16, %v478_v53  ;;  %v3371_v6 = vpack.c.bf16 %v834_v38, %v832_v34 }
  0x64   : > { %v3342_v14 = vpack.c.bf16 %v830_v56, %v828_v43  ;;  %v711_v43 = vadd.f32 %v3103_v17, %v571_v21  ;;  %v616_v56 = vmul.f32 %v3130_v35, %v477_v46  ;;  %v572_v22 = vmul.f32 %v3130_v35, %v433_v2 }
  0x65   : > { %1304 = vmatprep.mubr.bf16.mxu1 %v967_v55  ;;  %v619_v49 = vmul.f32 %v3101_v16, %v480_v39  ;;  %v3362_v55 = vpack.c.bf16 %v835_v27, %v833_v26  ;;  %v438_v27 = vunpack.c.h.bf16 %v350_v11  ;;  %v440_v53 = vunpack.c.h.bf16 %v351_v18 }
  0x66   : > { %v839_v0 = vmax.f32 %v711_v43, 0.0  ;;  %v756_v3 = vadd.f32 %v3139_v47, %v616_v56  ;;  %v712_v38 = vadd.f32 %v3139_v47, %v572_v22  ;;  %v374_v43 = vld [vmem:[%s3082_s12 + $0x170] sm:$0xff]  ;;  %v437_v46 = vunpack.c.l.bf16 %v350_v11  ;;  %v375_v56 = vld [vmem:[%s3082_s12 + $0x178] sm:$0xff] }
  0x67   : > { %1177 = vmatmul.mubr.bf16.gmra.mrb[12].mxu0 %v3239_v25  ;;  %v429_v25 = vunpack.c.l.bf16 %v346_v44  ;;  %1305 = vmatmul.mubr.bf16.gmra.mrb[12].mxu1 %v966_v63  ;;  %v349_v44 = vld [vmem:[%s3082_s12 + $0xa8] sm:$0xff]  ;;  %v759_v59 = vadd.f32 %v3103_v17, %v619_v49  ;;  %v837_v63 = vmax.f32 %v709_v41, 0.0  ;;  %v439_v54 = vunpack.c.l.bf16 %v351_v18 }
  0x68   : > { %1184 = vmatprep.mubr.bf16.mxu0 %v3254_v57  ;;  %v614_v57 = vmul.f32 %v3130_v35, %v475_v7  ;;  %1312 = vmatprep.mubr.bf16.mxu1 %v969_v61  ;;  %v436_v58 = vunpack.c.h.bf16 %v349_v44  ;;  %v573_v7 = vmul.f32 %v3101_v16, %v434_v51  ;;  %v884_v12 = vmax.f32 %v756_v3, 0.0  ;;  %v352_v51 = vld [vmem:[%s3082_s12 + $0xc0] sm:$0xff] }
  0x69   : > { %v568_v29 = vmul.f32 %v3130_v35, %v429_v25  ;;  %v887_v8 = vmax.f32 %v759_v59, 0.0  ;;  %v373_v25 = vld [vmem:[%s3082_s12 + $0x168] sm:$0xff]  ;;  %v435_v15 = vunpack.c.l.bf16 %v349_v44  ;;  %v3381_v21 = vpack.c.bf16 %v839_v0, %v837_v63 }
  0x6a   : > { %v754_v23 = vadd.f32 %v3139_v47, %v614_v57  ;;  %v482_v57 = vunpack.c.h.bf16 %v372_v62  ;;  %v575_v13 = vmul.f32 %v3101_v16, %v436_v58  ;;  %v713_v26 = vadd.f32 %v3103_v17, %v573_v7  ;;  %v353_v63 = vld [vmem:[%s3082_s12 + $0xc8] sm:$0xff] }
  0x6b   : > { %v708_v50 = vadd.f32 %v3139_v47, %v568_v29  ;;  %v486_v60 = vunpack.c.h.bf16 %v374_v43  ;;  %v442_v0 = vunpack.c.h.bf16 %v352_v51  ;;  %v488_v9 = vunpack.c.h.bf16 %v375_v56 }
  0x6c   : > { %v882_v33 = vmax.f32 %v754_v23, 0.0  ;;  %v484_v23 = vunpack.c.h.bf16 %v373_v25  ;;  %v621_v24 = vmul.f32 %v3101_v16, %v482_v57  ;;  %v715_v61 = vadd.f32 %v3103_v17, %v575_v13 }
  0x6d   : > { %v836_v10 = vmax.f32 %v708_v50, 0.0  ;;  %v841_v44 = vmax.f32 %v713_v26, 0.0  ;;  %v444_v11 = vunpack.c.h.bf16 %v353_v63  ;;  %v487_v13 = vunpack.c.l.bf16 %v375_v56 }
  0x6e   : > { %v968_v45 = vpack.c.bf16 %v882_v33, %v880_v28  ;;  %v481_v28 = vunpack.c.l.bf16 %v372_v62  ;;  %v623_v29 = vmul.f32 %v3101_v16, %v484_v23  ;;  %v574_v33 = vmul.f32 %v3130_v35, %v435_v15 }
  0x6f   : > { %1185 = vmatmul.mubr.bf16.gmra.mrb[16].mxu0 %v3265_v4  ;;  %v757_v4 = vadd.f32 %v3103_v17, %v617_v40  ;;  %v843_v58 = vmax.f32 %v715_v61, 0.0  ;;  %v840_v62 = vmax.f32 %v712_v38, 0.0  ;;  %v441_v22 = vunpack.c.l.bf16 %v352_v51 }
  0x70   : > { %1192 = vmatprep.mubr.bf16.mxu0 %v3274_v20  ;;  %v710_v20 = vadd.f32 %v3139_v47, %v570_v30  ;;  %1313 = vmatmul.mubr.bf16.gmra.mrb[16].mxu1 %v968_v45  ;;  %v483_v30 = vunpack.c.l.bf16 %v373_v25  ;;  %v620_v34 = vmul.f32 %v3130_v35, %v481_v28  ;;  %v763_v39 = vadd.f32 %v3103_v17, %v623_v29 }
  0x71   : > { %v885_v1 = vmax.f32 %v757_v4, 0.0  ;;  %v577_v45 = vmul.f32 %v3101_v16, %v438_v27  ;;  %v579_v4 = vmul.f32 %v3101_v16, %v440_v53  ;;  %v714_v59 = vadd.f32 %v3139_v47, %v574_v33  ;;  %v376_v27 = vld [vmem:[%s3082_s12 + $0x180] sm:$0xff] }
  0x72   : > { %v838_v37 = vmax.f32 %v710_v20, 0.0  ;;  %v622_v41 = vmul.f32 %v3130_v35, %v483_v30  ;;  %v760_v49 = vadd.f32 %v3139_v47, %v620_v34  ;;  %v891_v50 = vmax.f32 %v763_v39, 0.0  ;;  %v377_v34 = vld [vmem:[%s3082_s12 + $0x188] sm:$0xff] }
  0x73   : > { %v971_v48 = vpack.c.bf16 %v887_v8, %v885_v1  ;;  %v717_v7 = vadd.f32 %v3103_v17, %v577_v45  ;;  %v576_v8 = vmul.f32 %v3130_v35, %v437_v46  ;;  %v625_v25 = vmul.f32 %v3101_v16, %v486_v60 }
  0x74   : > { %v3388_v31 = vpack.c.bf16 %v838_v37, %v836_v10  ;;  %v762_v20 = vadd.f32 %v3139_v47, %v622_v41  ;;  %v888_v1 = vmax.f32 %v760_v49, 0.0  ;;  %v578_v10 = vmul.f32 %v3130_v35, %v439_v54 }
  0x75   : > { %1320 = vmatprep.mubr.bf16.mxu1 %v971_v48  ;;  %v765_v57 = vadd.f32 %v3103_v17, %v625_v25  ;;  %v3414_v15 = vpack.c.bf16 %v843_v58, %v841_v44  ;;  %v842_v18 = vmax.f32 %v714_v59, 0.0  ;;  %v581_v48 = vmul.f32 %v3101_v16, %v442_v0  ;;  %v379_v58 = vld [vmem:[%s3082_s12 + $0x198] sm:$0xff] }
  0x76   : > { %v890_v3 = vmax.f32 %v762_v20, 0.0  ;;  %v626_v26 = vmul.f32 %v3130_v35, %v487_v13  ;;  %v3422_v53 = vadd.f32 %v3139_v47, %v576_v8  ;;  %v583_v30 = vmul.f32 %v3101_v16, %v444_v11 }
  0x77   : > { %1193 = vmatmul.mubr.bf16.gmra.mrb[20].mxu0 %v3291_v52  ;;  %v970_v52 = vpack.c.bf16 %v886_v19, %v884_v12  ;;  %v627_v12 = vmul.f32 %v3101_v16, %v488_v9  ;;  %v3433_v38 = vpack.c.bf16 %v842_v18, %v840_v62  ;;  %v443_v39 = vunpack.c.l.bf16 %v353_v63 }
  0x78   : > { %1200 = vmatprep.mubr.bf16.mxu0 %v3315_v32  ;;  %v761_v32 = vadd.f32 %v3103_v17, %v621_v24  ;;  %v972_v37 = vpack.c.bf16 %v890_v3, %v888_v1  ;;  %v893_v24 = vmax.f32 %v765_v57, 0.0  ;;  %v766_v33 = vadd.f32 %v3139_v47, %v626_v26  ;;  %v3453_v1 = vld [vmem:[%s3082_s12 + $0xd0] sm:$0xff] }
  0x79   : > { %1321 = vmatmul.mubr.bf16.gmra.mrb[20].mxu1 %v970_v52  ;;  %v767_v23 = vadd.f32 %v3103_v17, %v627_v12  ;;  %v845_v52 = vmax.f32 %v717_v7, 0.0  ;;  %v490_v41 = vunpack.c.h.bf16 %v376_v27  ;;  %v844_v51 = vmax.f32 %v3422_v53, 0.0 }
  0x7a   : > { %v889_v40 = vmax.f32 %v761_v32, 0.0  ;;  %v3427_v32 = vadd.f32 %v3139_v47, %v578_v10  ;;  %v894_v45 = vmax.f32 %v766_v33, 0.0  ;;  %v492_v49 = vunpack.c.h.bf16 %v377_v34  ;;  %v380_v10 = vld [vmem:[%s3082_s12 + $0x1a0] sm:$0xff]  ;;  %v382_v33 = vld [vmem:[%s3082_s12 + $0x1b0] sm:$0xff] }
  0x7b   : > { %v895_v61 = vmax.f32 %v767_v23, 0.0  ;;  %v489_v56 = vunpack.c.l.bf16 %v376_v27  ;;  %v3450_v59 = vmul.f32 %v3130_v35, %v443_v39  ;;  %v491_v63 = vunpack.c.l.bf16 %v377_v34 }
  0x7c   : > { %v973_v2 = vpack.c.bf16 %v891_v50, %v889_v40  ;;  %v846_v54 = vmax.f32 %v3427_v32, 0.0  ;;  %v3446_v50 = vadd.f32 %v3103_v17, %v583_v30  ;;  %v631_v60 = vmul.f32 %v3101_v16, %v492_v49 }
  0x7d   : > { %v975_v44 = vpack.c.bf16 %v895_v61, %v893_v24  ;;  %v628_v3 = vmul.f32 %v3130_v35, %v489_v56  ;;  %v630_v25 = vmul.f32 %v3130_v35, %v491_v63  ;;  %v498_v24 = vunpack.c.h.bf16 %v380_v10 }
  0x7e   : > { %1328 = vmatprep.mubr.bf16.mxu1 %v973_v2  ;;  %v771_v8 = vadd.f32 %v3103_v17, %v631_v60  ;;  %v502_v60 = vunpack.c.h.bf16 %v382_v33 }
  0x7f   : > { %1201 = vmatmul.mubr.bf16.gmra.mrb[24].mxu0 %v3319_v36  ;;  %v719_v36 = vadd.f32 %v3103_v17, %v579_v4  ;;  %v378_v4 = vld [vmem:[%s3082_s12 + $0x190] sm:$0xff]  ;;  %v770_v13 = vadd.f32 %v3139_v47, %v630_v25  ;;  %v637_v61 = vmul.f32 %v3101_v16, %v498_v24  ;;  %v445_v25 = vunpack.c.l.bf16 %v3453_v1 }
  0x80   : > { %1208 = vmatprep.mubr.bf16.mxu0 %v3323_v42  ;;  %v485_v42 = vunpack.c.l.bf16 %v374_v43  ;;  %v580_v43 = vmul.f32 %v3130_v35, %v441_v22  ;;  %v494_v7 = vunpack.c.h.bf16 %v378_v4  ;;  %v493_v12 = vunpack.c.l.bf16 %v378_v4 }
  0x81   : > { %1329 = vmatmul.mubr.bf16.gmra.mrb[24].mxu1 %v972_v37  ;;  %v847_v28 = vmax.f32 %v719_v36, 0.0  ;;  %v496_v36 = vunpack.c.h.bf16 %v379_v58  ;;  %v446_v37 = vunpack.c.h.bf16 %v3453_v1  ;;  %v899_v57 = vmax.f32 %v771_v8, 0.0  ;;  %v3490_v8 = vld [vmem:[%s3082_s12 + $0x1c0] sm:$0xff] }
  0x82   : > { %v624_v19 = vmul.f32 %v3130_v35, %v485_v42  ;;  %1336 = vmatprep.mubr.bf16.mxu1 %v975_v44  ;;  %v3459_v2 = vadd.f32 %v3139_v47, %v580_v43  ;;  %v768_v42 = vadd.f32 %v3139_v47, %v628_v3  ;;  %v633_v11 = vmul.f32 %v3101_v16, %v494_v7  ;;  %v383_v43 = vld [vmem:[%s3082_s12 + $0x1b8] sm:$0xff]  ;;  %v356_v1 = vld [vmem:[%s3082_s12 + $0xe0] sm:$0xff] }
  0x83   : > { %v3439_v46 = vpack.c.bf16 %v847_v28, %v845_v52  ;;  %v635_v18 = vmul.f32 %v3101_v16, %v496_v36  ;;  %v632_v23 = vmul.f32 %v3130_v35, %v493_v12  ;;  %v898_v27 = vmax.f32 %v770_v13, 0.0  ;;  %v355_v44 = vld [vmem:[%s3082_s12 + $0xd8] sm:$0xff] }
  0x84   : > { %v764_v29 = vadd.f32 %v3139_v47, %v624_v19  ;;  %v381_v19 = vld [vmem:[%s3082_s12 + $0x1a8] sm:$0xff]  ;;  %v896_v22 = vmax.f32 %v768_v42, 0.0  ;;  %v504_v7 = vunpack.c.h.bf16 %v383_v43  ;;  %v501_v12 = vunpack.c.l.bf16 %v382_v33 }
  0x85   : > { %v500_v30 = vunpack.c.h.bf16 %v381_v19  ;;  %v499_v4 = vunpack.c.l.bf16 %v381_v19  ;;  %v851_v13 = vmax.f32 %v3446_v50, 0.0  ;;  %v722_v19 = vadd.f32 %v3139_v47, %v3450_v59 }
  0x86   : > { %v892_v40 = vmax.f32 %v764_v29, 0.0  ;;  %v772_v29 = vadd.f32 %v3139_v47, %v632_v23  ;;  %v976_v34 = vpack.c.bf16 %v898_v27, %v896_v22  ;;  %v585_v24 = vmul.f32 %v3101_v16, %v446_v37 }
  0x87   : > { %1209 = vmatmul.mubr.bf16.gmra.mrb[28].mxu0 %v3342_v14  ;;  %v3436_v14 = vadd.f32 %v3103_v17, %v581_v48  ;;  %v495_v48 = vunpack.c.l.bf16 %v379_v58  ;;  %v639_v49 = vmul.f32 %v3101_v16, %v500_v30  ;;  %v638_v3 = vmul.f32 %v3130_v35, %v499_v4 }
  0x88   : > { %1216 = vmatprep.mubr.bf16.mxu0 %v3362_v55  ;;  %v629_v55 = vmul.f32 %v3101_v16, %v490_v41  ;;  %v974_v20 = vpack.c.bf16 %v894_v45, %v892_v40  ;;  %v497_v41 = vunpack.c.l.bf16 %v380_v10  ;;  %v900_v45 = vmax.f32 %v772_v29, 0.0 }
  0x89   : > { %v849_v0 = vmax.f32 %v3436_v14, 0.0  ;;  %v634_v52 = vmul.f32 %v3130_v35, %v495_v48  ;;  %v641_v10 = vmul.f32 %v3101_v16, %v502_v60  ;;  %v778_v42 = vadd.f32 %v3139_v47, %v638_v3  ;;  %v357_v14 = vld [vmem:[%s3082_s12 + $0xe8] sm:$0xff] }
  0x8a   : > { %v769_v62 = vadd.f32 %v3103_v17, %v629_v55  ;;  %1337 = vmatmul.mubr.bf16.gmra.mrb[28].mxu1 %v974_v20  ;;  %v777_v55 = vadd.f32 %v3103_v17, %v637_v61  ;;  %v636_v58 = vmul.f32 %v3130_v35, %v497_v41  ;;  %v503_v48 = vunpack.c.l.bf16 %v383_v43  ;;  %v387_v41 = vld [vmem:[%s3082_s12 + $0x1d8] sm:$0xff] }
  0x8b   : > { %v774_v40 = vadd.f32 %v3139_v47, %v634_v52  ;;  %v447_v50 = vunpack.c.l.bf16 %v355_v44  ;;  %v640_v29 = vmul.f32 %v3130_v35, %v501_v12  ;;  %v950_v59 = vpack.c.bf16 %v846_v54, %v844_v51 }
  0x8c   : > { %v897_v9 = vmax.f32 %v769_v62, 0.0  ;;  %v779_v62 = vadd.f32 %v3103_v17, %v639_v49  ;;  %v905_v63 = vmax.f32 %v777_v55, 0.0  ;;  %v776_v36 = vadd.f32 %v3139_v47, %v636_v58 }
  0x8d   : > { %v902_v56 = vmax.f32 %v774_v40, 0.0  ;;  %v848_v30 = vmax.f32 %v3459_v2, 0.0  ;;  %v642_v37 = vmul.f32 %v3130_v35, %v503_v48  ;;  %v953_v33 = vpack.c.bf16 %v851_v13, %v849_v0  ;;  %v386_v40 = vld [vmem:[%s3082_s12 + $0x1d0] sm:$0xff] }
  0x8e   : > { %v977_v26 = vpack.c.bf16 %v899_v57, %v897_v9  ;;  %v448_v9 = vunpack.c.h.bf16 %v355_v44  ;;  %v385_v57 = vld [vmem:[%s3082_s12 + $0x1c8] sm:$0xff]  ;;  %v904_v52 = vmax.f32 %v776_v36, 0.0  ;;  %v850_v54 = vmax.f32 %v722_v19, 0.0 }
  0x8f   : > { %1217 = vmatmul.mubr.bf16.gmra.mrb[32].mxu0 %v3371_v6  ;;  %v773_v6 = vadd.f32 %v3103_v17, %v633_v11  ;;  %v643_v11 = vmul.f32 %v3101_v16, %v504_v7  ;;  %v508_v27 = vunpack.c.h.bf16 %v385_v57  ;;  %v725_v2 = vadd.f32 %v3103_v17, %v585_v24 }
  0x90   : > { %1224 = vmatprep.mubr.bf16.mxu0 %v3381_v21  ;;  %v775_v21 = vadd.f32 %v3103_v17, %v635_v18  ;;  %1344 = vmatprep.mubr.bf16.mxu1 %v977_v26  ;;  %v978_v18 = vpack.c.bf16 %v902_v56, %v900_v45  ;;  %v587_v26 = vmul.f32 %v3101_v16, %v448_v9  ;;  %v450_v0 = vunpack.c.h.bf16 %v356_v1 }
  0x91   : > { %v901_v28 = vmax.f32 %v773_v6, 0.0  ;;  %v781_v6 = vadd.f32 %v3103_v17, %v641_v10  ;;  %v783_v23 = vadd.f32 %v3103_v17, %v643_v11  ;;  %v647_v51 = vmul.f32 %v3101_v16, %v508_v27 }
  0x92   : > { %v903_v39 = vmax.f32 %v775_v21, 0.0  ;;  %1345 = vmatmul.mubr.bf16.gmra.mrb[32].mxu1 %v976_v34  ;;  %v584_v21 = vmul.f32 %v3130_v35, %v445_v25  ;;  %v727_v34 = vadd.f32 %v3103_v17, %v587_v26  ;;  %v780_v44 = vadd.f32 %v3139_v47, %v640_v29  ;;  %v358_v26 = vld [vmem:[%s3082_s12 + $0xf0] sm:$0xff] }
  0x93   : > { %v909_v53 = vmax.f32 %v781_v6, 0.0  ;;  %v911_v32 = vmax.f32 %v783_v23, 0.0  ;;  %v782_v45 = vadd.f32 %v3139_v47, %v642_v37  ;;  %v505_v49 = vunpack.c.l.bf16 %v3490_v8  ;;  %v3547_v6 = vld [vmem:[%s3082_s12 + $0x1e8] sm:$0xff] }
  0x94   : > { %v979_v20 = vpack.c.bf16 %v903_v39, %v901_v28  ;;  %v906_v28 = vmax.f32 %v778_v42, 0.0  ;;  %v586_v39 = vmul.f32 %v3130_v35, %v447_v50  ;;  %v507_v55 = vunpack.c.l.bf16 %v385_v57  ;;  %v359_v50 = vld [vmem:[%s3082_s12 + $0xf8] sm:$0xff] }
  0x95   : > { %v983_v4 = vpack.c.bf16 %v911_v32, %v909_v53  ;;  %v510_v56 = vunpack.c.h.bf16 %v386_v40  ;;  %v512_v58 = vunpack.c.h.bf16 %v387_v41  ;;  %v853_v60 = vmax.f32 %v725_v2, 0.0 }
  0x96   : > { %1352 = vmatprep.mubr.bf16.mxu1 %v979_v20  ;;  %v980_v43 = vpack.c.bf16 %v906_v28, %v904_v52  ;;  %v787_v20 = vadd.f32 %v3103_v17, %v647_v51  ;;  %v452_v3 = vunpack.c.h.bf16 %v357_v14  ;;  %v952_v7 = vpack.c.bf16 %v850_v54, %v848_v30 }
  0x97   : > { %1225 = vmatmul.mubr.bf16.gmra.mrb[36].mxu0 %v3388_v31  ;;  %v907_v31 = vmax.f32 %v779_v62, 0.0  ;;  %v855_v62 = vmax.f32 %v727_v34, 0.0  ;;  %v589_v25 = vmul.f32 %v3101_v16, %v450_v0  ;;  %v449_v36 = vunpack.c.l.bf16 %v356_v1 }
  0x98   : > { %1232 = vmatprep.mubr.bf16.mxu0 %v3414_v15  ;;  %v506_v15 = vunpack.c.h.bf16 %v3490_v8  ;;  %v908_v10 = vmax.f32 %v780_v44, 0.0  ;;  %v910_v8 = vmax.f32 %v782_v45, 0.0  ;;  %v646_v42 = vmul.f32 %v3130_v35, %v507_v55 }
  0x99   : > { %v981_v22 = vpack.c.bf16 %v907_v31, %v905_v63  ;;  %v726_v63 = vadd.f32 %v3139_v47, %v586_v39  ;;  %v644_v31 = vmul.f32 %v3130_v35, %v505_v49  ;;  %v915_v12 = vmax.f32 %v787_v20, 0.0  ;;  %v391_v20 = vld [vmem:[%s3082_s12 + $0x1f8] sm:$0xff] }
  0x9a   : > { %1353 = vmatmul.mubr.bf16.gmra.mrb[36].mxu1 %v978_v18  ;;  %v645_v61 = vmul.f32 %v3101_v16, %v506_v15  ;;  %v649_v57 = vmul.f32 %v3101_v16, %v510_v56  ;;  %v651_v13 = vmul.f32 %v3101_v16, %v512_v58  ;;  %v3543_v18 = vld [vmem:[%s3082_s12 + $0x1e0] sm:$0xff]  ;;  %v955_v48 = vpack.c.bf16 %v855_v62, %v853_v60 }
  0x9b   : > { %1360 = vmatprep.mubr.bf16.mxu1 %v981_v22  ;;  %v854_v15 = vmax.f32 %v726_v63, 0.0  ;;  %v591_v19 = vmul.f32 %v3101_v16, %v452_v3  ;;  %v451_v22 = vunpack.c.l.bf16 %v357_v14  ;;  %v729_v23 = vadd.f32 %v3103_v17, %v589_v25 }
  0x9c   : > { %v588_v24 = vmul.f32 %v3130_v35, %v449_v36  ;;  %v509_v27 = vunpack.c.l.bf16 %v386_v40  ;;  %v982_v52 = vpack.c.bf16 %v910_v8, %v908_v10  ;;  %v784_v28 = vadd.f32 %v3139_v47, %v644_v31 }
  0x9d   : > { %v786_v29 = vadd.f32 %v3139_v47, %v646_v42  ;;  %v789_v1 = vadd.f32 %v3103_v17, %v649_v57  ;;  %v791_v37 = vadd.f32 %v3103_v17, %v651_v13  ;;  %v590_v53 = vmul.f32 %v3130_v35, %v451_v22 }
  0x9e   : > { %v454_v32 = vunpack.c.h.bf16 %v358_v26  ;;  %v456_v51 = vunpack.c.h.bf16 %v359_v50  ;;  %v648_v2 = vmul.f32 %v3130_v35, %v509_v27  ;;  %v857_v39 = vmax.f32 %v729_v23, 0.0 }
  0x9f   : > { %1233 = vmatmul.mubr.bf16.gmra.mrb[40].mxu0 %v3433_v38  ;;  %v724_v38 = vadd.f32 %v3139_v47, %v584_v21  ;;  %v511_v21 = vunpack.c.l.bf16 %v387_v41  ;;  %v912_v40 = vmax.f32 %v784_v28, 0.0  ;;  %v914_v41 = vmax.f32 %v786_v29, 0.0 }
  0xa0   : > { %1240 = vmatprep.mubr.bf16.mxu0 %v3439_v46  ;;  %v785_v46 = vadd.f32 %v3103_v17, %v645_v61  ;;  %v516_v61 = vunpack.c.h.bf16 %v3547_v6  ;;  %v728_v14 = vadd.f32 %v3139_v47, %v588_v24  ;;  %v917_v0 = vmax.f32 %v789_v1, 0.0 }
  0xa1   : > { %v852_v9 = vmax.f32 %v724_v38, 0.0  ;;  %v650_v34 = vmul.f32 %v3130_v35, %v511_v21  ;;  %v593_v49 = vmul.f32 %v3101_v16, %v454_v32  ;;  %v595_v55 = vmul.f32 %v3101_v16, %v456_v51 }
  0xa2   : > { %1361 = vmatmul.mubr.bf16.gmra.mrb[40].mxu1 %v980_v43  ;;  %v913_v11 = vmax.f32 %v785_v46, 0.0  ;;  %v919_v43 = vmax.f32 %v791_v37, 0.0  ;;  %v655_v44 = vmul.f32 %v3101_v16, %v516_v61  ;;  %v730_v46 = vadd.f32 %v3139_v47, %v590_v53 }
  0xa3   : > { %1368 = vmatprep.mubr.bf16.mxu1 %v983_v4  ;;  %v954_v54 = vpack.c.bf16 %v854_v15, %v852_v9  ;;  %v390_v4 = vld [vmem:[%s3082_s12 + $0x1f0] sm:$0xff]  ;;  %v453_v56 = vunpack.c.l.bf16 %v358_v26  ;;  %v455_v58 = vunpack.c.l.bf16 %v359_v50  ;;  %v788_v60 = vadd.f32 %v3139_v47, %v648_v2  ;;  %s2838_s12 = sshll.u32 %s4658_s21, 8 }
  0xa4   : > { %v985_v30 = vpack.c.bf16 %v915_v12, %v913_v11  ;;  %v790_v62 = vadd.f32 %v3139_v47, %v650_v34  ;;  %v984_v63 = vpack.c.bf16 %v914_v41, %v912_v40  ;;  %v515_v9 = vunpack.c.l.bf16 %v3547_v6  ;;  %s3599_s28 = scalar_lea.vmem %s4580_s4, %s2838_s12 }
  0xa5   : > { %v987_v25 = vpack.c.bf16 %v919_v43, %v917_v0  ;;  %v795_v36 = vadd.f32 %v3103_v17, %v655_v44  ;;  %v518_v10 = vunpack.c.h.bf16 %v390_v4  ;;  %v520_v8 = vunpack.c.h.bf16 %v391_v20 }
  0xa6   : > { %v856_v42 = vmax.f32 %v728_v14, 0.0  ;;  %v733_v11 = vadd.f32 %v3103_v17, %v593_v49  ;;  %v735_v12 = vadd.f32 %v3103_v17, %v595_v55  ;;  %v858_v57 = vmax.f32 %v730_v46, 0.0 }
  0xa7   : > { %1241 = vmatmul.mubr.bf16.gmra.mrb[44].mxu0 %v950_v59  ;;  %v514_v59 = vunpack.c.h.bf16 %v3543_v18  ;;  %v592_v13 = vmul.f32 %v3130_v35, %v453_v56  ;;  %v918_v15 = vmax.f32 %v790_v62, 0.0  ;;  %v654_v22 = vmul.f32 %v3130_v35, %v515_v9 }
  0xa8   : > { %1248 = vmatprep.mubr.bf16.mxu0 %v953_v33  ;;  %v731_v33 = vadd.f32 %v3103_v17, %v591_v19  ;;  %v923_v23 = vmax.f32 %v795_v36, 0.0  ;;  %v657_v24 = vmul.f32 %v3101_v16, %v518_v10  ;;  %v659_v26 = vmul.f32 %v3101_v16, %v520_v8 }
  0xa9   : > { %v653_v38 = vmul.f32 %v3101_v16, %v514_v59  ;;  %v861_v50 = vmax.f32 %v733_v11, 0.0  ;;  %v863_v27 = vmax.f32 %v735_v12, 0.0  ;;  %v956_v21 = vpack.c.bf16 %v858_v57, %v856_v42 }
  0xaa   : > { %1369 = vmatmul.mubr.bf16.gmra.mrb[44].mxu1 %v982_v52  ;;  %v859_v45 = vmax.f32 %v731_v33, 0.0  ;;  %v732_v52 = vadd.f32 %v3139_v47, %v592_v13  ;;  %v794_v59 = vadd.f32 %v3139_v47, %v654_v22  ;;  %v519_v1 = vunpack.c.l.bf16 %v391_v20 }
  0xab   : > { %1376 = vmatprep.mubr.bf16.mxu1 %v985_v30  ;;  %v793_v3 = vadd.f32 %v3103_v17, %v653_v38  ;;  %v517_v30 = vunpack.c.l.bf16 %v390_v4  ;;  %v797_v33 = vadd.f32 %v3103_v17, %v657_v24  ;;  %v799_v16 = vadd.f32 %v3103_v17, %v659_v26 }
  0xac   : > { %v957_v31 = vpack.c.bf16 %v859_v45, %v857_v39  ;;  %v959_v53 = vpack.c.bf16 %v863_v27, %v861_v50  ;;  %v922_v51 = vmax.f32 %v794_v59, 0.0  ;;  %v658_v2 = vmul.f32 %v3130_v35, %v519_v1 }
  0xad   : > { %v921_v6 = vmax.f32 %v793_v3, 0.0  ;;  %v860_v34 = vmax.f32 %v732_v52, 0.0  ;;  %v925_v40 = vmax.f32 %v797_v33, 0.0  ;;  %v927_v41 = vmax.f32 %v799_v16, 0.0 }
  0xae   : > { %v798_v17 = vadd.f32 %v3139_v47, %v658_v2 }
  0xaf   : > { %1249 = vmatmul.mubr.bf16.gmra.mrb[48].mxu0 %v952_v7  ;;  %v513_v7 = vunpack.c.l.bf16 %v3543_v18  ;;  %v594_v18 = vmul.f32 %v3130_v35, %v455_v58  ;;  %v989_v61 = vpack.c.bf16 %v923_v23, %v921_v6  ;;  %v991_v43 = vpack.c.bf16 %v927_v41, %v925_v40 }
  0xb0   : > { %1256 = vmatprep.mubr.bf16.mxu0 %v955_v48  ;;  %v916_v48 = vmax.f32 %v788_v60, 0.0  ;;  %v926_v45 = vmax.f32 %v798_v17, 0.0 }
  0xb1   : > { %v652_v19 = vmul.f32 %v3130_v35, %v513_v7  ;;  %v734_v37 = vadd.f32 %v3139_v47, %v594_v18 }
  0xb2   : > { %1377 = vmatmul.mubr.bf16.gmra.mrb[48].mxu1 %v984_v63  ;;  %v986_v28 = vpack.c.bf16 %v918_v15, %v916_v48 }
  0xb3   : > { %1384 = vmatprep.mubr.bf16.mxu1 %v987_v25  ;;  %v792_v29 = vadd.f32 %v3139_v47, %v652_v19  ;;  %v862_v39 = vmax.f32 %v734_v37, 0.0 }
  0xb5   : > { %v920_v32 = vmax.f32 %v792_v29, 0.0  ;;  %v958_v0 = vpack.c.bf16 %v862_v39, %v860_v34 }
  0xb7   : > { %1257 = vmatmul.mubr.bf16.gmra.mrb[52].mxu0 %v954_v54  ;;  %v656_v54 = vmul.f32 %v3130_v35, %v517_v30  ;;  %v988_v38 = vpack.c.bf16 %v922_v51, %v920_v32 }
  0xb8   : > { %1264 = vmatprep.mubr.bf16.mxu0 %v957_v31 }
  0xb9   : > { %v796_v14 = vadd.f32 %v3139_v47, %v656_v54 }
  0xba   : > { %1385 = vmatmul.mubr.bf16.gmra.mrb[52].mxu1 %v986_v28 }
  0xbb   : > { %1392 = vmatprep.mubr.bf16.mxu1 %v989_v61  ;;  %v924_v44 = vmax.f32 %v796_v14, 0.0 }
  0xbd   : > { %v990_v35 = vpack.c.bf16 %v926_v45, %v924_v44 }
  0xbf   : > { %1265 = vmatmul.mubr.bf16.gmra.mrb[56].mxu0 %v956_v21 }
  0xc0   : > { %1272 = vmatprep.mubr.bf16.mxu0 %v959_v53 }
  0xc2   : > { %1393 = vmatmul.mubr.bf16.gmra.mrb[56].mxu1 %v988_v38 }
  0xc3   : > { %1400 = vmatprep.mubr.bf16.mxu1 %v991_v43 }
  0xc7   : > { %1273 = vmatmul.mubr.bf16.gmra.mrb[60].mxu0 %v958_v0 }
  0xca   : > { %1401 = vmatmul.mubr.bf16.gmra.mrb[60].mxu1 %v990_v35 }
 0x122   : > { %v3601_v46 = vpop.f32.mrb[0].mxu0  ;;  %v3607_v4 = vpop.f32.mrb[0].mxu1 }
 0x123   : > { %v2839_v47 = vpack.c.bf16 %v3601_v46, %v3601_v46  ;;  %v1156_v49 = vpop.f32.mrb[1].mxu0  ;;  %4600 = vst [vmem:[#allocation2_spill] sm:$0xff] %v3607_v4  ;;  %v2122_v20 = vsel %vm2121_vm1, %v3601_v46, 0.0  ;;  %v2871_v62 = vpack.c.bf16 %v3607_v4, %v3607_v4  ;;  %v1284_v63 = vpop.f32.mrb[1].mxu1 }
 0x124   : > { %v3605_v55 = vpop.f32.mrb[2].mxu0  ;;  %v3619_v7 = vpop.f32.mrb[2].mxu1 }
 0x125   : > { %1666 = vst.msk [vmem:[%s3599_s28] sm:$0xf] %vm1665_vm0, %v2839_v47  ;;  %v2840_v56 = vpack.c.bf16 %v3605_v55, %v3605_v55  ;;  %v2123_v58 = vsel %vm2121_vm1, %v3605_v55, 0.0  ;;  %v1159_v60 = vpop.f32.mrb[3].mxu0  ;;  %1698 = vst.msk [vmem:[%s3599_s28 + $0x80] sm:$0xf] %vm1665_vm0, %v2871_v62  ;;  %v2872_v9 = vpack.c.bf16 %v3619_v7, %v3619_v7 }
 0x126   : > { %v2124_v3 = vadd.f32 %v2123_v58, %v2122_v20  ;;  %v1287_v25 = vpop.f32.mrb[3].mxu1 }
 0x127   : > { %1667 = vst.msk [vmem:[%s3599_s28 + $0x4] sm:$0xf] %vm1665_vm0, %v2840_v56  ;;  %1699 = vst.msk [vmem:[%s3599_s28 + $0x84] sm:$0xf] %vm1665_vm0, %v2872_v9 }
 0x12a   : > { %v3629_v36 = vpop.f32.mrb[4].mxu0  ;;  %v3637_v12 = vpop.f32.mrb[4].mxu1 }
 0x12b   : > { %v2841_v10 = vpack.c.bf16 %v3629_v36, %v3629_v36  ;;  %v2125_v8 = vsel %vm2121_vm1, %v3629_v36, 0.0  ;;  %v1164_v31 = vpop.f32.mrb[5].mxu0  ;;  %4601 = vst [vmem:[#allocation3_spill] sm:$0xff] %v3637_v12  ;;  %v2873_v15 = vpack.c.bf16 %v3637_v12, %v3637_v12  ;;  %v1292_v18 = vpop.f32.mrb[5].mxu1 }
 0x12c   : > { %v2126_v42 = vadd.f32 %v2125_v8, %v2124_v3  ;;  %v3635_v11 = vpop.f32.mrb[6].mxu0  ;;  %v3647_v22 = vpop.f32.mrb[6].mxu1 }
 0x12d   : > { %1668 = vst.msk [vmem:[%s3599_s28 + $0x8] sm:$0xf] %vm1665_vm0, %v2841_v10  ;;  %v2842_v57 = vpack.c.bf16 %v3635_v11, %v3635_v11  ;;  %v2127_v13 = vsel %vm2121_vm1, %v3635_v11, 0.0  ;;  %v1167_v48 = vpop.f32.mrb[7].mxu0  ;;  %1700 = vst.msk [vmem:[%s3599_s28 + $0x88] sm:$0xf] %vm1665_vm0, %v2873_v15  ;;  %v2874_v6 = vpack.c.bf16 %v3647_v22, %v3647_v22 }
 0x12e   : > { %v2128_v19 = vadd.f32 %v2127_v13, %v2126_v42  ;;  %v1295_v23 = vpop.f32.mrb[7].mxu1 }
 0x12f   : > { %1669 = vst.msk [vmem:[%s3599_s28 + $0xc] sm:$0xf] %vm1665_vm0, %v2842_v57  ;;  %1701 = vst.msk [vmem:[%s3599_s28 + $0x8c] sm:$0xf] %vm1665_vm0, %v2874_v6 }
 0x132   : > { %v3657_v24 = vpop.f32.mrb[8].mxu0  ;;  %v3665_v28 = vpop.f32.mrb[8].mxu1 }
 0x133   : > { %v2843_v26 = vpack.c.bf16 %v3657_v24, %v3657_v24  ;;  %v2129_v50 = vsel %vm2121_vm1, %v3657_v24, 0.0  ;;  %v1172_v27 = vpop.f32.mrb[9].mxu0  ;;  %v2875_v1 = vpack.c.bf16 %v3665_v28, %v3665_v28  ;;  %v1300_v37 = vpop.f32.mrb[9].mxu1 }
 0x134   : > { %v2130_v21 = vadd.f32 %v2129_v50, %v2128_v19  ;;  %v3663_v52 = vpop.f32.mrb[10].mxu0  ;;  %v3675_v33 = vpop.f32.mrb[10].mxu1 }
 0x135   : > { %1670 = vst.msk [vmem:[%s3599_s28 + $0x10] sm:$0xf] %vm1665_vm0, %v2843_v26  ;;  %v2844_v29 = vpack.c.bf16 %v3663_v52, %v3663_v52  ;;  %v2131_v59 = vsel %vm2121_vm1, %v3663_v52, 0.0  ;;  %v1175_v30 = vpop.f32.mrb[11].mxu0  ;;  %1702 = vst.msk [vmem:[%s3599_s28 + $0x90] sm:$0xf] %vm1665_vm0, %v2875_v1  ;;  %v2876_v16 = vpack.c.bf16 %v3675_v33, %v3675_v33 }
 0x136   : > { %v2132_v61 = vadd.f32 %v2131_v59, %v2130_v21  ;;  %v1303_v53 = vpop.f32.mrb[11].mxu1 }
 0x137   : > { %1671 = vst.msk [vmem:[%s3599_s28 + $0x14] sm:$0xf] %vm1665_vm0, %v2844_v29  ;;  %1703 = vst.msk [vmem:[%s3599_s28 + $0x94] sm:$0xf] %vm1665_vm0, %v2876_v16 }
 0x13a   : > { %v3685_v32 = vpop.f32.mrb[12].mxu0  ;;  %v3693_v40 = vpop.f32.mrb[12].mxu1 }
 0x13b   : > { %v2845_v51 = vpack.c.bf16 %v3685_v32, %v3685_v32  ;;  %v2133_v54 = vsel %vm2121_vm1, %v3685_v32, 0.0  ;;  %v1180_v2 = vpop.f32.mrb[13].mxu0  ;;  %v2877_v17 = vpack.c.bf16 %v3693_v40, %v3693_v40  ;;  %v1308_v0 = vpop.f32.mrb[13].mxu1 }
 0x13c   : > { %v2134_v34 = vadd.f32 %v2133_v54, %v2132_v61  ;;  %v3691_v39 = vpop.f32.mrb[14].mxu0  ;;  %v3703_v44 = vpop.f32.mrb[14].mxu1 }
 0x13d   : > { %1672 = vst.msk [vmem:[%s3599_s28 + $0x18] sm:$0xf] %vm1665_vm0, %v2845_v51  ;;  %v2846_v41 = vpack.c.bf16 %v3691_v39, %v3691_v39  ;;  %v2135_v38 = vsel %vm2121_vm1, %v3691_v39, 0.0  ;;  %v1183_v14 = vpop.f32.mrb[15].mxu0  ;;  %1704 = vst.msk [vmem:[%s3599_s28 + $0x98] sm:$0xf] %vm1665_vm0, %v2877_v17  ;;  %v2878_v45 = vpack.c.bf16 %v3703_v44, %v3703_v44 }
 0x13e   : > { %v2136_v43 = vadd.f32 %v2135_v38, %v2134_v34  ;;  %v1311_v35 = vpop.f32.mrb[15].mxu1 }
 0x13f   : > { %1673 = vst.msk [vmem:[%s3599_s28 + $0x1c] sm:$0xf] %vm1665_vm0, %v2846_v41  ;;  %1705 = vst.msk [vmem:[%s3599_s28 + $0x9c] sm:$0xf] %vm1665_vm0, %v2878_v45 }
 0x142   : > { %v3713_v47 = vpop.f32.mrb[16].mxu0 }
 0x143   : > { %v2847_v49 = vpack.c.bf16 %v3713_v47, %v3713_v47  ;;  %v2137_v20 = vsel %vm2121_vm1, %v3713_v47, 0.0  ;;  %v1188_v56 = vpop.f32.mrb[17].mxu0  ;;  %v3727_v9 = vpop.f32.mrb[16].mxu1 }
 0x144   : > { %v2138_v58 = vadd.f32 %v2137_v20, %v2136_v43  ;;  %v3719_v60 = vpop.f32.mrb[18].mxu0  ;;  %v2879_v10 = vpack.c.bf16 %v3727_v9, %v3727_v9  ;;  %v1316_v8 = vpop.f32.mrb[17].mxu1 }
 0x145   : > { %1674 = vst.msk [vmem:[%s3599_s28 + $0x20] sm:$0xf] %vm1665_vm0, %v2847_v49  ;;  %v2848_v62 = vpack.c.bf16 %v3719_v60, %v3719_v60  ;;  %v2139_v63 = vsel %vm2121_vm1, %v3719_v60, 0.0  ;;  %v1191_v3 = vpop.f32.mrb[19].mxu0  ;;  %v3733_v31 = vpop.f32.mrb[18].mxu1 }
 0x146   : > { %v2140_v25 = vadd.f32 %v2139_v63, %v2138_v58  ;;  %1706 = vst.msk [vmem:[%s3599_s28 + $0xa0] sm:$0xf] %vm1665_vm0, %v2879_v10  ;;  %v2880_v42 = vpack.c.bf16 %v3733_v31, %v3733_v31  ;;  %v1319_v57 = vpop.f32.mrb[19].mxu1 }
 0x147   : > { %1675 = vst.msk [vmem:[%s3599_s28 + $0x24] sm:$0xf] %vm1665_vm0, %v2848_v62 }
 0x148   : > { %1707 = vst.msk [vmem:[%s3599_s28 + $0xa4] sm:$0xf] %vm1665_vm0, %v2880_v42 }
 0x14a   : > { %v3739_v13 = vpop.f32.mrb[20].mxu0 }
 0x14b   : > { %v2849_v48 = vpack.c.bf16 %v3739_v13, %v3739_v13  ;;  %v2141_v15 = vsel %vm2121_vm1, %v3739_v13, 0.0  ;;  %v1196_v18 = vpop.f32.mrb[21].mxu0 }
 0x14c   : > { %v2142_v19 = vadd.f32 %v2141_v15, %v2140_v25  ;;  %v3747_v6 = vpop.f32.mrb[22].mxu0  ;;  %v3755_v21 = vpop.f32.mrb[20].mxu1 }
 0x14d   : > { %1676 = vst.msk [vmem:[%s3599_s28 + $0x28] sm:$0xf] %vm1665_vm0, %v2849_v48  ;;  %v2850_v23 = vpack.c.bf16 %v3747_v6, %v3747_v6  ;;  %v2143_v26 = vsel %vm2121_vm1, %v3747_v6, 0.0  ;;  %v1199_v50 = vpop.f32.mrb[23].mxu0  ;;  %v2881_v29 = vpack.c.bf16 %v3755_v21, %v3755_v21  ;;  %v1324_v59 = vpop.f32.mrb[21].mxu1 }
 0x14e   : > { %v2144_v27 = vadd.f32 %v2143_v26, %v2142_v19  ;;  %v3761_v30 = vpop.f32.mrb[22].mxu1 }
 0x14f   : > { %1677 = vst.msk [vmem:[%s3599_s28 + $0x2c] sm:$0xf] %vm1665_vm0, %v2850_v23  ;;  %1708 = vst.msk [vmem:[%s3599_s28 + $0xa8] sm:$0xf] %vm1665_vm0, %v2881_v29  ;;  %v2882_v1 = vpack.c.bf16 %v3761_v30, %v3761_v30  ;;  %v1327_v37 = vpop.f32.mrb[23].mxu1 }
 0x151   : > { %1709 = vst.msk [vmem:[%s3599_s28 + $0xac] sm:$0xf] %vm1665_vm0, %v2882_v1 }
 0x152   : > { %v3767_v61 = vpop.f32.mrb[24].mxu0 }
 0x153   : > { %v2851_v16 = vpack.c.bf16 %v3767_v61, %v3767_v61  ;;  %v2145_v53 = vsel %vm2121_vm1, %v3767_v61, 0.0  ;;  %v1204_v51 = vpop.f32.mrb[25].mxu0 }
 0x154   : > { %v2146_v54 = vadd.f32 %v2145_v53, %v2144_v27  ;;  %v3775_v2 = vpop.f32.mrb[26].mxu0  ;;  %v3785_v17 = vpop.f32.mrb[24].mxu1 }
 0x155   : > { %1678 = vst.msk [vmem:[%s3599_s28 + $0x30] sm:$0xf] %vm1665_vm0, %v2851_v16  ;;  %v2852_v34 = vpack.c.bf16 %v3775_v2, %v3775_v2  ;;  %v2147_v41 = vsel %vm2121_vm1, %v3775_v2, 0.0  ;;  %v1207_v38 = vpop.f32.mrb[27].mxu0  ;;  %v2883_v0 = vpack.c.bf16 %v3785_v17, %v3785_v17  ;;  %v1332_v43 = vpop.f32.mrb[25].mxu1 }
 0x156   : > { %v2148_v14 = vadd.f32 %v2147_v41, %v2146_v54  ;;  %v3789_v45 = vpop.f32.mrb[26].mxu1 }
 0x157   : > { %1679 = vst.msk [vmem:[%s3599_s28 + $0x34] sm:$0xf] %vm1665_vm0, %v2852_v34  ;;  %1710 = vst.msk [vmem:[%s3599_s28 + $0xb0] sm:$0xf] %vm1665_vm0, %v2883_v0  ;;  %v2884_v49 = vpack.c.bf16 %v3789_v45, %v3789_v45  ;;  %v1335_v20 = vpop.f32.mrb[27].mxu1 }
 0x159   : > { %1711 = vst.msk [vmem:[%s3599_s28 + $0xb4] sm:$0xf] %vm1665_vm0, %v2884_v49 }
 0x15a   : > { %v3791_v35 = vpop.f32.mrb[28].mxu0 }
 0x15b   : > { %v2853_v56 = vpack.c.bf16 %v3791_v35, %v3791_v35  ;;  %v2149_v58 = vsel %vm2121_vm1, %v3791_v35, 0.0  ;;  %v1212_v62 = vpop.f32.mrb[29].mxu0 }
 0x15c   : > { %v2150_v63 = vadd.f32 %v2149_v58, %v2148_v14  ;;  %v3801_v3 = vpop.f32.mrb[30].mxu0 }
 0x15d   : > { %1680 = vst.msk [vmem:[%s3599_s28 + $0x38] sm:$0xf] %vm1665_vm0, %v2853_v56  ;;  %v2854_v25 = vpack.c.bf16 %v3801_v3, %v3801_v3  ;;  %v2151_v10 = vsel %vm2121_vm1, %v3801_v3, 0.0  ;;  %v1215_v8 = vpop.f32.mrb[31].mxu0  ;;  %v3813_v57 = vpop.f32.mrb[28].mxu1 }
 0x15e   : > { %v2152_v42 = vadd.f32 %v2151_v10, %v2150_v63  ;;  %v2885_v48 = vpack.c.bf16 %v3813_v57, %v3813_v57  ;;  %v1340_v15 = vpop.f32.mrb[29].mxu1 }
 0x15f   : > { %1681 = vst.msk [vmem:[%s3599_s28 + $0x3c] sm:$0xf] %vm1665_vm0, %v2854_v25  ;;  %v3819_v19 = vpop.f32.mrb[30].mxu1 }
 0x160   : > { %1712 = vst.msk [vmem:[%s3599_s28 + $0xb8] sm:$0xf] %vm1665_vm0, %v2885_v48  ;;  %v2886_v27 = vpack.c.bf16 %v3819_v19, %v3819_v19  ;;  %v1343_v29 = vpop.f32.mrb[31].mxu1 }
 0x162   : > { %v3817_v18 = vpop.f32.mrb[32].mxu0  ;;  %1713 = vst.msk [vmem:[%s3599_s28 + $0xbc] sm:$0xf] %vm1665_vm0, %v2886_v27 }
 0x163   : > { %v2855_v23 = vpack.c.bf16 %v3817_v18, %v3817_v18  ;;  %v2153_v26 = vsel %vm2121_vm1, %v3817_v18, 0.0  ;;  %v1220_v50 = vpop.f32.mrb[33].mxu0 }
 0x164   : > { %v2154_v59 = vadd.f32 %v2153_v26, %v2152_v42  ;;  %v3829_v1 = vpop.f32.mrb[34].mxu0 }
 0x165   : > { %1682 = vst.msk [vmem:[%s3599_s28 + $0x40] sm:$0xf] %vm1665_vm0, %v2855_v23  ;;  %v2856_v37 = vpack.c.bf16 %v3829_v1, %v3829_v1  ;;  %v2155_v16 = vsel %vm2121_vm1, %v3829_v1, 0.0  ;;  %v1223_v53 = vpop.f32.mrb[35].mxu0  ;;  %v3841_v54 = vpop.f32.mrb[32].mxu1 }
 0x166   : > { %v2156_v51 = vadd.f32 %v2155_v16, %v2154_v59  ;;  %v2887_v41 = vpack.c.bf16 %v3841_v54, %v3841_v54  ;;  %v1348_v38 = vpop.f32.mrb[33].mxu1 }
 0x167   : > { %1683 = vst.msk [vmem:[%s3599_s28 + $0x44] sm:$0xf] %vm1665_vm0, %v2856_v37  ;;  %v3851_v49 = vpop.f32.mrb[34].mxu1 }
 0x168   : > { %1714 = vst.msk [vmem:[%s3599_s28 + $0xc0] sm:$0xf] %vm1665_vm0, %v2887_v41  ;;  %v2888_v58 = vpack.c.bf16 %v3851_v49, %v3851_v49  ;;  %v1351_v62 = vpop.f32.mrb[35].mxu1 }
 0x16a   : > { %v3843_v34 = vpop.f32.mrb[36].mxu0  ;;  %1715 = vst.msk [vmem:[%s3599_s28 + $0xc4] sm:$0xf] %vm1665_vm0, %v2888_v58 }
 0x16b   : > { %v2857_v14 = vpack.c.bf16 %v3843_v34, %v3843_v34  ;;  %v2157_v0 = vsel %vm2121_vm1, %v3843_v34, 0.0  ;;  %v1228_v43 = vpop.f32.mrb[37].mxu0 }
 0x16c   : > { %v2158_v20 = vadd.f32 %v2157_v0, %v2156_v51  ;;  %v3853_v56 = vpop.f32.mrb[38].mxu0 }
 0x16d   : > { %1684 = vst.msk [vmem:[%s3599_s28 + $0x48] sm:$0xf] %vm1665_vm0, %v2857_v14  ;;  %v2858_v63 = vpack.c.bf16 %v3853_v56, %v3853_v56  ;;  %v2159_v25 = vsel %vm2121_vm1, %v3853_v56, 0.0  ;;  %v1231_v10 = vpop.f32.mrb[39].mxu0  ;;  %v3869_v42 = vpop.f32.mrb[36].mxu1 }
 0x16e   : > { %v2160_v8 = vadd.f32 %v2159_v25, %v2158_v20  ;;  %v2889_v15 = vpack.c.bf16 %v3869_v42, %v3869_v42  ;;  %v1356_v23 = vpop.f32.mrb[37].mxu1 }
 0x16f   : > { %1685 = vst.msk [vmem:[%s3599_s28 + $0x4c] sm:$0xf] %vm1665_vm0, %v2858_v63  ;;  %v3879_v29 = vpop.f32.mrb[38].mxu1 }
 0x170   : > { %1716 = vst.msk [vmem:[%s3599_s28 + $0xc8] sm:$0xf] %vm1665_vm0, %v2889_v15  ;;  %v2890_v16 = vpack.c.bf16 %v3879_v29, %v3879_v29  ;;  %v1359_v53 = vpop.f32.mrb[39].mxu1 }
 0x172   : > { %v3871_v48 = vpop.f32.mrb[40].mxu0  ;;  %1717 = vst.msk [vmem:[%s3599_s28 + $0xcc] sm:$0xf] %vm1665_vm0, %v2890_v16 }
 0x173   : > { %v2859_v26 = vpack.c.bf16 %v3871_v48, %v3871_v48  ;;  %v2161_v50 = vsel %vm2121_vm1, %v3871_v48, 0.0  ;;  %v1236_v27 = vpop.f32.mrb[41].mxu0 }
 0x174   : > { %v2162_v59 = vadd.f32 %v2161_v50, %v2160_v8  ;;  %v3881_v37 = vpop.f32.mrb[42].mxu0 }
 0x175   : > { %4602 = vst [vmem:[#allocation4_spill] sm:$0xff] %v3881_v37  ;;  %1686 = vst.msk [vmem:[%s3599_s28 + $0x50] sm:$0xf] %vm1665_vm0, %v2859_v26  ;;  %v2860_v51 = vpack.c.bf16 %v3881_v37, %v3881_v37  ;;  %v2163_v41 = vsel %vm2121_vm1, %v3881_v37, 0.0  ;;  %v1239_v38 = vpop.f32.mrb[43].mxu0  ;;  %v3897_v0 = vpop.f32.mrb[40].mxu1 }
 0x176   : > { %v2164_v14 = vadd.f32 %v2163_v41, %v2162_v59  ;;  %v2891_v20 = vpack.c.bf16 %v3897_v0, %v3897_v0  ;;  %v1364_v58 = vpop.f32.mrb[41].mxu1 }
 0x177   : > { %1687 = vst.msk [vmem:[%s3599_s28 + $0x54] sm:$0xf] %vm1665_vm0, %v2860_v51  ;;  %v3907_v10 = vpop.f32.mrb[42].mxu1 }
 0x178   : > { %1718 = vst.msk [vmem:[%s3599_s28 + $0xd0] sm:$0xf] %vm1665_vm0, %v2891_v20  ;;  %v2892_v23 = vpack.c.bf16 %v3907_v10, %v3907_v10  ;;  %v1367_v26 = vpop.f32.mrb[43].mxu1 }
 0x17a   : > { %v3899_v43 = vpop.f32.mrb[44].mxu0  ;;  %1719 = vst.msk [vmem:[%s3599_s28 + $0xd4] sm:$0xf] %vm1665_vm0, %v2892_v23 }
 0x17b   : > { %4603 = vst [vmem:[#allocation5_spill] sm:$0xff] %v3899_v43  ;;  %v2861_v62 = vpack.c.bf16 %v3899_v43, %v3899_v43  ;;  %v2165_v63 = vsel %vm2121_vm1, %v3899_v43, 0.0  ;;  %v1244_v25 = vpop.f32.mrb[45].mxu0 }
 0x17c   : > { %v2166_v8 = vadd.f32 %v2165_v63, %v2164_v14  ;;  %v3909_v15 = vpop.f32.mrb[46].mxu0 }
 0x17d   : > { %4604 = vst [vmem:[#allocation6_spill] sm:$0xff] %v3909_v15  ;;  %1688 = vst.msk [vmem:[%s3599_s28 + $0x58] sm:$0xf] %vm1665_vm0, %v2861_v62  ;;  %v2862_v50 = vpack.c.bf16 %v3909_v15, %v3909_v15  ;;  %v2167_v27 = vsel %vm2121_vm1, %v3909_v15, 0.0  ;;  %v1247_v59 = vpop.f32.mrb[47].mxu0  ;;  %v3925_v53 = vpop.f32.mrb[44].mxu1 }
 0x17e   : > { %v2168_v16 = vadd.f32 %v2167_v27, %v2166_v8  ;;  %v2893_v41 = vpack.c.bf16 %v3925_v53, %v3925_v53  ;;  %v1372_v38 = vpop.f32.mrb[45].mxu1 }
 0x17f   : > { %1689 = vst.msk [vmem:[%s3599_s28 + $0x5c] sm:$0xf] %vm1665_vm0, %v2862_v50  ;;  %v3935_v62 = vpop.f32.mrb[46].mxu1 }
 0x180   : > { %1720 = vst.msk [vmem:[%s3599_s28 + $0xd8] sm:$0xf] %vm1665_vm0, %v2893_v41  ;;  %v2894_v8 = vpack.c.bf16 %v3935_v62, %v3935_v62  ;;  %v1375_v23 = vpop.f32.mrb[47].mxu1 }
 0x182   : > { %v3927_v51 = vpop.f32.mrb[48].mxu0  ;;  %1721 = vst.msk [vmem:[%s3599_s28 + $0xdc] sm:$0xf] %vm1665_vm0, %v2894_v8 }
 0x183   : > { %4605 = vst [vmem:[#allocation7_spill] sm:$0xff] %v3927_v51  ;;  %v2863_v14 = vpack.c.bf16 %v3927_v51, %v3927_v51  ;;  %v2169_v20 = vsel %vm2121_vm1, %v3927_v51, 0.0  ;;  %v1252_v58 = vpop.f32.mrb[49].mxu0 }
 0x184   : > { %v2170_v63 = vadd.f32 %v2169_v20, %v2168_v16  ;;  %v3937_v25 = vpop.f32.mrb[50].mxu0 }
 0x185   : > { %4606 = vst [vmem:[#allocation8_spill] sm:$0xff] %v3937_v25  ;;  %1690 = vst.msk [vmem:[%s3599_s28 + $0x60] sm:$0xf] %vm1665_vm0, %v2863_v14  ;;  %v2864_v26 = vpack.c.bf16 %v3937_v25, %v3937_v25  ;;  %v2171_v50 = vsel %vm2121_vm1, %v3937_v25, 0.0  ;;  %v1255_v27 = vpop.f32.mrb[51].mxu0  ;;  %v3953_v16 = vpop.f32.mrb[48].mxu1 }
 0x186   : > { %v2172_v59 = vadd.f32 %v2171_v50, %v2170_v63  ;;  %v2895_v38 = vpack.c.bf16 %v3953_v16, %v3953_v16  ;;  %v1380_v14 = vpop.f32.mrb[49].mxu1 }
 0x187   : > { %1691 = vst.msk [vmem:[%s3599_s28 + $0x64] sm:$0xf] %vm1665_vm0, %v2864_v26  ;;  %v3963_v8 = vpop.f32.mrb[50].mxu1 }
 0x188   : > { %1722 = vst.msk [vmem:[%s3599_s28 + $0xe0] sm:$0xf] %vm1665_vm0, %v2895_v38  ;;  %v2896_v50 = vpack.c.bf16 %v3963_v8, %v3963_v8  ;;  %v1383_v27 = vpop.f32.mrb[51].mxu1 }
 0x18a   : > { %v3955_v41 = vpop.f32.mrb[52].mxu0  ;;  %1723 = vst.msk [vmem:[%s3599_s28 + $0xe4] sm:$0xf] %vm1665_vm0, %v2896_v50 }
 0x18b   : > { %4607 = vst [vmem:[#allocation9_spill] sm:$0xff] %v3955_v41  ;;  %v2865_v20 = vpack.c.bf16 %v3955_v41, %v3955_v41  ;;  %v2173_v58 = vsel %vm2121_vm1, %v3955_v41, 0.0  ;;  %v1260_v63 = vpop.f32.mrb[53].mxu0 }
 0x18c   : > { %v2174_v23 = vadd.f32 %v2173_v58, %v2172_v59  ;;  %v3965_v26 = vpop.f32.mrb[54].mxu0 }
 0x18d   : > { %4608 = vst [vmem:[#allocation10_spill] sm:$0xff] %v3965_v26  ;;  %1692 = vst.msk [vmem:[%s3599_s28 + $0x68] sm:$0xf] %vm1665_vm0, %v2865_v20  ;;  %v2866_v14 = vpack.c.bf16 %v3965_v26, %v3965_v26  ;;  %v2175_v63 = vsel %vm2121_vm1, %v3965_v26, 0.0  ;;  %v1263_v41 = vpop.f32.mrb[55].mxu0  ;;  %v3981_v59 = vpop.f32.mrb[52].mxu1 }
 0x18e   : > { %v2176_v25 = vadd.f32 %v2175_v63, %v2174_v23  ;;  %v2897_v20 = vpack.c.bf16 %v3981_v59, %v3981_v59  ;;  %v1388_v58 = vpop.f32.mrb[53].mxu1 }
 0x18f   : > { %1693 = vst.msk [vmem:[%s3599_s28 + $0x6c] sm:$0xf] %vm1665_vm0, %v2866_v14  ;;  %v3991_v50 = vpop.f32.mrb[54].mxu1 }
 0x190   : > { %4610 = vst [vmem:[#allocation12_spill] sm:$0xff] %v3991_v50  ;;  %1724 = vst.msk [vmem:[%s3599_s28 + $0xe8] sm:$0xf] %vm1665_vm0, %v2897_v20  ;;  %v2898_v26 = vpack.c.bf16 %v3991_v50, %v3991_v50  ;;  %v1391_v51 = vpop.f32.mrb[55].mxu1 }
 0x192   : > { %v3983_v38 = vpop.f32.mrb[56].mxu0  ;;  %1725 = vst.msk [vmem:[%s3599_s28 + $0xec] sm:$0xf] %vm1665_vm0, %v2898_v26 }
 0x193   : > { %4609 = vst [vmem:[#allocation11_spill] sm:$0xff] %v3983_v38  ;;  %v2867_v27 = vpack.c.bf16 %v3983_v38, %v3983_v38  ;;  %v2177_v41 = vsel %vm2121_vm1, %v3983_v38, 0.0  ;;  %v1268_v23 = vpop.f32.mrb[57].mxu0 }
 0x194   : > { %v2178_v14 = vadd.f32 %v2177_v41, %v2176_v25  ;;  %v3993_v63 = vpop.f32.mrb[58].mxu0 }
 0x195   : > { %4611 = vst [vmem:[#allocation13_spill] sm:$0xff] %v3993_v63  ;;  %1694 = vst.msk [vmem:[%s3599_s28 + $0x70] sm:$0xf] %vm1665_vm0, %v2867_v27  ;;  %v2868_v58 = vpack.c.bf16 %v3993_v63, %v3993_v63  ;;  %v2179_v23 = vsel %vm2121_vm1, %v3993_v63, 0.0  ;;  %v1271_v38 = vpop.f32.mrb[59].mxu0  ;;  %v4009_v25 = vpop.f32.mrb[56].mxu1 }
 0x196   : > { %v2180_v15 = vadd.f32 %v2179_v23, %v2178_v14  ;;  %v2899_v51 = vpack.c.bf16 %v4009_v25, %v4009_v25  ;;  %v1396_v27 = vpop.f32.mrb[57].mxu1 }
 0x197   : > { %1695 = vst.msk [vmem:[%s3599_s28 + $0x74] sm:$0xf] %vm1665_vm0, %v2868_v58  ;;  %v4019_v26 = vpop.f32.mrb[58].mxu1 }
 0x198   : > { %1726 = vst.msk [vmem:[%s3599_s28 + $0xf0] sm:$0xf] %vm1665_vm0, %v2899_v51  ;;  %v2900_v63 = vpack.c.bf16 %v4019_v26, %v4019_v26  ;;  %v1399_v43 = vpop.f32.mrb[59].mxu1  ;;  %v2187_v51 = vsel %vm2121_vm1, %v3619_v7, 0.0 }
 0x19a   : > { %v4011_v20 = vpop.f32.mrb[60].mxu0  ;;  %1727 = vst.msk [vmem:[%s3599_s28 + $0xf4] sm:$0xf] %vm1665_vm0, %v2900_v63  ;;  %v2189_v63 = vsel %vm2121_vm1, %v3637_v12, 0.0 }
 0x19b   : > { %4612 = vst [vmem:[#allocation14_spill] sm:$0xff] %v4011_v20  ;;  %v2869_v41 = vpack.c.bf16 %v4011_v20, %v4011_v20  ;;  %v2181_v38 = vsel %vm2121_vm1, %v4011_v20, 0.0  ;;  %v1276_v14 = vpop.f32.mrb[61].mxu0 }
 0x19c   : > { %v2182_v58 = vadd.f32 %v2181_v38, %v2180_v15  ;;  %v4021_v23 = vpop.f32.mrb[62].mxu0  ;;  %v2185_v15 = vsel %vm2121_vm1, %v3607_v4, 0.0 }
 0x19d   : > { %4613 = vst [vmem:[#allocation15_spill] sm:$0xff] %v4021_v23  ;;  %1696 = vst.msk [vmem:[%s3599_s28 + $0x78] sm:$0xf] %vm1665_vm0, %v2869_v41  ;;  %v2870_v27 = vpack.c.bf16 %v4021_v23, %v4021_v23  ;;  %v2183_v14 = vsel %vm2121_vm1, %v4021_v23, 0.0  ;;  %v1279_v20 = vpop.f32.mrb[63].mxu0  ;;  %v4041_v41 = vpop.f32.mrb[60].mxu1 }
 0x19e   : > { %v2184_v37 = vadd.f32 %v2183_v14, %v2182_v58  ;;  %4614 = vst [vmem:[#allocation16_spill] sm:$0xff] %v4041_v41  ;;  %v2901_v23 = vpack.c.bf16 %v4041_v41, %v4041_v41  ;;  %v1404_v20 = vpop.f32.mrb[61].mxu1 }
 0x19f   : > { %1697 = vst.msk [vmem:[%s3599_s28 + $0x7c] sm:$0xf] %vm1665_vm0, %v2870_v27  ;;  %v1405_v58 = vpop.f32.mrb[62].mxu1  ;;  %v2195_v20 = vsel %vm2121_vm1, %v3675_v33, 0.0 }
 0x1a0   : > { %v2186_v43 = vadd.f32 %v2185_v15, %v2184_v37  ;;  %1728 = vst.msk [vmem:[%s3599_s28 + $0xf8] sm:$0xf] %vm1665_vm0, %v2901_v23  ;;  %v2902_v4 = vpack.c.bf16 %v1405_v58, %v1405_v58  ;;  %v1407_v27 = vpop.f32.mrb[63].mxu1  ;;  %v2191_v37 = vsel %vm2121_vm1, %v3647_v22, 0.0 }
 0x1a1   : > { %v2203_v27 = vsel %vm2121_vm1, %v3733_v31, 0.0 }
 0x1a2   : > { %v2188_v38 = vadd.f32 %v2187_v51, %v2186_v43  ;;  %1729 = vst.msk [vmem:[%s3599_s28 + $0xfc] sm:$0xf] %vm1665_vm0, %v2902_v4  ;;  %v2193_v43 = vsel %vm2121_vm1, %v3665_v28, 0.0 }
 0x1a4   : > { %v2190_v14 = vadd.f32 %v2189_v63, %v2188_v38  ;;  %v2197_v38 = vsel %vm2121_vm1, %v3693_v40, 0.0  ;;  %v2199_v63 = vsel %vm2121_vm1, %v3703_v44, 0.0 }
 0x1a6   : > { %v2192_v15 = vadd.f32 %v2191_v37, %v2190_v14  ;;  %v2201_v14 = vsel %vm2121_vm1, %v3727_v9, 0.0 }
 0x1a8   : > { %v2194_v51 = vadd.f32 %v2193_v43, %v2192_v15  ;;  %v2205_v15 = vsel %vm2121_vm1, %v3755_v21, 0.0 }
 0x1aa   : > { %v2196_v12 = vadd.f32 %v2195_v20, %v2194_v51  ;;  %v2207_v51 = vsel %vm2121_vm1, %v3761_v30, 0.0  ;;  %v2209_v20 = vsel %vm2121_vm1, %v3785_v17, 0.0 }
 0x1ac   : > { %v2198_v23 = vadd.f32 %v2197_v38, %v2196_v12 }
 0x1ae   : > { %v2200_v58 = vadd.f32 %v2199_v63, %v2198_v23  ;;  %v2211_v23 = vsel %vm2121_vm1, %v3789_v45, 0.0 }
 0x1b0   : > { %v2202_v4 = vadd.f32 %v2201_v14, %v2200_v58  ;;  %v2213_v58 = vsel %vm2121_vm1, %v3813_v57, 0.0 }
 0x1b2   : > { %v2204_v37 = vadd.f32 %v2203_v27, %v2202_v4  ;;  %v2215_v4 = vsel %vm2121_vm1, %v3819_v19, 0.0 }
 0x1b4   : > { %v2206_v43 = vadd.f32 %v2205_v15, %v2204_v37  ;;  %v2217_v37 = vsel %vm2121_vm1, %v3841_v54, 0.0 }
 0x1b6   : > { %v2208_v12 = vadd.f32 %v2207_v51, %v2206_v43  ;;  %v2219_v43 = vsel %vm2121_vm1, %v3851_v49, 0.0 }
 0x1b8   : > { %v2210_v38 = vadd.f32 %v2209_v20, %v2208_v12  ;;  %v2221_v12 = vsel %vm2121_vm1, %v3869_v42, 0.0 }
 0x1ba   : > { %v2212_v63 = vadd.f32 %v2211_v23, %v2210_v38  ;;  %v2223_v38 = vsel %vm2121_vm1, %v3879_v29, 0.0 }
 0x1bc   : > { %v2214_v14 = vadd.f32 %v2213_v58, %v2212_v63  ;;  %v2225_v63 = vsel %vm2121_vm1, %v3897_v0, 0.0 }
 0x1be   : > { %v2216_v27 = vadd.f32 %v2215_v4, %v2214_v14  ;;  %v2227_v14 = vsel %vm2121_vm1, %v3907_v10, 0.0 }
 0x1c0   : > { %v2218_v15 = vadd.f32 %v2217_v37, %v2216_v27  ;;  %v2229_v27 = vsel %vm2121_vm1, %v3925_v53, 0.0 }
 0x1c2   : > { %v2220_v51 = vadd.f32 %v2219_v43, %v2218_v15  ;;  %v2231_v15 = vsel %vm2121_vm1, %v3935_v62, 0.0 }
 0x1c4   : > { %v2222_v20 = vadd.f32 %v2221_v12, %v2220_v51  ;;  %v2233_v51 = vsel %vm2121_vm1, %v3953_v16, 0.0  ;;  %v4096_v12 = vadd.s32 496, %v3071_v5 }
 0x1c6   : > { %v2224_v23 = vadd.f32 %v2223_v38, %v2222_v20  ;;  %4615 = vst [vmem:[#allocation17_spill] sm:$0xff] %v4096_v12  ;;  %v2235_v38 = vsel %vm2121_vm1, %v3963_v8, 0.0  ;;  %vm1923_vm2 = vcmp.lt.s32.totalorder %v4096_v12, 500 }
 0x1c7   : > { %v2119_v5 = vsel %vm1923_vm2, %v4041_v41, 0.0 }
 0x1c8   : > { %v2226_v58 = vadd.f32 %v2225_v63, %v2224_v23  ;;  %v2237_v63 = vsel %vm2121_vm1, %v3981_v59, 0.0 }
 0x1ca   : > { %v2228_v4 = vadd.f32 %v2227_v14, %v2226_v58  ;;  %v2239_v14 = vsel %vm2121_vm1, %v3991_v50, 0.0 }
 0x1cc   : > { %v2230_v37 = vadd.f32 %v2229_v27, %v2228_v4  ;;  %v2241_v27 = vsel %vm2121_vm1, %v4009_v25, 0.0 }
 0x1ce   : > { %v2232_v43 = vadd.f32 %v2231_v15, %v2230_v37  ;;  %v2243_v15 = vsel %vm2121_vm1, %v4019_v26, 0.0 }
 0x1d0   : > { %v2234_v20 = vadd.f32 %v2233_v51, %v2232_v43  ;;  %v2245_v43 = vsel %vm2121_vm1, %v2119_v5, 0.0 }
 0x1d2   : > { %v2236_v23 = vadd.f32 %v2235_v38, %v2234_v20 }
 0x1d4   : > { %v2238_v58 = vadd.f32 %v2237_v63, %v2236_v23 }
 0x1d6   : > { %v2240_v4 = vadd.f32 %v2239_v14, %v2238_v58 }
 0x1d8   : > { %v2242_v37 = vadd.f32 %v2241_v27, %v2240_v4 }
 0x1da   : > { %v2244_v51 = vadd.f32 %v2243_v15, %v2242_v37  ;;  %v4617_v15 = vld [vmem:[#allocation4_spill] sm:$0xff] }
 0x1dc   : > { %v2246_v20 = vadd.f32 %v2245_v43, %v2244_v51  ;;  %v4618_v43 = vld [vmem:[#allocation5_spill] sm:$0xff]  ;;  %v4619_v51 = vld [vmem:[#allocation6_spill] sm:$0xff] }
 0x1de   : > { %v2249_v38 = vrot.slane %v2246_v20, 4 }
 0x1e0   : > { %v2250_v23 = vadd.f32 %v2249_v38, %v2246_v20  ;;  %v4620_v20 = vld [vmem:[#allocation7_spill] sm:$0xff]  ;;  %v4622_v38 = vld [vmem:[#allocation8_spill] sm:$0xff] }
 0x1e2   : > { %v2251_v63 = vrot.slane %v2250_v23, 2 }
 0x1e4   : > { %v2252_v50 = vadd.f32 %v2251_v63, %v2250_v23  ;;  %v4624_v23 = vld [vmem:[#allocation9_spill] sm:$0xff] }
 0x1e6   : > { %v2253_v58 = vrot.slane %v2252_v50, 1 }
 0x1e8   : > { %v2254_v14 = vadd.f32 %v2253_v58, %v2252_v50  ;;  %v4626_v58 = vld [vmem:[#allocation10_spill] sm:$0xff] }
 0x1ea   : > { %v4117_v12 = vmul.f32 0.002, %v2254_v14  ;;  %2584 = vst.msk [vmem:[%s320_s7] sm:$0x1] %vm2583_vm3, %v2254_v14 }
 0x1ec   : > { %4616 = vst [vmem:[#allocation18_spill] sm:$0xff] %v4117_v12  ;;  %v4122_v4 = vsub.f32 %v3601_v46, %v4117_v12  ;;  %v4126_v5 = vsub.f32 %v3605_v55, %v4117_v12  ;;  %v4130_v27 = vsub.f32 %v3629_v36, %v4117_v12  ;;  %v4134_v37 = vsub.f32 %v3635_v11, %v4117_v12 }
 0x1ed   : > { %v4138_v50 = vsub.f32 %v3657_v24, %v4117_v12  ;;  %v4142_v46 = vsub.f32 %v3663_v52, %v4117_v12  ;;  %v4146_v55 = vsub.f32 %v3685_v32, %v4117_v12  ;;  %v4150_v36 = vsub.f32 %v3691_v39, %v4117_v12 }
 0x1ee   : > { %v4154_v11 = vsub.f32 %v3713_v47, %v4117_v12  ;;  %v4158_v24 = vsub.f32 %v3719_v60, %v4117_v12  ;;  %v4162_v52 = vsub.f32 %v3739_v13, %v4117_v12  ;;  %v4166_v32 = vsub.f32 %v3747_v6, %v4117_v12 }
 0x1ef   : > { %v4170_v39 = vsub.f32 %v3767_v61, %v4117_v12  ;;  %v4174_v47 = vsub.f32 %v3775_v2, %v4117_v12  ;;  %v4178_v60 = vsub.f32 %v3791_v35, %v4117_v12  ;;  %v4182_v13 = vsub.f32 %v3801_v3, %v4117_v12 }
 0x1f0   : > { %v4186_v6 = vsub.f32 %v3817_v18, %v4117_v12  ;;  %v4190_v61 = vsub.f32 %v3829_v1, %v4117_v12  ;;  %v4194_v2 = vsub.f32 %v3843_v34, %v4117_v12  ;;  %v4198_v35 = vsub.f32 %v3853_v56, %v4117_v12 }
 0x1f1   : > { %v4202_v3 = vsub.f32 %v3871_v48, %v4117_v12  ;;  %v4206_v18 = vsub.f32 %v4617_v15, %v4117_v12  ;;  %v4210_v1 = vsub.f32 %v4618_v43, %v4117_v12  ;;  %v4214_v34 = vsub.f32 %v4619_v51, %v4117_v12  ;;  %v4627_v15 = vld [vmem:[#allocation11_spill] sm:$0xff]  ;;  %v4629_v51 = vld [vmem:[#allocation13_spill] sm:$0xff] }
 0x1f2   : > { %v4218_v56 = vsub.f32 %v4620_v20, %v4117_v12  ;;  %v4222_v48 = vsub.f32 %v4622_v38, %v4117_v12  ;;  %v4226_v63 = vsub.f32 %v4624_v23, %v4117_v12  ;;  %v4230_v14 = vsub.f32 %v4626_v58, %v4117_v12 }
 0x1f3   : > { %v4234_v43 = vsub.f32 %v4627_v15, %v4117_v12  ;;  %v4238_v20 = vsub.f32 %v4629_v51, %v4117_v12  ;;  %v4254_v15 = vsub.f32 %v3619_v7, %v4117_v12  ;;  %v4274_v7 = vsub.f32 %v3693_v40, %v4117_v12 }
 0x1f4   : > { %4621 = vst [vmem:[#allocation4_spill] sm:$0xff] %v4218_v56  ;;  %4623 = vst [vmem:[#allocation5_spill] sm:$0xff] %v4222_v48  ;;  %v4630_v56 = vld [vmem:[#allocation14_spill] sm:$0xff]  ;;  %v4631_v48 = vld [vmem:[#allocation15_spill] sm:$0xff]  ;;  %v4294_v40 = vsub.f32 %v3761_v30, %v4117_v12  ;;  %v4314_v30 = vsub.f32 %v3841_v54, %v4117_v12  ;;  %v4334_v54 = vsub.f32 %v3907_v10, %v4117_v12 }
 0x1f5   : > { %4625 = vst [vmem:[#allocation6_spill] sm:$0xff] %v4226_v63  ;;  %4628 = vst [vmem:[#allocation7_spill] sm:$0xff] %v4234_v43  ;;  %v4242_v38 = vsub.f32 %v4630_v56, %v4117_v12  ;;  %v4246_v23 = vsub.f32 %v4631_v48, %v4117_v12  ;;  %v4632_v63 = vld [vmem:[#allocation2_spill] sm:$0xff]  ;;  %v4633_v43 = vld [vmem:[#allocation3_spill] sm:$0xff]  ;;  %v4262_v56 = vsub.f32 %v3647_v22, %v4117_v12 }
 0x1f6   : > { %v4250_v58 = vsub.f32 %v4632_v63, %v4117_v12  ;;  %v4258_v51 = vsub.f32 %v4633_v43, %v4117_v12  ;;  %v4266_v48 = vsub.f32 %v3665_v28, %v4117_v12  ;;  %v4270_v63 = vsub.f32 %v3675_v33, %v4117_v12  ;;  %4634 = vst [vmem:[#allocation8_spill] sm:$0xff] %v4334_v54  ;;  %v4636_v54 = vld [vmem:[#allocation12_spill] sm:$0xff] }
 0x1f7   : > { %v4278_v43 = vsub.f32 %v3703_v44, %v4117_v12  ;;  %v4282_v22 = vsub.f32 %v3727_v9, %v4117_v12  ;;  %v4286_v28 = vsub.f32 %v3733_v31, %v4117_v12  ;;  %v4290_v33 = vsub.f32 %v3755_v21, %v4117_v12 }
 0x1f8   : > { %v4298_v44 = vsub.f32 %v3785_v17, %v4117_v12  ;;  %v4302_v9 = vsub.f32 %v3789_v45, %v4117_v12  ;;  %v4306_v31 = vsub.f32 %v3813_v57, %v4117_v12  ;;  %v4310_v21 = vsub.f32 %v3819_v19, %v4117_v12 }
 0x1f9   : > { %v4318_v17 = vsub.f32 %v3851_v49, %v4117_v12  ;;  %v4322_v45 = vsub.f32 %v3869_v42, %v4117_v12  ;;  %v4326_v57 = vsub.f32 %v3879_v29, %v4117_v12  ;;  %v4330_v19 = vsub.f32 %v3897_v0, %v4117_v12 }
 0x1fa   : > { %v4338_v49 = vsub.f32 %v3925_v53, %v4117_v12  ;;  %v4342_v42 = vsub.f32 %v3935_v62, %v4117_v12  ;;  %v4346_v29 = vsub.f32 %v3953_v16, %v4117_v12  ;;  %v4350_v0 = vsub.f32 %v3963_v8, %v4117_v12 }
 0x1fb   : > { %v4354_v10 = vsub.f32 %v3981_v59, %v4117_v12  ;;  %v4358_v53 = vsub.f32 %v4636_v54, %v4117_v12  ;;  %v4362_v62 = vsub.f32 %v4009_v25, %v4117_v12  ;;  %v4366_v16 = vsub.f32 %v4019_v26, %v4117_v12 }
 0x1fc   : > { %4635 = vst [vmem:[#allocation9_spill] sm:$0xff] %v4350_v0  ;;  %v2386_v0 = vmul.f32 %v4122_v4, %v4122_v4  ;;  %v2387_v59 = vmul.f32 %v4126_v5, %v4126_v5  ;;  %v2388_v54 = vmul.f32 %v4130_v27, %v4130_v27  ;;  %v2389_v25 = vmul.f32 %v4134_v37, %v4134_v37 }
 0x1fd   : > { %4637 = vst [vmem:[#allocation10_spill] sm:$0xff] %v4358_v53  ;;  %4638 = vst [vmem:[#allocation11_spill] sm:$0xff] %v4362_v62  ;;  %v2390_v8 = vmul.f32 %v4138_v50, %v4138_v50  ;;  %v2391_v5 = vmul.f32 %v4142_v46, %v4142_v46 }
 0x1fe   : > { %4639 = vst [vmem:[#allocation13_spill] sm:$0xff] %v4366_v16  ;;  %v2450_v53 = vsel %vm2121_vm1, %v2386_v0, 0.0  ;;  %v2451_v26 = vsel %vm2121_vm1, %v2387_v59, 0.0  ;;  %v2453_v12 = vsel %vm2121_vm1, %v2388_v54, 0.0  ;;  %v2455_v41 = vsel %vm2121_vm1, %v2389_v25, 0.0 }
 0x1ff   : > { %v2452_v16 = vadd.f32 %v2451_v26, %v2450_v53  ;;  %v2392_v0 = vmul.f32 %v4146_v55, %v4146_v55  ;;  %v2457_v37 = vsel %vm2121_vm1, %v2390_v8, 0.0  ;;  %v2393_v53 = vmul.f32 %v4150_v36, %v4150_v36 }
 0x200   : > { %v2459_v50 = vsel %vm2121_vm1, %v2391_v5, 0.0  ;;  %v2396_v8 = vmul.f32 %v4162_v52, %v4162_v52 }
 0x201   : > { %v2454_v4 = vadd.f32 %v2453_v12, %v2452_v16  ;;  %v2394_v12 = vmul.f32 %v4154_v11, %v4154_v11  ;;  %v2461_v46 = vsel %vm2121_vm1, %v2392_v0, 0.0  ;;  %v2463_v55 = vsel %vm2121_vm1, %v2393_v53, 0.0 }
 0x203   : > { %v2456_v27 = vadd.f32 %v2455_v41, %v2454_v4  ;;  %v2395_v41 = vmul.f32 %v4158_v24, %v4158_v24  ;;  %v2465_v36 = vsel %vm2121_vm1, %v2394_v12, 0.0  ;;  %v2398_v4 = vmul.f32 %v4170_v39, %v4170_v39 }
 0x204   : > { %v2469_v24 = vsel %vm2121_vm1, %v2396_v8, 0.0  ;;  %v2402_v12 = vmul.f32 %v4186_v6, %v4186_v6  ;;  %v2405_v8 = vmul.f32 %v4198_v35, %v4198_v35 }
 0x205   : > { %v2458_v62 = vadd.f32 %v2457_v37, %v2456_v27  ;;  %v2467_v11 = vsel %vm2121_vm1, %v2395_v41, 0.0  ;;  %v2399_v27 = vmul.f32 %v4174_v47, %v4174_v47  ;;  %v2400_v37 = vmul.f32 %v4178_v60, %v4178_v60 }
 0x207   : > { %v2460_v59 = vadd.f32 %v2459_v50, %v2458_v62  ;;  %v2397_v62 = vmul.f32 %v4166_v32, %v4166_v32  ;;  %v2473_v32 = vsel %vm2121_vm1, %v2398_v4, 0.0  ;;  %v2401_v50 = vmul.f32 %v4182_v13, %v4182_v13 }
 0x208   : > { %v2475_v39 = vsel %vm2121_vm1, %v2399_v27, 0.0  ;;  %v2477_v47 = vsel %vm2121_vm1, %v2400_v37, 0.0  ;;  %v2481_v13 = vsel %vm2121_vm1, %v2402_v12, 0.0  ;;  %v2408_v4 = vmul.f32 %v4210_v1, %v4210_v1 }
 0x209   : > { %v2462_v16 = vadd.f32 %v2461_v46, %v2460_v59  ;;  %v2471_v52 = vsel %vm2121_vm1, %v2397_v62, 0.0  ;;  %v2479_v60 = vsel %vm2121_vm1, %v2401_v50, 0.0 }
 0x20b   : > { %v2464_v54 = vadd.f32 %v2463_v55, %v2462_v16  ;;  %v2403_v16 = vmul.f32 %v4190_v61, %v4190_v61  ;;  %v2404_v55 = vmul.f32 %v4194_v2, %v4194_v2  ;;  %v2487_v2 = vsel %vm2121_vm1, %v2405_v8, 0.0 }
 0x20d   : > { %v2466_v25 = vadd.f32 %v2465_v36, %v2464_v54  ;;  %v2483_v6 = vsel %vm2121_vm1, %v2403_v16, 0.0  ;;  %v2485_v61 = vsel %vm2121_vm1, %v2404_v55, 0.0 }
 0x20f   : > { %v2468_v26 = vadd.f32 %v2467_v11, %v2466_v25  ;;  %v2406_v25 = vmul.f32 %v4202_v3, %v4202_v3  ;;  %v2407_v11 = vmul.f32 %v4206_v18, %v4206_v18  ;;  %v2493_v18 = vsel %vm2121_vm1, %v2408_v4, 0.0 }
 0x210   : > { %v2419_v4 = vmul.f32 %v4254_v15, %v4254_v15 }
 0x211   : > { %v2470_v5 = vadd.f32 %v2469_v24, %v2468_v26  ;;  %v2489_v35 = vsel %vm2121_vm1, %v2406_v25, 0.0  ;;  %v2491_v3 = vsel %vm2121_vm1, %v2407_v11, 0.0 }
 0x213   : > { %v2472_v0 = vadd.f32 %v2471_v52, %v2470_v5  ;;  %v2409_v5 = vmul.f32 %v4214_v34, %v4214_v34  ;;  %v4640_v52 = vld [vmem:[#allocation4_spill] sm:$0xff] }
 0x215   : > { %v2474_v53 = vadd.f32 %v2473_v32, %v2472_v0  ;;  %v2410_v0 = vmul.f32 %v4640_v52, %v4640_v52  ;;  %v4641_v32 = vld [vmem:[#allocation5_spill] sm:$0xff]  ;;  %v2495_v1 = vsel %vm2121_vm1, %v2409_v5, 0.0  ;;  %v2422_v52 = vmul.f32 %v4266_v48, %v4266_v48 }
 0x217   : > { %v2476_v59 = vadd.f32 %v2475_v39, %v2474_v53  ;;  %v2411_v53 = vmul.f32 %v4641_v32, %v4641_v32  ;;  %v4642_v39 = vld [vmem:[#allocation6_spill] sm:$0xff]  ;;  %v2497_v34 = vsel %vm2121_vm1, %v2410_v0, 0.0  ;;  %v2424_v32 = vmul.f32 %v4274_v7, %v4274_v7 }
 0x219   : > { %v2478_v46 = vadd.f32 %v2477_v47, %v2476_v59  ;;  %v2412_v59 = vmul.f32 %v4642_v39, %v4642_v39  ;;  %v2413_v47 = vmul.f32 %v4230_v14, %v4230_v14  ;;  %v2426_v39 = vmul.f32 %v4282_v22, %v4282_v22 }
 0x21b   : > { %v2480_v41 = vadd.f32 %v2479_v60, %v2478_v46  ;;  %v2499_v46 = vsel %vm2121_vm1, %v2411_v53, 0.0  ;;  %v4643_v60 = vld [vmem:[#allocation7_spill] sm:$0xff]  ;;  %v2501_v55 = vsel %vm2121_vm1, %v2412_v59, 0.0  ;;  %v2503_v8 = vsel %vm2121_vm1, %v2413_v47, 0.0 }
 0x21c   : > { %v2428_v47 = vmul.f32 %v4290_v33, %v4290_v33 }
 0x21d   : > { %v2482_v54 = vadd.f32 %v2481_v13, %v2480_v41  ;;  %v2414_v41 = vmul.f32 %v4643_v60, %v4643_v60 }
 0x21f   : > { %v2484_v36 = vadd.f32 %v2483_v6, %v2482_v54  ;;  %v2415_v54 = vmul.f32 %v4238_v20, %v4238_v20  ;;  %v2505_v14 = vsel %vm2121_vm1, %v2414_v41, 0.0  ;;  %v2430_v41 = vmul.f32 %v4298_v44, %v4298_v44 }
 0x221   : > { %v2486_v62 = vadd.f32 %v2485_v61, %v2484_v36  ;;  %v2416_v36 = vmul.f32 %v4242_v38, %v4242_v38  ;;  %v2417_v61 = vmul.f32 %v4246_v23, %v4246_v23 }
 0x223   : > { %v2488_v26 = vadd.f32 %v2487_v2, %v2486_v62  ;;  %v2507_v62 = vsel %vm2121_vm1, %v2415_v54, 0.0  ;;  %v2418_v2 = vmul.f32 %v4250_v58, %v4250_v58  ;;  %v2509_v20 = vsel %vm2121_vm1, %v2416_v36, 0.0 }
 0x224   : > { %v2511_v38 = vsel %vm2121_vm1, %v2417_v61, 0.0  ;;  %v2515_v58 = vsel %vm2121_vm1, %v2419_v4, 0.0  ;;  %v2433_v36 = vmul.f32 %v4310_v21, %v4310_v21 }
 0x225   : > { %v2490_v24 = vadd.f32 %v2489_v35, %v2488_v26  ;;  %v2513_v23 = vsel %vm2121_vm1, %v2418_v2, 0.0  ;;  %v2436_v2 = vmul.f32 %v4322_v45, %v4322_v45 }
 0x227   : > { %v2492_v27 = vadd.f32 %v2491_v3, %v2490_v24  ;;  %v2420_v24 = vmul.f32 %v4258_v51, %v4258_v51  ;;  %v2421_v3 = vmul.f32 %v4262_v56, %v4262_v56  ;;  %v2521_v56 = vsel %vm2121_vm1, %v2422_v52, 0.0 }
 0x229   : > { %v2494_v37 = vadd.f32 %v2493_v18, %v2492_v27  ;;  %v2517_v15 = vsel %vm2121_vm1, %v2420_v24, 0.0  ;;  %v2423_v18 = vmul.f32 %v4270_v63, %v4270_v63  ;;  %v2519_v51 = vsel %vm2121_vm1, %v2421_v3, 0.0  ;;  %v4644_v24 = vld [vmem:[#allocation8_spill] sm:$0xff] }
 0x22a   : > { %v2525_v63 = vsel %vm2121_vm1, %v2424_v32, 0.0  ;;  %v2440_v3 = vmul.f32 %v4338_v49, %v4338_v49 }
 0x22b   : > { %v2496_v50 = vadd.f32 %v2495_v1, %v2494_v37  ;;  %v2425_v1 = vmul.f32 %v4278_v43, %v4278_v43  ;;  %v2523_v48 = vsel %vm2121_vm1, %v2423_v18, 0.0  ;;  %v2529_v43 = vsel %vm2121_vm1, %v2426_v39, 0.0  ;;  %v4647_v39 = vld [vmem:[#allocation11_spill] sm:$0xff] }
 0x22d   : > { %v2498_v12 = vadd.f32 %v2497_v34, %v2496_v50  ;;  %v2427_v34 = vmul.f32 %v4286_v28, %v4286_v28  ;;  %v2527_v7 = vsel %vm2121_vm1, %v2425_v1, 0.0  ;;  %v2533_v28 = vsel %vm2121_vm1, %v2428_v47, 0.0  ;;  %v4646_v1 = vld [vmem:[#allocation10_spill] sm:$0xff] }
 0x22f   : > { %v2500_v16 = vadd.f32 %v2499_v46, %v2498_v12  ;;  %v2531_v22 = vsel %vm2121_vm1, %v2427_v34, 0.0  ;;  %v4648_v34 = vld [vmem:[#allocation16_spill] sm:$0xff] }
 0x231   : > { %v2502_v13 = vadd.f32 %v2501_v55, %v2500_v16  ;;  %v2429_v16 = vmul.f32 %v4294_v40, %v4294_v40  ;;  %v2537_v40 = vsel %vm2121_vm1, %v2430_v41, 0.0 }
 0x233   : > { %v2504_v6 = vadd.f32 %v2503_v8, %v2502_v13  ;;  %v2431_v13 = vmul.f32 %v4302_v9, %v4302_v9  ;;  %v2535_v33 = vsel %vm2121_vm1, %v2429_v16, 0.0  ;;  %v2432_v8 = vmul.f32 %v4306_v31, %v4306_v31 }
 0x234   : > { %v2543_v31 = vsel %vm2121_vm1, %v2433_v36, 0.0 }
 0x235   : > { %v2506_v25 = vadd.f32 %v2505_v14, %v2504_v6  ;;  %v2539_v44 = vsel %vm2121_vm1, %v2431_v13, 0.0  ;;  %v2541_v9 = vsel %vm2121_vm1, %v2432_v8, 0.0 }
 0x237   : > { %v2508_v11 = vadd.f32 %v2507_v62, %v2506_v25  ;;  %v2434_v25 = vmul.f32 %v4314_v30, %v4314_v30  ;;  %v2435_v62 = vmul.f32 %v4318_v17, %v4318_v17  ;;  %v2549_v17 = vsel %vm2121_vm1, %v2436_v2, 0.0 }
 0x239   : > { %v2510_v26 = vadd.f32 %v2509_v20, %v2508_v11  ;;  %v2545_v21 = vsel %vm2121_vm1, %v2434_v25, 0.0  ;;  %v2547_v30 = vsel %vm2121_vm1, %v2435_v62, 0.0 }
 0x23b   : > { %v2512_v35 = vadd.f32 %v2511_v38, %v2510_v26  ;;  %v2437_v26 = vmul.f32 %v4326_v57, %v4326_v57  ;;  %v2438_v38 = vmul.f32 %v4330_v19, %v4330_v19 }
 0x23d   : > { %v2514_v5 = vadd.f32 %v2513_v23, %v2512_v35  ;;  %v2439_v23 = vmul.f32 %v4644_v24, %v4644_v24  ;;  %v2551_v45 = vsel %vm2121_vm1, %v2437_v26, 0.0  ;;  %v2553_v57 = vsel %vm2121_vm1, %v2438_v38, 0.0 }
 0x23f   : > { %v2516_v27 = vadd.f32 %v2515_v58, %v2514_v5  ;;  %v2555_v19 = vsel %vm2121_vm1, %v2439_v23, 0.0 }
 0x241   : > { %v2518_v0 = vadd.f32 %v2517_v15, %v2516_v27  ;;  %v2441_v27 = vmul.f32 %v4342_v42, %v4342_v42  ;;  %v2442_v15 = vmul.f32 %v4346_v29, %v4346_v29 }
 0x243   : > { %v2520_v37 = vadd.f32 %v2519_v51, %v2518_v0  ;;  %v2557_v0 = vsel %vm2121_vm1, %v2440_v3, 0.0  ;;  %v4645_v51 = vld [vmem:[#allocation9_spill] sm:$0xff]  ;;  %v2559_v49 = vsel %vm2121_vm1, %v2441_v27, 0.0  ;;  %v2561_v42 = vsel %vm2121_vm1, %v2442_v15, 0.0 }
 0x245   : > { %v2522_v53 = vadd.f32 %v2521_v56, %v2520_v37  ;;  %v2443_v37 = vmul.f32 %v4645_v51, %v4645_v51  ;;  %v2444_v56 = vmul.f32 %v4354_v10, %v4354_v10 }
 0x247   : > { %v2524_v50 = vadd.f32 %v2523_v48, %v2522_v53  ;;  %v2445_v48 = vmul.f32 %v4646_v1, %v4646_v1  ;;  %v2563_v29 = vsel %vm2121_vm1, %v2443_v37, 0.0 }
 0x249   : > { %v2526_v59 = vadd.f32 %v2525_v63, %v2524_v50  ;;  %v2446_v63 = vmul.f32 %v4647_v39, %v4647_v39 }
 0x24b   : > { %v2528_v12 = vadd.f32 %v2527_v7, %v2526_v59  ;;  %v2565_v59 = vsel %vm2121_vm1, %v2444_v56, 0.0  ;;  %v4649_v7 = vld [vmem:[#allocation18_spill] sm:$0xff] }
 0x24d   : > { %v2530_v46 = vadd.f32 %v2529_v43, %v2528_v12  ;;  %v4650_v12 = vsub.f32 %v4648_v34, %v4649_v7 }
 0x24f   : > { %v2532_v60 = vadd.f32 %v2531_v22, %v2530_v46  ;;  %v2384_v10 = vsel %vm1923_vm2, %v4650_v12, 0.0  ;;  %v4652_v46 = vld [vmem:[#allocation13_spill] sm:$0xff]  ;;  %v2567_v22 = vsel %vm2121_vm1, %v2445_v48, 0.0 }
 0x250   : > { %v2447_v16 = vmul.f32 %v4652_v46, %v4652_v46  ;;  %v2448_v41 = vmul.f32 %v2384_v10, %v2384_v10 }
 0x251   : > { %v2534_v55 = vadd.f32 %v2533_v28, %v2532_v60  ;;  %v2569_v28 = vsel %vm2121_vm1, %v2446_v63, 0.0 }
 0x252   : > { %v2571_v13 = vsel %vm2121_vm1, %v2447_v16, 0.0 }
 0x253   : > { %v2536_v54 = vadd.f32 %v2535_v33, %v2534_v55 }
 0x255   : > { %v2538_v6 = vadd.f32 %v2537_v40, %v2536_v54  ;;  %v2573_v54 = vsel %vm2121_vm1, %v2448_v41, 0.0 }
 0x257   : > { %v2540_v14 = vadd.f32 %v2539_v44, %v2538_v6 }
 0x259   : > { %v2542_v61 = vadd.f32 %v2541_v9, %v2540_v14 }
 0x25b   : > { %v2544_v11 = vadd.f32 %v2543_v31, %v2542_v61 }
 0x25d   : > { %v2546_v20 = vadd.f32 %v2545_v21, %v2544_v11 }
 0x25f   : > { %v2548_v4 = vadd.f32 %v2547_v30, %v2546_v20 }
 0x261   : > { %v2550_v35 = vadd.f32 %v2549_v17, %v2548_v4 }
 0x263   : > { %v2552_v5 = vadd.f32 %v2551_v45, %v2550_v35 }
 0x265   : > { %v2554_v58 = vadd.f32 %v2553_v57, %v2552_v5 }
 0x267   : > { %v2556_v52 = vadd.f32 %v2555_v19, %v2554_v58 }
 0x269   : > { %v2558_v18 = vadd.f32 %v2557_v0, %v2556_v52 }
 0x26b   : > { %v2560_v32 = vadd.f32 %v2559_v49, %v2558_v18 }
 0x26d   : > { %v2562_v53 = vadd.f32 %v2561_v42, %v2560_v32 }
 0x26f   : > { %v2564_v50 = vadd.f32 %v2563_v29, %v2562_v53 }
 0x271   : > { %v2566_v43 = vadd.f32 %v2565_v59, %v2564_v50 }
 0x273   : > { %v2568_v60 = vadd.f32 %v2567_v22, %v2566_v43 }
 0x275   : > { %v2570_v55 = vadd.f32 %v2569_v28, %v2568_v60 }
 0x277   : > { %v2572_v33 = vadd.f32 %v2571_v13, %v2570_v55 }
 0x279   : > { %v2574_v8 = vadd.f32 %v2573_v54, %v2572_v33 }
 0x27b   : > { %v2577_v40 = vrot.slane %v2574_v8, 4 }
 0x27d   : > { %v2578_v6 = vadd.f32 %v2577_v40, %v2574_v8 }
 0x27f   : > { %v2579_v36 = vrot.slane %v2578_v6, 2 }
 0x281   : > { %v2580_v44 = vadd.f32 %v2579_v36, %v2578_v6 }
 0x283   : > { %v2581_v14 = vrot.slane %v2580_v44, 1 }
 0x285   : > { %v2582_v25 = vadd.f32 %v2581_v14, %v2580_v44 }
 0x287   : > { %2585 = vst.msk [vmem:[%s326_s10] sm:$0x1] %vm2583_vm3, %v2582_v25 }
 0x288 PF: > { %s17_s23 = sadd.s32 1, %s2998_s23   ;;  %s4653_s21 = smov %s2994_s22 }
 0x289   : > { %p14_p5 = scmp.ge.s32.totalorder %s17_s23, 4   ;;  %s4654_s22 = smov %s4656_s24 }
 0x28b   :  { %16 = sbr.rel (!%p14_p5) target bundleno = 2 (0x2), region = 90 }

</bundles_post_ra>
